<compile_context>
chip_gen: v5e
topology: v5e:2x2
jax: 0.10.0
libtpu: 0.0.40
codegen_flags: <defaults>
</compile_context>

<pallas_src>
import jax
import jax.numpy as jnp
from jax.experimental import pallas as pl
from jax.experimental.pallas import tpu as pltpu

BN_EPS = 1e-5


def _vmem_spec():
    return pl.BlockSpec(memory_space=pltpu.MemorySpace.VMEM)


# ------------------------------ Pallas kernel ------------------------------ #

def _convt_rows(xb_ref, bw_ref, bias, n):
    """Transposed conv (stride 2) for batch element n.

    xb_ref : (N, Hp, Win*Cin)  H-dilated/padded rows, (iw, ci) flattened on lanes.
    bw_ref : (K, Win*Cin, Wo*Cout) banded weight, bf16.
    bias   : (1, Wo*Cout) f32, channel bias replicated across width.
    Returns f32 (Ho, Wo*Cout).
    """
    k = bw_ref.shape[0]
    ho = xb_ref.shape[1] - k + 1
    acc = None
    for kh in range(k):
        xs = xb_ref[n, kh:kh + ho, :].astype(jnp.bfloat16)
        part = jnp.dot(xs, bw_ref[kh], preferred_element_type=jnp.float32)
        acc = part if acc is None else acc + part
    return acc + bias


def _bn_relu(zs, gamma_ref, beta_ref, g_ref, gt_ref, m_total):
    """Training-mode BatchNorm (batch stats, biased var) + ReLU.

    zs: list (one per batch element) of f32 (Ho, Wo*Cout) blocks, channels interleaved
    on lanes.  g_ref (Wo*Cout, Cout) gathers lanes per channel, gt_ref expands back.
    """
    lout = zs[0].shape[1]
    s1 = jnp.zeros((1, lout), jnp.float32)
    s2 = jnp.zeros((1, lout), jnp.float32)
    for z in zs:
        s1 = s1 + jnp.sum(z, axis=0, keepdims=True)
        s2 = s2 + jnp.sum(z * z, axis=0, keepdims=True)
    inv_m = 1.0 / m_total
    ch_s1 = jnp.dot(s1, g_ref[...], preferred_element_type=jnp.float32)   # (1, Cout)
    ch_s2 = jnp.dot(s2, g_ref[...], preferred_element_type=jnp.float32)
    mean = ch_s1 * inv_m
    var = jnp.maximum(ch_s2 * inv_m - mean * mean, 0.0)
    scale = gamma_ref[...] * jax.lax.rsqrt(var + BN_EPS)
    shift = beta_ref[...] - mean * scale
    scale_l = jnp.dot(scale, gt_ref[...], preferred_element_type=jnp.float32)  # (1, Lout)
    shift_l = jnp.dot(shift, gt_ref[...], preferred_element_type=jnp.float32)
    return [jnp.maximum(z * scale_l + shift_l, 0.0) for z in zs]


def _decoder_kernel(xb1_ref, bw1_ref, bias1_ref, gamma1_ref, beta1_ref, g1_ref, gt1_ref, dil2_ref,
                    bw2_ref, bias2_ref, gamma2_ref, beta2_ref, g2_ref, gt2_ref, dil3_ref,
                    bw3_ref, bias3_ref,
                    out_ref, xb2_ref, xb3_ref):
    n_batch = xb1_ref.shape[0]

    # ---- layer 1: ConvTranspose2d(32 -> 16, k=3, s=2) + BatchNorm + ReLU ----
    ho1 = xb1_ref.shape[1] - bw1_ref.shape[0] + 1
    wo1 = bw1_ref.shape[2] // gamma1_ref.shape[1]
    b1 = bias1_ref[...]
    z1 = [_convt_rows(xb1_ref, bw1_ref, b1, n) for n in range(n_batch)]
    y1 = _bn_relu(z1, gamma1_ref, beta1_ref, g1_ref, gt1_ref, float(n_batch * ho1 * wo1))
    dil2 = dil2_ref[...]                       # (Hp2, Ho1) 0/1 selection matrix, bf16
    for n in range(n_batch):
        # One tiny MXU matmul scatters y1 rows into the H-dilated/padded layer-2 input
        # buffer (zeros included), then ONE dense full-height block store per image.
        xb2_ref[n, :, :] = jnp.dot(dil2, y1[n].astype(jnp.bfloat16),
                                   preferred_element_type=jnp.float32)

    # ---- layer 2: ConvTranspose2d(16 -> 8, k=8, s=2) + BatchNorm + ReLU ----
    ho2 = xb2_ref.shape[1] - bw2_ref.shape[0] + 1
    wo2 = bw2_ref.shape[2] // gamma2_ref.shape[1]
    b2 = bias2_ref[...]
    z2 = [_convt_rows(xb2_ref, bw2_ref, b2, n) for n in range(n_batch)]
    y2 = _bn_relu(z2, gamma2_ref, beta2_ref, g2_ref, gt2_ref, float(n_batch * ho2 * wo2))
    dil3 = dil3_ref[...]                       # (Hp3, Ho2)
    for n in range(n_batch):
        xb3_ref[n, :, :] = jnp.dot(dil3, y2[n].astype(jnp.bfloat16),
                                   preferred_element_type=jnp.float32)

    # ---- layer 3: ConvTranspose2d(8 -> 1, k=3, s=2) + sigmoid ----
    b3 = bias3_ref[...]
    for n in range(n_batch):
        out_ref[n, :, :] = jax.nn.sigmoid(_convt_rows(xb3_ref, bw3_ref, b3, n))


# ------------------------- one-time parameter packing ----------------------- #

def prepare_params(params, input_hw):
    """Pack PyTorch-layout parameters into kernel operands (done once, outside jit)."""
    h0, w0 = input_hw
    w1, w2, w3 = params["w1"], params["w2"], params["w3"]
    k1, k2, k3 = w1.shape[2], w2.shape[2], w3.shape[2]
    c1, c2 = w1.shape[1], w2.shape[1]
    ho1, wo1 = 2 * (h0 - 1) + k1, 2 * (w0 - 1) + k1
    ho2, wo2 = 2 * (ho1 - 1) + k2, 2 * (wo1 - 1) + k2
    ho3, wo3 = 2 * (ho2 - 1) + k3, 2 * (wo2 - 1) + k3
    hp2, hp3 = ho2 + k2 - 1, ho3 + k3 - 1

    def banded_weight(wt, win, wo):
        # BW[kh, iw*Ci+ci, ow*Co+co] = Wt[ci, co, K-1-kh, K-1-kw], kw = (K-1)+2*iw-ow
        ci, co, k, _ = wt.shape
        wf = jnp.transpose(wt[:, :, ::-1, ::-1], (2, 3, 0, 1))      # (K, K, Ci, Co)
        iw = jnp.arange(win)[:, None]
        ow = jnp.arange(wo)[None, :]
        kw = (k - 1) + 2 * iw - ow                                  # (Win, Wo)
        valid = (kw >= 0) & (kw < k)
        bw = wf[:, jnp.clip(kw, 0, k - 1)]                          # (K, Win, Wo, Ci, Co)
        bw = jnp.where(valid[None, :, :, None, None], bw, 0.0)
        bw = jnp.transpose(bw, (0, 1, 3, 2, 4))                     # (K, Win, Ci, Wo, Co)
        return bw.reshape(k, win * ci, wo * co).astype(jnp.bfloat16)

    def channel_gather(wo, co):
        g = jnp.tile(jnp.eye(co, dtype=jnp.float32), (wo, 1))       # (Wo*Co, Co)
        return g, jnp.transpose(g)

    def dilation(hp, ho, k):
        # Dil[r, oh] = 1 iff r == (k-1) + 2*oh : scatters output row oh of the previous
        # layer into the H-dilated/padded input buffer of the next layer.
        m = jnp.arange(hp)[:, None] == (k - 1) + 2 * jnp.arange(ho)[None, :]
        return m.astype(jnp.bfloat16)

    g1, gt1 = channel_gather(wo1, c1)
    g2, gt2 = channel_gather(wo2, c2)
    return {
        "bw1": banded_weight(w1, w0, wo1),
        "bias1": jnp.tile(params["b1"], wo1)[None, :],
        "gamma1": params["g1"][None, :], "beta1": params["be1"][None, :],
        "g1": g1, "gt1": gt1,
        "dil2": dilation(hp2, ho1, k2),
        "bw2": banded_weight(w2, wo1, wo2),
        "bias2": jnp.tile(params["b2"], wo2)[None, :],
        "gamma2": params["g2"][None, :], "beta2": params["be2"][None, :],
        "g2": g2, "gt2": gt2,
        "dil3": dilation(hp3, ho2, k3),
        "bw3": banded_weight(w3, wo2, wo3),
        "bias3": jnp.tile(params["b3"], wo3)[None, :],
    }


# --------------------------------- forward ---------------------------------- #

@jax.jit
def decoder_forward(x_nchw, prep):
    """Matches Decoder.forward: x (N, 32, H, W) -> (N, 1, 8H+1, 8W+1)."""
    n, c0, h0, w0 = x_nchw.shape
    k1 = prep["bw1"].shape[0]
    k3 = prep["bw3"].shape[0]
    hp1 = (2 * (h0 - 1) + k1) + (k1 - 1)
    hp2, l2in = prep["dil2"].shape[0], prep["bw2"].shape[1]
    hp3, l3in = prep["dil3"].shape[0], prep["bw3"].shape[1]
    ho3 = hp3 - k3 + 1
    l3out = prep["bw3"].shape[2]
    wo2 = prep["bw2"].shape[2] // prep["gamma2"].shape[1]
    wo3 = 2 * (wo2 - 1) + k3
    c3 = l3out // wo3

    # Layer-1 input buffer: H-dilated + H-padded rows, (iw, ci) flattened on lanes.
    rows = jnp.transpose(x_nchw, (0, 2, 3, 1)).reshape(n, h0, w0 * c0).astype(jnp.float32)
    xb1 = jnp.zeros((n, hp1, w0 * c0), jnp.float32)
    xb1 = xb1.at[:, k1 - 1:k1 - 1 + 2 * h0 - 1:2, :].set(rows)

    out = pl.pallas_call(
        _decoder_kernel,
        out_shape=jax.ShapeDtypeStruct((n, ho3, l3out), jnp.float32),
        in_specs=[_vmem_spec()] * 17,
        out_specs=_vmem_spec(),
        scratch_shapes=[
            pltpu.VMEM((n, hp2, l2in), jnp.float32),   # layer-2 input rows
            pltpu.VMEM((n, hp3, l3in), jnp.float32),   # layer-3 input rows
        ],
    )(xb1,
      prep["bw1"], prep["bias1"], prep["gamma1"], prep["beta1"], prep["g1"], prep["gt1"],
      prep["dil2"],
      prep["bw2"], prep["bias2"], prep["gamma2"], prep["beta2"], prep["g2"], prep["gt2"],
      prep["dil3"],
      prep["bw3"], prep["bias3"])
    return jnp.transpose(out.reshape(n, ho3, wo3, c3), (0, 3, 1, 2))


# ------------------------------ reference & init ---------------------------- #

@jax.jit
def _reference_forward(x_nchw, params):
    """Pure-JAX/XLA f32 reference with the same math as the PyTorch module (train mode)."""
    def convt(x_nhwc, wt, b):
        n, h, w, ci = x_nhwc.shape
        _, co, k, _ = wt.shape
        hd, wd = (h - 1) * 2 + 1, (w - 1) * 2 + 1
        xd = jnp.zeros((n, hd, wd, ci), x_nhwc.dtype).at[:, ::2, ::2, :].set(x_nhwc)
        p = k - 1
        xp = jnp.pad(xd, ((0, 0), (p, p), (p, p), (0, 0)))
        ho, wo = hd + p, wd + p
        wmat = jnp.transpose(wt[:, :, ::-1, ::-1], (2, 3, 0, 1)).reshape(k * k * ci, co)
        patches = jnp.concatenate(
            [xp[:, kh:kh + ho, kw:kw + wo, :] for kh in range(k) for kw in range(k)],
            axis=-1).reshape(n * ho * wo, k * k * ci)
        return (patches @ wmat + b).reshape(n, ho, wo, co)

    def bn_relu(z, gamma, beta):
        mean = jnp.mean(z, axis=(0, 1, 2), keepdims=True)
        var = jnp.mean(jnp.square(z - mean), axis=(0, 1, 2), keepdims=True)
        return jnp.maximum((z - mean) * jax.lax.rsqrt(var + BN_EPS) * gamma + beta, 0.0)

    y = jnp.transpose(x_nchw, (0, 2, 3, 1))
    y = bn_relu(convt(y, params["w1"], params["b1"]), params["g1"], params["be1"])
    y = bn_relu(convt(y, params["w2"], params["b2"]), params["g2"], params["be2"])
    y = jax.nn.sigmoid(convt(y, params["w3"], params["b3"]))
    return jnp.transpose(y, (0, 3, 1, 2))


def init_params(key):
    ks = jax.random.split(key, 6)

    def u(k, shape, fan_in):
        bound = 1.0 / jnp.sqrt(fan_in)
        return jax.random.uniform(k, shape, jnp.float32, -bound, bound)

    return {
        # ConvTranspose2d weight layout: (Cin, Cout, KH, KW)
        "w1": u(ks[0], (32, 16, 3, 3), 32 * 9),
        "b1": u(ks[1], (16,), 32 * 9),
        "g1": jnp.ones((16,), jnp.float32),
        "be1": jnp.zeros((16,), jnp.float32),
        "w2": u(ks[2], (16, 8, 8, 8), 16 * 64),
        "b2": u(ks[3], (8,), 16 * 64),
        "g2": jnp.ones((8,), jnp.float32),
        "be2": jnp.zeros((8,), jnp.float32),
        "w3": u(ks[4], (8, 1, 3, 3), 8 * 9),
        "b3": u(ks[5], (1,), 8 * 9),
    }


if __name__ == "__main__":
    key = jax.random.PRNGKey(0)
    kx, kp = jax.random.split(key)
    params = init_params(kp)
    x = jax.random.normal(kx, (2, 32, 4, 4), jnp.float32)   # N=2, C=32, H=W=4

    prep = prepare_params(params, input_hw=(4, 4))          # one-time weight packing
    y = jax.block_until_ready(decoder_forward(x, prep))

    # Expected output spatial size: (((4-1)*2+3 - 1)*2 + 8 - 1)*2 + 3 = 49
    assert y.shape == (2, 1, 49, 49), y.shape
    assert bool(jnp.all(jnp.isfinite(y)))
    assert bool(jnp.all((y >= 0.0) & (y <= 1.0)))

    # Cross-check against the pure-JAX reference (bf16 GEMM operands => loose tolerance).
    y_ref = jax.block_until_ready(_reference_forward(x, params))
    max_err = float(jnp.max(jnp.abs(y - y_ref)))
    assert max_err < 0.08, f"mismatch vs reference: max abs err {max_err}"

    print("KERNEL_OK")
</pallas_src>

<mosaic_0001>
module attributes {stable_mosaic.version = 11 : i64} {
  func.func @_decoder_kernel(%arg0: memref<2x11x128xf32, #tpu.memory_space<vmem>>, %arg1: memref<3x128x144xbf16, #tpu.memory_space<vmem>>, %arg2: memref<1x144xf32, #tpu.memory_space<vmem>>, %arg3: memref<1x16xf32, #tpu.memory_space<vmem>>, %arg4: memref<1x16xf32, #tpu.memory_space<vmem>>, %arg5: memref<144x16xf32, #tpu.memory_space<vmem>>, %arg6: memref<16x144xf32, #tpu.memory_space<vmem>>, %arg7: memref<31x9xbf16, #tpu.memory_space<vmem>>, %arg8: memref<8x144x192xbf16, #tpu.memory_space<vmem>>, %arg9: memref<1x192xf32, #tpu.memory_space<vmem>>, %arg10: memref<1x8xf32, #tpu.memory_space<vmem>>, %arg11: memref<1x8xf32, #tpu.memory_space<vmem>>, %arg12: memref<192x8xf32, #tpu.memory_space<vmem>>, %arg13: memref<8x192xf32, #tpu.memory_space<vmem>>, %arg14: memref<51x24xbf16, #tpu.memory_space<vmem>>, %arg15: memref<3x192x49xbf16, #tpu.memory_space<vmem>>, %arg16: memref<1x49xf32, #tpu.memory_space<vmem>>, %arg17: memref<2x49x49xf32, #tpu.memory_space<vmem>>, %arg18: memref<2x31x144xf32, #tpu.memory_space<vmem>>, %arg19: memref<2x51x192xf32, #tpu.memory_space<vmem>>) attributes {dimension_semantics = [], scalar_prefetch = 0 : i64, scratch_operands = 2 : i64, tpu.core_type = #tpu.core_type<tc>} {
    %c0 = arith.constant 0 : index
    %c0_0 = arith.constant 0 : index
    %0 = vector.load %arg2[%c0, %c0_0] : memref<1x144xf32, #tpu.memory_space<vmem>>, vector<1x144xf32>
    %c0_1 = arith.constant 0 : index
    %c0_2 = arith.constant 0 : index
    %c0_3 = arith.constant 0 : index
    %1 = vector.load %arg0[%c0_1, %c0_2, %c0_3] : memref<2x11x128xf32, #tpu.memory_space<vmem>>, vector<1x9x128xf32>
    %2 = vector.shape_cast %1 : vector<1x9x128xf32> to vector<9x128xf32>
    %3 = arith.truncf %2 : vector<9x128xf32> to vector<9x128xbf16>
    %c0_4 = arith.constant 0 : index
    %c0_5 = arith.constant 0 : index
    %c0_6 = arith.constant 0 : index
    %4 = vector.load %arg1[%c0_4, %c0_5, %c0_6] : memref<3x128x144xbf16, #tpu.memory_space<vmem>>, vector<1x128x144xbf16>
    %5 = vector.shape_cast %4 : vector<1x128x144xbf16> to vector<128x144xbf16>
    %cst = arith.constant dense<0.000000e+00> : vector<9x144xf32>
    %6 = tpu.matmul %3, %5, %cst {dimension_numbers = #tpu.dot_dimension_numbers<[1], [0], [0], [1], [0, 0, 1, 1], [], []>} : vector<9x128xbf16>, vector<128x144xbf16>, vector<9x144xf32> -> vector<9x144xf32>
    %c0_7 = arith.constant 0 : index
    %c1 = arith.constant 1 : index
    %c0_8 = arith.constant 0 : index
    %7 = vector.load %arg0[%c0_7, %c1, %c0_8] : memref<2x11x128xf32, #tpu.memory_space<vmem>>, vector<1x9x128xf32>
    %8 = vector.shape_cast %7 : vector<1x9x128xf32> to vector<9x128xf32>
    %9 = arith.truncf %8 : vector<9x128xf32> to vector<9x128xbf16>
    %c1_9 = arith.constant 1 : index
    %c0_10 = arith.constant 0 : index
    %c0_11 = arith.constant 0 : index
    %10 = vector.load %arg1[%c1_9, %c0_10, %c0_11] : memref<3x128x144xbf16, #tpu.memory_space<vmem>>, vector<1x128x144xbf16>
    %11 = vector.shape_cast %10 : vector<1x128x144xbf16> to vector<128x144xbf16>
    %cst_12 = arith.constant dense<0.000000e+00> : vector<9x144xf32>
    %12 = tpu.matmul %9, %11, %cst_12 {dimension_numbers = #tpu.dot_dimension_numbers<[1], [0], [0], [1], [0, 0, 1, 1], [], []>} : vector<9x128xbf16>, vector<128x144xbf16>, vector<9x144xf32> -> vector<9x144xf32>
    %13 = arith.addf %6, %12 : vector<9x144xf32>
    %c0_13 = arith.constant 0 : index
    %c2 = arith.constant 2 : index
    %c0_14 = arith.constant 0 : index
    %14 = vector.load %arg0[%c0_13, %c2, %c0_14] : memref<2x11x128xf32, #tpu.memory_space<vmem>>, vector<1x9x128xf32>
    %15 = vector.shape_cast %14 : vector<1x9x128xf32> to vector<9x128xf32>
    %16 = arith.truncf %15 : vector<9x128xf32> to vector<9x128xbf16>
    %c2_15 = arith.constant 2 : index
    %c0_16 = arith.constant 0 : index
    %c0_17 = arith.constant 0 : index
    %17 = vector.load %arg1[%c2_15, %c0_16, %c0_17] : memref<3x128x144xbf16, #tpu.memory_space<vmem>>, vector<1x128x144xbf16>
    %18 = vector.shape_cast %17 : vector<1x128x144xbf16> to vector<128x144xbf16>
    %cst_18 = arith.constant dense<0.000000e+00> : vector<9x144xf32>
    %19 = tpu.matmul %16, %18, %cst_18 {dimension_numbers = #tpu.dot_dimension_numbers<[1], [0], [0], [1], [0, 0, 1, 1], [], []>} : vector<9x128xbf16>, vector<128x144xbf16>, vector<9x144xf32> -> vector<9x144xf32>
    %20 = arith.addf %13, %19 : vector<9x144xf32>
    %21 = vector.broadcast %0 : vector<1x144xf32> to vector<9x144xf32>
    %22 = arith.addf %20, %21 : vector<9x144xf32>
    %c1_19 = arith.constant 1 : index
    %c0_20 = arith.constant 0 : index
    %c0_21 = arith.constant 0 : index
    %23 = vector.load %arg0[%c1_19, %c0_20, %c0_21] : memref<2x11x128xf32, #tpu.memory_space<vmem>>, vector<1x9x128xf32>
    %24 = vector.shape_cast %23 : vector<1x9x128xf32> to vector<9x128xf32>
    %25 = arith.truncf %24 : vector<9x128xf32> to vector<9x128xbf16>
    %c0_22 = arith.constant 0 : index
    %c0_23 = arith.constant 0 : index
    %c0_24 = arith.constant 0 : index
    %26 = vector.load %arg1[%c0_22, %c0_23, %c0_24] : memref<3x128x144xbf16, #tpu.memory_space<vmem>>, vector<1x128x144xbf16>
    %27 = vector.shape_cast %26 : vector<1x128x144xbf16> to vector<128x144xbf16>
    %cst_25 = arith.constant dense<0.000000e+00> : vector<9x144xf32>
    %28 = tpu.matmul %25, %27, %cst_25 {dimension_numbers = #tpu.dot_dimension_numbers<[1], [0], [0], [1], [0, 0, 1, 1], [], []>} : vector<9x128xbf16>, vector<128x144xbf16>, vector<9x144xf32> -> vector<9x144xf32>
    %c1_26 = arith.constant 1 : index
    %c1_27 = arith.constant 1 : index
    %c0_28 = arith.constant 0 : index
    %29 = vector.load %arg0[%c1_26, %c1_27, %c0_28] : memref<2x11x128xf32, #tpu.memory_space<vmem>>, vector<1x9x128xf32>
    %30 = vector.shape_cast %29 : vector<1x9x128xf32> to vector<9x128xf32>
    %31 = arith.truncf %30 : vector<9x128xf32> to vector<9x128xbf16>
    %c1_29 = arith.constant 1 : index
    %c0_30 = arith.constant 0 : index
    %c0_31 = arith.constant 0 : index
    %32 = vector.load %arg1[%c1_29, %c0_30, %c0_31] : memref<3x128x144xbf16, #tpu.memory_space<vmem>>, vector<1x128x144xbf16>
    %33 = vector.shape_cast %32 : vector<1x128x144xbf16> to vector<128x144xbf16>
    %cst_32 = arith.constant dense<0.000000e+00> : vector<9x144xf32>
    %34 = tpu.matmul %31, %33, %cst_32 {dimension_numbers = #tpu.dot_dimension_numbers<[1], [0], [0], [1], [0, 0, 1, 1], [], []>} : vector<9x128xbf16>, vector<128x144xbf16>, vector<9x144xf32> -> vector<9x144xf32>
    %35 = arith.addf %28, %34 : vector<9x144xf32>
    %c1_33 = arith.constant 1 : index
    %c2_34 = arith.constant 2 : index
    %c0_35 = arith.constant 0 : index
    %36 = vector.load %arg0[%c1_33, %c2_34, %c0_35] : memref<2x11x128xf32, #tpu.memory_space<vmem>>, vector<1x9x128xf32>
    %37 = vector.shape_cast %36 : vector<1x9x128xf32> to vector<9x128xf32>
    %38 = arith.truncf %37 : vector<9x128xf32> to vector<9x128xbf16>
    %c2_36 = arith.constant 2 : index
    %c0_37 = arith.constant 0 : index
    %c0_38 = arith.constant 0 : index
    %39 = vector.load %arg1[%c2_36, %c0_37, %c0_38] : memref<3x128x144xbf16, #tpu.memory_space<vmem>>, vector<1x128x144xbf16>
    %40 = vector.shape_cast %39 : vector<1x128x144xbf16> to vector<128x144xbf16>
    %cst_39 = arith.constant dense<0.000000e+00> : vector<9x144xf32>
    %41 = tpu.matmul %38, %40, %cst_39 {dimension_numbers = #tpu.dot_dimension_numbers<[1], [0], [0], [1], [0, 0, 1, 1], [], []>} : vector<9x128xbf16>, vector<128x144xbf16>, vector<9x144xf32> -> vector<9x144xf32>
    %42 = arith.addf %35, %41 : vector<9x144xf32>
    %43 = vector.broadcast %0 : vector<1x144xf32> to vector<9x144xf32>
    %44 = arith.addf %42, %43 : vector<9x144xf32>
    %cst_40 = arith.constant 0.000000e+00 : f32
    %45 = vector.broadcast %cst_40 : f32 to vector<1x144xf32>
    %cst_41 = arith.constant 0.000000e+00 : f32
    %46 = vector.broadcast %cst_41 : f32 to vector<1x144xf32>
    %cst_42 = arith.constant dense<0.000000e+00> : vector<144xf32>
    %47 = vector.multi_reduction <add>, %22, %cst_42 [0] : vector<9x144xf32> to vector<144xf32>
    %48 = vector.shape_cast %47 : vector<144xf32> to vector<1x144xf32>
    %49 = arith.addf %45, %48 : vector<1x144xf32>
    %50 = arith.mulf %22, %22 : vector<9x144xf32>
    %cst_43 = arith.constant dense<0.000000e+00> : vector<144xf32>
    %51 = vector.multi_reduction <add>, %50, %cst_43 [0] : vector<9x144xf32> to vector<144xf32>
    %52 = vector.shape_cast %51 : vector<144xf32> to vector<1x144xf32>
    %53 = arith.addf %46, %52 : vector<1x144xf32>
    %cst_44 = arith.constant dense<0.000000e+00> : vector<144xf32>
    %54 = vector.multi_reduction <add>, %44, %cst_44 [0] : vector<9x144xf32> to vector<144xf32>
    %55 = vector.shape_cast %54 : vector<144xf32> to vector<1x144xf32>
    %56 = arith.addf %49, %55 : vector<1x144xf32>
    %57 = arith.mulf %44, %44 : vector<9x144xf32>
    %cst_45 = arith.constant dense<0.000000e+00> : vector<144xf32>
    %58 = vector.multi_reduction <add>, %57, %cst_45 [0] : vector<9x144xf32> to vector<144xf32>
    %59 = vector.shape_cast %58 : vector<144xf32> to vector<1x144xf32>
    %60 = arith.addf %53, %59 : vector<1x144xf32>
    %c0_46 = arith.constant 0 : index
    %c0_47 = arith.constant 0 : index
    %61 = vector.load %arg5[%c0_46, %c0_47] : memref<144x16xf32, #tpu.memory_space<vmem>>, vector<144x16xf32>
    %cst_48 = arith.constant dense<0.000000e+00> : vector<1x16xf32>
    %62 = tpu.matmul %56, %61, %cst_48 {dimension_numbers = #tpu.dot_dimension_numbers<[1], [0], [0], [1], [0, 0, 1, 1], [], []>} : vector<1x144xf32>, vector<144x16xf32>, vector<1x16xf32> -> vector<1x16xf32>
    %c0_49 = arith.constant 0 : index
    %c0_50 = arith.constant 0 : index
    %63 = vector.load %arg5[%c0_49, %c0_50] : memref<144x16xf32, #tpu.memory_space<vmem>>, vector<144x16xf32>
    %cst_51 = arith.constant dense<0.000000e+00> : vector<1x16xf32>
    %64 = tpu.matmul %60, %63, %cst_51 {dimension_numbers = #tpu.dot_dimension_numbers<[1], [0], [0], [1], [0, 0, 1, 1], [], []>} : vector<1x144xf32>, vector<144x16xf32>, vector<1x16xf32> -> vector<1x16xf32>
    %cst_52 = arith.constant 0.00617283955 : f32
    %65 = vector.broadcast %cst_52 : f32 to vector<1x16xf32>
    %66 = arith.mulf %62, %65 : vector<1x16xf32>
    %cst_53 = arith.constant 0.00617283955 : f32
    %67 = vector.broadcast %cst_53 : f32 to vector<1x16xf32>
    %68 = arith.mulf %64, %67 : vector<1x16xf32>
    %69 = arith.mulf %66, %66 : vector<1x16xf32>
    %70 = arith.subf %68, %69 : vector<1x16xf32>
    %cst_54 = arith.constant 0.000000e+00 : f32
    %71 = vector.broadcast %cst_54 : f32 to vector<1x16xf32>
    %72 = arith.maximumf %70, %71 : vector<1x16xf32>
    %c0_55 = arith.constant 0 : index
    %c0_56 = arith.constant 0 : index
    %73 = vector.load %arg3[%c0_55, %c0_56] : memref<1x16xf32, #tpu.memory_space<vmem>>, vector<1x16xf32>
    %cst_57 = arith.constant 9.99999974E-6 : f32
    %74 = vector.broadcast %cst_57 : f32 to vector<1x16xf32>
    %75 = arith.addf %72, %74 : vector<1x16xf32>
    %76 = math.rsqrt %75 : vector<1x16xf32>
    %77 = arith.mulf %73, %76 : vector<1x16xf32>
    %c0_58 = arith.constant 0 : index
    %c0_59 = arith.constant 0 : index
    %78 = vector.load %arg4[%c0_58, %c0_59] : memref<1x16xf32, #tpu.memory_space<vmem>>, vector<1x16xf32>
    %79 = arith.mulf %66, %77 : vector<1x16xf32>
    %80 = arith.subf %78, %79 : vector<1x16xf32>
    %c0_60 = arith.constant 0 : index
    %c0_61 = arith.constant 0 : index
    %81 = vector.load %arg6[%c0_60, %c0_61] : memref<16x144xf32, #tpu.memory_space<vmem>>, vector<16x144xf32>
    %cst_62 = arith.constant dense<0.000000e+00> : vector<1x144xf32>
    %82 = tpu.matmul %77, %81, %cst_62 {dimension_numbers = #tpu.dot_dimension_numbers<[1], [0], [0], [1], [0, 0, 1, 1], [], []>} : vector<1x16xf32>, vector<16x144xf32>, vector<1x144xf32> -> vector<1x144xf32>
    %c0_63 = arith.constant 0 : index
    %c0_64 = arith.constant 0 : index
    %83 = vector.load %arg6[%c0_63, %c0_64] : memref<16x144xf32, #tpu.memory_space<vmem>>, vector<16x144xf32>
    %cst_65 = arith.constant dense<0.000000e+00> : vector<1x144xf32>
    %84 = tpu.matmul %80, %83, %cst_65 {dimension_numbers = #tpu.dot_dimension_numbers<[1], [0], [0], [1], [0, 0, 1, 1], [], []>} : vector<1x16xf32>, vector<16x144xf32>, vector<1x144xf32> -> vector<1x144xf32>
    %85 = vector.broadcast %82 : vector<1x144xf32> to vector<9x144xf32>
    %86 = arith.mulf %22, %85 : vector<9x144xf32>
    %87 = vector.broadcast %84 : vector<1x144xf32> to vector<9x144xf32>
    %88 = arith.addf %86, %87 : vector<9x144xf32>
    %cst_66 = arith.constant 0.000000e+00 : f32
    %89 = vector.broadcast %cst_66 : f32 to vector<9x144xf32>
    %90 = arith.maximumf %88, %89 : vector<9x144xf32>
    %91 = vector.broadcast %82 : vector<1x144xf32> to vector<9x144xf32>
    %92 = arith.mulf %44, %91 : vector<9x144xf32>
    %93 = vector.broadcast %84 : vector<1x144xf32> to vector<9x144xf32>
    %94 = arith.addf %92, %93 : vector<9x144xf32>
    %cst_67 = arith.constant 0.000000e+00 : f32
    %95 = vector.broadcast %cst_67 : f32 to vector<9x144xf32>
    %96 = arith.maximumf %94, %95 : vector<9x144xf32>
    %c0_68 = arith.constant 0 : index
    %c0_69 = arith.constant 0 : index
    %97 = vector.load %arg7[%c0_68, %c0_69] : memref<31x9xbf16, #tpu.memory_space<vmem>>, vector<31x9xbf16>
    %98 = arith.truncf %90 : vector<9x144xf32> to vector<9x144xbf16>
    %cst_70 = arith.constant dense<0.000000e+00> : vector<31x144xf32>
    %99 = tpu.matmul %97, %98, %cst_70 {dimension_numbers = #tpu.dot_dimension_numbers<[1], [0], [0], [1], [0, 0, 1, 1], [], []>} : vector<31x9xbf16>, vector<9x144xbf16>, vector<31x144xf32> -> vector<31x144xf32>
    %c0_71 = arith.constant 0 : index
    %c0_72 = arith.constant 0 : index
    %c0_73 = arith.constant 0 : index
    %100 = vector.load %arg18[%c0_71, %c0_72, %c0_73] : memref<2x31x144xf32, #tpu.memory_space<vmem>>, vector<1x31x144xf32>
    %101 = vector.shape_cast %100 : vector<1x31x144xf32> to vector<31x144xf32>
    %102 = vector.shape_cast %99 : vector<31x144xf32> to vector<1x31x144xf32>
    tpu.vector_store %arg18[%c0_71, %c0_72, %c0_73], %102 {strides = array<i32>} : memref<2x31x144xf32, #tpu.memory_space<vmem>>, vector<1x31x144xf32>,
    %103 = arith.truncf %96 : vector<9x144xf32> to vector<9x144xbf16>
    %cst_74 = arith.constant dense<0.000000e+00> : vector<31x144xf32>
    %104 = tpu.matmul %97, %103, %cst_74 {dimension_numbers = #tpu.dot_dimension_numbers<[1], [0], [0], [1], [0, 0, 1, 1], [], []>} : vector<31x9xbf16>, vector<9x144xbf16>, vector<31x144xf32> -> vector<31x144xf32>
    %c1_75 = arith.constant 1 : index
    %c0_76 = arith.constant 0 : index
    %c0_77 = arith.constant 0 : index
    %105 = vector.load %arg18[%c1_75, %c0_76, %c0_77] : memref<2x31x144xf32, #tpu.memory_space<vmem>>, vector<1x31x144xf32>
    %106 = vector.shape_cast %105 : vector<1x31x144xf32> to vector<31x144xf32>
    %107 = vector.shape_cast %104 : vector<31x144xf32> to vector<1x31x144xf32>
    tpu.vector_store %arg18[%c1_75, %c0_76, %c0_77], %107 {strides = array<i32>} : memref<2x31x144xf32, #tpu.memory_space<vmem>>, vector<1x31x144xf32>,
    %c0_78 = arith.constant 0 : index
    %c0_79 = arith.constant 0 : index
    %108 = vector.load %arg9[%c0_78, %c0_79] : memref<1x192xf32, #tpu.memory_space<vmem>>, vector<1x192xf32>
    %c0_80 = arith.constant 0 : index
    %c0_81 = arith.constant 0 : index
    %c0_82 = arith.constant 0 : index
    %109 = vector.load %arg18[%c0_80, %c0_81, %c0_82] : memref<2x31x144xf32, #tpu.memory_space<vmem>>, vector<1x24x144xf32>
    %110 = vector.shape_cast %109 : vector<1x24x144xf32> to vector<24x144xf32>
    %111 = arith.truncf %110 : vector<24x144xf32> to vector<24x144xbf16>
    %c0_83 = arith.constant 0 : index
    %c0_84 = arith.constant 0 : index
    %c0_85 = arith.constant 0 : index
    %112 = vector.load %arg8[%c0_83, %c0_84, %c0_85] : memref<8x144x192xbf16, #tpu.memory_space<vmem>>, vector<1x144x192xbf16>
    %113 = vector.shape_cast %112 : vector<1x144x192xbf16> to vector<144x192xbf16>
    %cst_86 = arith.constant dense<0.000000e+00> : vector<24x192xf32>
    %114 = tpu.matmul %111, %113, %cst_86 {dimension_numbers = #tpu.dot_dimension_numbers<[1], [0], [0], [1], [0, 0, 1, 1], [], []>} : vector<24x144xbf16>, vector<144x192xbf16>, vector<24x192xf32> -> vector<24x192xf32>
    %c0_87 = arith.constant 0 : index
    %c1_88 = arith.constant 1 : index
    %c0_89 = arith.constant 0 : index
    %115 = vector.load %arg18[%c0_87, %c1_88, %c0_89] : memref<2x31x144xf32, #tpu.memory_space<vmem>>, vector<1x24x144xf32>
    %116 = vector.shape_cast %115 : vector<1x24x144xf32> to vector<24x144xf32>
    %117 = arith.truncf %116 : vector<24x144xf32> to vector<24x144xbf16>
    %c1_90 = arith.constant 1 : index
    %c0_91 = arith.constant 0 : index
    %c0_92 = arith.constant 0 : index
    %118 = vector.load %arg8[%c1_90, %c0_91, %c0_92] : memref<8x144x192xbf16, #tpu.memory_space<vmem>>, vector<1x144x192xbf16>
    %119 = vector.shape_cast %118 : vector<1x144x192xbf16> to vector<144x192xbf16>
    %cst_93 = arith.constant dense<0.000000e+00> : vector<24x192xf32>
    %120 = tpu.matmul %117, %119, %cst_93 {dimension_numbers = #tpu.dot_dimension_numbers<[1], [0], [0], [1], [0, 0, 1, 1], [], []>} : vector<24x144xbf16>, vector<144x192xbf16>, vector<24x192xf32> -> vector<24x192xf32>
    %121 = arith.addf %114, %120 : vector<24x192xf32>
    %c0_94 = arith.constant 0 : index
    %c2_95 = arith.constant 2 : index
    %c0_96 = arith.constant 0 : index
    %122 = vector.load %arg18[%c0_94, %c2_95, %c0_96] : memref<2x31x144xf32, #tpu.memory_space<vmem>>, vector<1x24x144xf32>
    %123 = vector.shape_cast %122 : vector<1x24x144xf32> to vector<24x144xf32>
    %124 = arith.truncf %123 : vector<24x144xf32> to vector<24x144xbf16>
    %c2_97 = arith.constant 2 : index
    %c0_98 = arith.constant 0 : index
    %c0_99 = arith.constant 0 : index
    %125 = vector.load %arg8[%c2_97, %c0_98, %c0_99] : memref<8x144x192xbf16, #tpu.memory_space<vmem>>, vector<1x144x192xbf16>
    %126 = vector.shape_cast %125 : vector<1x144x192xbf16> to vector<144x192xbf16>
    %cst_100 = arith.constant dense<0.000000e+00> : vector<24x192xf32>
    %127 = tpu.matmul %124, %126, %cst_100 {dimension_numbers = #tpu.dot_dimension_numbers<[1], [0], [0], [1], [0, 0, 1, 1], [], []>} : vector<24x144xbf16>, vector<144x192xbf16>, vector<24x192xf32> -> vector<24x192xf32>
    %128 = arith.addf %121, %127 : vector<24x192xf32>
    %c0_101 = arith.constant 0 : index
    %c3 = arith.constant 3 : index
    %c0_102 = arith.constant 0 : index
    %129 = vector.load %arg18[%c0_101, %c3, %c0_102] : memref<2x31x144xf32, #tpu.memory_space<vmem>>, vector<1x24x144xf32>
    %130 = vector.shape_cast %129 : vector<1x24x144xf32> to vector<24x144xf32>
    %131 = arith.truncf %130 : vector<24x144xf32> to vector<24x144xbf16>
    %c3_103 = arith.constant 3 : index
    %c0_104 = arith.constant 0 : index
    %c0_105 = arith.constant 0 : index
    %132 = vector.load %arg8[%c3_103, %c0_104, %c0_105] : memref<8x144x192xbf16, #tpu.memory_space<vmem>>, vector<1x144x192xbf16>
    %133 = vector.shape_cast %132 : vector<1x144x192xbf16> to vector<144x192xbf16>
    %cst_106 = arith.constant dense<0.000000e+00> : vector<24x192xf32>
    %134 = tpu.matmul %131, %133, %cst_106 {dimension_numbers = #tpu.dot_dimension_numbers<[1], [0], [0], [1], [0, 0, 1, 1], [], []>} : vector<24x144xbf16>, vector<144x192xbf16>, vector<24x192xf32> -> vector<24x192xf32>
    %135 = arith.addf %128, %134 : vector<24x192xf32>
    %c0_107 = arith.constant 0 : index
    %c4 = arith.constant 4 : index
    %c0_108 = arith.constant 0 : index
    %136 = vector.load %arg18[%c0_107, %c4, %c0_108] : memref<2x31x144xf32, #tpu.memory_space<vmem>>, vector<1x24x144xf32>
    %137 = vector.shape_cast %136 : vector<1x24x144xf32> to vector<24x144xf32>
    %138 = arith.truncf %137 : vector<24x144xf32> to vector<24x144xbf16>
    %c4_109 = arith.constant 4 : index
    %c0_110 = arith.constant 0 : index
    %c0_111 = arith.constant 0 : index
    %139 = vector.load %arg8[%c4_109, %c0_110, %c0_111] : memref<8x144x192xbf16, #tpu.memory_space<vmem>>, vector<1x144x192xbf16>
    %140 = vector.shape_cast %139 : vector<1x144x192xbf16> to vector<144x192xbf16>
    %cst_112 = arith.constant dense<0.000000e+00> : vector<24x192xf32>
    %141 = tpu.matmul %138, %140, %cst_112 {dimension_numbers = #tpu.dot_dimension_numbers<[1], [0], [0], [1], [0, 0, 1, 1], [], []>} : vector<24x144xbf16>, vector<144x192xbf16>, vector<24x192xf32> -> vector<24x192xf32>
    %142 = arith.addf %135, %141 : vector<24x192xf32>
    %c0_113 = arith.constant 0 : index
    %c5 = arith.constant 5 : index
    %c0_114 = arith.constant 0 : index
    %143 = vector.load %arg18[%c0_113, %c5, %c0_114] : memref<2x31x144xf32, #tpu.memory_space<vmem>>, vector<1x24x144xf32>
    %144 = vector.shape_cast %143 : vector<1x24x144xf32> to vector<24x144xf32>
    %145 = arith.truncf %144 : vector<24x144xf32> to vector<24x144xbf16>
    %c5_115 = arith.constant 5 : index
    %c0_116 = arith.constant 0 : index
    %c0_117 = arith.constant 0 : index
    %146 = vector.load %arg8[%c5_115, %c0_116, %c0_117] : memref<8x144x192xbf16, #tpu.memory_space<vmem>>, vector<1x144x192xbf16>
    %147 = vector.shape_cast %146 : vector<1x144x192xbf16> to vector<144x192xbf16>
    %cst_118 = arith.constant dense<0.000000e+00> : vector<24x192xf32>
    %148 = tpu.matmul %145, %147, %cst_118 {dimension_numbers = #tpu.dot_dimension_numbers<[1], [0], [0], [1], [0, 0, 1, 1], [], []>} : vector<24x144xbf16>, vector<144x192xbf16>, vector<24x192xf32> -> vector<24x192xf32>
    %149 = arith.addf %142, %148 : vector<24x192xf32>
    %c0_119 = arith.constant 0 : index
    %c6 = arith.constant 6 : index
    %c0_120 = arith.constant 0 : index
    %150 = vector.load %arg18[%c0_119, %c6, %c0_120] : memref<2x31x144xf32, #tpu.memory_space<vmem>>, vector<1x24x144xf32>
    %151 = vector.shape_cast %150 : vector<1x24x144xf32> to vector<24x144xf32>
    %152 = arith.truncf %151 : vector<24x144xf32> to vector<24x144xbf16>
    %c6_121 = arith.constant 6 : index
    %c0_122 = arith.constant 0 : index
    %c0_123 = arith.constant 0 : index
    %153 = vector.load %arg8[%c6_121, %c0_122, %c0_123] : memref<8x144x192xbf16, #tpu.memory_space<vmem>>, vector<1x144x192xbf16>
    %154 = vector.shape_cast %153 : vector<1x144x192xbf16> to vector<144x192xbf16>
    %cst_124 = arith.constant dense<0.000000e+00> : vector<24x192xf32>
    %155 = tpu.matmul %152, %154, %cst_124 {dimension_numbers = #tpu.dot_dimension_numbers<[1], [0], [0], [1], [0, 0, 1, 1], [], []>} : vector<24x144xbf16>, vector<144x192xbf16>, vector<24x192xf32> -> vector<24x192xf32>
    %156 = arith.addf %149, %155 : vector<24x192xf32>
    %c0_125 = arith.constant 0 : index
    %c7 = arith.constant 7 : index
    %c0_126 = arith.constant 0 : index
    %157 = vector.load %arg18[%c0_125, %c7, %c0_126] : memref<2x31x144xf32, #tpu.memory_space<vmem>>, vector<1x24x144xf32>
    %158 = vector.shape_cast %157 : vector<1x24x144xf32> to vector<24x144xf32>
    %159 = arith.truncf %158 : vector<24x144xf32> to vector<24x144xbf16>
    %c7_127 = arith.constant 7 : index
    %c0_128 = arith.constant 0 : index
    %c0_129 = arith.constant 0 : index
    %160 = vector.load %arg8[%c7_127, %c0_128, %c0_129] : memref<8x144x192xbf16, #tpu.memory_space<vmem>>, vector<1x144x192xbf16>
    %161 = vector.shape_cast %160 : vector<1x144x192xbf16> to vector<144x192xbf16>
    %cst_130 = arith.constant dense<0.000000e+00> : vector<24x192xf32>
    %162 = tpu.matmul %159, %161, %cst_130 {dimension_numbers = #tpu.dot_dimension_numbers<[1], [0], [0], [1], [0, 0, 1, 1], [], []>} : vector<24x144xbf16>, vector<144x192xbf16>, vector<24x192xf32> -> vector<24x192xf32>
    %163 = arith.addf %156, %162 : vector<24x192xf32>
    %164 = vector.broadcast %108 : vector<1x192xf32> to vector<24x192xf32>
    %165 = arith.addf %163, %164 : vector<24x192xf32>
    %c1_131 = arith.constant 1 : index
    %c0_132 = arith.constant 0 : index
    %c0_133 = arith.constant 0 : index
    %166 = vector.load %arg18[%c1_131, %c0_132, %c0_133] : memref<2x31x144xf32, #tpu.memory_space<vmem>>, vector<1x24x144xf32>
    %167 = vector.shape_cast %166 : vector<1x24x144xf32> to vector<24x144xf32>
    %168 = arith.truncf %167 : vector<24x144xf32> to vector<24x144xbf16>
    %c0_134 = arith.constant 0 : index
    %c0_135 = arith.constant 0 : index
    %c0_136 = arith.constant 0 : index
    %169 = vector.load %arg8[%c0_134, %c0_135, %c0_136] : memref<8x144x192xbf16, #tpu.memory_space<vmem>>, vector<1x144x192xbf16>
    %170 = vector.shape_cast %169 : vector<1x144x192xbf16> to vector<144x192xbf16>
    %cst_137 = arith.constant dense<0.000000e+00> : vector<24x192xf32>
    %171 = tpu.matmul %168, %170, %cst_137 {dimension_numbers = #tpu.dot_dimension_numbers<[1], [0], [0], [1], [0, 0, 1, 1], [], []>} : vector<24x144xbf16>, vector<144x192xbf16>, vector<24x192xf32> -> vector<24x192xf32>
    %c1_138 = arith.constant 1 : index
    %c1_139 = arith.constant 1 : index
    %c0_140 = arith.constant 0 : index
    %172 = vector.load %arg18[%c1_138, %c1_139, %c0_140] : memref<2x31x144xf32, #tpu.memory_space<vmem>>, vector<1x24x144xf32>
    %173 = vector.shape_cast %172 : vector<1x24x144xf32> to vector<24x144xf32>
    %174 = arith.truncf %173 : vector<24x144xf32> to vector<24x144xbf16>
    %c1_141 = arith.constant 1 : index
    %c0_142 = arith.constant 0 : index
    %c0_143 = arith.constant 0 : index
    %175 = vector.load %arg8[%c1_141, %c0_142, %c0_143] : memref<8x144x192xbf16, #tpu.memory_space<vmem>>, vector<1x144x192xbf16>
    %176 = vector.shape_cast %175 : vector<1x144x192xbf16> to vector<144x192xbf16>
    %cst_144 = arith.constant dense<0.000000e+00> : vector<24x192xf32>
    %177 = tpu.matmul %174, %176, %cst_144 {dimension_numbers = #tpu.dot_dimension_numbers<[1], [0], [0], [1], [0, 0, 1, 1], [], []>} : vector<24x144xbf16>, vector<144x192xbf16>, vector<24x192xf32> -> vector<24x192xf32>
    %178 = arith.addf %171, %177 : vector<24x192xf32>
    %c1_145 = arith.constant 1 : index
    %c2_146 = arith.constant 2 : index
    %c0_147 = arith.constant 0 : index
    %179 = vector.load %arg18[%c1_145, %c2_146, %c0_147] : memref<2x31x144xf32, #tpu.memory_space<vmem>>, vector<1x24x144xf32>
    %180 = vector.shape_cast %179 : vector<1x24x144xf32> to vector<24x144xf32>
    %181 = arith.truncf %180 : vector<24x144xf32> to vector<24x144xbf16>
    %c2_148 = arith.constant 2 : index
    %c0_149 = arith.constant 0 : index
    %c0_150 = arith.constant 0 : index
    %182 = vector.load %arg8[%c2_148, %c0_149, %c0_150] : memref<8x144x192xbf16, #tpu.memory_space<vmem>>, vector<1x144x192xbf16>
    %183 = vector.shape_cast %182 : vector<1x144x192xbf16> to vector<144x192xbf16>
    %cst_151 = arith.constant dense<0.000000e+00> : vector<24x192xf32>
    %184 = tpu.matmul %181, %183, %cst_151 {dimension_numbers = #tpu.dot_dimension_numbers<[1], [0], [0], [1], [0, 0, 1, 1], [], []>} : vector<24x144xbf16>, vector<144x192xbf16>, vector<24x192xf32> -> vector<24x192xf32>
    %185 = arith.addf %178, %184 : vector<24x192xf32>
    %c1_152 = arith.constant 1 : index
    %c3_153 = arith.constant 3 : index
    %c0_154 = arith.constant 0 : index
    %186 = vector.load %arg18[%c1_152, %c3_153, %c0_154] : memref<2x31x144xf32, #tpu.memory_space<vmem>>, vector<1x24x144xf32>
    %187 = vector.shape_cast %186 : vector<1x24x144xf32> to vector<24x144xf32>
    %188 = arith.truncf %187 : vector<24x144xf32> to vector<24x144xbf16>
    %c3_155 = arith.constant 3 : index
    %c0_156 = arith.constant 0 : index
    %c0_157 = arith.constant 0 : index
    %189 = vector.load %arg8[%c3_155, %c0_156, %c0_157] : memref<8x144x192xbf16, #tpu.memory_space<vmem>>, vector<1x144x192xbf16>
    %190 = vector.shape_cast %189 : vector<1x144x192xbf16> to vector<144x192xbf16>
    %cst_158 = arith.constant dense<0.000000e+00> : vector<24x192xf32>
    %191 = tpu.matmul %188, %190, %cst_158 {dimension_numbers = #tpu.dot_dimension_numbers<[1], [0], [0], [1], [0, 0, 1, 1], [], []>} : vector<24x144xbf16>, vector<144x192xbf16>, vector<24x192xf32> -> vector<24x192xf32>
    %192 = arith.addf %185, %191 : vector<24x192xf32>
    %c1_159 = arith.constant 1 : index
    %c4_160 = arith.constant 4 : index
    %c0_161 = arith.constant 0 : index
    %193 = vector.load %arg18[%c1_159, %c4_160, %c0_161] : memref<2x31x144xf32, #tpu.memory_space<vmem>>, vector<1x24x144xf32>
    %194 = vector.shape_cast %193 : vector<1x24x144xf32> to vector<24x144xf32>
    %195 = arith.truncf %194 : vector<24x144xf32> to vector<24x144xbf16>
    %c4_162 = arith.constant 4 : index
    %c0_163 = arith.constant 0 : index
    %c0_164 = arith.constant 0 : index
    %196 = vector.load %arg8[%c4_162, %c0_163, %c0_164] : memref<8x144x192xbf16, #tpu.memory_space<vmem>>, vector<1x144x192xbf16>
    %197 = vector.shape_cast %196 : vector<1x144x192xbf16> to vector<144x192xbf16>
    %cst_165 = arith.constant dense<0.000000e+00> : vector<24x192xf32>
    %198 = tpu.matmul %195, %197, %cst_165 {dimension_numbers = #tpu.dot_dimension_numbers<[1], [0], [0], [1], [0, 0, 1, 1], [], []>} : vector<24x144xbf16>, vector<144x192xbf16>, vector<24x192xf32> -> vector<24x192xf32>
    %199 = arith.addf %192, %198 : vector<24x192xf32>
    %c1_166 = arith.constant 1 : index
    %c5_167 = arith.constant 5 : index
    %c0_168 = arith.constant 0 : index
    %200 = vector.load %arg18[%c1_166, %c5_167, %c0_168] : memref<2x31x144xf32, #tpu.memory_space<vmem>>, vector<1x24x144xf32>
    %201 = vector.shape_cast %200 : vector<1x24x144xf32> to vector<24x144xf32>
    %202 = arith.truncf %201 : vector<24x144xf32> to vector<24x144xbf16>
    %c5_169 = arith.constant 5 : index
    %c0_170 = arith.constant 0 : index
    %c0_171 = arith.constant 0 : index
    %203 = vector.load %arg8[%c5_169, %c0_170, %c0_171] : memref<8x144x192xbf16, #tpu.memory_space<vmem>>, vector<1x144x192xbf16>
    %204 = vector.shape_cast %203 : vector<1x144x192xbf16> to vector<144x192xbf16>
    %cst_172 = arith.constant dense<0.000000e+00> : vector<24x192xf32>
    %205 = tpu.matmul %202, %204, %cst_172 {dimension_numbers = #tpu.dot_dimension_numbers<[1], [0], [0], [1], [0, 0, 1, 1], [], []>} : vector<24x144xbf16>, vector<144x192xbf16>, vector<24x192xf32> -> vector<24x192xf32>
    %206 = arith.addf %199, %205 : vector<24x192xf32>
    %c1_173 = arith.constant 1 : index
    %c6_174 = arith.constant 6 : index
    %c0_175 = arith.constant 0 : index
    %207 = vector.load %arg18[%c1_173, %c6_174, %c0_175] : memref<2x31x144xf32, #tpu.memory_space<vmem>>, vector<1x24x144xf32>
    %208 = vector.shape_cast %207 : vector<1x24x144xf32> to vector<24x144xf32>
    %209 = arith.truncf %208 : vector<24x144xf32> to vector<24x144xbf16>
    %c6_176 = arith.constant 6 : index
    %c0_177 = arith.constant 0 : index
    %c0_178 = arith.constant 0 : index
    %210 = vector.load %arg8[%c6_176, %c0_177, %c0_178] : memref<8x144x192xbf16, #tpu.memory_space<vmem>>, vector<1x144x192xbf16>
    %211 = vector.shape_cast %210 : vector<1x144x192xbf16> to vector<144x192xbf16>
    %cst_179 = arith.constant dense<0.000000e+00> : vector<24x192xf32>
    %212 = tpu.matmul %209, %211, %cst_179 {dimension_numbers = #tpu.dot_dimension_numbers<[1], [0], [0], [1], [0, 0, 1, 1], [], []>} : vector<24x144xbf16>, vector<144x192xbf16>, vector<24x192xf32> -> vector<24x192xf32>
    %213 = arith.addf %206, %212 : vector<24x192xf32>
    %c1_180 = arith.constant 1 : index
    %c7_181 = arith.constant 7 : index
    %c0_182 = arith.constant 0 : index
    %214 = vector.load %arg18[%c1_180, %c7_181, %c0_182] : memref<2x31x144xf32, #tpu.memory_space<vmem>>, vector<1x24x144xf32>
    %215 = vector.shape_cast %214 : vector<1x24x144xf32> to vector<24x144xf32>
    %216 = arith.truncf %215 : vector<24x144xf32> to vector<24x144xbf16>
    %c7_183 = arith.constant 7 : index
    %c0_184 = arith.constant 0 : index
    %c0_185 = arith.constant 0 : index
    %217 = vector.load %arg8[%c7_183, %c0_184, %c0_185] : memref<8x144x192xbf16, #tpu.memory_space<vmem>>, vector<1x144x192xbf16>
    %218 = vector.shape_cast %217 : vector<1x144x192xbf16> to vector<144x192xbf16>
    %cst_186 = arith.constant dense<0.000000e+00> : vector<24x192xf32>
    %219 = tpu.matmul %216, %218, %cst_186 {dimension_numbers = #tpu.dot_dimension_numbers<[1], [0], [0], [1], [0, 0, 1, 1], [], []>} : vector<24x144xbf16>, vector<144x192xbf16>, vector<24x192xf32> -> vector<24x192xf32>
    %220 = arith.addf %213, %219 : vector<24x192xf32>
    %221 = vector.broadcast %108 : vector<1x192xf32> to vector<24x192xf32>
    %222 = arith.addf %220, %221 : vector<24x192xf32>
    %cst_187 = arith.constant 0.000000e+00 : f32
    %223 = vector.broadcast %cst_187 : f32 to vector<1x192xf32>
    %cst_188 = arith.constant 0.000000e+00 : f32
    %224 = vector.broadcast %cst_188 : f32 to vector<1x192xf32>
    %cst_189 = arith.constant dense<0.000000e+00> : vector<192xf32>
    %225 = vector.multi_reduction <add>, %165, %cst_189 [0] : vector<24x192xf32> to vector<192xf32>
    %226 = vector.shape_cast %225 : vector<192xf32> to vector<1x192xf32>
    %227 = arith.addf %223, %226 : vector<1x192xf32>
    %228 = arith.mulf %165, %165 : vector<24x192xf32>
    %cst_190 = arith.constant dense<0.000000e+00> : vector<192xf32>
    %229 = vector.multi_reduction <add>, %228, %cst_190 [0] : vector<24x192xf32> to vector<192xf32>
    %230 = vector.shape_cast %229 : vector<192xf32> to vector<1x192xf32>
    %231 = arith.addf %224, %230 : vector<1x192xf32>
    %cst_191 = arith.constant dense<0.000000e+00> : vector<192xf32>
    %232 = vector.multi_reduction <add>, %222, %cst_191 [0] : vector<24x192xf32> to vector<192xf32>
    %233 = vector.shape_cast %232 : vector<192xf32> to vector<1x192xf32>
    %234 = arith.addf %227, %233 : vector<1x192xf32>
    %235 = arith.mulf %222, %222 : vector<24x192xf32>
    %cst_192 = arith.constant dense<0.000000e+00> : vector<192xf32>
    %236 = vector.multi_reduction <add>, %235, %cst_192 [0] : vector<24x192xf32> to vector<192xf32>
    %237 = vector.shape_cast %236 : vector<192xf32> to vector<1x192xf32>
    %238 = arith.addf %231, %237 : vector<1x192xf32>
    %c0_193 = arith.constant 0 : index
    %c0_194 = arith.constant 0 : index
    %239 = vector.load %arg12[%c0_193, %c0_194] : memref<192x8xf32, #tpu.memory_space<vmem>>, vector<192x8xf32>
    %cst_195 = arith.constant dense<0.000000e+00> : vector<1x8xf32>
    %240 = tpu.matmul %234, %239, %cst_195 {dimension_numbers = #tpu.dot_dimension_numbers<[1], [0], [0], [1], [0, 0, 1, 1], [], []>} : vector<1x192xf32>, vector<192x8xf32>, vector<1x8xf32> -> vector<1x8xf32>
    %c0_196 = arith.constant 0 : index
    %c0_197 = arith.constant 0 : index
    %241 = vector.load %arg12[%c0_196, %c0_197] : memref<192x8xf32, #tpu.memory_space<vmem>>, vector<192x8xf32>
    %cst_198 = arith.constant dense<0.000000e+00> : vector<1x8xf32>
    %242 = tpu.matmul %238, %241, %cst_198 {dimension_numbers = #tpu.dot_dimension_numbers<[1], [0], [0], [1], [0, 0, 1, 1], [], []>} : vector<1x192xf32>, vector<192x8xf32>, vector<1x8xf32> -> vector<1x8xf32>
    %cst_199 = arith.constant 8.68055562E-4 : f32
    %243 = vector.broadcast %cst_199 : f32 to vector<1x8xf32>
    %244 = arith.mulf %240, %243 : vector<1x8xf32>
    %cst_200 = arith.constant 8.68055562E-4 : f32
    %245 = vector.broadcast %cst_200 : f32 to vector<1x8xf32>
    %246 = arith.mulf %242, %245 : vector<1x8xf32>
    %247 = arith.mulf %244, %244 : vector<1x8xf32>
    %248 = arith.subf %246, %247 : vector<1x8xf32>
    %cst_201 = arith.constant 0.000000e+00 : f32
    %249 = vector.broadcast %cst_201 : f32 to vector<1x8xf32>
    %250 = arith.maximumf %248, %249 : vector<1x8xf32>
    %c0_202 = arith.constant 0 : index
    %c0_203 = arith.constant 0 : index
    %251 = vector.load %arg10[%c0_202, %c0_203] : memref<1x8xf32, #tpu.memory_space<vmem>>, vector<1x8xf32>
    %cst_204 = arith.constant 9.99999974E-6 : f32
    %252 = vector.broadcast %cst_204 : f32 to vector<1x8xf32>
    %253 = arith.addf %250, %252 : vector<1x8xf32>
    %254 = math.rsqrt %253 : vector<1x8xf32>
    %255 = arith.mulf %251, %254 : vector<1x8xf32>
    %c0_205 = arith.constant 0 : index
    %c0_206 = arith.constant 0 : index
    %256 = vector.load %arg11[%c0_205, %c0_206] : memref<1x8xf32, #tpu.memory_space<vmem>>, vector<1x8xf32>
    %257 = arith.mulf %244, %255 : vector<1x8xf32>
    %258 = arith.subf %256, %257 : vector<1x8xf32>
    %c0_207 = arith.constant 0 : index
    %c0_208 = arith.constant 0 : index
    %259 = vector.load %arg13[%c0_207, %c0_208] : memref<8x192xf32, #tpu.memory_space<vmem>>, vector<8x192xf32>
    %cst_209 = arith.constant dense<0.000000e+00> : vector<1x192xf32>
    %260 = tpu.matmul %255, %259, %cst_209 {dimension_numbers = #tpu.dot_dimension_numbers<[1], [0], [0], [1], [0, 0, 1, 1], [], []>} : vector<1x8xf32>, vector<8x192xf32>, vector<1x192xf32> -> vector<1x192xf32>
    %c0_210 = arith.constant 0 : index
    %c0_211 = arith.constant 0 : index
    %261 = vector.load %arg13[%c0_210, %c0_211] : memref<8x192xf32, #tpu.memory_space<vmem>>, vector<8x192xf32>
    %cst_212 = arith.constant dense<0.000000e+00> : vector<1x192xf32>
    %262 = tpu.matmul %258, %261, %cst_212 {dimension_numbers = #tpu.dot_dimension_numbers<[1], [0], [0], [1], [0, 0, 1, 1], [], []>} : vector<1x8xf32>, vector<8x192xf32>, vector<1x192xf32> -> vector<1x192xf32>
    %263 = vector.broadcast %260 : vector<1x192xf32> to vector<24x192xf32>
    %264 = arith.mulf %165, %263 : vector<24x192xf32>
    %265 = vector.broadcast %262 : vector<1x192xf32> to vector<24x192xf32>
    %266 = arith.addf %264, %265 : vector<24x192xf32>
    %cst_213 = arith.constant 0.000000e+00 : f32
    %267 = vector.broadcast %cst_213 : f32 to vector<24x192xf32>
    %268 = arith.maximumf %266, %267 : vector<24x192xf32>
    %269 = vector.broadcast %260 : vector<1x192xf32> to vector<24x192xf32>
    %270 = arith.mulf %222, %269 : vector<24x192xf32>
    %271 = vector.broadcast %262 : vector<1x192xf32> to vector<24x192xf32>
    %272 = arith.addf %270, %271 : vector<24x192xf32>
    %cst_214 = arith.constant 0.000000e+00 : f32
    %273 = vector.broadcast %cst_214 : f32 to vector<24x192xf32>
    %274 = arith.maximumf %272, %273 : vector<24x192xf32>
    %c0_215 = arith.constant 0 : index
    %c0_216 = arith.constant 0 : index
    %275 = vector.load %arg14[%c0_215, %c0_216] : memref<51x24xbf16, #tpu.memory_space<vmem>>, vector<51x24xbf16>
    %276 = arith.truncf %268 : vector<24x192xf32> to vector<24x192xbf16>
    %cst_217 = arith.constant dense<0.000000e+00> : vector<51x192xf32>
    %277 = tpu.matmul %275, %276, %cst_217 {dimension_numbers = #tpu.dot_dimension_numbers<[1], [0], [0], [1], [0, 0, 1, 1], [], []>} : vector<51x24xbf16>, vector<24x192xbf16>, vector<51x192xf32> -> vector<51x192xf32>
    %c0_218 = arith.constant 0 : index
    %c0_219 = arith.constant 0 : index
    %c0_220 = arith.constant 0 : index
    %278 = vector.load %arg19[%c0_218, %c0_219, %c0_220] : memref<2x51x192xf32, #tpu.memory_space<vmem>>, vector<1x51x192xf32>
    %279 = vector.shape_cast %278 : vector<1x51x192xf32> to vector<51x192xf32>
    %280 = vector.shape_cast %277 : vector<51x192xf32> to vector<1x51x192xf32>
    tpu.vector_store %arg19[%c0_218, %c0_219, %c0_220], %280 {strides = array<i32>} : memref<2x51x192xf32, #tpu.memory_space<vmem>>, vector<1x51x192xf32>,
    %281 = arith.truncf %274 : vector<24x192xf32> to vector<24x192xbf16>
    %cst_221 = arith.constant dense<0.000000e+00> : vector<51x192xf32>
    %282 = tpu.matmul %275, %281, %cst_221 {dimension_numbers = #tpu.dot_dimension_numbers<[1], [0], [0], [1], [0, 0, 1, 1], [], []>} : vector<51x24xbf16>, vector<24x192xbf16>, vector<51x192xf32> -> vector<51x192xf32>
    %c1_222 = arith.constant 1 : index
    %c0_223 = arith.constant 0 : index
    %c0_224 = arith.constant 0 : index
    %283 = vector.load %arg19[%c1_222, %c0_223, %c0_224] : memref<2x51x192xf32, #tpu.memory_space<vmem>>, vector<1x51x192xf32>
    %284 = vector.shape_cast %283 : vector<1x51x192xf32> to vector<51x192xf32>
    %285 = vector.shape_cast %282 : vector<51x192xf32> to vector<1x51x192xf32>
    tpu.vector_store %arg19[%c1_222, %c0_223, %c0_224], %285 {strides = array<i32>} : memref<2x51x192xf32, #tpu.memory_space<vmem>>, vector<1x51x192xf32>,
    %c0_225 = arith.constant 0 : index
    %c0_226 = arith.constant 0 : index
    %286 = vector.load %arg16[%c0_225, %c0_226] : memref<1x49xf32, #tpu.memory_space<vmem>>, vector<1x49xf32>
    %c0_227 = arith.constant 0 : index
    %c0_228 = arith.constant 0 : index
    %c0_229 = arith.constant 0 : index
    %287 = vector.load %arg19[%c0_227, %c0_228, %c0_229] : memref<2x51x192xf32, #tpu.memory_space<vmem>>, vector<1x49x192xf32>
    %288 = vector.shape_cast %287 : vector<1x49x192xf32> to vector<49x192xf32>
    %289 = arith.truncf %288 : vector<49x192xf32> to vector<49x192xbf16>
    %c0_230 = arith.constant 0 : index
    %c0_231 = arith.constant 0 : index
    %c0_232 = arith.constant 0 : index
    %290 = vector.load %arg15[%c0_230, %c0_231, %c0_232] : memref<3x192x49xbf16, #tpu.memory_space<vmem>>, vector<1x192x49xbf16>
    %291 = vector.shape_cast %290 : vector<1x192x49xbf16> to vector<192x49xbf16>
    %cst_233 = arith.constant dense<0.000000e+00> : vector<49x49xf32>
    %292 = tpu.matmul %289, %291, %cst_233 {dimension_numbers = #tpu.dot_dimension_numbers<[1], [0], [0], [1], [0, 0, 1, 1], [], []>} : vector<49x192xbf16>, vector<192x49xbf16>, vector<49x49xf32> -> vector<49x49xf32>
    %c0_234 = arith.constant 0 : index
    %c1_235 = arith.constant 1 : index
    %c0_236 = arith.constant 0 : index
    %293 = vector.load %arg19[%c0_234, %c1_235, %c0_236] : memref<2x51x192xf32, #tpu.memory_space<vmem>>, vector<1x49x192xf32>
    %294 = vector.shape_cast %293 : vector<1x49x192xf32> to vector<49x192xf32>
    %295 = arith.truncf %294 : vector<49x192xf32> to vector<49x192xbf16>
    %c1_237 = arith.constant 1 : index
    %c0_238 = arith.constant 0 : index
    %c0_239 = arith.constant 0 : index
    %296 = vector.load %arg15[%c1_237, %c0_238, %c0_239] : memref<3x192x49xbf16, #tpu.memory_space<vmem>>, vector<1x192x49xbf16>
    %297 = vector.shape_cast %296 : vector<1x192x49xbf16> to vector<192x49xbf16>
    %cst_240 = arith.constant dense<0.000000e+00> : vector<49x49xf32>
    %298 = tpu.matmul %295, %297, %cst_240 {dimension_numbers = #tpu.dot_dimension_numbers<[1], [0], [0], [1], [0, 0, 1, 1], [], []>} : vector<49x192xbf16>, vector<192x49xbf16>, vector<49x49xf32> -> vector<49x49xf32>
    %299 = arith.addf %292, %298 : vector<49x49xf32>
    %c0_241 = arith.constant 0 : index
    %c2_242 = arith.constant 2 : index
    %c0_243 = arith.constant 0 : index
    %300 = vector.load %arg19[%c0_241, %c2_242, %c0_243] : memref<2x51x192xf32, #tpu.memory_space<vmem>>, vector<1x49x192xf32>
    %301 = vector.shape_cast %300 : vector<1x49x192xf32> to vector<49x192xf32>
    %302 = arith.truncf %301 : vector<49x192xf32> to vector<49x192xbf16>
    %c2_244 = arith.constant 2 : index
    %c0_245 = arith.constant 0 : index
    %c0_246 = arith.constant 0 : index
    %303 = vector.load %arg15[%c2_244, %c0_245, %c0_246] : memref<3x192x49xbf16, #tpu.memory_space<vmem>>, vector<1x192x49xbf16>
    %304 = vector.shape_cast %303 : vector<1x192x49xbf16> to vector<192x49xbf16>
    %cst_247 = arith.constant dense<0.000000e+00> : vector<49x49xf32>
    %305 = tpu.matmul %302, %304, %cst_247 {dimension_numbers = #tpu.dot_dimension_numbers<[1], [0], [0], [1], [0, 0, 1, 1], [], []>} : vector<49x192xbf16>, vector<192x49xbf16>, vector<49x49xf32> -> vector<49x49xf32>
    %306 = arith.addf %299, %305 : vector<49x49xf32>
    %307 = vector.broadcast %286 : vector<1x49xf32> to vector<49x49xf32>
    %308 = arith.addf %306, %307 : vector<49x49xf32>
    %309 = arith.negf %308 : vector<49x49xf32>
    %310 = math.exp %309 : vector<49x49xf32>
    %cst_248 = arith.constant 1.000000e+00 : f32
    %311 = vector.broadcast %cst_248 : f32 to vector<49x49xf32>
    %312 = arith.addf %311, %310 : vector<49x49xf32>
    %313 = arith.divf %311, %312 : vector<49x49xf32>
    %c0_249 = arith.constant 0 : index
    %c0_250 = arith.constant 0 : index
    %c0_251 = arith.constant 0 : index
    %314 = vector.load %arg17[%c0_249, %c0_250, %c0_251] : memref<2x49x49xf32, #tpu.memory_space<vmem>>, vector<1x49x49xf32>
    %315 = vector.shape_cast %314 : vector<1x49x49xf32> to vector<49x49xf32>
    %316 = vector.shape_cast %313 : vector<49x49xf32> to vector<1x49x49xf32>
    tpu.vector_store %arg17[%c0_249, %c0_250, %c0_251], %316 {strides = array<i32>} : memref<2x49x49xf32, #tpu.memory_space<vmem>>, vector<1x49x49xf32>,
    %c1_252 = arith.constant 1 : index
    %c0_253 = arith.constant 0 : index
    %c0_254 = arith.constant 0 : index
    %317 = vector.load %arg19[%c1_252, %c0_253, %c0_254] : memref<2x51x192xf32, #tpu.memory_space<vmem>>, vector<1x49x192xf32>
    %318 = vector.shape_cast %317 : vector<1x49x192xf32> to vector<49x192xf32>
    %319 = arith.truncf %318 : vector<49x192xf32> to vector<49x192xbf16>
    %c0_255 = arith.constant 0 : index
    %c0_256 = arith.constant 0 : index
    %c0_257 = arith.constant 0 : index
    %320 = vector.load %arg15[%c0_255, %c0_256, %c0_257] : memref<3x192x49xbf16, #tpu.memory_space<vmem>>, vector<1x192x49xbf16>
    %321 = vector.shape_cast %320 : vector<1x192x49xbf16> to vector<192x49xbf16>
    %cst_258 = arith.constant dense<0.000000e+00> : vector<49x49xf32>
    %322 = tpu.matmul %319, %321, %cst_258 {dimension_numbers = #tpu.dot_dimension_numbers<[1], [0], [0], [1], [0, 0, 1, 1], [], []>} : vector<49x192xbf16>, vector<192x49xbf16>, vector<49x49xf32> -> vector<49x49xf32>
    %c1_259 = arith.constant 1 : index
    %c1_260 = arith.constant 1 : index
    %c0_261 = arith.constant 0 : index
    %323 = vector.load %arg19[%c1_259, %c1_260, %c0_261] : memref<2x51x192xf32, #tpu.memory_space<vmem>>, vector<1x49x192xf32>
    %324 = vector.shape_cast %323 : vector<1x49x192xf32> to vector<49x192xf32>
    %325 = arith.truncf %324 : vector<49x192xf32> to vector<49x192xbf16>
    %c1_262 = arith.constant 1 : index
    %c0_263 = arith.constant 0 : index
    %c0_264 = arith.constant 0 : index
    %326 = vector.load %arg15[%c1_262, %c0_263, %c0_264] : memref<3x192x49xbf16, #tpu.memory_space<vmem>>, vector<1x192x49xbf16>
    %327 = vector.shape_cast %326 : vector<1x192x49xbf16> to vector<192x49xbf16>
    %cst_265 = arith.constant dense<0.000000e+00> : vector<49x49xf32>
    %328 = tpu.matmul %325, %327, %cst_265 {dimension_numbers = #tpu.dot_dimension_numbers<[1], [0], [0], [1], [0, 0, 1, 1], [], []>} : vector<49x192xbf16>, vector<192x49xbf16>, vector<49x49xf32> -> vector<49x49xf32>
    %329 = arith.addf %322, %328 : vector<49x49xf32>
    %c1_266 = arith.constant 1 : index
    %c2_267 = arith.constant 2 : index
    %c0_268 = arith.constant 0 : index
    %330 = vector.load %arg19[%c1_266, %c2_267, %c0_268] : memref<2x51x192xf32, #tpu.memory_space<vmem>>, vector<1x49x192xf32>
    %331 = vector.shape_cast %330 : vector<1x49x192xf32> to vector<49x192xf32>
    %332 = arith.truncf %331 : vector<49x192xf32> to vector<49x192xbf16>
    %c2_269 = arith.constant 2 : index
    %c0_270 = arith.constant 0 : index
    %c0_271 = arith.constant 0 : index
    %333 = vector.load %arg15[%c2_269, %c0_270, %c0_271] : memref<3x192x49xbf16, #tpu.memory_space<vmem>>, vector<1x192x49xbf16>
    %334 = vector.shape_cast %333 : vector<1x192x49xbf16> to vector<192x49xbf16>
    %cst_272 = arith.constant dense<0.000000e+00> : vector<49x49xf32>
    %335 = tpu.matmul %332, %334, %cst_272 {dimension_numbers = #tpu.dot_dimension_numbers<[1], [0], [0], [1], [0, 0, 1, 1], [], []>} : vector<49x192xbf16>, vector<192x49xbf16>, vector<49x49xf32> -> vector<49x49xf32>
    %336 = arith.addf %329, %335 : vector<49x49xf32>
    %337 = vector.broadcast %286 : vector<1x49xf32> to vector<49x49xf32>
    %338 = arith.addf %336, %337 : vector<49x49xf32>
    %339 = arith.negf %338 : vector<49x49xf32>
    %340 = math.exp %339 : vector<49x49xf32>
    %cst_273 = arith.constant 1.000000e+00 : f32
    %341 = vector.broadcast %cst_273 : f32 to vector<49x49xf32>
    %342 = arith.addf %341, %340 : vector<49x49xf32>
    %343 = arith.divf %341, %342 : vector<49x49xf32>
    %c1_274 = arith.constant 1 : index
    %c0_275 = arith.constant 0 : index
    %c0_276 = arith.constant 0 : index
    %344 = vector.load %arg17[%c1_274, %c0_275, %c0_276] : memref<2x49x49xf32, #tpu.memory_space<vmem>>, vector<1x49x49xf32>
    %345 = vector.shape_cast %344 : vector<1x49x49xf32> to vector<49x49xf32>
    %346 = vector.shape_cast %343 : vector<49x49xf32> to vector<1x49x49xf32>
    tpu.vector_store %arg17[%c1_274, %c0_275, %c0_276], %346 {strides = array<i32>} : memref<2x49x49xf32, #tpu.memory_space<vmem>>, vector<1x49x49xf32>,
    return
  }
}

</mosaic_0001>

<bundles_post_ra>
// kernel: decoder_forward.1
= control target key start
LH: loop header
LB: loop body
LE: loop exit
PB: predicated region body
PF: predicated region fallthrough
CT: control target
= control target key end

     0   :  { %s10272_s0 = inlined_call_operand.vmem [shape: f32[2,11,128], index: 0, kind: input, shape index: {}]   ;;  %s10273_s1 = inlined_call_operand.vmem [shape: bf16[3,128,144], index: 1, kind: input, shape index: {}]   ;;  %s10274_s2 = inlined_call_operand.vmem [shape: f32[1,144], index: 2, kind: input, shape index: {}]   ;;  %s10275_s3 = inlined_call_operand.vmem [shape: f32[1,16], index: 3, kind: input, shape index: {}]   ;;  %s10276_s4 = inlined_call_operand.vmem [shape: f32[1,16], index: 4, kind: input, shape index: {}]   ;;  %s10277_s5 = inlined_call_operand.vmem [shape: f32[144,16], index: 5, kind: input, shape index: {}]   ;;  %s10278_s6 = inlined_call_operand.vmem [shape: f32[16,144], index: 6, kind: input, shape index: {}]   ;;  %s10279_s7 = inlined_call_operand.vmem [shape: bf16[31,9], index: 7, kind: input, shape index: {}]   ;;  %s10280_s8 = inlined_call_operand.hbm [shape: bf16[8,144,192], index: 8, kind: input, shape index: {}]   ;;  %s10281_s9 = inlined_call_operand.vmem [shape: f32[1,192], index: 9, kind: input, shape index: {}]   ;;  %s10282_s10 = inlined_call_operand.vmem [shape: f32[1,8], index: 10, kind: input, shape index: {}]   ;;  %s10283_s11 = inlined_call_operand.vmem [shape: f32[1,8], index: 11, kind: input, shape index: {}]   ;;  %s10284_s12 = inlined_call_operand.vmem [shape: f32[192,8], index: 12, kind: input, shape index: {}]   ;;  %s10285_s13 = inlined_call_operand.vmem [shape: f32[8,192], index: 13, kind: input, shape index: {}]   ;;  %s10286_s14 = inlined_call_operand.vmem [shape: bf16[51,24], index: 14, kind: input, shape index: {}]   ;;  %s10287_s15 = inlined_call_operand.vmem [shape: bf16[3,192,49], index: 15, kind: input, shape index: {}]   ;;  %s10288_s16 = inlined_call_operand.vmem [shape: f32[1,49], index: 16, kind: input, shape index: {}]   ;;  %s10289_s17 = inlined_call_operand.vmem [shape: f32[2,49,49], index: 17, kind: output, shape index: {}]  }
   0x1   :  { %10438 = sst [smem:[#allocation140_spill]] %s10272_s0 }
   0x2   :  { %10439 = sst [smem:[#allocation141_spill]] %s10273_s1 }
   0x3   :  { %22 = vsyncpa [#allocation5], 0  ;;  %s43_s26 = sshll.u32 %s10280_s8, 4  ;;  %s7573_s27 = smov [#allocation4]   ;;  %s44_s26 = int_to_ptr.hbm [resolvable:$true] %s43_s26 }
   0x4   :  { %s45_s28 = sshll.u32 %s7573_s27, 4  ;;  %s7574_s29 = smov 128   ;;  %s46_s28 = int_to_ptr.vmem [resolvable:$true] %s45_s28 }
   0x5   :  { %s7575_s0 = smov 8  }
   0x6   :  { %51 = dma.hbm_to_vmem [thread:$0]  %s44_s26, 18432, %s46_s28, [#allocation5], %s7574_s29, %s7574_s29, %s7575_s0  }
   0x7   :  { %7571 = dma.done.wait [#allocation5], 18432  }
   0x8   :  { %7572 = vsyncadd [#allocation5], 4294948864  ;;  %s10440_s19 = sld [smem:[#allocation141_spill]]  ;;  %vm572_vm0 = vcmask 1040384   ;;  %vm583_vm1 = vcmask 122880   ;;  %vm581_vm2 = vcmask 130048  }
   0x9   :  { %s10441_s20 = sld [smem:[#allocation140_spill]]  ;;  %vm925_vm6 = vcmask 1043456   ;;  %vm926_vm7 = vcmask 1044480   ;;  %vm918_vm8 = vcmask 72704   ;;  %vm980_vm9 = vcmask 129024  }
   0xa   :  { %vm1093_vm10 = vsmask.f32 7424  ;;  %vm1493_vm11 = vcmask 1046528   ;;  %vm1703_vm12 = vsmask.f32 6400  ;;  %vm1945_vm13 = vcmask 1045504  }
   0xb   :  { %vm2155_vm14 = vsmask.f32 5376  ;;  %vm2607_vm15 = vsmask.f32 4352 }
   0xe   :  { %v5926_v0 = vld [vmem:[%s10440_s19 + $0xf0] sm:$0xf]  ;;  %v7238_v1 = vld [vmem:[%s10440_s19 + $0xf4] sm:$0xf0]  ;;  %v7237_v2 = vld [vmem:[%s10440_s19 + $0xf4] sm:$0xf] }
   0xf   :  { %v7679_v3 = vor.u32 %v7238_v1, %v5926_v0  ;;  %v5928_v4 = vld [vmem:[%s10440_s19 + $0xf8] sm:$0xf0]  ;;  %v5990_v5 = vld [vmem:[%s10440_s19 + $0x70] sm:$0xf]  ;;  %v7222_v6 = vld [vmem:[%s10440_s19 + $0x74] sm:$0xf0] }
  0x10   :  { %v7690_v7 = vor.u32 %v7237_v2, %v5928_v4  ;;  %v7692_v8 = vor.u32 %v7222_v6, %v5990_v5  ;;  %v7221_v9 = vld [vmem:[%s10440_s19 + $0x74] sm:$0xf]  ;;  %v5992_v10 = vld [vmem:[%s10440_s19 + $0x78] sm:$0xf0]  ;;  %v5918_v11 = vld [vmem:[%s10440_s19 + $0xe0] sm:$0xf] }
  0x11   :  { %193 = vmatpush.bf16.msra.mxu0 %v7679_v3  ;;  %v7704_v12 = vor.u32 %v7221_v9, %v5992_v10  ;;  %v7236_v13 = vld [vmem:[%s10440_s19 + $0xe4] sm:$0xf0]  ;;  %v7235_v14 = vld [vmem:[%s10440_s19 + $0xe4] sm:$0xf]  ;;  %v5920_v15 = vld [vmem:[%s10440_s19 + $0xe8] sm:$0xf0] }
  0x12   :  { %207 = vmatpush.bf16.msra.mxu1 %v7690_v7  ;;  %301 = vmatpush.bf16.msra.mxu2 %v7692_v8  ;;  %v7717_v16 = vor.u32 %v7236_v13, %v5918_v11  ;;  %v7719_v17 = vor.u32 %v7235_v14, %v5920_v15  ;;  %v5982_v18 = vld [vmem:[%s10440_s19 + $0x60] sm:$0xf]  ;;  %v7220_v19 = vld [vmem:[%s10440_s19 + $0x64] sm:$0xf0]  ;;  %v7219_v20 = vld [vmem:[%s10440_s19 + $0x64] sm:$0xf] }
  0x13   :  { %315 = vmatpush.bf16.msra.mxu3 %v7704_v12  ;;  %v7731_v21 = vor.u32 %v7220_v19, %v5982_v18  ;;  %v5984_v22 = vld [vmem:[%s10440_s19 + $0x68] sm:$0xf0]  ;;  %v5910_v23 = vld [vmem:[%s10440_s19 + $0xd0] sm:$0xf]  ;;  %v7234_v24 = vld [vmem:[%s10440_s19 + $0xd4] sm:$0xf0] }
  0x14   :  { %v7742_v25 = vor.u32 %v7219_v20, %v5984_v22  ;;  %v7233_v26 = vld [vmem:[%s10440_s19 + $0xd4] sm:$0xf]  ;;  %v5912_v27 = vld [vmem:[%s10440_s19 + $0xd8] sm:$0xf0]  ;;  %v5974_v28 = vld [vmem:[%s10440_s19 + $0x50] sm:$0xf]  ;;  %v7754_v29 = vor.u32 %v7234_v24, %v5910_v23 }
  0x15   :  { %194 = vmatpush.bf16.msra.mxu0 %v7717_v16  ;;  %v7218_v30 = vld [vmem:[%s10440_s19 + $0x54] sm:$0xf0]  ;;  %v7217_v31 = vld [vmem:[%s10440_s19 + $0x54] sm:$0xf]  ;;  %v5976_v32 = vld [vmem:[%s10440_s19 + $0x58] sm:$0xf0]  ;;  %v7767_v33 = vor.u32 %v7233_v26, %v5912_v27 }
  0x16   :  { %208 = vmatpush.bf16.msra.mxu1 %v7719_v17  ;;  %302 = vmatpush.bf16.msra.mxu2 %v7731_v21  ;;  %v7769_v34 = vor.u32 %v7218_v30, %v5974_v28  ;;  %v5902_v35 = vld [vmem:[%s10440_s19 + $0xc0] sm:$0xf]  ;;  %v7232_v36 = vld [vmem:[%s10440_s19 + $0xc4] sm:$0xf0]  ;;  %v7231_v37 = vld [vmem:[%s10440_s19 + $0xc4] sm:$0xf]  ;;  %v7781_v38 = vor.u32 %v7217_v31, %v5976_v32 }
  0x17   :  { %316 = vmatpush.bf16.msra.mxu3 %v7742_v25  ;;  %v5904_v39 = vld [vmem:[%s10440_s19 + $0xc8] sm:$0xf0]  ;;  %v5966_v40 = vld [vmem:[%s10440_s19 + $0x40] sm:$0xf]  ;;  %v7216_v41 = vld [vmem:[%s10440_s19 + $0x44] sm:$0xf0]  ;;  %v7799_v44 = vor.u32 %v7232_v36, %v5902_v35 }
  0x18   :  { %v7215_v42 = vld [vmem:[%s10440_s19 + $0x44] sm:$0xf]  ;;  %v5968_v43 = vld [vmem:[%s10440_s19 + $0x48] sm:$0xf0]  ;;  %v7803_v45 = vor.u32 %v7231_v37, %v5904_v39  ;;  %v7805_v46 = vor.u32 %v7216_v41, %v5966_v40  ;;  %v5894_v47 = vld [vmem:[%s10440_s19 + $0xb0] sm:$0xf] }
  0x19   :  { %195 = vmatpush.bf16.msra.mxu0 %v7754_v29  ;;  %v7230_v48 = vld [vmem:[%s10440_s19 + $0xb4] sm:$0xf0]  ;;  %v7229_v49 = vld [vmem:[%s10440_s19 + $0xb4] sm:$0xf]  ;;  %v7817_v50 = vor.u32 %v7215_v42, %v5968_v43  ;;  %v5896_v51 = vld [vmem:[%s10440_s19 + $0xb8] sm:$0xf0] }
  0x1a   :  { %209 = vmatpush.bf16.msra.mxu1 %v7767_v33  ;;  %303 = vmatpush.bf16.msra.mxu2 %v7769_v34  ;;  %v5958_v52 = vld [vmem:[%s10440_s19 + $0x30] sm:$0xf]  ;;  %v7214_v53 = vld [vmem:[%s10440_s19 + $0x34] sm:$0xf0]  ;;  %v7213_v54 = vld [vmem:[%s10440_s19 + $0x34] sm:$0xf]  ;;  %v7835_v56 = vor.u32 %v7230_v48, %v5894_v47  ;;  %v7839_v57 = vor.u32 %v7229_v49, %v5896_v51 }
  0x1b   :  { %317 = vmatpush.bf16.msra.mxu3 %v7781_v38  ;;  %v5960_v55 = vld [vmem:[%s10440_s19 + $0x38] sm:$0xf0]  ;;  %v7841_v58 = vor.u32 %v7214_v53, %v5958_v52  ;;  %v5886_v59 = vld [vmem:[%s10440_s19 + $0xa0] sm:$0xf]  ;;  %v7228_v60 = vld [vmem:[%s10440_s19 + $0xa4] sm:$0xf0] }
  0x1c   :  { %v7227_v61 = vld [vmem:[%s10440_s19 + $0xa4] sm:$0xf]  ;;  %v7853_v62 = vor.u32 %v7213_v54, %v5960_v55  ;;  %v5888_v63 = vld [vmem:[%s10440_s19 + $0xa8] sm:$0xf0]  ;;  %v5950_v0 = vld [vmem:[%s10440_s19 + $0x20] sm:$0xf]  ;;  %v7871_v5 = vor.u32 %v7228_v60, %v5886_v59 }
  0x1d   :  { %196 = vmatpush.bf16.msra.mxu0 %v7799_v44  ;;  %v7212_v1 = vld [vmem:[%s10440_s19 + $0x24] sm:$0xf0]  ;;  %v7211_v2 = vld [vmem:[%s10440_s19 + $0x24] sm:$0xf]  ;;  %v5952_v4 = vld [vmem:[%s10440_s19 + $0x28] sm:$0xf0]  ;;  %v7875_v6 = vor.u32 %v7227_v61, %v5888_v63 }
  0x1e   :  { %210 = vmatpush.bf16.msra.mxu1 %v7803_v45  ;;  %304 = vmatpush.bf16.msra.mxu2 %v7805_v46  ;;  %v7877_v9 = vor.u32 %v7212_v1, %v5950_v0  ;;  %v5878_v10 = vld [vmem:[%s10440_s19 + $0x90] sm:$0xf]  ;;  %v7226_v11 = vld [vmem:[%s10440_s19 + $0x94] sm:$0xf0]  ;;  %v7225_v13 = vld [vmem:[%s10440_s19 + $0x94] sm:$0xf]  ;;  %v7889_v14 = vor.u32 %v7211_v2, %v5952_v4 }
  0x1f   :  { %318 = vmatpush.bf16.msra.mxu3 %v7817_v50  ;;  %v5880_v15 = vld [vmem:[%s10440_s19 + $0x98] sm:$0xf0]  ;;  %v5942_v18 = vld [vmem:[%s10440_s19 + $0x10] sm:$0xf]  ;;  %v7210_v19 = vld [vmem:[%s10440_s19 + $0x14] sm:$0xf0]  ;;  %v7907_v23 = vor.u32 %v7226_v11, %v5878_v10 }
  0x20   :  { %v7209_v20 = vld [vmem:[%s10440_s19 + $0x14] sm:$0xf]  ;;  %v5944_v22 = vld [vmem:[%s10440_s19 + $0x18] sm:$0xf0]  ;;  %v5870_v24 = vld [vmem:[%s10440_s19 + $0x80] sm:$0xf]  ;;  %v7914_v26 = vor.u32 %v7225_v13, %v5880_v15  ;;  %v7916_v27 = vor.u32 %v7210_v19, %v5942_v18 }
  0x21   :  { %197 = vmatpush.bf16.msra.mxu0 %v7835_v56  ;;  %v7224_v28 = vld [vmem:[%s10440_s19 + $0x84] sm:$0xf0]  ;;  %v7223_v30 = vld [vmem:[%s10440_s19 + $0x84] sm:$0xf]  ;;  %v5872_v31 = vld [vmem:[%s10440_s19 + $0x88] sm:$0xf0]  ;;  %v7928_v32 = vor.u32 %v7209_v20, %v5944_v22 }
  0x22   :  { %211 = vmatpush.bf16.msra.mxu1 %v7839_v57  ;;  %305 = vmatpush.bf16.msra.mxu2 %v7841_v58  ;;  %v5934_v35 = vld [vmem:[%s10440_s19] sm:$0xf]  ;;  %v7208_v36 = vld [vmem:[%s10440_s19 + $0x4] sm:$0xf0]  ;;  %v7207_v37 = vld [vmem:[%s10440_s19 + $0x4] sm:$0xf]  ;;  %v7949_v42 = vor.u32 %v7224_v28, %v5870_v24  ;;  %v7959_v48 = vor.u32 %v7223_v30, %v5872_v31 }
  0x23   :  { %319 = vmatpush.bf16.msra.mxu3 %v7853_v62  ;;  %v5936_v39 = vld [vmem:[%s10440_s19 + $0x8] sm:$0xf0]  ;;  %v6070_v40 = vld [vmem:[%s10440_s19 + $0x170] sm:$0xf]  ;;  %v7254_v41 = vld [vmem:[%s10440_s19 + $0x174] sm:$0xf0]  ;;  %v7961_v49 = vor.u32 %v7208_v36, %v5934_v35 }
  0x24   :  { %v7253_v43 = vld [vmem:[%s10440_s19 + $0x174] sm:$0xf]  ;;  %v6072_v47 = vld [vmem:[%s10440_s19 + $0x178] sm:$0xf0]  ;;  %v93_v51 = vld [vmem:[%s10441_s20 + $0x1] sm:$0xff]  ;;  %v7970_v53 = vor.u32 %v7207_v37, %v5936_v39  ;;  %v7972_v54 = vor.u32 %v7254_v41, %v6070_v40 }
  0x25   :  { %198 = vmatpush.bf16.msra.mxu0 %v7871_v5  ;;  %v94_v52 = vld [vmem:[%s10441_s20 + $0x9] sm:$0x1]  ;;  %v74_v55 = vld [vmem:[%s10441_s20] sm:$0xff]  ;;  %v75_v59 = vld [vmem:[%s10441_s20 + $0x8] sm:$0x1]  ;;  %v7980_v60 = vor.u32 %v7253_v43, %v6072_v47 }
  0x26   :  { %212 = vmatpush.bf16.msra.mxu1 %v7875_v6  ;;  %306 = vmatpush.bf16.msra.mxu2 %v7877_v9  ;;  %v6062_v61 = vld [vmem:[%s10440_s19 + $0x160] sm:$0xf]  ;;  %v7252_v63 = vld [vmem:[%s10440_s19 + $0x164] sm:$0xf0]  ;;  %v7251_v0 = vld [vmem:[%s10440_s19 + $0x164] sm:$0xf]  ;;  %v95_v2 = vpack.c.bf16 %v94_v52, %v93_v51  ;;  %v76_v4 = vpack.c.bf16 %v75_v59, %v74_v55 }
  0x27   :  { %320 = vmatpush.bf16.msra.mxu3 %v7889_v14  ;;  %v6064_v1 = vld [vmem:[%s10440_s19 + $0x168] sm:$0xf0]  ;;  %v7999_v10 = vor.u32 %v7252_v63, %v6062_v61  ;;  %v6054_v13 = vld [vmem:[%s10440_s19 + $0x150] sm:$0xf]  ;;  %v7250_v15 = vld [vmem:[%s10440_s19 + $0x154] sm:$0xf0] }
  0x28   :  { %v8003_v11 = vor.u32 %v7251_v0, %v6064_v1  ;;  %v7249_v18 = vld [vmem:[%s10440_s19 + $0x154] sm:$0xf]  ;;  %v8019_v19 = vor.u32 %v7250_v15, %v6054_v13  ;;  %v6046_v20 = vld [vmem:[%s10440_s19 + $0x140] sm:$0xf]  ;;  %v7248_v22 = vld [vmem:[%s10440_s19 + $0x144] sm:$0xf0] }
  0x29   :  { %199 = vmatpush.bf16.msra.mxu0 %v7907_v23  ;;  %v7247_v24 = vld [vmem:[%s10440_s19 + $0x144] sm:$0xf]  ;;  %v8039_v28 = vor.u32 %v7248_v22, %v6046_v20  ;;  %v7246_v31 = vld [vmem:[%s10440_s19 + $0x134] sm:$0xf0]  ;;  %v7245_v35 = vld [vmem:[%s10440_s19 + $0x134] sm:$0xf] }
  0x2a   :  { %213 = vmatpush.bf16.msra.mxu1 %v7914_v26  ;;  %307 = vmatpush.bf16.msra.mxu2 %v7916_v27  ;;  %v7244_v39 = vld [vmem:[%s10440_s19 + $0x124] sm:$0xf0]  ;;  %v7243_v40 = vld [vmem:[%s10440_s19 + $0x124] sm:$0xf]  ;;  %v7242_v47 = vld [vmem:[%s10440_s19 + $0x114] sm:$0xf0] }
  0x2b   :  { %321 = vmatpush.bf16.msra.mxu3 %v7928_v32  ;;  %v7241_v51 = vld [vmem:[%s10440_s19 + $0x114] sm:$0xf]  ;;  %v6024_v52 = vld [vmem:[%s10440_s19 + $0x118] sm:$0xf0]  ;;  %v6014_v59 = vld [vmem:[%s10440_s19 + $0x100] sm:$0xf] }
  0x2c   :  { %v6027_v55 = vor.u32 %v7241_v51, %v6024_v52  ;;  %v7239_v61 = vld [vmem:[%s10440_s19 + $0x104] sm:$0xf]  ;;  %v6016_v63 = vld [vmem:[%s10440_s19 + $0x108] sm:$0xf0]  ;;  %v665_v20 = vld [vmem:[%s10277_s5 + $0x30] sm:$0xff] }
  0x2d   :  { %200 = vmatpush.bf16.msra.mxu0 %v7949_v42  ;;  %v6019_v0 = vor.u32 %v7239_v61, %v6016_v63  ;;  %v329_v1 = vld [vmem:[%s10441_s20 + $0x2] sm:$0xff]  ;;  %v661_v51 = vld [vmem:[%s10277_s5 + $0x10] sm:$0xff] }
  0x2e   :  { %214 = vmatpush.bf16.msra.mxu1 %v7959_v48  ;;  %308 = vmatpush.bf16.msra.mxu2 %v7961_v49  ;;  %v667_v15 = vld [vmem:[%s10277_s5 + $0x40] sm:$0xff]  ;;  %v660_v52 = vld [vmem:[%s10277_s5 + $0x8] sm:$0xff] }
  0x2f   :  { %322 = vmatpush.bf16.msra.mxu3 %v7970_v53  ;;  %v659_v61 = vld [vmem:[%s10277_s5] sm:$0xff] }
  0x30   :  { %201 = vmatmul.bf16.vlgmr.msra.gmra.mxu0 %v95_v2 }
  0x31   :  { %429 = vmatpush.bf16.msrb.mxu0 %v7972_v54  ;;  %215 = vmatmul.bf16.vlgmr.msra.gmra.mxu1 %v95_v2  ;;  %v6078_v2 = vld [vmem:[%s10441_s20 + $0x11] sm:$0xff] }
  0x32   :  { %443 = vmatpush.bf16.msrb.mxu1 %v7980_v60  ;;  %477 = vmatpush.bf16.msrb.mxu2 %v7679_v3  ;;  %v6056_v3 = vld [vmem:[%s10440_s19 + $0x158] sm:$0xf0] }
  0x33   :  { %491 = vmatpush.bf16.msrb.mxu3 %v7690_v7  ;;  %309 = vmatmul.bf16.vlgmr.msra.gmra.mxu2 %v76_v4  ;;  %v8023_v7 = vor.u32 %v7249_v18, %v6056_v3 }
  0x34   :  { %323 = vmatmul.bf16.vlgmr.msra.gmra.mxu3 %v76_v4  ;;  %v6079_v4 = vld [vmem:[%s10441_s20 + $0x19] sm:$0x1] }
  0x35   :  { %430 = vmatpush.bf16.msrb.mxu0 %v7999_v10  ;;  %v476_v13 = vpack.c.bf16 %v6079_v4, %v6078_v2 }
  0x36   :  { %444 = vmatpush.bf16.msrb.mxu1 %v8003_v11  ;;  %478 = vmatpush.bf16.msrb.mxu2 %v7717_v16  ;;  %v6048_v16 = vld [vmem:[%s10440_s19 + $0x148] sm:$0xf0] }
  0x37   :  { %492 = vmatpush.bf16.msrb.mxu3 %v7719_v17  ;;  %v8043_v30 = vor.u32 %v7247_v24, %v6048_v16  ;;  %v6038_v17 = vld [vmem:[%s10440_s19 + $0x130] sm:$0xf]  ;;  %v73_v24 = vld [vmem:[%s10274_s2] sm:$0x3] }
  0x38   :  { %v8059_v36 = vor.u32 %v7246_v31, %v6038_v17 }
  0x39   :  { %431 = vmatpush.bf16.msrb.mxu0 %v8019_v19 }
  0x3a   :  { %445 = vmatpush.bf16.msrb.mxu1 %v8023_v7  ;;  %479 = vmatpush.bf16.msrb.mxu2 %v7754_v29  ;;  %v6040_v29 = vld [vmem:[%s10440_s19 + $0x138] sm:$0xf0] }
  0x3b   :  { %493 = vmatpush.bf16.msrb.mxu3 %v7767_v33  ;;  %v8063_v37 = vor.u32 %v7245_v35, %v6040_v29  ;;  %v6030_v33 = vld [vmem:[%s10440_s19 + $0x120] sm:$0xf] }
  0x3c   :  { %v6031_v41 = vor.u32 %v7244_v39, %v6030_v33  ;;  %v663_v29 = vld [vmem:[%s10277_s5 + $0x20] sm:$0xff]  ;;  %v662_v33 = vld [vmem:[%s10277_s5 + $0x18] sm:$0xff] }
  0x3d   :  { %432 = vmatpush.bf16.msrb.mxu0 %v8039_v28 }
  0x3e   :  { %446 = vmatpush.bf16.msrb.mxu1 %v8043_v30  ;;  %480 = vmatpush.bf16.msrb.mxu2 %v7799_v44  ;;  %v6032_v44 = vld [vmem:[%s10440_s19 + $0x128] sm:$0xf0] }
  0x3f   :  { %494 = vmatpush.bf16.msrb.mxu3 %v7803_v45  ;;  %v6035_v43 = vor.u32 %v7243_v40, %v6032_v44  ;;  %v6022_v45 = vld [vmem:[%s10440_s19 + $0x110] sm:$0xf]  ;;  %v8210_v40 = vperm.slane %v73_v24, 1 }
  0x41   :  { %433 = vmatpush.bf16.msrb.mxu0 %v8059_v36 }
  0x42   :  { %447 = vmatpush.bf16.msrb.mxu1 %v8063_v37  ;;  %481 = vmatpush.bf16.msrb.mxu2 %v7835_v56  ;;  %v6023_v56 = vor.u32 %v7242_v47, %v6022_v45  ;;  %v676_v47 = vld [vmem:[%s10277_s5 + $0x88] sm:$0xff] }
  0x43   :  { %495 = vmatpush.bf16.msrb.mxu3 %v7839_v57  ;;  %v7240_v57 = vld [vmem:[%s10440_s19 + $0x104] sm:$0xf0] }
  0x45   :  { %434 = vmatpush.bf16.msrb.mxu0 %v6031_v41 }
  0x46   :  { %448 = vmatpush.bf16.msrb.mxu1 %v6035_v43  ;;  %482 = vmatpush.bf16.msrb.mxu2 %v7871_v5  ;;  %v6015_v5 = vor.u32 %v7240_v57, %v6014_v59  ;;  %v675_v59 = vld [vmem:[%s10277_s5 + $0x80] sm:$0xff] }
  0x47   :  { %496 = vmatpush.bf16.msrb.mxu3 %v7875_v6  ;;  %v330_v6 = vld [vmem:[%s10441_s20 + $0xa] sm:$0x1] }
  0x49   :  { %435 = vmatpush.bf16.msrb.mxu0 %v6023_v56 }
  0x4a   :  { %449 = vmatpush.bf16.msrb.mxu1 %v6027_v55  ;;  %483 = vmatpush.bf16.msrb.mxu2 %v7907_v23  ;;  %v331_v23 = vpack.c.bf16 %v330_v6, %v329_v1 }
  0x4b   :  { %497 = vmatpush.bf16.msrb.mxu3 %v7914_v26 }
  0x4d   :  { %436 = vmatpush.bf16.msrb.mxu0 %v6015_v5 }
  0x4e   :  { %450 = vmatpush.bf16.msrb.mxu1 %v6019_v0  ;;  %484 = vmatpush.bf16.msrb.mxu2 %v7949_v42  ;;  %v671_v42 = vld [vmem:[%s10277_s5 + $0x60] sm:$0xff] }
  0x4f   :  { %498 = vmatpush.bf16.msrb.mxu3 %v7959_v48 }
  0x50   :  { %437 = vmatmul.bf16.vlgmr.msrb.gmra.mxu0 %v331_v23 }
  0x51   :  { %505 = vmatpush.bf16.msra.mxu0 %v7692_v8  ;;  %451 = vmatmul.bf16.vlgmr.msrb.gmra.mxu1 %v331_v23  ;;  %v6076_v8 = vld [vmem:[%s10441_s20 + $0x10] sm:$0xff] }
  0x52   :  { %519 = vmatpush.bf16.msra.mxu1 %v7704_v12  ;;  %536 = vmatpush.bf16.msra.mxu2 %v7972_v54  ;;  %v6077_v12 = vld [vmem:[%s10441_s20 + $0x18] sm:$0x1] }
  0x53   :  { %550 = vmatpush.bf16.msra.mxu3 %v7980_v60  ;;  %485 = vmatmul.bf16.vlgmr.msrb.gmra.mxu2 %v476_v13  ;;  %v670_v54 = vld [vmem:[%s10277_s5 + $0x58] sm:$0xff] }
  0x54   :  { %499 = vmatmul.bf16.vlgmr.msrb.gmra.mxu3 %v476_v13 }
  0x55   :  { %506 = vmatpush.bf16.msra.mxu0 %v7731_v21  ;;  %v6080_v21 = vld [vmem:[%s10441_s20 + $0x12] sm:$0xff] }
  0x56   :  { %520 = vmatpush.bf16.msra.mxu1 %v7742_v25  ;;  %537 = vmatpush.bf16.msra.mxu2 %v7999_v10  ;;  %v6081_v25 = vld [vmem:[%s10441_s20 + $0x1a] sm:$0x1]  ;;  %v669_v10 = vld [vmem:[%s10277_s5 + $0x50] sm:$0xff] }
  0x57   :  { %551 = vmatpush.bf16.msra.mxu3 %v8003_v11  ;;  %v668_v11 = vld [vmem:[%s10277_s5 + $0x48] sm:$0xff] }
  0x59   :  { %507 = vmatpush.bf16.msra.mxu0 %v7769_v34  ;;  %v473_v34 = vpack.c.bf16 %v6077_v12, %v6076_v8 }
  0x5a   :  { %521 = vmatpush.bf16.msra.mxu1 %v7781_v38  ;;  %538 = vmatpush.bf16.msra.mxu2 %v8019_v19  ;;  %v535_v38 = vpack.c.bf16 %v6081_v25, %v6080_v21  ;;  %v666_v19 = vld [vmem:[%s10277_s5 + $0x38] sm:$0xff] }
  0x5b   :  { %552 = vmatpush.bf16.msra.mxu3 %v8023_v7 }
  0x5d   :  { %508 = vmatpush.bf16.msra.mxu0 %v7805_v46 }
  0x5e   :  { %522 = vmatpush.bf16.msra.mxu1 %v7817_v50  ;;  %539 = vmatpush.bf16.msra.mxu2 %v8039_v28  ;;  %v664_v28 = vld [vmem:[%s10277_s5 + $0x28] sm:$0xff] }
  0x5f   :  { %553 = vmatpush.bf16.msra.mxu3 %v8043_v30 }
  0x61   :  { %509 = vmatpush.bf16.msra.mxu0 %v7841_v58  ;;  %v674_v58 = vld [vmem:[%s10277_s5 + $0x78] sm:$0xff] }
  0x62   :  { %523 = vmatpush.bf16.msra.mxu1 %v7853_v62  ;;  %540 = vmatpush.bf16.msra.mxu2 %v8059_v36  ;;  %v8205_v36 = vperm.slane %v73_v24, 0 }
  0x63   :  { %554 = vmatpush.bf16.msra.mxu3 %v8063_v37 }
  0x65   :  { %510 = vmatpush.bf16.msra.mxu0 %v7877_v9 }
  0x66   :  { %524 = vmatpush.bf16.msra.mxu1 %v7889_v14  ;;  %541 = vmatpush.bf16.msra.mxu2 %v6031_v41 }
  0x67   :  { %555 = vmatpush.bf16.msra.mxu3 %v6035_v43 }
  0x69   :  { %511 = vmatpush.bf16.msra.mxu0 %v7916_v27  ;;  %v673_v27 = vld [vmem:[%s10277_s5 + $0x70] sm:$0xff] }
  0x6a   :  { %525 = vmatpush.bf16.msra.mxu1 %v7928_v32  ;;  %542 = vmatpush.bf16.msra.mxu2 %v6023_v56  ;;  %v672_v32 = vld [vmem:[%s10277_s5 + $0x68] sm:$0xff] }
  0x6b   :  { %556 = vmatpush.bf16.msra.mxu3 %v6027_v55 }
  0x6d   :  { %512 = vmatpush.bf16.msra.mxu0 %v7961_v49 }
  0x6e   :  { %526 = vmatpush.bf16.msra.mxu1 %v7970_v53  ;;  %543 = vmatpush.bf16.msra.mxu2 %v6015_v5 }
  0x6f   :  { %557 = vmatpush.bf16.msra.mxu3 %v6019_v0 }
  0x70   :  { %513 = vmatmul.bf16.vlgmr.msra.gmra.mxu0 %v473_v34 }
  0x71   :  { %527 = vmatmul.bf16.vlgmr.msra.gmra.mxu1 %v473_v34  ;;  %544 = vmatmul.bf16.vlgmr.msra.gmra.mxu2 %v535_v38 }
  0x72   :  { %558 = vmatmul.bf16.vlgmr.msra.gmra.mxu3 %v535_v38  ;;  %680 = vmatpush.msrb.mxu0 %v674_v58 }
  0x73   :  { %723 = vmatpush.msrb.mxu2 %v674_v58  ;;  %757 = vmatpush.msrb.mxu3 %v676_v47 }
  0x74   :  { %681 = vmatpush.msrb.mxu0 %v673_v27  ;;  %714 = vmatpush.msrb.mxu1 %v676_v47 }
  0x75   :  { %724 = vmatpush.msrb.mxu2 %v673_v27  ;;  %758 = vmatpush.msrb.mxu3 %v675_v59 }
  0x76   :  { %682 = vmatpush.msrb.mxu0 %v672_v32  ;;  %715 = vmatpush.msrb.mxu1 %v675_v59 }
  0x77   :  { %725 = vmatpush.msrb.mxu2 %v672_v32 }
  0x78   :  { %683 = vmatpush.msrb.mxu0 %v671_v42 }
  0x79   :  { %726 = vmatpush.msrb.mxu2 %v671_v42 }
  0x7a   :  { %684 = vmatpush.msrb.mxu0 %v670_v54 }
  0x7b   :  { %727 = vmatpush.msrb.mxu2 %v670_v54 }
  0x7c   :  { %685 = vmatpush.msrb.mxu0 %v669_v10 }
  0x7d   :  { %728 = vmatpush.msrb.mxu2 %v669_v10 }
  0x7e   :  { %686 = vmatpush.msrb.mxu0 %v668_v11 }
  0x7f   :  { %729 = vmatpush.msrb.mxu2 %v668_v11 }
  0x80   :  { %687 = vmatpush.msrb.mxu0 %v667_v15 }
  0x81   :  { %730 = vmatpush.msrb.mxu2 %v667_v15 }
  0x82   :  { %688 = vmatpush.msrb.mxu0 %v666_v19 }
  0x83   :  { %731 = vmatpush.msrb.mxu2 %v666_v19 }
  0x84   :  { %689 = vmatpush.msrb.mxu0 %v665_v20 }
  0x85   :  { %732 = vmatpush.msrb.mxu2 %v665_v20 }
  0x86   :  { %690 = vmatpush.msrb.mxu0 %v664_v28 }
  0x87   :  { %733 = vmatpush.msrb.mxu2 %v664_v28 }
  0x88   :  { %691 = vmatpush.msrb.mxu0 %v663_v29 }
  0x89   :  { %734 = vmatpush.msrb.mxu2 %v663_v29 }
  0x8a   :  { %692 = vmatpush.msrb.mxu0 %v662_v33 }
  0x8b   :  { %735 = vmatpush.msrb.mxu2 %v662_v33 }
  0x8c   :  { %693 = vmatpush.msrb.mxu0 %v661_v51 }
  0x8d   :  { %736 = vmatpush.msrb.mxu2 %v661_v51 }
  0x8e   :  { %694 = vmatpush.msrb.mxu0 %v660_v52 }
  0x8f   :  { %737 = vmatpush.msrb.mxu2 %v660_v52 }
  0x90   :  { %695 = vmatpush.msrb.mxu0 %v659_v61 }
  0x91   :  { %738 = vmatpush.msrb.mxu2 %v659_v61 }
  0xad   :  { %v202_v46 = vpop.f32.mrf.mxu0 }
  0xae   :  { %v216_v50 = vpop.f32.mrf.mxu1 }
  0xb5   :  { %v204_v9 = vpop.f32.mrf.mxu0 }
  0xb6   :  { %v310_v62 = vpop.f32.mrf.mxu2  ;;  %v218_v26 = vpop.f32.mrf.mxu1 }
  0xb7   :  { %v324_v14 = vpop.f32.mrf.mxu3  ;;  %v311_v35 = vadd.f32 %v310_v62, %v202_v46 }
  0xb8   :  { %v325_v30 = vadd.f32 %v324_v14, %v216_v50 }
  0xbe   :  { %v312_v48 = vpop.f32.mrf.mxu2 }
  0xbf   :  { %v326_v53 = vpop.f32.mrf.mxu3  ;;  %v313_v22 = vadd.f32 %v312_v48, %v204_v9 }
  0xc0   :  { %v327_v17 = vadd.f32 %v326_v53, %v218_v26 }
  0xcd   :  { %v438_v49 = vpop.f32.mrf.mxu0 }
  0xce   :  { %v452_v60 = vpop.f32.mrf.mxu1  ;;  %v457_v43 = vadd.f32 %v438_v49, %v311_v35 }
  0xcf   :  { %v458_v39 = vadd.f32 %v452_v60, %v325_v30 }
  0xd0   :  { %v8239_v0 = vadd.f32 %v8205_v36, %v457_v43 }
  0xd1   :  { %v8234_v63 = vadd.f32 %v8210_v40, %v458_v39 }
  0xd2   :  { %v594_v12 = vmul.f32 %v8239_v0, %v8239_v0 }
  0xd3   :  { %v595_v2 = vmul.f32 %v8234_v63, %v8234_v63  ;;  %v582_v25 = vsel %vm581_vm2, %v8234_v63, 0.0 }
  0xd5   :  { %v440_v7 = vpop.f32.mrf.mxu0  ;;  %v606_v62 = vsel %vm581_vm2, %v595_v2, 0.0 }
  0xd6   :  { %v8186_v18 = vpop.f32.mrf.mxu2  ;;  %v454_v16 = vpop.f32.mrf.mxu1  ;;  %v459_v31 = vadd.f32 %v440_v7, %v313_v22 }
  0xd7   :  { %v8188_v3 = vpop.f32.mrf.mxu3  ;;  %v460_v37 = vadd.f32 %v454_v16, %v327_v17 }
  0xd8   :  { %v8213_v44 = vadd.f32 %v8205_v36, %v459_v31 }
  0xd9   :  { %v8225_v56 = vadd.f32 %v8210_v40, %v460_v37 }
  0xda   :  { %v596_v5 = vmul.f32 %v8213_v44, %v8213_v44  ;;  %v573_v1 = vsel %vm572_vm0, %v8213_v44, 0.0 }
  0xdb   :  { %v597_v6 = vmul.f32 %v8225_v56, %v8225_v56  ;;  %v574_v4 = vadd.f32 %v573_v1, %v8239_v0  ;;  %v584_v13 = vsel %vm583_vm1, %v8225_v56, 0.0 }
  0xdc   :  { %v598_v23 = vsel %vm572_vm0, %v596_v5, 0.0  ;;  %v585_v50 = vadd.f32 %v584_v13, %v582_v25 }
  0xdd   :  { %v607_v34 = vsel %vm583_vm1, %v597_v6, 0.0  ;;  %v599_v46 = vadd.f32 %v598_v23, %v594_v12  ;;  %v575_v9 = vrot.slane %v574_v4, 4 }
  0xde   :  { %v488_v41 = vpop.f32.mrf.mxu2  ;;  %v608_v27 = vadd.f32 %v607_v34, %v606_v62  ;;  %v586_v49 = vrot.slane %v585_v50, 4 }
  0xdf   :  { %v502_v45 = vpop.f32.mrf.mxu3  ;;  %v600_v48 = vrot.slane %v599_v46, 4  ;;  %v576_v54 = vadd.f32 %v575_v9, %v574_v4 }
  0xe0   :  { %v609_v15 = vrot.slane %v608_v27, 4  ;;  %v587_v22 = vadd.f32 %v586_v49, %v585_v50 }
  0xe1   :  { %v601_v20 = vadd.f32 %v600_v48, %v599_v46  ;;  %v577_v16 = vrot.slane %v576_v54, 2 }
  0xe2   :  { %v610_v17 = vadd.f32 %v609_v15, %v608_v27 }
  0xe3   :  { %v578_v6 = vadd.f32 %v577_v16, %v576_v54 }
  0xe4   :  { %v611_v59 = vrot.slane %v610_v17, 2 }
  0xed   :  { %v514_v55 = vpop.f32.mrf.mxu0 }
  0xee   :  { %v528_v57 = vpop.f32.mrf.mxu1  ;;  %v515_v58 = vadd.f32 %v514_v55, %v8186_v18 }
  0xef   :  { %v529_v38 = vadd.f32 %v528_v57, %v8188_v3 }
  0xf4   :  { %v545_v8 = vpop.f32.mrf.mxu2 }
  0xf5   :  { %v559_v21 = vpop.f32.mrf.mxu3  ;;  %v516_v26 = vpop.f32.mrf.mxu0  ;;  %v564_v32 = vadd.f32 %v545_v8, %v515_v58 }
  0xf6   :  { %v565_v14 = vadd.f32 %v559_v21, %v529_v38  ;;  %v530_v42 = vpop.f32.mrf.mxu1  ;;  %v517_v53 = vadd.f32 %v516_v26, %v488_v41  ;;  %v612_v21 = vadd.f32 %v611_v59, %v610_v17  ;;  %v579_v38 = vrot.slane %v578_v6, 1 }
  0xf7   :  { %v531_v10 = vadd.f32 %v530_v42, %v502_v45  ;;  %v8263_v18 = vadd.f32 %v564_v32, %v8205_v36  ;;  %v602_v45 = vrot.slane %v601_v20, 2 }
  0xf8   :  { %v8260_v60 = vadd.f32 %v565_v14, %v8210_v40  ;;  %v613_v48 = vrot.slane %v612_v21, 1  ;;  %v580_v49 = vadd.f32 %v579_v38, %v578_v6 }
  0xf9   :  { %v636_v31 = vmul.f32 %v8263_v18, %v8263_v18  ;;  %v603_v12 = vadd.f32 %v602_v45, %v601_v20 }
  0xfa   :  { %v637_v28 = vmul.f32 %v8260_v60, %v8260_v60 }
  0xfb   :  { %v604_v26 = vrot.slane %v603_v12, 1 }
  0xfc   :  { %v547_v11 = vpop.f32.mrf.mxu2  ;;  %v648_v47 = vsel %vm581_vm2, %v637_v28, 0.0 }
  0xfd   :  { %v566_v3 = vadd.f32 %v547_v11, %v517_v53  ;;  %v561_v19 = vpop.f32.mrf.mxu3 }
  0xfe   :  { %v567_v7 = vadd.f32 %v561_v19, %v531_v10  ;;  %v605_v19 = vadd.f32 %v604_v26, %v603_v12  ;;  %v781_v12 = vld [vmem:[%s10276_s4] sm:$0x1] }
  0xff   :  { %v8266_v24 = vadd.f32 %v566_v3, %v8205_v36  ;;  %v625_v36 = vsel %vm581_vm2, %v8260_v60, 0.0 }
 0x100   :  { %v8271_v30 = vadd.f32 %v567_v7, %v8210_v40  ;;  %v588_v40 = vrot.slane %v587_v22, 2 }
 0x101   :  { %v617_v35 = vsel %vm572_vm0, %v8266_v24, 0.0  ;;  %v638_v29 = vmul.f32 %v8266_v24, %v8266_v24 }
 0x102   :  { %v618_v37 = vadd.f32 %v617_v35, %v8263_v18  ;;  %v626_v33 = vsel %vm583_vm1, %v8271_v30, 0.0  ;;  %v639_v39 = vmul.f32 %v8271_v30, %v8271_v30  ;;  %v589_v2 = vadd.f32 %v588_v40, %v587_v22 }
 0x103   :  { %v640_v41 = vsel %vm572_vm0, %v638_v29, 0.0  ;;  %v627_v43 = vadd.f32 %v626_v33, %v625_v36  ;;  %v614_v22 = vadd.f32 %v613_v48, %v612_v21  ;;  %v786_v29 = vld [vmem:[%s10278_s6 + $0x10] sm:$0xff]  ;;  %v787_v36 = vld [vmem:[%s10278_s6 + $0x18] sm:$0xff]  ;;  %vm3745_vm0 = vcmask 523264  }
 0x104   :  { %v619_v51 = vrot.slane %v618_v37, 4  ;;  %v641_v52 = vadd.f32 %v640_v41, %v636_v31  ;;  %v649_v55 = vsel %vm583_vm1, %v639_v39, 0.0  ;;  %v590_v58 = vrot.slane %v589_v2, 1  ;;  %805 = vmatpush.msra.mxu1 %v786_v29  ;;  %825 = vmatpush.msra.mxu3 %v787_v36  ;;  %v785_v39 = vld [vmem:[%s10278_s6 + $0x8] sm:$0xff] }
 0x105   :  { %v628_v57 = vrot.slane %v627_v43, 4  ;;  %v650_v61 = vadd.f32 %v649_v55, %v648_v47 }
 0x106   :  { %v620_v5 = vadd.f32 %v619_v51, %v618_v37  ;;  %v642_v1 = vrot.slane %v641_v52, 4  ;;  %v591_v10 = vadd.f32 %v590_v58, %v589_v2  ;;  %v784_v37 = vld [vmem:[%s10278_s6] sm:$0xff]  ;;  %826 = vmatpush.msra.mxu3 %v785_v39 }
 0x107   :  { %v629_v4 = vadd.f32 %v628_v57, %v627_v43  ;;  %v651_v23 = vrot.slane %v650_v61, 4  ;;  %806 = vmatpush.msra.mxu1 %v784_v37 }
 0x108   :  { %v621_v13 = vrot.slane %v620_v5, 2  ;;  %v643_v8 = vadd.f32 %v642_v1, %v641_v52 }
 0x109   :  { %v630_v25 = vrot.slane %v629_v4, 2  ;;  %v652_v34 = vadd.f32 %v651_v23, %v650_v61 }
 0x10a   :  { %v622_v46 = vadd.f32 %v621_v13, %v620_v5  ;;  %v644_v50 = vrot.slane %v643_v8, 2 }
 0x10b   :  { %v631_v62 = vadd.f32 %v630_v25, %v629_v4  ;;  %v653_v9 = vrot.slane %v652_v34, 2  ;;  %v768_v4 = vld [vmem:[%s10275_s3] sm:$0x1] }
 0x10c   :  { %v623_v14 = vrot.slane %v622_v46, 1  ;;  %v645_v27 = vadd.f32 %v644_v50, %v643_v8 }
 0x10d   :  { %v632_v32 = vrot.slane %v631_v62, 1  ;;  %v654_v42 = vadd.f32 %v653_v9, %v652_v34 }
 0x10e   :  { %v624_v53 = vadd.f32 %v623_v14, %v622_v46  ;;  %v646_v54 = vrot.slane %v645_v27, 1 }
 0x10f   :  { %v633_v11 = vadd.f32 %v632_v32, %v631_v62  ;;  %v655_v15 = vrot.slane %v654_v42, 1  ;;  %v7576_v62 = vmov 65535  }
 0x110   :  { %v634_v3 = vadd.f32 %v624_v53, %v580_v49  ;;  %v647_v7 = vadd.f32 %v646_v54, %v645_v27  ;;  %v927_v9 = vsel %vm925_vm6, 4294967295, %v7576_v62 }
 0x111   :  { %v635_v20 = vadd.f32 %v633_v11, %v591_v10  ;;  %v656_v16 = vadd.f32 %v655_v15, %v654_v42 }
 0x112   :  { %696 = vmatmul.f32.vlgmr.msrb.gmra.mxu0 %v634_v3  ;;  %v657_v28 = vadd.f32 %v647_v7, %v605_v19 }
 0x113   :  { %6082 = vmatmul.msk.f32.vlgmr.msrb.gmra.mxu1 %vm581_vm2, %v635_v20  ;;  %v658_v17 = vadd.f32 %v656_v16, %v614_v22 }
 0x114   :  { %739 = vmatmul.f32.vlgmr.msrb.gmra.mxu2 %v657_v28  ;;  %848 = vmatpush.msrb.mxu1 %v786_v29 }
 0x115   :  { %6083 = vmatmul.msk.f32.vlgmr.msrb.gmra.mxu3 %vm581_vm2, %v658_v17 }
 0x116   :  { %868 = vmatpush.msrb.mxu3 %v787_v36  ;;  %849 = vmatpush.msrb.mxu1 %v784_v37 }
 0x118   :  { %869 = vmatpush.msrb.mxu3 %v785_v39 }
 0x18f   :  { %v697_v31 = vpop.f32.mrf.mxu0 }
 0x190   :  { %v717_v35 = vpop.f32.mrf.mxu1 }
 0x191   :  { %v718_v33 = vadd.f32 %v717_v35, %v697_v31 }
 0x193   :  { %v763_v40 = vmul.f32 0.0061728396, %v718_v33 }
 0x195   :  { %v765_v47 = vmul.f32 %v763_v40, %v763_v40 }
 0x197   :  { %v740_v41 = vpop.f32.mrf.mxu2 }
 0x198   :  { %v760_v43 = vpop.f32.mrf.mxu3 }
 0x199   :  { %v761_v45 = vadd.f32 %v760_v43, %v740_v41  ;;  %v7256_v41 = vld [vmem:[%s10279_s7 + $0x8] sm:$0xff]  ;;  %v6162_v43 = vld [vmem:[#allocation4 + $0x100] sm:$0xf] }
 0x19b   :  { %v764_v51 = vmul.f32 0.0061728396, %v761_v45  ;;  %v7290_v45 = vld [vmem:[#allocation4 + $0x104] sm:$0xf0] }
 0x19d   :  { %v766_v52 = vsub.f32 %v764_v51, %v765_v47  ;;  %v7289_v47 = vld [vmem:[#allocation4 + $0x104] sm:$0xf]  ;;  %v8329_v51 = vor.u32 %v7290_v45, %v6162_v43  ;;  %v7270_v43 = vld [vmem:[#allocation4 + $0x64] sm:$0xf0] }
 0x19f   :  { %v767_v55 = vmax.f32 %v766_v52, 0.0  ;;  %v6164_v52 = vld [vmem:[#allocation4 + $0x108] sm:$0xf0] }
 0x1a1   :  { %v769_v59 = vadd.f32 1e-05, %v767_v55  ;;  %v8331_v55 = vor.u32 %v7289_v47, %v6164_v52  ;;  %v7269_v47 = vld [vmem:[#allocation4 + $0x64] sm:$0xf]  ;;  %v6232_v52 = vld [vmem:[#allocation4 + $0x68] sm:$0xf0] }
 0x1a3   :  { %7481 = vrsqrt.f32 %v769_v59  ;;  %vm776_vm4 = vweird.f32 %v769_v59 }
 0x1a9   :  { %v7482_v57 = vpop.eup %7481 }
 0x1aa   :  { %v771_v61 = vmul.f32 %v7482_v57, %v769_v59  ;;  %vm777_vm3 = vweird.f32 %v7482_v57  ;;  %v6154_v59 = vld [vmem:[#allocation4 + $0xf0] sm:$0xf] }
 0x1ab   :  { %vm778_vm5 = vmor %vm776_vm4, %vm777_vm3  ;;  %vm3967_vm4 = vcmask 64512  }
 0x1ac   :  { %v772_v5 = vmul.f32 %v7482_v57, %v771_v61  ;;  %v7287_v61 = vld [vmem:[#allocation4 + $0xf4] sm:$0xf] }
 0x1ae   :  { %v773_v1 = vmul.f32 0.5, %v772_v5 }
 0x1b0   :  { %v774_v6 = vsub.f32 1.5, %v773_v1  ;;  %v6156_v1 = vld [vmem:[#allocation4 + $0xf8] sm:$0xf0] }
 0x1b2   :  { %v775_v2 = vmul.f32 %v7482_v57, %v774_v6  ;;  %v8337_v6 = vor.u32 %v7287_v61, %v6156_v1  ;;  %v6222_v61 = vld [vmem:[#allocation4 + $0x50] sm:$0xf]  ;;  %v7268_v1 = vld [vmem:[#allocation4 + $0x54] sm:$0xf0] }
 0x1b4   :  { %v779_v23 = vsel %vm778_vm5, %v7482_v57, %v775_v2  ;;  %v7288_v57 = vld [vmem:[#allocation4 + $0xf4] sm:$0xf0]  ;;  %v6146_v2 = vld [vmem:[#allocation4 + $0xe0] sm:$0xf]  ;;  %vm4123_vm5 = vcmask 195584  }
 0x1b5   :  { %v780_v13 = vmul.f32 %v779_v23, %v768_v4  ;;  %v8335_v5 = vor.u32 %v7288_v57, %v6154_v59  ;;  %v7286_v4 = vld [vmem:[#allocation4 + $0xe4] sm:$0xf0]  ;;  %v7285_v23 = vld [vmem:[#allocation4 + $0xe4] sm:$0xf]  ;;  %v8398_v59 = vor.u32 %v7269_v47, %v6232_v52 }
 0x1b7   :  { %6084 = vmatmul.msk.f32.vlgmr.msra.gmra.mxu1 %vm581_vm2, %v780_v13  ;;  %6085 = vmatmul.msk.f32.vlgmr.msra.gmra.mxu3 %vm581_vm2, %v780_v13  ;;  %v782_v8 = vmul.f32 %v780_v13, %v763_v40  ;;  %v8341_v13 = vor.u32 %v7286_v4, %v6146_v2  ;;  %10448 = vst [vmem:[#allocation13_spill] sm:$0xff] %v8398_v59  ;;  %v7267_v2 = vld [vmem:[#allocation4 + $0x54] sm:$0xf] }
 0x1b8   :  { %v8403_v4 = vor.u32 %v7268_v1, %v6222_v61  ;;  %v6190_v61 = vld [vmem:[#allocation4 + $0x10] sm:$0xf]  ;;  %v7260_v1 = vld [vmem:[#allocation4 + $0x14] sm:$0xf0] }
 0x1b9   :  { %v783_v21 = vsub.f32 %v781_v12, %v782_v8  ;;  %v6148_v8 = vld [vmem:[#allocation4 + $0xe8] sm:$0xf0] }
 0x1ba   :  { %v8343_v12 = vor.u32 %v7285_v23, %v6148_v8  ;;  %10449 = vst [vmem:[#allocation14_spill] sm:$0xff] %v8403_v4  ;;  %v6224_v23 = vld [vmem:[#allocation4 + $0x58] sm:$0xf0]  ;;  %v7273_v8 = vld [vmem:[#allocation4 + $0x84] sm:$0xf] }
 0x1bf   :  { %6086 = vmatmul.msk.f32.vlgmr.msrb.gmra.mxu1 %vm581_vm2, %v783_v21  ;;  %6087 = vmatmul.msk.f32.vlgmr.msrb.gmra.mxu3 %vm581_vm2, %v783_v21  ;;  %v7291_v21 = vld [vmem:[#allocation4 + $0x114] sm:$0xf] }
 0x234   :  { %v808_v25 = vpop.f32.mrf.mxu1 }
 0x235   :  { %v874_v34 = vperm.slane %v808_v25, 0  ;;  %v6172_v25 = vld [vmem:[#allocation4 + $0x118] sm:$0xf0] }
 0x237   :  { %v876_v50 = vmul.f32 %v874_v34, %v8239_v0  ;;  %v878_v14 = vmul.f32 %v874_v34, %v8213_v44  ;;  %v890_v26 = vmul.f32 %v874_v34, %v8263_v18  ;;  %v892_v27 = vmul.f32 %v874_v34, %v8266_v24  ;;  %v6138_v34 = vld [vmem:[#allocation4 + $0xd0] sm:$0xf] }
 0x238   :  { %v928_v0 = vsel %vm926_vm7, %v927_v9, 0 }
 0x23a   :  { %v828_v38 = vpop.f32.mrf.mxu3 }
 0x23b   :  { %v875_v58 = vperm.slane %v828_v38, 0  ;;  %v8347_v38 = vor.u32 %v7291_v21, %v6172_v25  ;;  %v6248_v21 = vld [vmem:[#allocation4 + $0x88] sm:$0xf0] }
 0x23c   :  { %v851_v46 = vpop.f32.mrf.mxu1 }
 0x23d   :  { %v880_v32 = vperm.slane %v851_v46, 0  ;;  %v877_v54 = vmul.f32 %v875_v58, %v8234_v63  ;;  %v879_v44 = vmul.f32 %v875_v58, %v8225_v56  ;;  %v891_v18 = vmul.f32 %v875_v58, %v8260_v60  ;;  %v7255_v56 = vld [vmem:[%s10279_s7] sm:$0xff]  ;;  %v7284_v46 = vld [vmem:[#allocation4 + $0xd4] sm:$0xf0] }
 0x23e   :  { %v893_v24 = vmul.f32 %v875_v58, %v8271_v30  ;;  %v6140_v58 = vld [vmem:[#allocation4 + $0xd8] sm:$0xf0]  ;;  %v8349_v62 = vor.u32 %v7284_v46, %v6138_v34  ;;  %v8407_v34 = vor.u32 %v7267_v2, %v6224_v23  ;;  %v8409_v46 = vor.u32 %v7273_v8, %v6248_v21  ;;  %v7259_v8 = vld [vmem:[#allocation4 + $0x14] sm:$0xf] }
 0x23f   :  { %v882_v42 = vadd.f32 %v880_v32, %v876_v50  ;;  %v884_v48 = vadd.f32 %v880_v32, %v878_v14  ;;  %v894_v49 = vadd.f32 %v890_v26, %v880_v32  ;;  %v896_v53 = vadd.f32 %v892_v27, %v880_v32  ;;  %v7283_v50 = vld [vmem:[#allocation4 + $0xd4] sm:$0xf]  ;;  %v6130_v14 = vld [vmem:[#allocation4 + $0xc0] sm:$0xf]  ;;  %v7282_v26 = vld [vmem:[#allocation4 + $0xc4] sm:$0xf0] }
 0x240   :  { %v8351_v9 = vor.u32 %v7283_v50, %v6140_v58  ;;  %v7281_v27 = vld [vmem:[#allocation4 + $0xc4] sm:$0xf]  ;;  %v8356_v32 = vor.u32 %v7282_v26, %v6130_v14  ;;  %10450 = vst [vmem:[#allocation15_spill] sm:$0xff] %v8407_v34  ;;  %v6214_v50 = vld [vmem:[#allocation4 + $0x40] sm:$0xf]  ;;  %v8444_v23 = vor.u32 %v7260_v1, %v6190_v61 }
 0x241   :  { %v886_v10 = vmax.f32 %v882_v42, 0.0  ;;  %v888_v11 = vmax.f32 %v884_v48, 0.0  ;;  %v898_v15 = vmax.f32 %v894_v49, 0.0  ;;  %v900_v3 = vmax.f32 %v896_v53, 0.0  ;;  %v6132_v42 = vld [vmem:[#allocation4 + $0xc8] sm:$0xf0] }
 0x242   :  { %v871_v19 = vpop.f32.mrf.mxu3  ;;  %v8358_v48 = vor.u32 %v7281_v27, %v6132_v42  ;;  %v6170_v49 = vld [vmem:[#allocation4 + $0x110] sm:$0xf]  ;;  %v7292_v53 = vld [vmem:[#allocation4 + $0x114] sm:$0xf0]  ;;  %10451 = vst [vmem:[#allocation16_spill] sm:$0xff] %v8409_v46 }
 0x243   :  { %v881_v7 = vperm.slane %v871_v19, 0  ;;  %v906_v20 = vpack.c.bf16 %v888_v11, %v886_v10  ;;  %v982_v22 = vpack.c.bf16 %v900_v3, %v898_v15  ;;  %v7280_v10 = vld [vmem:[#allocation4 + $0xb4] sm:$0xf0]  ;;  %v7279_v11 = vld [vmem:[#allocation4 + $0xb4] sm:$0xf]  ;;  %10459 = vst [vmem:[#allocation24_spill] sm:$0xff] %v8444_v23 }
 0x244   :  { %v6124_v15 = vld [vmem:[#allocation4 + $0xb8] sm:$0xf0]  ;;  %v7266_v58 = vld [vmem:[#allocation4 + $0x44] sm:$0xf0]  ;;  %v7265_v14 = vld [vmem:[#allocation4 + $0x44] sm:$0xf] }
 0x245   :  { %v883_v16 = vadd.f32 %v881_v7, %v877_v54  ;;  %v885_v28 = vadd.f32 %v881_v7, %v879_v44  ;;  %v895_v17 = vadd.f32 %v891_v18, %v881_v7  ;;  %v897_v63 = vadd.f32 %v893_v24, %v881_v7  ;;  %v6122_v54 = vld [vmem:[#allocation4 + $0xb0] sm:$0xf]  ;;  %v6114_v44 = vld [vmem:[#allocation4 + $0xa0] sm:$0xf]  ;;  %v7278_v18 = vld [vmem:[#allocation4 + $0xa4] sm:$0xf0] }
 0x246   :  { %v930_v31 = vand.u32 %v928_v0, %v906_v20  ;;  %v985_v35 = vand.u32 %v982_v22, %v928_v0  ;;  %v8364_v3 = vor.u32 %v7280_v10, %v6122_v54  ;;  %v8366_v19 = vor.u32 %v7279_v11, %v6124_v15  ;;  %v7277_v24 = vld [vmem:[#allocation4 + $0xa4] sm:$0xf]  ;;  %v6116_v20 = vld [vmem:[#allocation4 + $0xa8] sm:$0xf0]  ;;  %v6106_v22 = vld [vmem:[#allocation4 + $0x90] sm:$0xf] }
 0x247   :  { %v887_v29 = vmax.f32 %v883_v16, 0.0  ;;  %v889_v36 = vmax.f32 %v885_v28, 0.0  ;;  %v899_v37 = vmax.f32 %v895_v17, 0.0  ;;  %v901_v33 = vmax.f32 %v897_v63, 0.0  ;;  %v7276_v16 = vld [vmem:[#allocation4 + $0x94] sm:$0xf0] }
 0x248   :  { %942 = vmatpush.bf16.msra.mxu0 %v930_v31  ;;  %997 = vmatpush.bf16.msra.mxu2 %v985_v35  ;;  %v8371_v7 = vor.u32 %v7278_v18, %v6114_v44  ;;  %v8375_v17 = vor.u32 %v7277_v24, %v6116_v20  ;;  %v7275_v63 = vld [vmem:[#allocation4 + $0x94] sm:$0xf]  ;;  %v6108_v31 = vld [vmem:[#allocation4 + $0x98] sm:$0xf0]  ;;  %v8379_v35 = vor.u32 %v7276_v16, %v6106_v22  ;;  %v6216_v27 = vld [vmem:[#allocation4 + $0x48] sm:$0xf0] }
 0x249   :  { %v907_v60 = vpack.c.bf16 %v889_v36, %v887_v29  ;;  %v983_v30 = vpack.c.bf16 %v901_v33, %v899_v37  ;;  %v8382_v29 = vor.u32 %v7275_v63, %v6108_v31  ;;  %v6238_v37 = vld [vmem:[#allocation4 + $0x70] sm:$0xf]  ;;  %v7272_v33 = vld [vmem:[#allocation4 + $0x74] sm:$0xf0]  ;;  %v8413_v26 = vor.u32 %v7266_v58, %v6214_v50  ;;  %v7263_v15 = vld [vmem:[#allocation4 + $0x34] sm:$0xf] }
 0x24a   :  { %10442 = vst [vmem:[#allocation7_spill] sm:$0xff] %v8375_v17  ;;  %v8417_v42 = vor.u32 %v7265_v14, %v6216_v27  ;;  %v6206_v54 = vld [vmem:[#allocation4 + $0x30] sm:$0xf]  ;;  %v7264_v10 = vld [vmem:[#allocation4 + $0x34] sm:$0xf0] }
 0x24b   :  { %6096 = vmatmul.msk.bf16.vlgmr.msra.gmra.mxu0 %vm918_vm8, %v7255_v56  ;;  %v933_v39 = vand.u32 %v928_v0, %v907_v60  ;;  %v988_v40 = vand.u32 %v983_v30, %v928_v0  ;;  %6100 = vmatmul.msk.bf16.vlgmr.msra.gmra.mxu2 %vm918_vm8, %v7255_v56  ;;  %v8362_v0 = vor.u32 %v7292_v53, %v6170_v49  ;;  %v7271_v60 = vld [vmem:[#allocation4 + $0x74] sm:$0xf]  ;;  %v6240_v30 = vld [vmem:[#allocation4 + $0x78] sm:$0xf0]  ;;  %v6246_v16 = vld [vmem:[#allocation4 + $0x80] sm:$0xf] }
 0x24c   :  { %1222 = vmatpush.bf16.msrb.mxu0 %v8329_v51  ;;  %1258 = vmatpush.bf16.msrb.mxu2 %v8331_v55  ;;  %10443 = vst [vmem:[#allocation8_spill] sm:$0xff] %v8379_v35  ;;  %v8422_v11 = vor.u32 %v7264_v10, %v6206_v54  ;;  %v6208_v44 = vld [vmem:[#allocation4 + $0x38] sm:$0xf0]  ;;  %v7274_v63 = vld [vmem:[#allocation4 + $0x84] sm:$0xf0] }
 0x24d   :  { %961 = vmatpush.bf16.msra.mxu1 %v933_v39  ;;  %1016 = vmatpush.bf16.msra.mxu3 %v988_v40  ;;  %10444 = vst [vmem:[#allocation9_spill] sm:$0xff] %v8382_v29  ;;  %v8391_v40 = vor.u32 %v7271_v60, %v6240_v30  ;;  %v8427_v22 = vor.u32 %v7263_v15, %v6208_v44  ;;  %v7261_v60 = vld [vmem:[#allocation4 + $0x24] sm:$0xf]  ;;  %v6200_v30 = vld [vmem:[#allocation4 + $0x28] sm:$0xf0] }
 0x24e   :  { %10452 = vst [vmem:[#allocation17_spill] sm:$0xff] %v8413_v26  ;;  %v8430_v31 = vor.u32 %v7274_v63, %v6246_v16  ;;  %v6192_v21 = vld [vmem:[#allocation4 + $0x18] sm:$0xf0]  ;;  %v6182_v58 = vld [vmem:[#allocation4] sm:$0xf] }
 0x24f   :  { %10446 = vst [vmem:[#allocation11_spill] sm:$0xff] %v8391_v40  ;;  %v8446_v50 = vor.u32 %v7259_v8, %v6192_v21  ;;  %v7258_v14 = vld [vmem:[#allocation4 + $0x4] sm:$0xf0]  ;;  %v7257_v27 = vld [vmem:[#allocation4 + $0x4] sm:$0xf] }
 0x250   :  { %6098 = vmatmul.msk.bf16.vlgmr.msra.gmra.mxu1 %vm918_vm8, %v7255_v56  ;;  %6102 = vmatmul.msk.bf16.vlgmr.msra.gmra.mxu3 %vm918_vm8, %v7255_v56  ;;  %v8387_v56 = vor.u32 %v7272_v33, %v6238_v37  ;;  %10453 = vst [vmem:[#allocation18_spill] sm:$0xff] %v8417_v42  ;;  %v7262_v37 = vld [vmem:[#allocation4 + $0x24] sm:$0xf0]  ;;  %v6184_v54 = vld [vmem:[#allocation4 + $0x8] sm:$0xf0] }
 0x251   :  { %1223 = vmatpush.bf16.msrb.mxu0 %v8335_v5  ;;  %1259 = vmatpush.bf16.msrb.mxu2 %v8337_v6  ;;  %10454 = vst [vmem:[#allocation19_spill] sm:$0xff] %v8422_v11  ;;  %v8457_v16 = vor.u32 %v7257_v27, %v6184_v54  ;;  %v6314_v27 = vld [vmem:[#allocation4 + $0x190] sm:$0xf] }
 0x252   :  { %1283 = vmatpush.bf16.msrb.mxu3 %v8347_v38  ;;  %1247 = vmatpush.bf16.msrb.mxu1 %v8362_v0  ;;  %10445 = vst [vmem:[#allocation10_spill] sm:$0xff] %v8387_v56 }
 0x253   :  { %10455 = vst [vmem:[#allocation20_spill] sm:$0xff] %v8427_v22 }
 0x254   :  { %10456 = vst [vmem:[#allocation21_spill] sm:$0xff] %v8430_v31 }
 0x255   :  { %1224 = vmatpush.bf16.msrb.mxu0 %v8341_v13  ;;  %1260 = vmatpush.bf16.msrb.mxu2 %v8343_v12  ;;  %10460 = vst [vmem:[#allocation25_spill] sm:$0xff] %v8446_v50 }
 0x256   :  { %1451 = vmatpush.bf16.msra.mxu3 %v8409_v46  ;;  %1415 = vmatpush.bf16.msra.mxu1 %v8430_v31  ;;  %10462 = vst [vmem:[#allocation27_spill] sm:$0xff] %v8457_v16 }
 0x259   :  { %1225 = vmatpush.bf16.msrb.mxu0 %v8349_v62  ;;  %1261 = vmatpush.bf16.msrb.mxu2 %v8351_v9 }
 0x25b   :  { %6097 = vmatmul.msk.bf16.gmra.mxu0 %vm918_vm8, %v7256_v41  ;;  %6101 = vmatmul.msk.bf16.gmra.mxu2 %vm918_vm8, %v7256_v41 }
 0x25d   :  { %1226 = vmatpush.bf16.msrb.mxu0 %v8356_v32  ;;  %1262 = vmatpush.bf16.msrb.mxu2 %v8358_v48 }
 0x260   :  { %6099 = vmatmul.msk.bf16.gmra.mxu1 %vm918_vm8, %v7256_v41  ;;  %6103 = vmatmul.msk.bf16.gmra.mxu3 %vm918_vm8, %v7256_v41  ;;  %v6230_v41 = vld [vmem:[#allocation4 + $0x60] sm:$0xf] }
 0x261   :  { %1227 = vmatpush.bf16.msrb.mxu0 %v8364_v3  ;;  %1263 = vmatpush.bf16.msrb.mxu2 %v8366_v19  ;;  %v8395_v45 = vor.u32 %v7270_v43, %v6230_v41  ;;  %v8436_v43 = vor.u32 %v7261_v60, %v6200_v30 }
 0x263   :  { %10447 = vst [vmem:[#allocation12_spill] sm:$0xff] %v8395_v45 }
 0x264   :  { %10458 = vst [vmem:[#allocation23_spill] sm:$0xff] %v8436_v43 }
 0x265   :  { %1228 = vmatpush.bf16.msrb.mxu0 %v8371_v7  ;;  %1264 = vmatpush.bf16.msrb.mxu2 %v8375_v17 }
 0x269   :  { %1229 = vmatpush.bf16.msrb.mxu0 %v8379_v35  ;;  %1265 = vmatpush.bf16.msrb.mxu2 %v8382_v29 }
 0x26d   :  { %1390 = vmatpush.bf16.msra.mxu0 %v8387_v56  ;;  %1426 = vmatpush.bf16.msra.mxu2 %v8391_v40  ;;  %v7375_v40 = vld [vmem:[#allocation4 + $0x3b4] sm:$0xf]  ;;  %v6588_v56 = vld [vmem:[#allocation4 + $0x398] sm:$0xf0] }
 0x271   :  { %1391 = vmatpush.bf16.msra.mxu0 %v8395_v45  ;;  %1427 = vmatpush.bf16.msra.mxu2 %v8398_v59 }
 0x275   :  { %1392 = vmatpush.bf16.msra.mxu0 %v8403_v4  ;;  %1428 = vmatpush.bf16.msra.mxu2 %v8407_v34 }
 0x279   :  { %1393 = vmatpush.bf16.msra.mxu0 %v8413_v26  ;;  %1429 = vmatpush.bf16.msra.mxu2 %v8417_v42  ;;  %v6292_v26 = vld [vmem:[#allocation4 + $0x168] sm:$0xf0] }
 0x27d   :  { %1394 = vmatpush.bf16.msra.mxu0 %v8422_v11  ;;  %1430 = vmatpush.bf16.msra.mxu2 %v8427_v22 }
 0x281   :  { %1431 = vmatpush.bf16.msra.mxu2 %v8436_v43  ;;  %v6308_v43 = vld [vmem:[#allocation4 + $0x188] sm:$0xf0] }
 0x285   :  { %1432 = vmatpush.bf16.msra.mxu2 %v8446_v50  ;;  %v7306_v50 = vld [vmem:[#allocation4 + $0x184] sm:$0xf0] }
 0x289   :  { %1433 = vmatpush.bf16.msra.mxu2 %v8457_v16 }
 0x2c8   :  { %v8373_v28 = vpop.f32.mrf.mxu0 }
 0x2c9   :  { %973 = vst [vmem:[#allocation2] sm:$0xff] %v8373_v28 }
 0x2cd   :  { %v963_v36 = vpop.f32.mrf.mxu1 }
 0x2ce   :  { %974 = vst.msk [vmem:[#allocation2 + $0x8] sm:$0xff] %vm581_vm2, %v963_v36  ;;  %v6198_v36 = vld [vmem:[#allocation4 + $0x20] sm:$0xf] }
 0x2cf   :  { %v8433_v33 = vor.u32 %v7262_v37, %v6198_v36 }
 0x2d0   :  { %v8389_v39 = vpop.f32.mrf.mxu0  ;;  %v1066_v53 = vld [vmem:[#allocation2] sm:$0xfe] }
 0x2d1   :  { %975 = vst [vmem:[#allocation2 + $0x10] sm:$0xff] %v8389_v39  ;;  %v1070_v24 = vpack.c.bf16 %v8389_v39, %v1066_v53  ;;  %1395 = vmatpush.bf16.msra.mxu0 %v8433_v33 }
 0x2d2   :  { %10457 = vst [vmem:[#allocation22_spill] sm:$0xff] %v8433_v33 }
 0x2d3   :  { %v1097_v47 = vshll.u32 %v1070_v24, 16  ;;  %v1095_v36 = vshrl.u32 %v1070_v24, 16 }
 0x2d5   :  { %v965_v57 = vpop.f32.mrf.mxu1  ;;  %v1067_v41 = vld [vmem:[#allocation2 + $0x8] sm:$0xfe]  ;;  %v1099_v44 = vrot.slane %v1097_v47, 1  ;;  %1396 = vmatpush.bf16.msra.mxu0 %v8444_v23 }
 0x2d6   :  { %976 = vst.msk [vmem:[#allocation2 + $0x18] sm:$0xff] %vm581_vm2, %v965_v57  ;;  %v1677_v2 = vld [vmem:[#allocation2 + $0x8] sm:$0xf8] }
 0x2d7   :  { %v1463_v63 = vld [vmem:[#allocation2 + $0x8] sm:$0xfc] }
 0x2d8   :  { %v8405_v25 = vpop.f32.mrf.mxu0  ;;  %v8461_v30 = vld [vmem:[#allocation2 + $0x8] sm:$0xf0] }
 0x2d9   :  { %977 = vst [vmem:[#allocation2 + $0x20] sm:$0xff] %v8405_v25  ;;  %v2129_v1 = vld [vmem:[#allocation2 + $0x8] sm:$0xe0] }
 0x2dd   :  { %v968_v49 = vpop.f32.mrf.mxu1  ;;  %v8425_v20 = vld [vmem:[#allocation2 + $0x18] sm:$0xff] }
 0x2de   :  { %978 = vst.msk [vmem:[#allocation2 + $0x28] sm:$0xff] %vm581_vm2, %v968_v49  ;;  %v8439_v52 = vpack.c.bf16 %v8425_v20, %v1067_v41  ;;  %v1681_v10 = vpack.c.bf16 %v8425_v20, %v1677_v2  ;;  %v1467_v60 = vpack.c.bf16 %v8425_v20, %v1463_v63  ;;  %v1100_v2 = vor.u32 %v1099_v44, %v1095_v36  ;;  %v6316_v63 = vld [vmem:[#allocation4 + $0x198] sm:$0xf0] }
 0x2e0   :  { %v951_v18 = vpop.f32.mrf.mxu0  ;;  %v1109_v53 = vshll.u32 %v8439_v52, 16  ;;  %v1107_v41 = vshrl.u32 %v8439_v52, 16  ;;  %v1725_v61 = vshll.u32 %v1681_v10, 16  ;;  %v7308_v52 = vld [vmem:[#allocation4 + $0x194] sm:$0xf0]  ;;  %v1497_v36 = vrot.slane %v1467_v60, 1 }
 0x2e1   :  { %979 = vst [vmem:[#allocation2 + $0x30] sm:$0x7f] %v951_v18  ;;  %v8454_v18 = vor.u32 %v7258_v14, %v6182_v58  ;;  %v8478_v44 = vor.u32 %v7308_v52, %v6314_v27  ;;  %v7305_v52 = vld [vmem:[#allocation4 + $0x184] sm:$0xf] }
 0x2e2   :  { %v1111_v47 = vrot.slane %v1109_v53, 1 }
 0x2e3   :  { %10461 = vst [vmem:[#allocation26_spill] sm:$0xff] %v8454_v18  ;;  %1397 = vmatpush.bf16.msra.mxu0 %v8454_v18 }
 0x2e4   :  { %10463 = vst [vmem:[#allocation28_spill] sm:$0xff] %v8478_v44  ;;  %v1112_v27 = vor.u32 %v1111_v47, %v1107_v41 }
 0x2e5   :  { %v970_v57 = vpop.f32.mrf.mxu1  ;;  %v8466_v21 = vld [vmem:[#allocation2 + $0x28] sm:$0xff] }
 0x2e6   :  { %981 = vst.msk [vmem:[#allocation2 + $0x38] sm:$0x7f] %vm980_vm9, %v970_v57  ;;  %v1722_v57 = vshrl.u32 %v1681_v10, 16 }
 0x2e8   :  { %v1068_v49 = vld [vmem:[#allocation2 + $0x30] sm:$0x1]  ;;  %v1724_v23 = vrot.slane %v1722_v57, 1 }
 0x2e9   :  { %v8451_v15 = vpack.c.bf16 %v1068_v49, %v8405_v25  ;;  %v7307_v49 = vld [vmem:[#allocation4 + $0x194] sm:$0xf] }
 0x2ea   :  { %v8482_v18 = vor.u32 %v7307_v49, %v6316_v63  ;;  %v8493_v49 = vor.u32 %v7305_v52, %v6308_v43  ;;  %v7303_v52 = vld [vmem:[#allocation4 + $0x174] sm:$0xf] }
 0x2eb   :  { %v1102_v37 = vshll.u32 %v8451_v15, 16 }
 0x2ec   :  { %10464 = vst [vmem:[#allocation29_spill] sm:$0xff] %v8482_v18 }
 0x2ed   :  { %v8464_v8 = vrot.slane %v1102_v37, 1  ;;  %v1069_v58 = vld [vmem:[#allocation2 + $0x38] sm:$0x1]  ;;  %10466 = vst [vmem:[#allocation31_spill] sm:$0xff] %v8493_v49 }
 0x2ee   :  { %v1465_v24 = vld [vmem:[#allocation2 + $0x38] sm:$0x3]  ;;  %v8470_v14 = vpack.c.bf16 %v1069_v58, %v8466_v21  ;;  %v2133_v58 = vpack.c.bf16 %v8425_v20, %v2129_v1 }
 0x2ef   :  { %v1469_v53 = vpack.c.bf16 %v1465_v24, %v8466_v21  ;;  %v1105_v10 = vsel %vm1093_vm10, %v1100_v2, %v8464_v8  ;;  %v1679_v37 = vld [vmem:[#allocation2 + $0x38] sm:$0x7]  ;;  %v6306_v24 = vld [vmem:[#allocation4 + $0x180] sm:$0xf]  ;;  %v2367_v2 = vld [vmem:[#allocation2 + $0x8] sm:$0xc0] }
 0x2f0   :  { %1230 = vmatmul.bf16.vlgmr.msrb.gmra.mxu0 %v1105_v10  ;;  %1266 = vmatmul.bf16.vlgmr.msrb.gmra.mxu2 %v1105_v10  ;;  %v1114_v16 = vshll.u32 %v8470_v14, 16  ;;  %v1683_v54 = vpack.c.bf16 %v1679_v37, %v8466_v21  ;;  %v8486_v60 = vor.u32 %v7306_v50, %v6306_v24  ;;  %v1727_v10 = vrot.slane %v1725_v61, 2  ;;  %v1917_v37 = vld [vmem:[#allocation2 + $0x38] sm:$0xf] }
 0x2f1   :  { %1598 = vmatpush.bf16.msrb.mxu0 %v8478_v44  ;;  %v8488_v1 = vrot.slane %v1469_v53, 1  ;;  %1634 = vmatpush.bf16.msrb.mxu2 %v8482_v18  ;;  %v2131_v50 = vld [vmem:[#allocation2 + $0x38] sm:$0x1f]  ;;  %v2174_v47 = vshrl.u32 %v2133_v58, 16  ;;  %v2177_v24 = vshll.u32 %v2133_v58, 16  ;;  %v2371_v61 = vpack.c.bf16 %v8425_v20, %v2367_v2 }
 0x2f2   :  { %10465 = vst [vmem:[#allocation30_spill] sm:$0xff] %v8486_v60  ;;  %v8490_v33 = vrot.slane %v1114_v16, 1  ;;  %v1730_v63 = vshrl.u32 %v1683_v54, 16  ;;  %v1733_v57 = vshll.u32 %v1683_v54, 16  ;;  %v2369_v53 = vld [vmem:[#allocation2 + $0x38] sm:$0x3f]  ;;  %v1921_v43 = vpack.c.bf16 %v1917_v37, %v8466_v21 }
 0x2f3   :  { %v8497_v41 = vsel %vm1493_vm11, %v1497_v36, %v8488_v1  ;;  %v6298_v54 = vld [vmem:[#allocation4 + $0x170] sm:$0xf]  ;;  %v7304_v36 = vld [vmem:[#allocation4 + $0x174] sm:$0xf0]  ;;  %v1728_v22 = vor.u32 %v1727_v10, %v1724_v23  ;;  %v2135_v58 = vpack.c.bf16 %v2131_v50, %v8466_v21  ;;  %v2373_v11 = vpack.c.bf16 %v2369_v53, %v8466_v21  ;;  %v6290_v23 = vld [vmem:[#allocation4 + $0x160] sm:$0xf] }
 0x2f4   :  { %v1117_v16 = vsel %vm1093_vm10, %v1112_v27, %v8490_v33  ;;  %v1732_v44 = vrot.slane %v1730_v63, 1  ;;  %v1735_v18 = vrot.slane %v1733_v57, 2  ;;  %v8508_v2 = vor.u32 %v7304_v36, %v6298_v54  ;;  %v6300_v27 = vld [vmem:[#allocation4 + $0x178] sm:$0xf0]  ;;  %v7309_v63 = vld [vmem:[#allocation4 + $0x1a4] sm:$0xf] }
 0x2f5   :  { %6176 = vmatmul.msk.bf16.vlgmr.msrb.gmra.mxu1 %vm581_vm2, %v1117_v16  ;;  %6178 = vmatmul.msk.bf16.vlgmr.msrb.gmra.mxu3 %vm581_vm2, %v1117_v16  ;;  %v6324_v57 = vld [vmem:[#allocation4 + $0x1a8] sm:$0xf0]  ;;  %v8513_v16 = vor.u32 %v7303_v52, %v6300_v27  ;;  %v7302_v10 = vld [vmem:[#allocation4 + $0x164] sm:$0xf0]  ;;  %v7301_v50 = vld [vmem:[#allocation4 + $0x164] sm:$0xf]  ;;  %v10470_v54 = vpack.c.bf16 %v8425_v20, %v8461_v30 }
 0x2f6   :  { %1599 = vmatpush.bf16.msrb.mxu0 %v8486_v60  ;;  %1635 = vmatpush.bf16.msrb.mxu2 %v8493_v49  ;;  %10467 = vst [vmem:[#allocation32_spill] sm:$0xff] %v8508_v2  ;;  %v8510_v37 = vor.u32 %v1735_v18, %v1732_v44  ;;  %v8515_v42 = vor.u32 %v7309_v63, %v6324_v57  ;;  %v8524_v18 = vrot.slane %v1921_v43, 2  ;;  %v2401_v44 = vrot.slane %v2371_v61, 3  ;;  %v7379_v60 = vld [vmem:[#allocation4 + $0x3d4] sm:$0xf] }
 0x2f7   :  { %10468 = vst [vmem:[#allocation33_spill] sm:$0xff] %v8513_v16  ;;  %v1949_v36 = vrot.slane %v10470_v54, 2  ;;  %v2176_v53 = vrot.slane %v2174_v47, 2  ;;  %v2179_v52 = vrot.slane %v2177_v24, 3  ;;  %v2182_v27 = vshrl.u32 %v2135_v58, 16 }
 0x2f8   :  { %10469 = vst [vmem:[#allocation34_spill] sm:$0xff] %v8515_v42  ;;  %v8519_v49 = vsel %vm1703_vm12, %v1728_v22, %v8510_v37  ;;  %1659 = vmatpush.bf16.msrb.mxu3 %v8515_v42  ;;  %v2185_v63 = vshll.u32 %v2135_v58, 16  ;;  %v8529_v57 = vor.u32 %v7302_v10, %v6290_v23  ;;  %v8531_v22 = vor.u32 %v7301_v50, %v6292_v26  ;;  %v2583_v58 = vld [vmem:[#allocation2 + $0x38] sm:$0x7f]  ;;  %v2581_v26 = vld [vmem:[#allocation2 + $0x8] sm:$0x80] }
 0x2f9   :  { %v8535_v30 = vsel %vm1945_vm13, %v1949_v36, %v8524_v18  ;;  %v8537_v43 = vrot.slane %v2373_v11, 3  ;;  %v2184_v61 = vrot.slane %v2182_v27, 2  ;;  %v1118_v47 = vshrl.u32 %v8451_v15, 16  ;;  %v6282_v11 = vld [vmem:[#allocation4 + $0x150] sm:$0xf] }
 0x2fa   :  { %1600 = vmatpush.bf16.msrb.mxu0 %v8508_v2  ;;  %1636 = vmatpush.bf16.msrb.mxu2 %v8513_v16  ;;  %10471 = vst [vmem:[#allocation35_spill] sm:$0xff] %v8529_v57  ;;  %v2187_v54 = vrot.slane %v2185_v63, 3  ;;  %v2180_v23 = vor.u32 %v2179_v52, %v2176_v53  ;;  %v7300_v36 = vld [vmem:[#allocation4 + $0x154] sm:$0xf0]  ;;  %v7299_v27 = vld [vmem:[#allocation4 + $0x154] sm:$0xf]  ;;  %v2585_v15 = vpack.c.bf16 %v8425_v20, %v2581_v26 }
 0x2fb   :  { %10472 = vst [vmem:[#allocation36_spill] sm:$0xff] %v8531_v22  ;;  %v8542_v24 = vsel %vm926_vm7, %v2401_v44, %v8537_v43  ;;  %v1120_v50 = vor.u32 %v1118_v47, %v8464_v8  ;;  %v1121_v44 = vshrl.u32 %v8470_v14, 16  ;;  %v8551_v63 = vor.u32 %v7300_v36, %v6282_v11  ;;  %v6284_v16 = vld [vmem:[#allocation4 + $0x158] sm:$0xf0]  ;;  %v6274_v47 = vld [vmem:[#allocation4 + $0x140] sm:$0xf] }
 0x2fc   :  { %v8544_v10 = vor.u32 %v2187_v54, %v2184_v61  ;;  %v2587_v8 = vpack.c.bf16 %v2583_v58, %v8466_v21  ;;  %v8558_v52 = vor.u32 %v7299_v27, %v6284_v16  ;;  %v6322_v61 = vld [vmem:[#allocation4 + $0x1a0] sm:$0xf]  ;;  %v7310_v54 = vld [vmem:[#allocation4 + $0x1a4] sm:$0xf0]  ;;  %v7297_v14 = vld [vmem:[#allocation4 + $0x144] sm:$0xf] }
 0x2fd   :  { %10473 = vst [vmem:[#allocation37_spill] sm:$0xff] %v8551_v63  ;;  %v7298_v26 = vld [vmem:[#allocation4 + $0x144] sm:$0xf0]  ;;  %v6276_v11 = vld [vmem:[#allocation4 + $0x148] sm:$0xf0]  ;;  %v2626_v58 = vshrl.u32 %v2585_v15, 16  ;;  %v1123_v16 = vor.u32 %v1121_v44, %v8490_v33 }
 0x2fe   :  { %1601 = vmatpush.bf16.msrb.mxu0 %v8529_v57  ;;  %1637 = vmatpush.bf16.msrb.mxu2 %v8531_v22  ;;  %v8555_v53 = vsel %vm2155_vm14, %v2180_v23, %v8544_v10  ;;  %10474 = vst [vmem:[#allocation38_spill] sm:$0xff] %v8558_v52  ;;  %v8560_v22 = vor.u32 %v7310_v54, %v6322_v61  ;;  %v2634_v27 = vshrl.u32 %v2587_v8, 16  ;;  %v2637_v54 = vshll.u32 %v2587_v8, 16  ;;  %v7296_v57 = vld [vmem:[#allocation4 + $0x134] sm:$0xf0] }
 0x2ff   :  { %v8564_v23 = vor.u32 %v7298_v26, %v6274_v47  ;;  %v8566_v36 = vor.u32 %v7297_v14, %v6276_v11  ;;  %v2628_v61 = vrot.slane %v2626_v58, 3  ;;  %v6268_v33 = vld [vmem:[#allocation4 + $0x138] sm:$0xf0]  ;;  %v6258_v44 = vld [vmem:[#allocation4 + $0x120] sm:$0xf] }
 0x300   :  { %1235 = vmatmul.bf16.gmra.mxu0 %v1120_v50  ;;  %1271 = vmatmul.bf16.gmra.mxu2 %v1120_v50  ;;  %10475 = vst [vmem:[#allocation39_spill] sm:$0xff] %v8560_v22  ;;  %v2629_v50 = vshll.u32 %v2585_v15, 16  ;;  %v7294_v26 = vld [vmem:[#allocation4 + $0x124] sm:$0xf0]  ;;  %v7293_v14 = vld [vmem:[#allocation4 + $0x124] sm:$0xf] }
 0x301   :  { %10476 = vst [vmem:[#allocation40_spill] sm:$0xff] %v8564_v23  ;;  %1623 = vmatpush.bf16.msrb.mxu1 %v8560_v22  ;;  %v6260_v8 = vld [vmem:[#allocation4 + $0x128] sm:$0xf0]  ;;  %v2636_v58 = vrot.slane %v2634_v27, 3  ;;  %v2639_v2 = vrot.slane %v2637_v54, 4 }
 0x302   :  { %1602 = vmatpush.bf16.msrb.mxu0 %v8551_v63  ;;  %1638 = vmatpush.bf16.msrb.mxu2 %v8558_v52  ;;  %10477 = vst [vmem:[#allocation41_spill] sm:$0xff] %v8566_v36  ;;  %v6266_v63 = vld [vmem:[#allocation4 + $0x130] sm:$0xf]  ;;  %v7295_v52 = vld [vmem:[#allocation4 + $0x134] sm:$0xf]  ;;  %v2631_v11 = vrot.slane %v2629_v50, 4  ;;  %v1044_v50 = vpack.c.bf16 %v8389_v39, %v8373_v28 }
 0x303   :  { %v8574_v47 = vor.u32 %v7296_v57, %v6266_v63  ;;  %v8576_v15 = vor.u32 %v7295_v52, %v6268_v33  ;;  %v8584_v63 = vor.u32 %v2639_v2, %v2636_v58  ;;  %v6390_v27 = vld [vmem:[#allocation4 + $0x220] sm:$0xf]  ;;  %v7326_v54 = vld [vmem:[#allocation4 + $0x224] sm:$0xf0]  ;;  %v7325_v33 = vld [vmem:[#allocation4 + $0x224] sm:$0xf] }
 0x304   :  { %v2632_v57 = vor.u32 %v2631_v11, %v2628_v61  ;;  %v8594_v61 = vor.u32 %v7326_v54, %v6390_v27  ;;  %v6392_v2 = vld [vmem:[#allocation4 + $0x228] sm:$0xf0]  ;;  %v7323_v11 = vld [vmem:[#allocation4 + $0x214] sm:$0xf]  ;;  %v6384_v58 = vld [vmem:[#allocation4 + $0x218] sm:$0xf0] }
 0x305   :  { %6177 = vmatmul.msk.bf16.gmra.mxu1 %vm581_vm2, %v1123_v16  ;;  %6179 = vmatmul.msk.bf16.gmra.mxu3 %vm581_vm2, %v1123_v16  ;;  %10478 = vst [vmem:[#allocation42_spill] sm:$0xff] %v8574_v47  ;;  %v8578_v16 = vor.u32 %v7294_v26, %v6258_v44  ;;  %v6382_v44 = vld [vmem:[#allocation4 + $0x210] sm:$0xf]  ;;  %v7324_v26 = vld [vmem:[#allocation4 + $0x214] sm:$0xf0] }
 0x306   :  { %1603 = vmatpush.bf16.msrb.mxu0 %v8564_v23  ;;  %1639 = vmatpush.bf16.msrb.mxu2 %v8566_v36  ;;  %10479 = vst [vmem:[#allocation43_spill] sm:$0xff] %v8576_v15  ;;  %v8582_v23 = vor.u32 %v7293_v14, %v6260_v8  ;;  %v8588_v52 = vsel %vm2607_vm15, %v2632_v57, %v8584_v63  ;;  %v1039_v14 = vld [vmem:[#allocation2 + $0x8] sm:$0xff]  ;;  %v6374_v27 = vld [vmem:[#allocation4 + $0x200] sm:$0xf] }
 0x307   :  { %10480 = vst [vmem:[#allocation44_spill] sm:$0xff] %v8578_v16  ;;  %v8596_v8 = vor.u32 %v7325_v33, %v6392_v2  ;;  %v1045_v28 = vpack.c.bf16 %v8425_v20, %v1039_v14  ;;  %v8600_v57 = vor.u32 %v7324_v26, %v6382_v44  ;;  %v7322_v54 = vld [vmem:[#allocation4 + $0x204] sm:$0xf0]  ;;  %v7321_v33 = vld [vmem:[#allocation4 + $0x204] sm:$0xf] }
 0x308   :  { %10481 = vst [vmem:[#allocation45_spill] sm:$0xff] %v8582_v23  ;;  %v6376_v2 = vld [vmem:[#allocation4 + $0x208] sm:$0xf0]  ;;  %v8608_v20 = vor.u32 %v7322_v54, %v6374_v27  ;;  %v6366_v14 = vld [vmem:[#allocation4 + $0x1f0] sm:$0xf] }
 0x309   :  { %10482 = vst [vmem:[#allocation46_spill] sm:$0xff] %v8584_v63  ;;  %v8613_v26 = vor.u32 %v7321_v33, %v6376_v2  ;;  %v7318_v54 = vld [vmem:[#allocation4 + $0x1e4] sm:$0xf0]  ;;  %v7317_v33 = vld [vmem:[#allocation4 + $0x1e4] sm:$0xf]  ;;  %v999_v2 = vpop.f32.mrf.mxu2 }
 0x30a   :  { %1604 = vmatpush.bf16.msrb.mxu0 %v8574_v47  ;;  %1640 = vmatpush.bf16.msrb.mxu2 %v8576_v15  ;;  %10483 = vst [vmem:[#allocation47_spill] sm:$0xff] %v8588_v52  ;;  %v6488_v47 = vld [vmem:[#allocation4 + $0x2d8] sm:$0xf0] }
 0x30b   :  { %10484 = vst [vmem:[#allocation48_spill] sm:$0xff] %v8594_v61 }
 0x30c   :  { %10485 = vst [vmem:[#allocation49_spill] sm:$0xff] %v8596_v8 }
 0x30d   :  { %10486 = vst [vmem:[#allocation50_spill] sm:$0xff] %v8600_v57 }
 0x30e   :  { %1605 = vmatpush.bf16.msrb.mxu0 %v8578_v16  ;;  %1641 = vmatpush.bf16.msrb.mxu2 %v8582_v23  ;;  %v7327_v23 = vld [vmem:[#allocation4 + $0x234] sm:$0xf]  ;;  %v6400_v16 = vld [vmem:[#allocation4 + $0x238] sm:$0xf0]  ;;  %10488 = vst [vmem:[#allocation52_spill] sm:$0xff] %v8608_v20 }
 0x30f   :  { %v8610_v44 = vor.u32 %v7327_v23, %v6400_v16  ;;  %10490 = vst [vmem:[#allocation54_spill] sm:$0xff] %v8613_v26  ;;  %v1046_v23 = vpack.c.bf16 %v8405_v25, %v8405_v25  ;;  %v6358_v16 = vld [vmem:[#allocation4 + $0x1e0] sm:$0xf] }
 0x310   :  { %1398 = vmatmul.bf16.vlgmr.msra.gmra.mxu0 %v1044_v50  ;;  %1434 = vmatmul.bf16.vlgmr.msra.gmra.mxu2 %v1044_v50  ;;  %v8603_v50 = vor.u32 %v7323_v11, %v6384_v58  ;;  %v7320_v11 = vld [vmem:[#allocation4 + $0x1f4] sm:$0xf0]  ;;  %v7319_v58 = vld [vmem:[#allocation4 + $0x1f4] sm:$0xf]  ;;  %1029 = vst [vmem:[#allocation2 + $0x40] sm:$0xff] %v999_v2 }
 0x311   :  { %10489 = vst [vmem:[#allocation53_spill] sm:$0xff] %v8610_v44  ;;  %v1462_v2 = vld [vmem:[#allocation2] sm:$0xfc] }
 0x312   :  { %1836 = vmatpush.bf16.msra.mxu0 %v8594_v61  ;;  %1872 = vmatpush.bf16.msra.mxu2 %v8596_v8  ;;  %10487 = vst [vmem:[#allocation51_spill] sm:$0xff] %v8603_v50  ;;  %v8617_v8 = vor.u32 %v7320_v11, %v6366_v14  ;;  %v8626_v14 = vor.u32 %v7318_v54, %v6358_v16  ;;  %v6360_v11 = vld [vmem:[#allocation4 + $0x1e8] sm:$0xf0]  ;;  %v7315_v16 = vld [vmem:[#allocation4 + $0x1d4] sm:$0xf] }
 0x313   :  { %v6352_v54 = vld [vmem:[#allocation4 + $0x1d8] sm:$0xf0]  ;;  %v7312_v61 = vld [vmem:[#allocation4 + $0x1b4] sm:$0xf0] }
 0x314   :  { %10491 = vst [vmem:[#allocation55_spill] sm:$0xff] %v8617_v8 }
 0x315   :  { %6252 = vmatmul.msk.bf16.vlgmr.msra.gmra.mxu1 %vm581_vm2, %v1045_v28  ;;  %6254 = vmatmul.msk.bf16.vlgmr.msra.gmra.mxu3 %vm581_vm2, %v1045_v28  ;;  %v6368_v28 = vld [vmem:[#allocation4 + $0x1f8] sm:$0xf0]  ;;  %10493 = vst [vmem:[#allocation57_spill] sm:$0xff] %v8626_v14 }
 0x316   :  { %1837 = vmatpush.bf16.msra.mxu0 %v8600_v57  ;;  %1873 = vmatpush.bf16.msra.mxu2 %v8603_v50  ;;  %v8620_v27 = vor.u32 %v7319_v58, %v6368_v28  ;;  %v7328_v58 = vld [vmem:[#allocation4 + $0x234] sm:$0xf0]  ;;  %v8628_v28 = vor.u32 %v7317_v33, %v6360_v11  ;;  %v1464_v57 = vld [vmem:[#allocation2 + $0x30] sm:$0x3]  ;;  %v7314_v33 = vld [vmem:[#allocation4 + $0x1c4] sm:$0xf0] }
 0x317   :  { %1897 = vmatpush.bf16.msra.mxu3 %v8610_v44  ;;  %v1018_v44 = vpop.f32.mrf.mxu3  ;;  %v7316_v50 = vld [vmem:[#allocation4 + $0x1d4] sm:$0xf0]  ;;  %v6344_v11 = vld [vmem:[#allocation4 + $0x1c8] sm:$0xf0]  ;;  %v3139_v42 = vld [vmem:[#allocation2 + $0x40] sm:$0xf8] }
 0x318   :  { %10492 = vst [vmem:[#allocation56_spill] sm:$0xff] %v8620_v27  ;;  %v3371_v45 = vld [vmem:[#allocation2 + $0x40] sm:$0xe0] }
 0x319   :  { %10494 = vst [vmem:[#allocation58_spill] sm:$0xff] %v8628_v28 }
 0x31a   :  { %1838 = vmatpush.bf16.msra.mxu0 %v8608_v20  ;;  %1874 = vmatpush.bf16.msra.mxu2 %v8613_v26  ;;  %v6398_v26 = vld [vmem:[#allocation4 + $0x230] sm:$0xf]  ;;  %1030 = vst.msk [vmem:[#allocation2 + $0x48] sm:$0xff] %vm581_vm2, %v1018_v44  ;;  %v1468_v44 = vpack.c.bf16 %v1464_v57, %v8405_v25 }
 0x31b   :  { %v8630_v20 = vor.u32 %v7328_v58, %v6398_v26  ;;  %v6342_v26 = vld [vmem:[#allocation4 + $0x1c0] sm:$0xf]  ;;  %v1001_v58 = vpop.f32.mrf.mxu2 }
 0x31c   :  { %1031 = vst [vmem:[#allocation2 + $0x50] sm:$0xff] %v1001_v58  ;;  %v1495_v57 = vrot.slane %v1468_v44, 1  ;;  %v7343_v44 = vld [vmem:[#allocation4 + $0x2b4] sm:$0xf] }
 0x31d   :  { %10495 = vst [vmem:[#allocation59_spill] sm:$0xff] %v8630_v20  ;;  %1861 = vmatpush.bf16.msra.mxu1 %v8630_v20  ;;  %v6334_v20 = vld [vmem:[#allocation4 + $0x1b0] sm:$0xf] }
 0x31e   :  { %1839 = vmatpush.bf16.msra.mxu0 %v8617_v8  ;;  %1875 = vmatpush.bf16.msra.mxu2 %v8620_v27  ;;  %v6350_v8 = vld [vmem:[#allocation4 + $0x1d0] sm:$0xf] }
 0x31f   :  { %v8636_v27 = vor.u32 %v7316_v50, %v6350_v8  ;;  %v8646_v8 = vor.u32 %v7314_v33, %v6342_v26  ;;  %v7313_v50 = vld [vmem:[#allocation4 + $0x1c4] sm:$0xf]  ;;  %v6336_v26 = vld [vmem:[#allocation4 + $0x1b8] sm:$0xf0] }
 0x320   :  { %1403 = vmatmul.bf16.gmra.mxu0 %v1046_v23  ;;  %1439 = vmatmul.bf16.gmra.mxu2 %v1046_v23  ;;  %v1047_v23 = vpack.c.bf16 %v8466_v21, %v8466_v21  ;;  %v8642_v21 = vor.u32 %v7315_v16, %v6352_v54  ;;  %v8654_v16 = vor.u32 %v7312_v61, %v6334_v20  ;;  %v7311_v54 = vld [vmem:[#allocation4 + $0x1b4] sm:$0xf]  ;;  %v6468_v20 = vld [vmem:[#allocation4 + $0x2b8] sm:$0xf0] }
 0x321   :  { %10496 = vst [vmem:[#allocation60_spill] sm:$0xff] %v8636_v27 }
 0x322   :  { %1840 = vmatpush.bf16.msra.mxu0 %v8626_v14  ;;  %1876 = vmatpush.bf16.msra.mxu2 %v8628_v28  ;;  %10497 = vst [vmem:[#allocation61_spill] sm:$0xff] %v8642_v21  ;;  %v1020_v14 = vpop.f32.mrf.mxu3  ;;  %v8650_v28 = vor.u32 %v7313_v50, %v6344_v11  ;;  %v6466_v50 = vld [vmem:[#allocation4 + $0x2b0] sm:$0xf] }
 0x323   :  { %10498 = vst [vmem:[#allocation62_spill] sm:$0xff] %v8646_v8  ;;  %v1004_v11 = vpop.f32.mrf.mxu2 }
 0x324   :  { %10499 = vst [vmem:[#allocation63_spill] sm:$0xff] %v8650_v28 }
 0x325   :  { %6253 = vmatmul.msk.bf16.gmra.mxu1 %vm581_vm2, %v1047_v23  ;;  %6255 = vmatmul.msk.bf16.gmra.mxu3 %vm581_vm2, %v1047_v23  ;;  %v1466_v23 = vpack.c.bf16 %v8389_v39, %v1462_v2  ;;  %1032 = vst.msk [vmem:[#allocation2 + $0x58] sm:$0xff] %vm581_vm2, %v1020_v14  ;;  %v7344_v14 = vld [vmem:[#allocation4 + $0x2b4] sm:$0xf0] }
 0x326   :  { %1841 = vmatpush.bf16.msra.mxu0 %v8636_v27  ;;  %1877 = vmatpush.bf16.msra.mxu2 %v8642_v21  ;;  %10500 = vst [vmem:[#allocation64_spill] sm:$0xff] %v8654_v16  ;;  %v8657_v27 = vor.u32 %v7311_v54, %v6336_v26  ;;  %v8661_v61 = vor.u32 %v7344_v14, %v6466_v50  ;;  %v7342_v26 = vld [vmem:[#allocation4 + $0x2a4] sm:$0xf0]  ;;  %v6450_v14 = vld [vmem:[#allocation4 + $0x290] sm:$0xf] }
 0x327   :  { %v1494_v33 = vrot.slane %v1466_v23, 1  ;;  %1033 = vst [vmem:[#allocation2 + $0x60] sm:$0xff] %v1004_v11  ;;  %v6458_v23 = vld [vmem:[#allocation4 + $0x2a0] sm:$0xf]  ;;  %v8664_v54 = vor.u32 %v7343_v44, %v6468_v20  ;;  %v7340_v44 = vld [vmem:[#allocation4 + $0x294] sm:$0xf0] }
 0x328   :  { %10501 = vst [vmem:[#allocation65_spill] sm:$0xff] %v8657_v27  ;;  %v7339_v11 = vld [vmem:[#allocation4 + $0x294] sm:$0xf]  ;;  %v7345_v20 = vld [vmem:[#allocation4 + $0x2c4] sm:$0xf] }
 0x329   :  { %v1496_v2 = vsel %vm1493_vm11, %v1494_v33, %v1495_v57  ;;  %10502 = vst [vmem:[#allocation66_spill] sm:$0xff] %v8661_v61  ;;  %v7341_v33 = vld [vmem:[#allocation4 + $0x2a4] sm:$0xf]  ;;  %v7347_v21 = vld [vmem:[#allocation4 + $0x2d4] sm:$0xf] }
 0x32a   :  { %1842 = vmatpush.bf16.msra.mxu0 %v8646_v8  ;;  %1878 = vmatpush.bf16.msra.mxu2 %v8650_v28  ;;  %v1023_v58 = vpop.f32.mrf.mxu3  ;;  %10503 = vst [vmem:[#allocation67_spill] sm:$0xff] %v8664_v54  ;;  %v7337_v28 = vld [vmem:[#allocation4 + $0x284] sm:$0xf]  ;;  %v6444_v8 = vld [vmem:[#allocation4 + $0x288] sm:$0xf0] }
 0x32b   :  { %1034 = vst.msk [vmem:[#allocation2 + $0x68] sm:$0xff] %vm581_vm2, %v1023_v58  ;;  %v6452_v58 = vld [vmem:[#allocation4 + $0x298] sm:$0xf0] }
 0x32e   :  { %1843 = vmatpush.bf16.msra.mxu0 %v8654_v16  ;;  %1879 = vmatpush.bf16.msra.mxu2 %v8657_v27  ;;  %v6460_v16 = vld [vmem:[#allocation4 + $0x2a8] sm:$0xf0] }
 0x32f   :  { %v8671_v50 = vor.u32 %v7341_v33, %v6460_v16  ;;  %v6476_v27 = vld [vmem:[#allocation4 + $0x2c8] sm:$0xf0]  ;;  %v8683_v16 = vor.u32 %v7339_v11, %v6452_v58  ;;  %v1006_v33 = vpop.f32.mrf.mxu2  ;;  %v1676_v11 = vld [vmem:[#allocation2] sm:$0xf8] }
 0x330   :  { %1606 = vmatmul.bf16.vlgmr.msrb.gmra.mxu0 %v1496_v2  ;;  %1642 = vmatmul.bf16.vlgmr.msrb.gmra.mxu2 %v1496_v2  ;;  %v8668_v2 = vor.u32 %v7342_v26, %v6458_v23  ;;  %v8678_v23 = vor.u32 %v7340_v44, %v6450_v14  ;;  %v8680_v26 = vor.u32 %v7345_v20, %v6476_v27  ;;  %v1678_v27 = vld [vmem:[#allocation2 + $0x30] sm:$0x7] }
 0x331   :  { %10505 = vst [vmem:[#allocation69_spill] sm:$0xff] %v8671_v50  ;;  %v8691_v44 = vor.u32 %v7337_v28, %v6444_v8  ;;  %v1682_v58 = vpack.c.bf16 %v1678_v27, %v8405_v25  ;;  %v6434_v20 = vld [vmem:[#allocation4 + $0x270] sm:$0xf]  ;;  %v7346_v28 = vld [vmem:[#allocation4 + $0x2c4] sm:$0xf0] }
 0x332   :  { %2050 = vmatpush.bf16.msrb.mxu0 %v8661_v61  ;;  %10504 = vst [vmem:[#allocation68_spill] sm:$0xff] %v8668_v2  ;;  %2086 = vmatpush.bf16.msrb.mxu2 %v8664_v54  ;;  %v1025_v54 = vpop.f32.mrf.mxu3  ;;  %v6442_v61 = vld [vmem:[#allocation4 + $0x280] sm:$0xf] }
 0x333   :  { %10506 = vst [vmem:[#allocation70_spill] sm:$0xff] %v8678_v23  ;;  %v6426_v27 = vld [vmem:[#allocation4 + $0x260] sm:$0xf] }
 0x334   :  { %10507 = vst [vmem:[#allocation71_spill] sm:$0xff] %v8680_v26 }
 0x335   :  { %6328 = vmatmul.msk.bf16.vlgmr.msrb.gmra.mxu1 %vm581_vm2, %v8497_v41  ;;  %6330 = vmatmul.msk.bf16.vlgmr.msrb.gmra.mxu3 %vm581_vm2, %v8497_v41  ;;  %10508 = vst [vmem:[#allocation72_spill] sm:$0xff] %v8683_v16  ;;  %v7338_v41 = vld [vmem:[#allocation4 + $0x284] sm:$0xf0] }
 0x336   :  { %2051 = vmatpush.bf16.msrb.mxu0 %v8668_v2  ;;  %2087 = vmatpush.bf16.msrb.mxu2 %v8671_v50  ;;  %1035 = vst [vmem:[#allocation2 + $0x70] sm:$0x7f] %v1006_v33  ;;  %v8688_v14 = vor.u32 %v7338_v41, %v6442_v61  ;;  %v7335_v33 = vld [vmem:[#allocation4 + $0x274] sm:$0xf]  ;;  %v6436_v41 = vld [vmem:[#allocation4 + $0x278] sm:$0xf0] }
 0x337   :  { %2111 = vmatpush.bf16.msrb.mxu3 %v8680_v26  ;;  %1036 = vst.msk [vmem:[#allocation2 + $0x78] sm:$0x7f] %vm980_vm9, %v1025_v54  ;;  %v7336_v54 = vld [vmem:[#allocation4 + $0x274] sm:$0xf0]  ;;  %v1680_v26 = vpack.c.bf16 %v8389_v39, %v1676_v11  ;;  %v8699_v8 = vor.u32 %v7335_v33, %v6436_v41  ;;  %v1713_v50 = vshrl.u32 %v1682_v58, 16 }
 0x338   :  { %10509 = vst [vmem:[#allocation73_spill] sm:$0xff] %v8688_v14  ;;  %v8697_v61 = vor.u32 %v7336_v54, %v6434_v20  ;;  %v7333_v39 = vld [vmem:[#allocation4 + $0x264] sm:$0xf]  ;;  %v6428_v11 = vld [vmem:[#allocation4 + $0x268] sm:$0xf0] }
 0x339   :  { %10510 = vst [vmem:[#allocation74_spill] sm:$0xff] %v8691_v44  ;;  %v1708_v20 = vshll.u32 %v1680_v26, 16  ;;  %v6418_v54 = vld [vmem:[#allocation4 + $0x250] sm:$0xf]  ;;  %v7332_v33 = vld [vmem:[#allocation4 + $0x254] sm:$0xf0] }
 0x33a   :  { %2052 = vmatpush.bf16.msrb.mxu0 %v8678_v23  ;;  %2088 = vmatpush.bf16.msrb.mxu2 %v8683_v16  ;;  %10511 = vst [vmem:[#allocation75_spill] sm:$0xff] %v8697_v61  ;;  %v6474_v16 = vld [vmem:[#allocation4 + $0x2c0] sm:$0xf] }
 0x33b   :  { %10512 = vst [vmem:[#allocation76_spill] sm:$0xff] %v8699_v8  ;;  %v8701_v23 = vor.u32 %v7346_v28, %v6474_v16  ;;  %v1705_v16 = vshrl.u32 %v1680_v26, 16  ;;  %v8715_v28 = vor.u32 %v7332_v33, %v6418_v54  ;;  %v6412_v54 = vld [vmem:[#allocation4 + $0x248] sm:$0xf0] }
 0x33d   :  { %10513 = vst [vmem:[#allocation77_spill] sm:$0xff] %v8701_v23  ;;  %2075 = vmatpush.bf16.msrb.mxu1 %v8701_v23  ;;  %v1710_v23 = vrot.slane %v1708_v20, 2  ;;  %v7362_v20 = vld [vmem:[#allocation4 + $0x344] sm:$0xf0] }
 0x33e   :  { %2053 = vmatpush.bf16.msrb.mxu0 %v8688_v14  ;;  %2089 = vmatpush.bf16.msrb.mxu2 %v8691_v44  ;;  %v7334_v14 = vld [vmem:[#allocation4 + $0x264] sm:$0xf0]  ;;  %10516 = vst [vmem:[#allocation80_spill] sm:$0xff] %v8715_v28  ;;  %v1707_v44 = vrot.slane %v1705_v16, 1 }
 0x33f   :  { %v8704_v2 = vor.u32 %v7334_v14, %v6426_v27  ;;  %v1715_v14 = vrot.slane %v1713_v50, 1  ;;  %v7331_v27 = vld [vmem:[#allocation4 + $0x254] sm:$0xf]  ;;  %v7329_v50 = vld [vmem:[#allocation4 + $0x244] sm:$0xf] }
 0x340   :  { %1611 = vmatmul.bf16.gmra.mxu0 %v1495_v57  ;;  %1647 = vmatmul.bf16.gmra.mxu2 %v1495_v57  ;;  %v1716_v57 = vshll.u32 %v1682_v58, 16  ;;  %v8712_v58 = vor.u32 %v7333_v39, %v6428_v11  ;;  %v6410_v39 = vld [vmem:[#allocation4 + $0x240] sm:$0xf]  ;;  %v7330_v11 = vld [vmem:[#allocation4 + $0x244] sm:$0xf0]  ;;  %v8725_v16 = vor.u32 %v7329_v50, %v6412_v54 }
 0x341   :  { %10514 = vst [vmem:[#allocation78_spill] sm:$0xff] %v8704_v2  ;;  %v6536_v50 = vld [vmem:[#allocation4 + $0x338] sm:$0xf0] }
 0x342   :  { %2054 = vmatpush.bf16.msrb.mxu0 %v8697_v61  ;;  %2090 = vmatpush.bf16.msrb.mxu2 %v8699_v8  ;;  %10515 = vst [vmem:[#allocation79_spill] sm:$0xff] %v8712_v58  ;;  %v1718_v41 = vrot.slane %v1716_v57, 2  ;;  %v6420_v61 = vld [vmem:[#allocation4 + $0x258] sm:$0xf0]  ;;  %v1711_v8 = vor.u32 %v1710_v23, %v1707_v44  ;;  %v8722_v57 = vor.u32 %v7330_v11, %v6410_v39  ;;  %v6544_v44 = vld [vmem:[#allocation4 + $0x348] sm:$0xf0] }
 0x343   :  { %10519 = vst [vmem:[#allocation83_spill] sm:$0xff] %v8725_v16  ;;  %v7359_v39 = vld [vmem:[#allocation4 + $0x334] sm:$0xf] }
 0x344   :  { %v1719_v26 = vor.u32 %v1718_v41, %v1715_v14  ;;  %10518 = vst [vmem:[#allocation82_spill] sm:$0xff] %v8722_v57  ;;  %v7361_v14 = vld [vmem:[#allocation4 + $0x344] sm:$0xf]  ;;  %v8741_v54 = vor.u32 %v7359_v39, %v6536_v50  ;;  %v7356_v39 = vld [vmem:[#allocation4 + $0x314] sm:$0xf0] }
 0x345   :  { %6329 = vmatmul.msk.bf16.gmra.mxu1 %vm581_vm2, %v8488_v1  ;;  %6331 = vmatmul.msk.bf16.gmra.mxu3 %vm581_vm2, %v8488_v1  ;;  %v8718_v1 = vor.u32 %v7331_v27, %v6420_v61  ;;  %v6542_v61 = vld [vmem:[#allocation4 + $0x340] sm:$0xf]  ;;  %v8731_v41 = vor.u32 %v7361_v14, %v6544_v44  ;;  %v7360_v27 = vld [vmem:[#allocation4 + $0x334] sm:$0xf0]  ;;  %v6528_v44 = vld [vmem:[#allocation4 + $0x328] sm:$0xf0] }
 0x346   :  { %2055 = vmatpush.bf16.msrb.mxu0 %v8704_v2  ;;  %2091 = vmatpush.bf16.msrb.mxu2 %v8712_v58  ;;  %v1720_v33 = vsel %vm1703_vm12, %v1711_v8, %v1719_v26  ;;  %v8728_v23 = vor.u32 %v7362_v20, %v6542_v61  ;;  %v6534_v8 = vld [vmem:[#allocation4 + $0x330] sm:$0xf]  ;;  %10523 = vst [vmem:[#allocation87_spill] sm:$0xff] %v8741_v54  ;;  %v7358_v61 = vld [vmem:[#allocation4 + $0x324] sm:$0xf0] }
 0x347   :  { %10517 = vst [vmem:[#allocation81_spill] sm:$0xff] %v8718_v1  ;;  %v8739_v11 = vor.u32 %v7360_v27, %v6534_v8  ;;  %v7357_v20 = vld [vmem:[#allocation4 + $0x324] sm:$0xf]  ;;  %v6518_v27 = vld [vmem:[#allocation4 + $0x310] sm:$0xf] }
 0x348   :  { %10520 = vst [vmem:[#allocation84_spill] sm:$0xff] %v8728_v23  ;;  %v7355_v50 = vld [vmem:[#allocation4 + $0x314] sm:$0xf]  ;;  %v7350_v58 = vld [vmem:[#allocation4 + $0x2e4] sm:$0xf0] }
 0x349   :  { %10521 = vst [vmem:[#allocation85_spill] sm:$0xff] %v8731_v41 }
 0x34a   :  { %2056 = vmatpush.bf16.msrb.mxu0 %v8715_v28  ;;  %2092 = vmatpush.bf16.msrb.mxu2 %v8718_v1  ;;  %10522 = vst [vmem:[#allocation86_spill] sm:$0xff] %v8739_v11  ;;  %v6494_v28 = vld [vmem:[#allocation4 + $0x2e0] sm:$0xf] }
 0x34e   :  { %2057 = vmatpush.bf16.msrb.mxu0 %v8722_v57  ;;  %2093 = vmatpush.bf16.msrb.mxu2 %v8725_v16 }
 0x350   :  { %1844 = vmatmul.bf16.vlgmr.msra.gmra.mxu0 %v1720_v33  ;;  %1880 = vmatmul.bf16.vlgmr.msra.gmra.mxu2 %v1720_v33  ;;  %v6526_v33 = vld [vmem:[#allocation4 + $0x320] sm:$0xf] }
 0x351   :  { %v8745_v14 = vor.u32 %v7358_v61, %v6526_v33  ;;  %v6520_v33 = vld [vmem:[#allocation4 + $0x318] sm:$0xf0] }
 0x352   :  { %2288 = vmatpush.bf16.msra.mxu0 %v8728_v23  ;;  %2324 = vmatpush.bf16.msra.mxu2 %v8731_v41  ;;  %v8747_v41 = vor.u32 %v7357_v20, %v6528_v44  ;;  %v6552_v23 = vld [vmem:[#allocation4 + $0x358] sm:$0xf0]  ;;  %v8756_v61 = vor.u32 %v7355_v50, %v6520_v33  ;;  %v2128_v20 = vld [vmem:[#allocation2] sm:$0xe0]  ;;  %v2130_v44 = vld [vmem:[#allocation2 + $0x30] sm:$0x1f] }
 0x353   :  { %10524 = vst [vmem:[#allocation88_spill] sm:$0xff] %v8745_v14  ;;  %v8766_v33 = vld [vmem:[#allocation2 + $0x10] sm:$0xff] }
 0x354   :  { %10525 = vst [vmem:[#allocation89_spill] sm:$0xff] %v8747_v41 }
 0x355   :  { %6404 = vmatmul.msk.bf16.vlgmr.msra.gmra.mxu1 %vm581_vm2, %v8519_v49  ;;  %6406 = vmatmul.msk.bf16.vlgmr.msra.gmra.mxu3 %vm581_vm2, %v8519_v49  ;;  %v7363_v49 = vld [vmem:[#allocation4 + $0x354] sm:$0xf]  ;;  %10528 = vst [vmem:[#allocation92_spill] sm:$0xff] %v8756_v61 }
 0x356   :  { %2289 = vmatpush.bf16.msra.mxu0 %v8739_v11  ;;  %2325 = vmatpush.bf16.msra.mxu2 %v8741_v54  ;;  %v8750_v8 = vor.u32 %v7363_v49, %v6552_v23  ;;  %v8754_v54 = vor.u32 %v7356_v39, %v6518_v27  ;;  %v6510_v23 = vld [vmem:[#allocation4 + $0x300] sm:$0xf]  ;;  %v7354_v49 = vld [vmem:[#allocation4 + $0x304] sm:$0xf0]  ;;  %v6512_v11 = vld [vmem:[#allocation4 + $0x308] sm:$0xf0] }
 0x357   :  { %v7364_v27 = vld [vmem:[#allocation4 + $0x354] sm:$0xf0]  ;;  %v1916_v39 = vld [vmem:[#allocation2 + $0x30] sm:$0xf] }
 0x358   :  { %10526 = vst [vmem:[#allocation90_spill] sm:$0xff] %v8750_v8  ;;  %2349 = vmatpush.bf16.msra.mxu3 %v8750_v8  ;;  %v6550_v8 = vld [vmem:[#allocation4 + $0x350] sm:$0xf] }
 0x359   :  { %10527 = vst [vmem:[#allocation91_spill] sm:$0xff] %v8754_v54  ;;  %v8764_v50 = vor.u32 %v7364_v27, %v6550_v8 }
 0x35a   :  { %2290 = vmatpush.bf16.msra.mxu0 %v8745_v14  ;;  %2326 = vmatpush.bf16.msra.mxu2 %v8747_v41  ;;  %v7353_v41 = vld [vmem:[#allocation4 + $0x304] sm:$0xf]  ;;  %v8760_v14 = vor.u32 %v7354_v49, %v6510_v23  ;;  %v6502_v23 = vld [vmem:[#allocation4 + $0x2f0] sm:$0xf]  ;;  %v7352_v49 = vld [vmem:[#allocation4 + $0x2f4] sm:$0xf0] }
 0x35b   :  { %v8762_v16 = vor.u32 %v7353_v41, %v6512_v11  ;;  %10531 = vst [vmem:[#allocation95_spill] sm:$0xff] %v8764_v50  ;;  %v7351_v41 = vld [vmem:[#allocation4 + $0x2f4] sm:$0xf]  ;;  %v1920_v11 = vpack.c.bf16 %v1916_v39, %v8405_v25  ;;  %v8779_v8 = vor.u32 %v7352_v49, %v6502_v23  ;;  %2313 = vmatpush.bf16.msra.mxu1 %v8764_v50 }
 0x35c   :  { %10529 = vst [vmem:[#allocation93_spill] sm:$0xff] %v8760_v14  ;;  %v8790_v23 = vor.u32 %v7350_v58, %v6494_v28  ;;  %v8800_v50 = vld [vmem:[#allocation2 + $0x50] sm:$0xff]  ;;  %v8806_v58 = vld [vmem:[#allocation2 + $0x68] sm:$0xff] }
 0x35d   :  { %10530 = vst [vmem:[#allocation94_spill] sm:$0xff] %v8762_v16  ;;  %v8786_v39 = vrot.slane %v1920_v11, 2  ;;  %v8802_v11 = vld [vmem:[#allocation2 + $0x58] sm:$0xff] }
 0x35e   :  { %2291 = vmatpush.bf16.msra.mxu0 %v8754_v54  ;;  %2327 = vmatpush.bf16.msra.mxu2 %v8756_v61  ;;  %v2132_v54 = vpack.c.bf16 %v8766_v33, %v2128_v20  ;;  %v8770_v61 = vpack.c.bf16 %v2130_v44, %v8405_v25  ;;  %10532 = vst [vmem:[#allocation96_spill] sm:$0xff] %v8779_v8  ;;  %v6504_v20 = vld [vmem:[#allocation4 + $0x2f8] sm:$0xf0]  ;;  %v7349_v25 = vld [vmem:[#allocation4 + $0x2e4] sm:$0xf] }
 0x35f   :  { %v8783_v27 = vor.u32 %v7351_v41, %v6504_v20  ;;  %10534 = vst [vmem:[#allocation98_spill] sm:$0xff] %v8790_v23  ;;  %v8794_v41 = vld [vmem:[#allocation2 + $0x60] sm:$0xff] }
 0x360   :  { %1849 = vmatmul.bf16.gmra.mxu0 %v1719_v26  ;;  %1885 = vmatmul.bf16.gmra.mxu2 %v1719_v26  ;;  %v1914_v26 = vld [vmem:[#allocation2] sm:$0xf0]  ;;  %v2157_v57 = vshrl.u32 %v2132_v54, 16  ;;  %v2165_v1 = vshrl.u32 %v8770_v61, 16  ;;  %v2168_v36 = vshll.u32 %v8770_v61, 16 }
 0x361   :  { %v1918_v44 = vpack.c.bf16 %v8766_v33, %v1914_v26  ;;  %10533 = vst [vmem:[#allocation97_spill] sm:$0xff] %v8783_v27  ;;  %v6496_v26 = vld [vmem:[#allocation4 + $0x2e8] sm:$0xf0]  ;;  %v3141_v61 = vld [vmem:[#allocation2 + $0x70] sm:$0x7] }
 0x362   :  { %2292 = vmatpush.bf16.msra.mxu0 %v8760_v14  ;;  %2328 = vmatpush.bf16.msra.mxu2 %v8762_v16  ;;  %v8792_v16 = vor.u32 %v7349_v25, %v6496_v26  ;;  %v8796_v20 = vrot.slane %v2157_v57, 2  ;;  %v3038_v25 = vld [vmem:[#allocation2 + $0x78] sm:$0x3] }
 0x363   :  { %v1946_v49 = vrot.slane %v1918_v44, 2  ;;  %v3036_v44 = vld [vmem:[#allocation2 + $0x48] sm:$0xfc]  ;;  %v7348_v26 = vld [vmem:[#allocation4 + $0x2d4] sm:$0xf0]  ;;  %v3042_v63 = vpack.c.bf16 %v3038_v25, %v8806_v58  ;;  %v3145_v25 = vpack.c.bf16 %v3141_v61, %v8794_v41 }
 0x364   :  { %10535 = vst [vmem:[#allocation99_spill] sm:$0xff] %v8792_v16  ;;  %v3040_v22 = vpack.c.bf16 %v8802_v11, %v3036_v44 }
 0x365   :  { %6405 = vmatmul.msk.bf16.gmra.mxu1 %vm581_vm2, %v8510_v37  ;;  %6407 = vmatmul.msk.bf16.gmra.mxu3 %vm581_vm2, %v8510_v37  ;;  %v2160_v37 = vshll.u32 %v2132_v54, 16  ;;  %v3035_v54 = vld [vmem:[#allocation2 + $0x40] sm:$0xfc]  ;;  %v1948_v57 = vsel %vm1945_vm13, %v1946_v49, %v8786_v39  ;;  %v8818_v49 = vor.u32 %v7347_v21, %v6488_v47  ;;  %v8829_v47 = vrot.slane %v3042_v63, 1 }
 0x366   :  { %2293 = vmatpush.bf16.msra.mxu0 %v8779_v8  ;;  %2329 = vmatpush.bf16.msra.mxu2 %v8783_v27  ;;  %v3037_v8 = vld [vmem:[#allocation2 + $0x70] sm:$0x3]  ;;  %v8804_v27 = vrot.slane %v2165_v1, 2  ;;  %v3039_v28 = vpack.c.bf16 %v8800_v50, %v3035_v54  ;;  %v3143_v21 = vpack.c.bf16 %v8800_v50, %v3139_v42  ;;  %v3156_v61 = vshrl.u32 %v3145_v25, 16 }
 0x367   :  { %v8798_v14 = vrot.slane %v2160_v37, 3  ;;  %v6486_v37 = vld [vmem:[#allocation4 + $0x2d0] sm:$0xf]  ;;  %v3041_v15 = vpack.c.bf16 %v3037_v8, %v8794_v41  ;;  %10537 = vst [vmem:[#allocation101_spill] sm:$0xff] %v8818_v49  ;;  %v6620_v8 = vld [vmem:[#allocation4 + $0x3d8] sm:$0xf0] }
 0x368   :  { %v8814_v1 = vor.u32 %v7348_v26, %v6486_v37  ;;  %v3047_v54 = vrot.slane %v3039_v28, 1  ;;  %v3050_v26 = vrot.slane %v3040_v22, 1  ;;  %v8827_v44 = vor.u32 %v7379_v60, %v6620_v8  ;;  %10541 = vst [vmem:[#allocation105_spill] sm:$0xff] %v8829_v47 }
 0x369   :  { %v8823_v37 = vrot.slane %v3041_v15, 1  ;;  %v3151_v8 = vshll.u32 %v3143_v21, 16  ;;  %v3158_v31 = vrot.slane %v3156_v61, 1 }
 0x36a   :  { %2294 = vmatpush.bf16.msra.mxu0 %v8790_v23  ;;  %2330 = vmatpush.bf16.msra.mxu2 %v8792_v16  ;;  %10536 = vst [vmem:[#allocation100_spill] sm:$0xff] %v8814_v1  ;;  %v6618_v23 = vld [vmem:[#allocation4 + $0x3d0] sm:$0xf]  ;;  %v7380_v16 = vld [vmem:[#allocation4 + $0x3d4] sm:$0xf0]  ;;  %v8847_v42 = vsel %vm1493_vm11, %v3050_v26, %v8829_v47 }
 0x36b   :  { %v8821_v34 = vor.u32 %v7380_v16, %v6618_v23  ;;  %10539 = vst [vmem:[#allocation103_spill] sm:$0xff] %v8823_v37  ;;  %v3140_v16 = vld [vmem:[#allocation2 + $0x48] sm:$0xf8]  ;;  %v3142_v23 = vld [vmem:[#allocation2 + $0x78] sm:$0x7]  ;;  %v8838_v22 = vsel %vm1493_vm11, %v3047_v54, %v8823_v37  ;;  %v8853_v54 = vrot.slane %v2168_v36, 3 }
 0x36c   :  { %10540 = vst [vmem:[#allocation104_spill] sm:$0xff] %v8827_v44  ;;  %v3144_v60 = vpack.c.bf16 %v8802_v11, %v3140_v16  ;;  %v8842_v63 = vpack.c.bf16 %v3142_v23, %v8806_v58  ;;  %v3159_v16 = vshll.u32 %v3145_v25, 16  ;;  %v7378_v26 = vld [vmem:[#allocation4 + $0x3c4] sm:$0xf0]  ;;  %v7377_v47 = vld [vmem:[#allocation4 + $0x3c4] sm:$0xf] }
 0x36d   :  { %v1231_v2 = vpop.f32.mrf.mxu0  ;;  %10538 = vst [vmem:[#allocation102_spill] sm:$0xff] %v8821_v34  ;;  %v3268_v37 = vld [vmem:[#allocation2 + $0x48] sm:$0xf0]  ;;  %v3153_v4 = vrot.slane %v3151_v8, 2 }
 0x36e   :  { %2295 = vmatpush.bf16.msra.mxu0 %v8814_v1  ;;  %2331 = vmatpush.bf16.msra.mxu2 %v8818_v49  ;;  %10542 = vst [vmem:[#allocation106_spill] sm:$0xff] %v8838_v22  ;;  %v3165_v23 = vshrl.u32 %v3144_v60, 16  ;;  %v3269_v49 = vld [vmem:[#allocation2 + $0x70] sm:$0xf]  ;;  %v6610_v1 = vld [vmem:[#allocation4 + $0x3c0] sm:$0xf] }
 0x36f   :  { %10543 = vst [vmem:[#allocation107_spill] sm:$0xff] %v8847_v42  ;;  %v6612_v42 = vld [vmem:[#allocation4 + $0x3c8] sm:$0xf0]  ;;  %v3173_v36 = vshrl.u32 %v8842_v63, 16  ;;  %v3273_v8 = vpack.c.bf16 %v3269_v49, %v8794_v41 }
 0x370   :  { %2058 = vmatmul.bf16.vlgmr.msrb.gmra.mxu0 %v1948_v57  ;;  %2094 = vmatmul.bf16.vlgmr.msrb.gmra.mxu2 %v1948_v57  ;;  %v8857_v46 = vor.u32 %v7377_v47, %v6612_v42  ;;  %v6604_v42 = vld [vmem:[#allocation4 + $0x3b8] sm:$0xf0] }
 0x371   :  { %v8876_v29 = vor.u32 %v7375_v40, %v6604_v42  ;;  %v8891_v42 = vld [vmem:[#allocation2 + $0x40] sm:$0xc0] }
 0x372   :  { %v1249_v28 = vpop.f32.mrf.mxu1  ;;  %2502 = vmatpush.bf16.msrb.mxu0 %v8821_v34  ;;  %2538 = vmatpush.bf16.msrb.mxu2 %v8827_v44  ;;  %v3168_v44 = vshll.u32 %v3144_v60, 16  ;;  %10545 = vst [vmem:[#allocation109_spill] sm:$0xff] %v8857_v46  ;;  %v3270_v60 = vld [vmem:[#allocation2 + $0x78] sm:$0xf] }
 0x373   :  { %v8833_v57 = vadd.f32 %v1249_v28, %v1231_v2  ;;  %v1267_v15 = vpop.f32.mrf.mxu2  ;;  %v3148_v2 = vshrl.u32 %v3143_v21, 16  ;;  %v3267_v28 = vld [vmem:[#allocation2 + $0x40] sm:$0xf0]  ;;  %v8855_v21 = vor.u32 %v7378_v26, %v6610_v1  ;;  %v6602_v1 = vld [vmem:[#allocation4 + $0x3b0] sm:$0xf]  ;;  %10548 = vst [vmem:[#allocation112_spill] sm:$0xff] %v8876_v29  ;;  %v3274_v49 = vpack.c.bf16 %v3270_v60, %v8806_v58 }
 0x374   :  { %v3271_v25 = vpack.c.bf16 %v8800_v50, %v3267_v28  ;;  %v7376_v26 = vld [vmem:[#allocation4 + $0x3b4] sm:$0xf0]  ;;  %v8870_v28 = vrot.slane %v3165_v23, 1  ;;  %v3176_v23 = vshll.u32 %v8842_v63, 16  ;;  %v8889_v60 = vrot.slane %v3273_v8, 2 }
 0x375   :  { %v1233_v34 = vpop.f32.mrf.mxu0  ;;  %6480 = vmatmul.msk.bf16.vlgmr.msrb.gmra.mxu1 %vm581_vm2, %v8535_v30  ;;  %6482 = vmatmul.msk.bf16.vlgmr.msrb.gmra.mxu3 %vm581_vm2, %v8535_v30  ;;  %10544 = vst [vmem:[#allocation108_spill] sm:$0xff] %v8855_v21  ;;  %v3150_v22 = vrot.slane %v3148_v2, 1  ;;  %v3161_v30 = vrot.slane %v3159_v16, 2  ;;  %v8866_v47 = vor.u32 %v7376_v26, %v6602_v1  ;;  %v6628_v1 = vld [vmem:[#allocation4 + $0x3e8] sm:$0xf0] }
 0x376   :  { %2503 = vmatpush.bf16.msrb.mxu0 %v8855_v21  ;;  %2539 = vmatpush.bf16.msrb.mxu2 %v8857_v46  ;;  %v7381_v46 = vld [vmem:[#allocation4 + $0x3e4] sm:$0xf]  ;;  %10551 = vst [vmem:[#allocation115_spill] sm:$0xff] %v8889_v60  ;;  %v3178_v8 = vrot.slane %v3176_v23, 2  ;;  %v8914_v23 = vld [vmem:[#allocation2 + $0x78] sm:$0x3f] }
 0x377   :  { %v3154_v2 = vor.u32 %v3153_v4, %v3150_v22  ;;  %10546 = vst [vmem:[#allocation110_spill] sm:$0xff] %v8866_v47  ;;  %v8868_v16 = vor.u32 %v3161_v30, %v3158_v31  ;;  %v3272_v4 = vpack.c.bf16 %v8802_v11, %v3268_v37  ;;  %v3373_v22 = vld [vmem:[#allocation2 + $0x70] sm:$0x1f]  ;;  %v3372_v30 = vld [vmem:[#allocation2 + $0x48] sm:$0xe0]  ;;  %v8887_v40 = vor.u32 %v7381_v46, %v6628_v1 }
 0x378   :  { %v1285_v59 = vpop.f32.mrf.mxu3  ;;  %v3175_v37 = vrot.slane %v3173_v36, 1  ;;  %v7373_v63 = vld [vmem:[#allocation4 + $0x3a4] sm:$0xf]  ;;  %v6596_v36 = vld [vmem:[#allocation4 + $0x3a8] sm:$0xf0] }
 0x379   :  { %v8861_v52 = vadd.f32 %v1285_v59, %v1267_v15  ;;  %10547 = vst [vmem:[#allocation111_spill] sm:$0xff] %v8868_v16  ;;  %v8872_v59 = vrot.slane %v3168_v44, 2  ;;  %v8882_v31 = vsel %vm1703_vm12, %v3154_v2, %v8868_v16  ;;  %v3279_v44 = vrot.slane %v3271_v25, 2  ;;  %v6594_v2 = vld [vmem:[#allocation4 + $0x3a0] sm:$0xf]  ;;  %2563 = vmatpush.bf16.msrb.mxu3 %v8887_v40 }
 0x37a   :  { %v1251_v61 = vpop.f32.mrf.mxu1  ;;  %10549 = vst [vmem:[#allocation113_spill] sm:$0xff] %v8882_v31  ;;  %2504 = vmatpush.bf16.msrb.mxu0 %v8866_v47  ;;  %2540 = vmatpush.bf16.msrb.mxu2 %v8876_v29  ;;  %v7374_v16 = vld [vmem:[#allocation4 + $0x3a4] sm:$0xf0]  ;;  %v3377_v25 = vpack.c.bf16 %v3373_v22, %v8794_v41  ;;  %v3282_v47 = vrot.slane %v3272_v4, 2  ;;  %v8904_v29 = vld [vmem:[#allocation2 + $0x70] sm:$0x3f] }
 0x37b   :  { %v8874_v15 = vadd.f32 %v1251_v61, %v1233_v34  ;;  %v1269_v21 = vpop.f32.mrf.mxu2  ;;  %v3375_v34 = vpack.c.bf16 %v8800_v50, %v3371_v45  ;;  %10550 = vst [vmem:[#allocation114_spill] sm:$0xff] %v8887_v40  ;;  %v3374_v61 = vld [vmem:[#allocation2 + $0x78] sm:$0x1f]  ;;  %v3171_v45 = vor.u32 %v8872_v59, %v8870_v28  ;;  %v8898_v46 = vor.u32 %v7374_v16, %v6594_v2  ;;  %v8912_v40 = vld [vmem:[#allocation2 + $0x48] sm:$0xc0] }
 0x37c   :  { %v8902_v1 = vsel %vm1945_vm13, %v3279_v44, %v8889_v60  ;;  %v8908_v59 = vor.u32 %v7373_v63, %v6596_v36  ;;  %v8910_v22 = vrot.slane %v3274_v49, 2  ;;  %v3603_v44 = vld [vmem:[#allocation2 + $0x40] sm:$0x80]  ;;  %v6586_v4 = vld [vmem:[#allocation4 + $0x390] sm:$0xf]  ;;  %v3376_v63 = vpack.c.bf16 %v8802_v11, %v3372_v30 }
 0x37d   :  { %v1236_v26 = vpop.f32.mrf.mxu0  ;;  %10552 = vst [vmem:[#allocation116_spill] sm:$0xff] %v8898_v46  ;;  %v3380_v16 = vshrl.u32 %v3375_v34, 16  ;;  %v3383_v2 = vshll.u32 %v3375_v34, 16  ;;  %v7371_v31 = vld [vmem:[#allocation4 + $0x394] sm:$0xf]  ;;  %v8923_v49 = vpack.c.bf16 %v3374_v61, %v8806_v58  ;;  %v3505_v30 = vpack.c.bf16 %v8904_v29, %v8794_v41 }
 0x37e   :  { %10553 = vst [vmem:[#allocation117_spill] sm:$0xff] %v8902_v1  ;;  %2505 = vmatpush.bf16.msrb.mxu0 %v8898_v46  ;;  %v7372_v1 = vld [vmem:[#allocation4 + $0x394] sm:$0xf0]  ;;  %2541 = vmatpush.bf16.msrb.mxu2 %v8908_v59  ;;  %v8930_v46 = vsel %vm1945_vm13, %v3282_v47, %v8910_v22  ;;  %v8938_v35 = vor.u32 %v7371_v31, %v6588_v56  ;;  %v6578_v29 = vld [vmem:[#allocation4 + $0x380] sm:$0xf] }
 0x37f   :  { %10554 = vst [vmem:[#allocation118_spill] sm:$0xff] %v8908_v59  ;;  %v8926_v36 = vor.u32 %v7372_v1, %v6586_v4  ;;  %v3382_v59 = vrot.slane %v3380_v16, 2  ;;  %v3385_v47 = vrot.slane %v3383_v2, 3  ;;  %v7370_v56 = vld [vmem:[#allocation4 + $0x384] sm:$0xf0] }
 0x380   :  { %2063 = vmatmul.bf16.gmra.mxu0 %v8786_v39  ;;  %2099 = vmatmul.bf16.gmra.mxu2 %v8786_v39  ;;  %v1287_v28 = vpop.f32.mrf.mxu3  ;;  %10555 = vst [vmem:[#allocation119_spill] sm:$0xff] %v8910_v22  ;;  %v8919_v39 = vor.u32 %v3178_v8, %v3175_v37  ;;  %v3503_v37 = vpack.c.bf16 %v8800_v50, %v8891_v42  ;;  %v3388_v22 = vshrl.u32 %v3377_v25, 16  ;;  %v7369_v31 = vld [vmem:[#allocation4 + $0x384] sm:$0xf] }
 0x381   :  { %v8916_v60 = vadd.f32 %v1287_v28, %v1269_v21  ;;  %v6626_v21 = vld [vmem:[#allocation4 + $0x3e0] sm:$0xf]  ;;  %v7382_v28 = vld [vmem:[#allocation4 + $0x3e4] sm:$0xf0]  ;;  %10557 = vst [vmem:[#allocation121_spill] sm:$0xff] %v8930_v46  ;;  %v3391_v46 = vshll.u32 %v3377_v25, 16  ;;  %v3506_v42 = vpack.c.bf16 %v8914_v23, %v8806_v58 }
 0x382   :  { %10556 = vst [vmem:[#allocation120_spill] sm:$0xff] %v8919_v39  ;;  %v1254_v34 = vpop.f32.mrf.mxu1  ;;  %v8940_v1 = vor.u32 %v7382_v28, %v6626_v21  ;;  %v8944_v4 = vsel %vm1703_vm12, %v3171_v45, %v8919_v39  ;;  %v8955_v45 = vpack.c.bf16 %v8800_v50, %v3603_v44  ;;  %2506 = vmatpush.bf16.msrb.mxu0 %v8926_v36  ;;  %v6580_v25 = vld [vmem:[#allocation4 + $0x388] sm:$0xf0]  ;;  %v3390_v16 = vrot.slane %v3388_v22, 2 }
 0x383   :  { %v8936_v61 = vadd.f32 %v1254_v34, %v1236_v26  ;;  %v1272_v8 = vpop.f32.mrf.mxu2  ;;  %10558 = vst [vmem:[#allocation122_spill] sm:$0xff] %v8938_v35  ;;  %v3504_v26 = vpack.c.bf16 %v8802_v11, %v8912_v40  ;;  %2542 = vmatpush.bf16.msrb.mxu2 %v8938_v35  ;;  %v3393_v2 = vrot.slane %v3391_v46, 3  ;;  %v3605_v34 = vld [vmem:[#allocation2 + $0x70] sm:$0x7f]  ;;  %v8962_v40 = vor.u32 %v7369_v31, %v6580_v25  ;;  %v7368_v31 = vld [vmem:[#allocation4 + $0x374] sm:$0xf0] }
 0x384   :  { %2527 = vmatpush.bf16.msrb.mxu1 %v8940_v1  ;;  %v3397_v21 = vshrl.u32 %v3376_v63, 16  ;;  %v3400_v23 = vshll.u32 %v3376_v63, 16  ;;  %v3405_v44 = vshrl.u32 %v8923_v49, 16  ;;  %v3408_v35 = vshll.u32 %v8923_v49, 16  ;;  %v6570_v63 = vld [vmem:[#allocation4 + $0x370] sm:$0xf] }
 0x385   :  { %v1238_v17 = vpop.f32.mrf.mxu0  ;;  %6481 = vmatmul.msk.bf16.gmra.mxu1 %vm581_vm2, %v8524_v18  ;;  %6483 = vmatmul.msk.bf16.gmra.mxu3 %vm581_vm2, %v8524_v18  ;;  %v3386_v18 = vor.u32 %v3385_v47, %v3382_v59  ;;  %10560 = vst [vmem:[#allocation124_spill] sm:$0xff] %v8962_v40  ;;  %v8965_v39 = vor.u32 %v3393_v2, %v3390_v16  ;;  %v3604_v59 = vld [vmem:[#allocation2 + $0x48] sm:$0x80]  ;;  %v7367_v25 = vld [vmem:[#allocation4 + $0x374] sm:$0xf] }
 0x386   :  { %v8959_v17 = vor.u32 %v7370_v56, %v6578_v29  ;;  %v3511_v29 = vrot.slane %v3503_v37, 3  ;;  %v8968_v56 = vrot.slane %v3505_v30, 3  ;;  %v2163_v46 = vor.u32 %v8798_v14, %v8796_v20  ;;  %v6572_v37 = vld [vmem:[#allocation4 + $0x378] sm:$0xf0] }
 0x387   :  { %10561 = vst [vmem:[#allocation125_spill] sm:$0xff] %v8965_v39  ;;  %v8976_v47 = vor.u32 %v8853_v54, %v8804_v27  ;;  %v3609_v16 = vpack.c.bf16 %v3605_v34, %v8794_v41  ;;  %2543 = vmatpush.bf16.msrb.mxu2 %v8962_v40  ;;  %v8981_v49 = vor.u32 %v7368_v31, %v6570_v63  ;;  %v3399_v20 = vrot.slane %v3397_v21, 2  ;;  %v3606_v54 = vld [vmem:[#allocation2 + $0x78] sm:$0x7f] }
 0x388   :  { %10559 = vst [vmem:[#allocation123_spill] sm:$0xff] %v8959_v17  ;;  %v1290_v28 = vpop.f32.mrf.mxu3  ;;  %2507 = vmatpush.bf16.msrb.mxu0 %v8959_v17  ;;  %v8985_v14 = vsel %vm2155_vm14, %v3386_v18, %v8965_v39  ;;  %v3402_v27 = vrot.slane %v3400_v23, 3  ;;  %v3410_v34 = vrot.slane %v3408_v35, 3  ;;  %v3514_v63 = vrot.slane %v3504_v26, 3  ;;  %v6562_v23 = vld [vmem:[#allocation4 + $0x360] sm:$0xf] }
 0x389   :  { %10562 = vst [vmem:[#allocation126_spill] sm:$0xff] %v8968_v56  ;;  %v8970_v22 = vadd.f32 %v1290_v28, %v1272_v8  ;;  %v8987_v8 = vor.u32 %v7367_v25, %v6572_v37  ;;  %v3407_v28 = vrot.slane %v3405_v44, 2  ;;  %v8993_v31 = vrot.slane %v3506_v42, 3  ;;  %v7365_v25 = vld [vmem:[#allocation4 + $0x364] sm:$0xf] }
 0x38a   :  { %v1256_v2 = vpop.f32.mrf.mxu1  ;;  %v3403_v40 = vor.u32 %v3402_v27, %v3399_v20  ;;  %v3612_v17 = vshrl.u32 %v8955_v45, 16  ;;  %v2172_v21 = vsel %vm2155_vm14, %v2163_v46, %v8976_v47  ;;  %v3608_v35 = vpack.c.bf16 %v8802_v11, %v3604_v59  ;;  %v6564_v42 = vld [vmem:[#allocation4 + $0x368] sm:$0xf0]  ;;  %v7387_v39 = vld [vmem:[#allocation4 + $0x414] sm:$0xf] }
 0x38b   :  { %v1274_v30 = vpop.f32.mrf.mxu2  ;;  %v8991_v2 = vsel %vm926_vm7, %v3511_v29, %v8968_v56  ;;  %10564 = vst [vmem:[#allocation128_spill] sm:$0xff] %v8993_v31  ;;  %v8998_v37 = vor.u32 %v3410_v34, %v3407_v28  ;;  %v3610_v44 = vpack.c.bf16 %v3606_v54, %v8806_v58  ;;  %2544 = vmatpush.bf16.msrb.mxu2 %v8987_v8  ;;  %v3620_v54 = vshrl.u32 %v3609_v16, 16  ;;  %v6694_v34 = vld [vmem:[#allocation4 + $0x460] sm:$0xf] }
 0x38c   :  { %10563 = vst [vmem:[#allocation127_spill] sm:$0xff] %v8991_v2  ;;  %v7366_v30 = vld [vmem:[#allocation4 + $0x364] sm:$0xf0]  ;;  %2508 = vmatpush.bf16.msrb.mxu0 %v8981_v49  ;;  %v9009_v46 = vsel %vm926_vm7, %v3514_v63, %v8993_v31  ;;  %v3614_v20 = vrot.slane %v3612_v17, 3  ;;  %v9011_v27 = vor.u32 %v7365_v25, %v6564_v42  ;;  %v6696_v63 = vld [vmem:[#allocation4 + $0x468] sm:$0xf0] }
 0x38d   :  { %v1399_v18 = vpop.f32.mrf.mxu0  ;;  %10565 = vst [vmem:[#allocation129_spill] sm:$0xff] %v8998_v37  ;;  %v9005_v26 = vor.u32 %v7366_v30, %v6562_v23  ;;  %v9015_v59 = vsel %vm2155_vm14, %v3403_v40, %v8998_v37  ;;  %v7397_v23 = vld [vmem:[#allocation4 + $0x464] sm:$0xf]  ;;  %v3622_v17 = vrot.slane %v3620_v54, 3  ;;  %v3623_v25 = vshll.u32 %v3609_v16, 16 }
 0x38e   :  { %v1400_v29 = vadd.f32 %v1399_v18, %v8833_v57  ;;  %10566 = vst [vmem:[#allocation130_spill] sm:$0xff] %v9009_v46  ;;  %v3615_v57 = vshll.u32 %v8955_v45, 16  ;;  %v7398_v18 = vld [vmem:[#allocation4 + $0x464] sm:$0xf0]  ;;  %v9022_v40 = vor.u32 %v7397_v23, %v6696_v63  ;;  %v3629_v45 = vshrl.u32 %v3608_v35, 16 }
 0x38f   :  { %v9018_v30 = vor.u32 %v7398_v18, %v6694_v34  ;;  %2545 = vmatpush.bf16.msrb.mxu2 %v9011_v27  ;;  %v3632_v56 = vshll.u32 %v3608_v35, 16  ;;  %v3625_v18 = vrot.slane %v3623_v25, 4  ;;  %v6686_v35 = vld [vmem:[#allocation4 + $0x450] sm:$0xf]  ;;  %v7395_v63 = vld [vmem:[#allocation4 + $0x454] sm:$0xf] }
 0x390   :  { %2296 = vmatmul.bf16.vlgmr.msra.gmra.mxu0 %v2172_v21  ;;  %2332 = vmatmul.bf16.vlgmr.msra.gmra.mxu2 %v2172_v21  ;;  %v1292_v28 = vpop.f32.mrf.mxu3  ;;  %v3617_v31 = vrot.slane %v3615_v57, 4  ;;  %v3637_v21 = vshrl.u32 %v3610_v44, 16  ;;  %v3640_v57 = vshll.u32 %v3610_v44, 16  ;;  %v3631_v54 = vrot.slane %v3629_v45, 3 }
 0x391   :  { %2509 = vmatpush.bf16.msrb.mxu0 %v9005_v26  ;;  %v3634_v2 = vrot.slane %v3632_v56, 4 }
 0x392   :  { %v1417_v42 = vpop.f32.mrf.mxu1  ;;  %v3618_v34 = vor.u32 %v3617_v31, %v3614_v20  ;;  %v3639_v37 = vrot.slane %v3637_v21, 3  ;;  %v9033_v31 = vor.u32 %v3625_v18, %v3622_v17  ;;  %v3642_v56 = vrot.slane %v3640_v57, 4  ;;  %v6678_v57 = vld [vmem:[#allocation4 + $0x440] sm:$0xf] }
 0x393   :  { %v9024_v28 = vadd.f32 %v1417_v42, %v1400_v29  ;;  %v1435_v46 = vpop.f32.mrf.mxu2  ;;  %2776 = vmatpush.bf16.msra.mxu2 %v9022_v40  ;;  %v7396_v29 = vld [vmem:[#allocation4 + $0x454] sm:$0xf0]  ;;  %v3635_v20 = vor.u32 %v3634_v2, %v3631_v54  ;;  %v7393_v54 = vld [vmem:[#allocation4 + $0x444] sm:$0xf] }
 0x394   :  { %v1436_v16 = vadd.f32 %v1435_v46, %v8861_v52  ;;  %10567 = vst [vmem:[#allocation131_spill] sm:$0xff] %v9033_v31  ;;  %v9036_v52 = vor.u32 %v7396_v29, %v6686_v35  ;;  %v6688_v46 = vld [vmem:[#allocation4 + $0x458] sm:$0xf0]  ;;  %v9042_v42 = vsel %vm2607_vm15, %v3618_v34, %v9033_v31  ;;  %v7394_v34 = vld [vmem:[#allocation4 + $0x444] sm:$0xf0] }
 0x395   :  { %2740 = vmatpush.bf16.msra.mxu0 %v9018_v30  ;;  %v1401_v23 = vpop.f32.mrf.mxu0  ;;  %6556 = vmatmul.msk.bf16.vlgmr.msra.gmra.mxu1 %vm581_vm2, %v8555_v53  ;;  %v9038_v25 = vor.u32 %v7395_v63, %v6688_v46  ;;  %10568 = vst [vmem:[#allocation132_spill] sm:$0xff] %v9042_v42  ;;  %v9057_v35 = vor.u32 %v7394_v34, %v6678_v57  ;;  %v7399_v63 = vld [vmem:[#allocation4 + $0x474] sm:$0xf]  ;;  %v6704_v46 = vld [vmem:[#allocation4 + $0x478] sm:$0xf0] }
 0x396   :  { %6558 = vmatmul.msk.bf16.vlgmr.msra.gmra.mxu3 %vm581_vm2, %v8555_v53  ;;  %v1402_v44 = vadd.f32 %v1401_v23, %v8874_v15  ;;  %v9045_v53 = vor.u32 %v3642_v56, %v3639_v37  ;;  %v6680_v37 = vld [vmem:[#allocation4 + $0x448] sm:$0xf0]  ;;  %v6670_v56 = vld [vmem:[#allocation4 + $0x430] sm:$0xf]  ;;  %v7388_v42 = vld [vmem:[#allocation4 + $0x414] sm:$0xf0] }
 0x397   :  { %2777 = vmatpush.bf16.msra.mxu2 %v9038_v25  ;;  %v9059_v29 = vor.u32 %v7393_v54, %v6680_v37  ;;  %v2368_v54 = vld [vmem:[#allocation2 + $0x30] sm:$0x3f] }
 0x398   :  { %v1453_v45 = vpop.f32.mrf.mxu3  ;;  %10569 = vst [vmem:[#allocation133_spill] sm:$0xff] %v9045_v53  ;;  %v9052_v2 = vsel %vm2607_vm15, %v3635_v20, %v9045_v53  ;;  %v6672_v53 = vld [vmem:[#allocation4 + $0x438] sm:$0xf0] }
 0x399   :  { %2741 = vmatpush.bf16.msra.mxu0 %v9036_v52  ;;  %v9047_v17 = vadd.f32 %v1453_v45, %v1436_v16  ;;  %10570 = vst [vmem:[#allocation134_spill] sm:$0xff] %v9052_v2  ;;  %v7392_v45 = vld [vmem:[#allocation4 + $0x434] sm:$0xf0]  ;;  %v6654_v2 = vld [vmem:[#allocation4 + $0x410] sm:$0xf] }
 0x39a   :  { %v1419_v15 = vpop.f32.mrf.mxu1 }
 0x39b   :  { %v9054_v21 = vadd.f32 %v1419_v15, %v1402_v44  ;;  %v1437_v18 = vpop.f32.mrf.mxu2  ;;  %v9063_v44 = vor.u32 %v7399_v63, %v6704_v46  ;;  %v7391_v15 = vld [vmem:[#allocation4 + $0x434] sm:$0xf]  ;;  %2778 = vmatpush.bf16.msra.mxu2 %v9059_v29  ;;  %v2366_v63 = vld [vmem:[#allocation2] sm:$0xc0]  ;;  %v7390_v46 = vld [vmem:[#allocation4 + $0x424] sm:$0xf0] }
 0x39c   :  { %v1438_v23 = vadd.f32 %v1437_v18, %v8916_v60  ;;  %v9066_v60 = vor.u32 %v7392_v45, %v6670_v56  ;;  %v9068_v18 = vor.u32 %v7391_v15, %v6672_v53  ;;  %v6662_v53 = vld [vmem:[#allocation4 + $0x420] sm:$0xf]  ;;  %v7389_v56 = vld [vmem:[#allocation4 + $0x424] sm:$0xf]  ;;  %v6702_v15 = vld [vmem:[#allocation4 + $0x470] sm:$0xf] }
 0x39d   :  { %v1404_v16 = vpop.f32.mrf.mxu0  ;;  %2742 = vmatpush.bf16.msra.mxu0 %v9057_v35  ;;  %2801 = vmatpush.bf16.msra.mxu3 %v9063_v44  ;;  %v9080_v45 = vor.u32 %v7390_v46, %v6662_v53  ;;  %v6656_v53 = vld [vmem:[#allocation4 + $0x418] sm:$0xf0] }
 0x39e   :  { %v1405_v20 = vadd.f32 %v1404_v16, %v8936_v61  ;;  %10571 = vst [vmem:[#allocation135_spill] sm:$0xff] %v9066_v60 }
 0x39f   :  { %10572 = vst [vmem:[#allocation136_spill] sm:$0xff] %v9068_v18  ;;  %2779 = vmatpush.bf16.msra.mxu2 %v9068_v18 }
 0x3a0   :  { %2301 = vmatmul.bf16.gmra.mxu0 %v8976_v47  ;;  %2337 = vmatmul.bf16.gmra.mxu2 %v8976_v47  ;;  %v1455_v57 = vpop.f32.mrf.mxu3  ;;  %10573 = vst [vmem:[#allocation137_spill] sm:$0xff] %v9080_v45 }
 0x3a1   :  { %v9072_v34 = vadd.f32 %v1455_v57, %v1438_v23  ;;  %2743 = vmatpush.bf16.msra.mxu0 %v9066_v60  ;;  %v6664_v23 = vld [vmem:[#allocation4 + $0x428] sm:$0xf0]  ;;  %v7400_v57 = vld [vmem:[#allocation4 + $0x474] sm:$0xf0] }
 0x3a2   :  { %v1422_v61 = vpop.f32.mrf.mxu1 }
 0x3a3   :  { %v9076_v37 = vadd.f32 %v1422_v61, %v1405_v20  ;;  %v1440_v16 = vpop.f32.mrf.mxu2  ;;  %v9086_v20 = vor.u32 %v7389_v56, %v6664_v23  ;;  %v9088_v61 = vor.u32 %v7400_v57, %v6702_v15  ;;  %v2370_v56 = vpack.c.bf16 %v8766_v33, %v2366_v63  ;;  %v6638_v63 = vld [vmem:[#allocation4 + $0x3f0] sm:$0xf] }
 0x3a4   :  { %v1441_v47 = vadd.f32 %v1440_v16, %v8970_v22  ;;  %v9090_v22 = vld [vmem:[#allocation2 + $0x20] sm:$0xff] }
 0x3a5   :  { %v1406_v31 = vpop.f32.mrf.mxu0  ;;  %6557 = vmatmul.msk.bf16.gmra.mxu1 %vm581_vm2, %v8544_v10  ;;  %10574 = vst [vmem:[#allocation138_spill] sm:$0xff] %v9086_v20  ;;  %v2372_v16 = vpack.c.bf16 %v2368_v54, %v9090_v22  ;;  %2744 = vmatpush.bf16.msra.mxu0 %v9080_v45  ;;  %v7385_v45 = vld [vmem:[#allocation4 + $0x404] sm:$0xf] }
 0x3a6   :  { %6559 = vmatmul.msk.bf16.gmra.mxu3 %vm581_vm2, %v8544_v10  ;;  %v9094_v31 = vor.u32 %v7388_v42, %v6654_v2  ;;  %2780 = vmatpush.bf16.msra.mxu2 %v9086_v20  ;;  %v9098_v10 = vor.u32 %v7387_v39, %v6656_v53  ;;  %v6646_v42 = vld [vmem:[#allocation4 + $0x400] sm:$0xf]  ;;  %v7386_v2 = vld [vmem:[#allocation4 + $0x404] sm:$0xf0]  ;;  %v2398_v20 = vrot.slane %v2370_v56, 3 }
 0x3a7   :  { %2765 = vmatpush.bf16.msra.mxu1 %v9088_v61  ;;  %v2399_v57 = vrot.slane %v2372_v16, 3  ;;  %v9105_v18 = vor.u32 %v7386_v2, %v6646_v42  ;;  %v6648_v39 = vld [vmem:[#allocation4 + $0x408] sm:$0xf0] }
 0x3a8   :  { %10575 = vst [vmem:[#allocation139_spill] sm:$0xff] %v9098_v10  ;;  %v1458_v46 = vpop.f32.mrf.mxu3  ;;  %v9107_v60 = vor.u32 %v7385_v45, %v6648_v39 }
 0x3a9   :  { %v9101_v23 = vadd.f32 %v1458_v46, %v1441_v47  ;;  %2745 = vmatpush.bf16.msra.mxu0 %v9094_v31  ;;  %v7384_v47 = vld [vmem:[#allocation4 + $0x3f4] sm:$0xf0]  ;;  %v7383_v46 = vld [vmem:[#allocation4 + $0x3f4] sm:$0xf] }
 0x3aa   :  { %v1424_v15 = vpop.f32.mrf.mxu1  ;;  %2781 = vmatpush.bf16.msra.mxu2 %v9098_v10  ;;  %v9110_v16 = vor.u32 %v7384_v47, %v6638_v63 }
 0x3ab   :  { %v1442_v54 = vpop.f32.mrf.mxu2  ;;  %v6640_v15 = vld [vmem:[#allocation4 + $0x3f8] sm:$0xf0] }
 0x3ac   :  { %v2400_v54 = vsel %vm926_vm7, %v2398_v20, %v2399_v57  ;;  %v9114_v10 = vor.u32 %v7383_v46, %v6640_v15  ;;  %v2582_v46 = vld [vmem:[#allocation2 + $0x30] sm:$0x7f] }
 0x3ad   :  { %v1607_v53 = vpop.f32.mrf.mxu0  ;;  %2746 = vmatpush.bf16.msra.mxu0 %v9105_v18 }
 0x3ae   :  { %2782 = vmatpush.bf16.msra.mxu2 %v9107_v60 }
 0x3b0   :  { %2510 = vmatmul.bf16.vlgmr.msrb.gmra.mxu0 %v2400_v54  ;;  %2546 = vmatmul.bf16.vlgmr.msrb.gmra.mxu2 %v2400_v54  ;;  %v1460_v56 = vpop.f32.mrf.mxu3 }
 0x3b1   :  { %2747 = vmatpush.bf16.msra.mxu0 %v9110_v16 }
 0x3b2   :  { %v1625_v42 = vpop.f32.mrf.mxu1  ;;  %2783 = vmatpush.bf16.msra.mxu2 %v9114_v10 }
 0x3b3   :  { %v1626_v45 = vadd.f32 %v1625_v42, %v1607_v53  ;;  %v1643_v2 = vpop.f32.mrf.mxu2 }
 0x3b5   :  { %2885 = vmatpush.bf16.msrb.mxu0 %v8329_v51  ;;  %v9121_v20 = vadd.f32 %v1626_v45, %v9024_v28  ;;  %v1609_v39 = vpop.f32.mrf.mxu0  ;;  %6632 = vmatmul.msk.bf16.vlgmr.msrb.gmra.mxu1 %vm581_vm2, %v8542_v24 }
 0x3b6   :  { %2921 = vmatpush.bf16.msrb.mxu2 %v8331_v55  ;;  %6634 = vmatmul.msk.bf16.vlgmr.msrb.gmra.mxu3 %vm581_vm2, %v8542_v24  ;;  %v2586_v24 = vpack.c.bf16 %v2582_v46, %v9090_v22 }
 0x3b7   :  { %2946 = vmatpush.bf16.msrb.mxu3 %v8347_v38  ;;  %2910 = vmatpush.bf16.msrb.mxu1 %v8362_v0 }
 0x3b8   :  { %v1661_v53 = vpop.f32.mrf.mxu3  ;;  %v2617_v56 = vshrl.u32 %v2586_v24, 16  ;;  %v2620_v42 = vshll.u32 %v2586_v24, 16 }
 0x3b9   :  { %2886 = vmatpush.bf16.msrb.mxu0 %v8335_v5  ;;  %v1662_v51 = vadd.f32 %v1661_v53, %v1643_v2  ;;  %v2580_v5 = vld [vmem:[#allocation2] sm:$0x80] }
 0x3ba   :  { %2922 = vmatpush.bf16.msrb.mxu2 %v8337_v6  ;;  %v1627_v55 = vpop.f32.mrf.mxu1  ;;  %v2584_v15 = vpack.c.bf16 %v8766_v33, %v2580_v5 }
 0x3bb   :  { %v9132_v28 = vadd.f32 %v1662_v51, %v9047_v17  ;;  %v1628_v63 = vadd.f32 %v1627_v55, %v1609_v39  ;;  %v1645_v47 = vpop.f32.mrf.mxu2 }
 0x3bc   :  { %v2612_v33 = vshll.u32 %v2584_v15, 16 }
 0x3bd   :  { %2887 = vmatpush.bf16.msrb.mxu0 %v8341_v13  ;;  %v9137_v38 = vadd.f32 %v1628_v63, %v9054_v21  ;;  %v1612_v0 = vpop.f32.mrf.mxu0  ;;  %v10576_v63 = vld [vmem:[#allocation7_spill] sm:$0xff] }
 0x3be   :  { %2923 = vmatpush.bf16.msrb.mxu2 %v8343_v12 }
 0x3c0   :  { %2515 = vmatmul.bf16.gmra.mxu0 %v2399_v57  ;;  %2551 = vmatmul.bf16.gmra.mxu2 %v2399_v57  ;;  %v1663_v6 = vpop.f32.mrf.mxu3  ;;  %v2622_v57 = vrot.slane %v2620_v42, 4 }
 0x3c1   :  { %2888 = vmatpush.bf16.msrb.mxu0 %v8349_v62  ;;  %v1664_v17 = vadd.f32 %v1663_v6, %v1645_v47  ;;  %v10577_v47 = vld [vmem:[#allocation8_spill] sm:$0xff]  ;;  %v10580_v6 = vld [vmem:[#allocation11_spill] sm:$0xff] }
 0x3c2   :  { %2924 = vmatpush.bf16.msrb.mxu2 %v8351_v9  ;;  %v1630_v13 = vpop.f32.mrf.mxu1  ;;  %v2609_v9 = vshrl.u32 %v2584_v15, 16  ;;  %v10581_v15 = vld [vmem:[#allocation47_spill] sm:$0xff] }
 0x3c3   :  { %v9144_v12 = vadd.f32 %v1664_v17, %v9072_v34  ;;  %v1631_v21 = vadd.f32 %v1630_v13, %v1612_v0  ;;  %v1648_v54 = vpop.f32.mrf.mxu2  ;;  %v2619_v34 = vrot.slane %v2617_v56, 3  ;;  %v10578_v0 = vld [vmem:[#allocation10_spill] sm:$0xff]  ;;  %v10582_v13 = vld [vmem:[#allocation12_spill] sm:$0xff]  ;;  %v10585_v56 = vld [vmem:[#allocation21_spill] sm:$0xff] }
 0x3c4   :  { %v2611_v2 = vrot.slane %v2609_v9, 3 }
 0x3c5   :  { %2889 = vmatpush.bf16.msrb.mxu0 %v8356_v32  ;;  %v9148_v62 = vadd.f32 %v1631_v21, %v9076_v37  ;;  %v1614_v22 = vpop.f32.mrf.mxu0  ;;  %6633 = vmatmul.msk.bf16.gmra.mxu1 %vm581_vm2, %v8537_v43  ;;  %v2614_v37 = vrot.slane %v2612_v33, 4  ;;  %v10583_v21 = vld [vmem:[#allocation16_spill] sm:$0xff] }
 0x3c6   :  { %6635 = vmatmul.msk.bf16.gmra.mxu3 %vm581_vm2, %v8537_v43  ;;  %2925 = vmatpush.bf16.msrb.mxu2 %v8358_v48  ;;  %v2623_v43 = vor.u32 %v2622_v57, %v2619_v34 }
 0x3c7   :  { %v2615_v48 = vor.u32 %v2614_v37, %v2611_v2 }
 0x3c8   :  { %v1666_v45 = vpop.f32.mrf.mxu3 }
 0x3c9   :  { %2890 = vmatpush.bf16.msrb.mxu0 %v8364_v3  ;;  %v1667_v32 = vadd.f32 %v1666_v45, %v1648_v54  ;;  %v2624_v3 = vsel %vm2607_vm15, %v2615_v48, %v2623_v43  ;;  %v10584_v54 = vld [vmem:[#allocation13_spill] sm:$0xff]  ;;  %v10587_v45 = vld [vmem:[#allocation15_spill] sm:$0xff] }
 0x3ca   :  { %v1632_v39 = vpop.f32.mrf.mxu1  ;;  %2926 = vmatpush.bf16.msrb.mxu2 %v8366_v19 }
 0x3cb   :  { %v9158_v53 = vadd.f32 %v1667_v32, %v9101_v23  ;;  %v1650_v51 = vpop.f32.mrf.mxu2  ;;  %v10579_v23 = vld [vmem:[#allocation9_spill] sm:$0xff]  ;;  %v2839_v32 = vld [vmem:[#allocation2 + $0x40] sm:$0xfe] }
 0x3cc   :  { %v10588_v39 = vld [vmem:[#allocation17_spill] sm:$0xff]  ;;  %v2843_v51 = vpack.c.bf16 %v8800_v50, %v2839_v32 }
 0x3cd   :  { %2891 = vmatpush.bf16.msrb.mxu0 %v8371_v7  ;;  %v1845_v55 = vpop.f32.mrf.mxu0  ;;  %v10596_v32 = vld [vmem:[#allocation25_spill] sm:$0xff] }
 0x3ce   :  { %2927 = vmatpush.bf16.msrb.mxu2 %v10576_v63  ;;  %v2850_v50 = vshll.u32 %v2843_v51, 16 }
 0x3d0   :  { %2748 = vmatmul.bf16.vlgmr.msra.gmra.mxu0 %v2624_v3  ;;  %2784 = vmatmul.bf16.vlgmr.msra.gmra.mxu2 %v2624_v3  ;;  %v1668_v46 = vpop.f32.mrf.mxu3  ;;  %v2840_v3 = vld [vmem:[#allocation2 + $0x48] sm:$0xfe] }
 0x3d1   :  { %2892 = vmatpush.bf16.msrb.mxu0 %v10577_v47  ;;  %v10590_v46 = vld [vmem:[#allocation19_spill] sm:$0xff] }
 0x3d2   :  { %v1863_v19 = vpop.f32.mrf.mxu1  ;;  %2928 = vmatpush.bf16.msrb.mxu2 %v10579_v23 }
 0x3d3   :  { %v1864_v5 = vadd.f32 %v1863_v19, %v1845_v55  ;;  %v1881_v24 = vpop.f32.mrf.mxu2  ;;  %v10589_v55 = vld [vmem:[#allocation18_spill] sm:$0xff] }
 0x3d5   :  { %2963 = vmatpush.bf16.msra.mxu0 %v10578_v0  ;;  %v9168_v7 = vadd.f32 %v1864_v5, %v9121_v20  ;;  %v1847_v17 = vpop.f32.mrf.mxu0  ;;  %6708 = vmatmul.msk.bf16.vlgmr.msra.gmra.mxu1 %vm581_vm2, %v10581_v15  ;;  %v10586_v20 = vld [vmem:[#allocation14_spill] sm:$0xff]  ;;  %v10591_v5 = vld [vmem:[#allocation20_spill] sm:$0xff] }
 0x3d6   :  { %2999 = vmatpush.bf16.msra.mxu2 %v10580_v6  ;;  %6710 = vmatmul.msk.bf16.vlgmr.msra.gmra.mxu3 %vm581_vm2, %v10581_v15  ;;  %v10593_v15 = vld [vmem:[#allocation22_spill] sm:$0xff] }
 0x3d7   :  { %3024 = vmatpush.bf16.msra.mxu3 %v10583_v21  ;;  %2988 = vmatpush.bf16.msra.mxu1 %v10585_v56 }
 0x3d8   :  { %v1899_v42 = vpop.f32.mrf.mxu3 }
 0x3d9   :  { %2964 = vmatpush.bf16.msra.mxu0 %v10582_v13  ;;  %v1900_v22 = vadd.f32 %v1899_v42, %v1881_v24  ;;  %v2852_v13 = vrot.slane %v2850_v50, 1 }
 0x3da   :  { %3000 = vmatpush.bf16.msra.mxu2 %v10584_v54  ;;  %v1865_v9 = vpop.f32.mrf.mxu1  ;;  %v10594_v54 = vld [vmem:[#allocation23_spill] sm:$0xff] }
 0x3db   :  { %v9180_v33 = vadd.f32 %v1900_v22, %v9132_v28  ;;  %v1866_v34 = vadd.f32 %v1865_v9, %v1847_v17  ;;  %v1883_v57 = vpop.f32.mrf.mxu2  ;;  %v2841_v28 = vld [vmem:[#allocation2 + $0x70] sm:$0x1]  ;;  %v10592_v17 = vld [vmem:[#allocation46_spill] sm:$0xff]  ;;  %v10595_v9 = vld [vmem:[#allocation24_spill] sm:$0xff] }
 0x3dc   :  { %v9194_v23 = vpack.c.bf16 %v2841_v28, %v8794_v41  ;;  %v2848_v41 = vshrl.u32 %v2843_v51, 16  ;;  %v10598_v28 = vld [vmem:[#allocation27_spill] sm:$0xff] }
 0x3dd   :  { %2965 = vmatpush.bf16.msra.mxu0 %v10586_v20  ;;  %v9184_v2 = vadd.f32 %v1866_v34, %v9137_v38  ;;  %v1850_v37 = vpop.f32.mrf.mxu0 }
 0x3de   :  { %3001 = vmatpush.bf16.msra.mxu2 %v10587_v45  ;;  %v2855_v21 = vshll.u32 %v9194_v23, 16 }
 0x3e0   :  { %2753 = vmatmul.bf16.gmra.mxu0 %v2623_v43  ;;  %2789 = vmatmul.bf16.gmra.mxu2 %v2623_v43  ;;  %v1901_v48 = vpop.f32.mrf.mxu3  ;;  %v2844_v43 = vpack.c.bf16 %v8802_v11, %v2840_v3  ;;  %v2857_v45 = vrot.slane %v2855_v21, 1 }
 0x3e1   :  { %2966 = vmatpush.bf16.msra.mxu0 %v10588_v39  ;;  %v1902_v63 = vadd.f32 %v1901_v48, %v1883_v57  ;;  %v2853_v57 = vor.u32 %v2852_v13, %v2848_v41  ;;  %v10597_v48 = vld [vmem:[#allocation26_spill] sm:$0xff]  ;;  %v10604_v41 = vld [vmem:[#allocation39_spill] sm:$0xff] }
 0x3e2   :  { %3002 = vmatpush.bf16.msra.mxu2 %v10589_v55  ;;  %v1868_v47 = vpop.f32.mrf.mxu1  ;;  %v2862_v56 = vshll.u32 %v2844_v43, 16 }
 0x3e3   :  { %v9191_v0 = vadd.f32 %v1902_v63, %v9144_v12  ;;  %v1869_v38 = vadd.f32 %v1868_v47, %v1850_v37  ;;  %v1886_v19 = vpop.f32.mrf.mxu2  ;;  %v2842_v12 = vld [vmem:[#allocation2 + $0x78] sm:$0x1]  ;;  %v2860_v37 = vshrl.u32 %v2844_v43, 16  ;;  %v10599_v47 = vld [vmem:[#allocation28_spill] sm:$0xff] }
 0x3e4   :  { %v2864_v39 = vrot.slane %v2862_v56, 1  ;;  %v10606_v56 = vld [vmem:[#allocation33_spill] sm:$0xff] }
 0x3e5   :  { %2967 = vmatpush.bf16.msra.mxu0 %v10590_v46  ;;  %v9199_v24 = vadd.f32 %v1869_v38, %v9148_v62  ;;  %v1852_v6 = vpop.f32.mrf.mxu0  ;;  %6709 = vmatmul.msk.bf16.gmra.mxu1 %vm581_vm2, %v10592_v17  ;;  %v2846_v62 = vpack.c.bf16 %v2842_v12, %v8806_v58  ;;  %v2858_v58 = vsel %vm1093_vm10, %v2853_v57, %v2857_v45  ;;  %v10600_v46 = vld [vmem:[#allocation29_spill] sm:$0xff]  ;;  %v10602_v12 = vld [vmem:[#allocation31_spill] sm:$0xff] }
 0x3e6   :  { %3003 = vmatpush.bf16.msra.mxu2 %v10591_v5  ;;  %6711 = vmatmul.msk.bf16.gmra.mxu3 %vm581_vm2, %v10592_v17  ;;  %v10601_v17 = vld [vmem:[#allocation30_spill] sm:$0xff] }
 0x3e7   :  { %v2867_v51 = vshll.u32 %v2846_v62, 16 }
 0x3e8   :  { %v1904_v11 = vpop.f32.mrf.mxu3 }
 0x3e9   :  { %2968 = vmatpush.bf16.msra.mxu0 %v10593_v15  ;;  %v1905_v42 = vadd.f32 %v1904_v11, %v1886_v19  ;;  %v2869_v3 = vrot.slane %v2867_v51, 1  ;;  %v10603_v15 = vld [vmem:[#allocation34_spill] sm:$0xff]  ;;  %v2871_v11 = vshrl.u32 %v9194_v23, 16  ;;  %v2874_v51 = vshrl.u32 %v2846_v62, 16  ;;  %v10611_v62 = vld [vmem:[#allocation40_spill] sm:$0xff] }
 0x3ea   :  { %3004 = vmatpush.bf16.msra.mxu2 %v10594_v54  ;;  %v1870_v22 = vpop.f32.mrf.mxu1 }
 0x3eb   :  { %v9211_v20 = vadd.f32 %v1905_v42, %v9158_v53  ;;  %v1888_v34 = vpop.f32.mrf.mxu2  ;;  %v2865_v53 = vor.u32 %v2864_v39, %v2860_v37  ;;  %v10607_v37 = vld [vmem:[#allocation35_spill] sm:$0xff]  ;;  %v10608_v39 = vld [vmem:[#allocation36_spill] sm:$0xff] }
 0x3ed   :  { %2969 = vmatpush.bf16.msra.mxu0 %v10595_v9  ;;  %v2059_v55 = vpop.f32.mrf.mxu0  ;;  %v2870_v5 = vsel %vm1093_vm10, %v2865_v53, %v2869_v3 }
 0x3ee   :  { %3005 = vmatpush.bf16.msra.mxu2 %v10596_v32  ;;  %v2873_v32 = vor.u32 %v2871_v11, %v2857_v45  ;;  %v2876_v45 = vor.u32 %v2874_v51, %v2869_v3  ;;  %v10617_v11 = vld [vmem:[#allocation48_spill] sm:$0xff]  ;;  %v10620_v51 = vld [vmem:[#allocation51_spill] sm:$0xff] }
 0x3f0   :  { %2893 = vmatmul.bf16.vlgmr.msrb.gmra.mxu0 %v2858_v58  ;;  %2929 = vmatmul.bf16.vlgmr.msrb.gmra.mxu2 %v2858_v58  ;;  %v1906_v63 = vpop.f32.mrf.mxu3  ;;  %v10609_v58 = vld [vmem:[#allocation37_spill] sm:$0xff] }
 0x3f1   :  { %2970 = vmatpush.bf16.msra.mxu0 %v10597_v48 }
 0x3f2   :  { %3006 = vmatpush.bf16.msra.mxu2 %v10598_v28  ;;  %v2077_v38 = vpop.f32.mrf.mxu1 }
 0x3f3   :  { %v2078_v19 = vadd.f32 %v2077_v38, %v2059_v55  ;;  %v2095_v50 = vpop.f32.mrf.mxu2 }
 0x3f5   :  { %3061 = vmatpush.bf16.msrb.mxu0 %v10599_v47  ;;  %v9221_v43 = vadd.f32 %v2078_v19, %v9168_v7  ;;  %v2061_v6 = vpop.f32.mrf.mxu0  ;;  %6712 = vmatmul.msk.bf16.vlgmr.msrb.gmra.mxu1 %vm581_vm2, %v2870_v5  ;;  %v10605_v7 = vld [vmem:[#allocation32_spill] sm:$0xff] }
 0x3f6   :  { %3097 = vmatpush.bf16.msrb.mxu2 %v10600_v46  ;;  %6714 = vmatmul.msk.bf16.vlgmr.msrb.gmra.mxu3 %vm581_vm2, %v2870_v5  ;;  %v10612_v46 = vld [vmem:[#allocation41_spill] sm:$0xff]  ;;  %v10614_v5 = vld [vmem:[#allocation43_spill] sm:$0xff] }
 0x3f7   :  { %3122 = vmatpush.bf16.msrb.mxu3 %v10603_v15  ;;  %3086 = vmatpush.bf16.msrb.mxu1 %v10604_v41  ;;  %v10615_v41 = vld [vmem:[#allocation44_spill] sm:$0xff] }
 0x3f8   :  { %v2113_v13 = vpop.f32.mrf.mxu3 }
 0x3f9   :  { %3062 = vmatpush.bf16.msrb.mxu0 %v10601_v17  ;;  %v2114_v21 = vadd.f32 %v2113_v13, %v2095_v50  ;;  %v10616_v13 = vld [vmem:[#allocation45_spill] sm:$0xff] }
 0x3fa   :  { %3098 = vmatpush.bf16.msrb.mxu2 %v10602_v12  ;;  %v2079_v54 = vpop.f32.mrf.mxu1  ;;  %v7543_v12 = vld [vmem:[#allocation2 + $0x50] sm:$0xff] }
 0x3fb   :  { %v9233_v42 = vadd.f32 %v2114_v21, %v9180_v33  ;;  %v2080_v22 = vadd.f32 %v2079_v54, %v2061_v6  ;;  %v2097_v9 = vpop.f32.mrf.mxu2  ;;  %v10610_v33 = vld [vmem:[#allocation38_spill] sm:$0xff]  ;;  %v2829_v6 = vld [vmem:[#allocation2 + $0x40] sm:$0xff]  ;;  %v2830_v54 = vld [vmem:[#allocation2 + $0x48] sm:$0xff] }
 0x3fc   :  { %v2835_v15 = vpack.c.bf16 %v7543_v12, %v2829_v6  ;;  %v10628_v12 = vld [vmem:[#allocation58_spill] sm:$0xff] }
 0x3fd   :  { %3063 = vmatpush.bf16.msrb.mxu0 %v10605_v7  ;;  %v9236_v34 = vadd.f32 %v2080_v22, %v9184_v2  ;;  %v2064_v57 = vpop.f32.mrf.mxu0  ;;  %v10618_v7 = vld [vmem:[#allocation49_spill] sm:$0xff] }
 0x3fe   :  { %3099 = vmatpush.bf16.msrb.mxu2 %v10606_v56 }
 0x400   :  { %2898 = vmatmul.bf16.gmra.mxu0 %v2873_v32  ;;  %2934 = vmatmul.bf16.gmra.mxu2 %v2873_v32  ;;  %v2115_v23 = vpop.f32.mrf.mxu3 }
 0x401   :  { %3064 = vmatpush.bf16.msrb.mxu0 %v10607_v37  ;;  %v2116_v55 = vadd.f32 %v2115_v23, %v2097_v9  ;;  %v7544_v9 = vld [vmem:[#allocation2 + $0x58] sm:$0xff]  ;;  %v10621_v23 = vld [vmem:[#allocation53_spill] sm:$0xff] }
 0x402   :  { %3100 = vmatpush.bf16.msrb.mxu2 %v10608_v39  ;;  %v2082_v48 = vpop.f32.mrf.mxu1  ;;  %v10619_v39 = vld [vmem:[#allocation50_spill] sm:$0xff] }
 0x403   :  { %v9243_v28 = vadd.f32 %v2116_v55, %v9191_v0  ;;  %v2083_v2 = vadd.f32 %v2082_v48, %v2064_v57  ;;  %v2100_v63 = vpop.f32.mrf.mxu2  ;;  %v10613_v0 = vld [vmem:[#allocation42_spill] sm:$0xff]  ;;  %v2836_v57 = vpack.c.bf16 %v7544_v9, %v2830_v54  ;;  %v10622_v55 = vld [vmem:[#allocation59_spill] sm:$0xff] }
 0x404   :  { %v10631_v9 = vld [vmem:[#allocation62_spill] sm:$0xff] }
 0x405   :  { %3065 = vmatpush.bf16.msrb.mxu0 %v10609_v58  ;;  %v9246_v53 = vadd.f32 %v2083_v2, %v9199_v24  ;;  %v2066_v47 = vpop.f32.mrf.mxu0  ;;  %6713 = vmatmul.msk.bf16.gmra.mxu1 %vm581_vm2, %v2876_v45  ;;  %v10623_v2 = vld [vmem:[#allocation52_spill] sm:$0xff] }
 0x406   :  { %3101 = vmatpush.bf16.msrb.mxu2 %v10610_v33  ;;  %6715 = vmatmul.msk.bf16.gmra.mxu3 %vm581_vm2, %v2876_v45 }
 0x408   :  { %v2118_v38 = vpop.f32.mrf.mxu3 }
 0x409   :  { %3066 = vmatpush.bf16.msrb.mxu0 %v10611_v62  ;;  %v2119_v19 = vadd.f32 %v2118_v38, %v2100_v63  ;;  %v10624_v63 = vld [vmem:[#allocation54_spill] sm:$0xff]  ;;  %v7545_v38 = vld [vmem:[#allocation2 + $0x60] sm:$0xff] }
 0x40a   :  { %3102 = vmatpush.bf16.msrb.mxu2 %v10612_v46  ;;  %v2084_v50 = vpop.f32.mrf.mxu1 }
 0x40b   :  { %v9255_v3 = vadd.f32 %v2119_v19, %v9211_v20  ;;  %v2102_v24 = vpop.f32.mrf.mxu2  ;;  %v2837_v19 = vpack.c.bf16 %v7545_v38, %v7545_v38  ;;  %v10625_v50 = vld [vmem:[#allocation55_spill] sm:$0xff]  ;;  %v10640_v38 = vld [vmem:[#allocation69_spill] sm:$0xff] }
 0x40d   :  { %3067 = vmatpush.bf16.msrb.mxu0 %v10613_v0  ;;  %v2297_v17 = vpop.f32.mrf.mxu0  ;;  %v10626_v0 = vld [vmem:[#allocation56_spill] sm:$0xff] }
 0x40e   :  { %3103 = vmatpush.bf16.msrb.mxu2 %v10614_v5 }
 0x410   :  { %2971 = vmatmul.bf16.vlgmr.msra.gmra.mxu0 %v2835_v15  ;;  %3007 = vmatmul.bf16.vlgmr.msra.gmra.mxu2 %v2835_v15  ;;  %v2120_v21 = vpop.f32.mrf.mxu3 }
 0x411   :  { %3068 = vmatpush.bf16.msrb.mxu0 %v10615_v41  ;;  %v7546_v41 = vld [vmem:[#allocation2 + $0x68] sm:$0xff] }
 0x412   :  { %3104 = vmatpush.bf16.msrb.mxu2 %v10616_v13  ;;  %v2315_v56 = vpop.f32.mrf.mxu1  ;;  %v2838_v13 = vpack.c.bf16 %v7546_v41, %v7546_v41 }
 0x413   :  { %v2316_v20 = vadd.f32 %v2315_v56, %v2297_v17  ;;  %v2333_v22 = vpop.f32.mrf.mxu2  ;;  %v10627_v17 = vld [vmem:[#allocation57_spill] sm:$0xff] }
 0x415   :  { %3189 = vmatpush.bf16.msra.mxu0 %v10617_v11  ;;  %v2360_v32 = vadd.f32 %v2316_v20, %v9221_v43  ;;  %v2299_v37 = vpop.f32.mrf.mxu0  ;;  %6716 = vmatmul.msk.bf16.vlgmr.msra.gmra.mxu1 %vm581_vm2, %v2836_v57  ;;  %v10629_v11 = vld [vmem:[#allocation60_spill] sm:$0xff] }
 0x416   :  { %3225 = vmatpush.bf16.msra.mxu2 %v10618_v7  ;;  %6718 = vmatmul.msk.bf16.vlgmr.msra.gmra.mxu3 %vm581_vm2, %v2836_v57  ;;  %v10630_v7 = vld [vmem:[#allocation61_spill] sm:$0xff] }
 0x417   :  { %3250 = vmatpush.bf16.msra.mxu3 %v10621_v23  ;;  %3214 = vmatpush.bf16.msra.mxu1 %v10622_v55  ;;  %v10635_v23 = vld [vmem:[#allocation106_spill] sm:$0xff] }
 0x419   :  { %3190 = vmatpush.bf16.msra.mxu0 %v10619_v39  ;;  %v2351_v48 = vpop.f32.mrf.mxu3  ;;  %v10633_v39 = vld [vmem:[#allocation64_spill] sm:$0xff] }
 0x41a   :  { %3226 = vmatpush.bf16.msra.mxu2 %v10620_v51  ;;  %v2352_v58 = vadd.f32 %v2351_v48, %v2333_v22  ;;  %v2317_v33 = vpop.f32.mrf.mxu1  ;;  %v10634_v51 = vld [vmem:[#allocation65_spill] sm:$0xff]  ;;  %v10636_v48 = vld [vmem:[#allocation66_spill] sm:$0xff] }
 0x41b   :  { %v2318_v45 = vadd.f32 %v2317_v33, %v2299_v37  ;;  %v2335_v47 = vpop.f32.mrf.mxu2 }
 0x41c   :  { %v2361_v43 = vadd.f32 %v2352_v58, %v9233_v42  ;;  %v10637_v58 = vld [vmem:[#allocation67_spill] sm:$0xff] }
 0x41d   :  { %3191 = vmatpush.bf16.msra.mxu0 %v10623_v2  ;;  %v2362_v62 = vadd.f32 %v2318_v45, %v9236_v34  ;;  %v2302_v46 = vpop.f32.mrf.mxu0 }
 0x41e   :  { %3227 = vmatpush.bf16.msra.mxu2 %v10624_v63 }
 0x420   :  { %2976 = vmatmul.bf16.gmra.mxu0 %v2837_v19  ;;  %3012 = vmatmul.bf16.gmra.mxu2 %v2837_v19  ;;  %v10641_v19 = vld [vmem:[#allocation71_spill] sm:$0xff] }
 0x421   :  { %3192 = vmatpush.bf16.msra.mxu0 %v10625_v50  ;;  %v2353_v5 = vpop.f32.mrf.mxu3  ;;  %v10642_v50 = vld [vmem:[#allocation77_spill] sm:$0xff] }
 0x422   :  { %3228 = vmatpush.bf16.msra.mxu2 %v10626_v0  ;;  %v2354_v24 = vadd.f32 %v2353_v5, %v2335_v47  ;;  %v2320_v6 = vpop.f32.mrf.mxu1  ;;  %v10638_v47 = vld [vmem:[#allocation107_spill] sm:$0xff] }
 0x423   :  { %v2321_v15 = vadd.f32 %v2320_v6, %v2302_v46  ;;  %v2338_v34 = vpop.f32.mrf.mxu2  ;;  %v10639_v46 = vld [vmem:[#allocation68_spill] sm:$0xff]  ;;  %v10643_v6 = vld [vmem:[#allocation70_spill] sm:$0xff] }
 0x424   :  { %v2363_v42 = vadd.f32 %v2354_v24, %v9243_v28  ;;  %v10632_v28 = vld [vmem:[#allocation63_spill] sm:$0xff] }
 0x425   :  { %3193 = vmatpush.bf16.msra.mxu0 %v10627_v17  ;;  %v2364_v21 = vadd.f32 %v2321_v15, %v9246_v53  ;;  %v2304_v54 = vpop.f32.mrf.mxu0  ;;  %6717 = vmatmul.msk.bf16.gmra.mxu1 %vm581_vm2, %v2838_v13 }
 0x426   :  { %3229 = vmatpush.bf16.msra.mxu2 %v10628_v12  ;;  %6719 = vmatmul.msk.bf16.gmra.mxu3 %vm581_vm2, %v2838_v13  ;;  %v10645_v13 = vld [vmem:[#allocation73_spill] sm:$0xff]  ;;  %v10646_v54 = vld [vmem:[#allocation74_spill] sm:$0xff] }
 0x429   :  { %3194 = vmatpush.bf16.msra.mxu0 %v10629_v11  ;;  %v2356_v56 = vpop.f32.mrf.mxu3  ;;  %v10647_v11 = vld [vmem:[#allocation103_spill] sm:$0xff] }
 0x42a   :  { %3230 = vmatpush.bf16.msra.mxu2 %v10630_v7  ;;  %v2357_v20 = vadd.f32 %v2356_v56, %v2338_v34  ;;  %v2322_v22 = vpop.f32.mrf.mxu1 }
 0x42b   :  { %v2340_v37 = vpop.f32.mrf.mxu2  ;;  %v10648_v22 = vld [vmem:[#allocation75_spill] sm:$0xff] }
 0x42c   :  { %v2365_v57 = vadd.f32 %v2357_v20, %v9255_v3 }
 0x42d   :  { %3195 = vmatpush.bf16.msra.mxu0 %v10631_v9  ;;  %v2511_v53 = vpop.f32.mrf.mxu0  ;;  %v10649_v9 = vld [vmem:[#allocation76_spill] sm:$0xff] }
 0x42e   :  { %3231 = vmatpush.bf16.msra.mxu2 %v10632_v28 }
 0x430   :  { %3069 = vmatmul.bf16.vlgmr.msrb.gmra.mxu0 %v10635_v23  ;;  %3105 = vmatmul.bf16.vlgmr.msrb.gmra.mxu2 %v10635_v23  ;;  %v10652_v23 = vld [vmem:[#allocation79_spill] sm:$0xff] }
 0x431   :  { %3196 = vmatpush.bf16.msra.mxu0 %v10633_v39  ;;  %v2358_v55 = vpop.f32.mrf.mxu3  ;;  %v10650_v39 = vld [vmem:[#allocation105_spill] sm:$0xff] }
 0x432   :  { %3232 = vmatpush.bf16.msra.mxu2 %v10634_v51  ;;  %v2529_v33 = vpop.f32.mrf.mxu1  ;;  %v10651_v51 = vld [vmem:[#allocation78_spill] sm:$0xff] }
 0x433   :  { %v2530_v2 = vadd.f32 %v2529_v33, %v2511_v53  ;;  %v2547_v63 = vpop.f32.mrf.mxu2  ;;  %v10653_v33 = vld [vmem:[#allocation80_spill] sm:$0xff] }
 0x435   :  { %3293 = vmatpush.bf16.msrb.mxu0 %v10636_v48  ;;  %v2574_v45 = vadd.f32 %v2530_v2, %v2360_v32  ;;  %v2513_v3 = vpop.f32.mrf.mxu0  ;;  %6720 = vmatmul.msk.bf16.vlgmr.msrb.gmra.mxu1 %vm581_vm2, %v10638_v47  ;;  %v10644_v32 = vld [vmem:[#allocation72_spill] sm:$0xff] }
 0x436   :  { %3329 = vmatpush.bf16.msrb.mxu2 %v10637_v58  ;;  %6722 = vmatmul.msk.bf16.vlgmr.msrb.gmra.mxu3 %vm581_vm2, %v10638_v47  ;;  %v10656_v47 = vld [vmem:[#allocation83_spill] sm:$0xff] }
 0x437   :  { %3354 = vmatpush.bf16.msrb.mxu3 %v10641_v19  ;;  %3318 = vmatpush.bf16.msrb.mxu1 %v10642_v50  ;;  %v10658_v19 = vld [vmem:[#allocation84_spill] sm:$0xff]  ;;  %v10659_v50 = vld [vmem:[#allocation85_spill] sm:$0xff] }
 0x439   :  { %3294 = vmatpush.bf16.msrb.mxu0 %v10639_v46  ;;  %v2565_v0 = vpop.f32.mrf.mxu3  ;;  %v10657_v46 = vld [vmem:[#allocation113_spill] sm:$0xff] }
 0x43a   :  { %3330 = vmatpush.bf16.msrb.mxu2 %v10640_v38  ;;  %v2566_v5 = vadd.f32 %v2565_v0, %v2547_v63  ;;  %v2531_v24 = vpop.f32.mrf.mxu1 }
 0x43b   :  { %v2532_v12 = vadd.f32 %v2531_v24, %v2513_v3  ;;  %v2549_v15 = vpop.f32.mrf.mxu2  ;;  %v10655_v3 = vld [vmem:[#allocation82_spill] sm:$0xff] }
 0x43c   :  { %v2575_v17 = vadd.f32 %v2566_v5, %v2361_v43 }
 0x43d   :  { %3295 = vmatpush.bf16.msrb.mxu0 %v10643_v6  ;;  %v2576_v34 = vadd.f32 %v2532_v12, %v2362_v62  ;;  %v2516_v41 = vpop.f32.mrf.mxu0  ;;  %v10661_v12 = vld [vmem:[#allocation87_spill] sm:$0xff] }
 0x43e   :  { %3331 = vmatpush.bf16.msrb.mxu2 %v10644_v32  ;;  %v10660_v32 = vld [vmem:[#allocation86_spill] sm:$0xff] }
 0x440   :  { %3074 = vmatmul.bf16.gmra.mxu0 %v10647_v11  ;;  %3110 = vmatmul.bf16.gmra.mxu2 %v10647_v11 }
 0x441   :  { %3296 = vmatpush.bf16.msrb.mxu0 %v10645_v13  ;;  %v2567_v7 = vpop.f32.mrf.mxu3 }
 0x442   :  { %3332 = vmatpush.bf16.msrb.mxu2 %v10646_v54  ;;  %v2568_v56 = vadd.f32 %v2567_v7, %v2549_v15  ;;  %v2534_v20 = vpop.f32.mrf.mxu1  ;;  %v10662_v15 = vld [vmem:[#allocation90_spill] sm:$0xff]  ;;  %v10665_v7 = vld [vmem:[#allocation89_spill] sm:$0xff] }
 0x443   :  { %v2535_v28 = vadd.f32 %v2534_v20, %v2516_v41  ;;  %v2552_v37 = vpop.f32.mrf.mxu2  ;;  %v10663_v41 = vld [vmem:[#allocation95_spill] sm:$0xff] }
 0x444   :  { %v2577_v43 = vadd.f32 %v2568_v56, %v2363_v42  ;;  %v10654_v42 = vld [vmem:[#allocation81_spill] sm:$0xff] }
 0x445   :  { %3297 = vmatpush.bf16.msrb.mxu0 %v10648_v22  ;;  %v2578_v62 = vadd.f32 %v2535_v28, %v2364_v21  ;;  %v2518_v53 = vpop.f32.mrf.mxu0  ;;  %6721 = vmatmul.msk.bf16.gmra.mxu1 %vm581_vm2, %v10650_v39  ;;  %v10666_v28 = vld [vmem:[#allocation91_spill] sm:$0xff] }
 0x446   :  { %3333 = vmatpush.bf16.msrb.mxu2 %v10649_v9  ;;  %6723 = vmatmul.msk.bf16.gmra.mxu3 %vm581_vm2, %v10650_v39  ;;  %v10668_v53 = vld [vmem:[#allocation111_spill] sm:$0xff] }
 0x449   :  { %3298 = vmatpush.bf16.msrb.mxu0 %v10651_v51  ;;  %v2570_v55 = vpop.f32.mrf.mxu3 }
 0x44a   :  { %3334 = vmatpush.bf16.msrb.mxu2 %v10652_v23  ;;  %v2571_v48 = vadd.f32 %v2570_v55, %v2552_v37  ;;  %v2536_v58 = vpop.f32.mrf.mxu1  ;;  %v10667_v37 = vld [vmem:[#allocation92_spill] sm:$0xff]  ;;  %v10669_v55 = vld [vmem:[#allocation93_spill] sm:$0xff] }
 0x44b   :  { %v2554_v21 = vpop.f32.mrf.mxu2 }
 0x44c   :  { %v2579_v2 = vadd.f32 %v2571_v48, %v2365_v57  ;;  %v10671_v21 = vld [vmem:[#allocation120_spill] sm:$0xff] }
 0x44d   :  { %3299 = vmatpush.bf16.msrb.mxu0 %v10653_v33  ;;  %v2749_v63 = vpop.f32.mrf.mxu0 }
 0x44e   :  { %3335 = vmatpush.bf16.msrb.mxu2 %v10654_v42 }
 0x450   :  { %3197 = vmatmul.bf16.vlgmr.msra.gmra.mxu0 %v10657_v46  ;;  %3233 = vmatmul.bf16.vlgmr.msra.gmra.mxu2 %v10657_v46 }
 0x451   :  { %3300 = vmatpush.bf16.msrb.mxu0 %v10655_v3  ;;  %v2572_v38 = vpop.f32.mrf.mxu3  ;;  %v10673_v3 = vld [vmem:[#allocation97_spill] sm:$0xff] }
 0x452   :  { %3336 = vmatpush.bf16.msrb.mxu2 %v10656_v47  ;;  %v2767_v0 = vpop.f32.mrf.mxu1 }
 0x453   :  { %v2768_v5 = vadd.f32 %v2767_v0, %v2749_v63  ;;  %v2785_v24 = vpop.f32.mrf.mxu2  ;;  %v10672_v63 = vld [vmem:[#allocation96_spill] sm:$0xff] }
 0x455   :  { %3421 = vmatpush.bf16.msra.mxu0 %v10658_v19  ;;  %v9321_v6 = vadd.f32 %v2768_v5, %v2574_v45  ;;  %v2751_v57 = vpop.f32.mrf.mxu0  ;;  %6724 = vmatmul.msk.bf16.vlgmr.msra.gmra.mxu1 %vm581_vm2, %v8944_v4  ;;  %v10664_v45 = vld [vmem:[#allocation88_spill] sm:$0xff]  ;;  %v10675_v19 = vld [vmem:[#allocation99_spill] sm:$0xff] }
 0x456   :  { %3457 = vmatpush.bf16.msra.mxu2 %v10659_v50  ;;  %6726 = vmatmul.msk.bf16.vlgmr.msra.gmra.mxu3 %vm581_vm2, %v8944_v4  ;;  %v10676_v5 = vld [vmem:[#allocation100_spill] sm:$0xff] }
 0x457   :  { %3482 = vmatpush.bf16.msra.mxu3 %v10662_v15  ;;  %3446 = vmatpush.bf16.msra.mxu1 %v10663_v41  ;;  %v10680_v15 = vld [vmem:[#allocation104_spill] sm:$0xff] }
 0x459   :  { %3422 = vmatpush.bf16.msra.mxu0 %v10660_v32  ;;  %v2803_v13 = vpop.f32.mrf.mxu3 }
 0x45a   :  { %3458 = vmatpush.bf16.msra.mxu2 %v10661_v12  ;;  %v2804_v54 = vadd.f32 %v2803_v13, %v2785_v24  ;;  %v2769_v11 = vpop.f32.mrf.mxu1  ;;  %v10677_v24 = vld [vmem:[#allocation101_spill] sm:$0xff]  ;;  %v10679_v12 = vld [vmem:[#allocation102_spill] sm:$0xff] }
 0x45b   :  { %v2770_v20 = vadd.f32 %v2769_v11, %v2751_v57  ;;  %v2787_v22 = vpop.f32.mrf.mxu2  ;;  %v10678_v57 = vld [vmem:[#allocation117_spill] sm:$0xff] }
 0x45c   :  { %v9333_v56 = vadd.f32 %v2804_v54, %v2575_v17  ;;  %v10670_v17 = vld [vmem:[#allocation94_spill] sm:$0xff]  ;;  %v10681_v11 = vld [vmem:[#allocation121_spill] sm:$0xff] }
 0x45d   :  { %3423 = vmatpush.bf16.msra.mxu0 %v10664_v45  ;;  %v9335_v4 = vadd.f32 %v2770_v20, %v2576_v34  ;;  %v2754_v9 = vpop.f32.mrf.mxu0  ;;  %v10682_v45 = vld [vmem:[#allocation108_spill] sm:$0xff]  ;;  %v10684_v20 = vld [vmem:[#allocation114_spill] sm:$0xff] }
 0x45e   :  { %3459 = vmatpush.bf16.msra.mxu2 %v10665_v7  ;;  %v10683_v7 = vld [vmem:[#allocation109_spill] sm:$0xff] }
 0x460   :  { %3202 = vmatmul.bf16.gmra.mxu0 %v10668_v53  ;;  %3238 = vmatmul.bf16.gmra.mxu2 %v10668_v53  ;;  %v10686_v53 = vld [vmem:[#allocation112_spill] sm:$0xff] }
 0x461   :  { %3424 = vmatpush.bf16.msra.mxu0 %v10666_v28  ;;  %v2805_v39 = vpop.f32.mrf.mxu3 }
 0x462   :  { %3460 = vmatpush.bf16.msra.mxu2 %v10667_v37  ;;  %v2806_v51 = vadd.f32 %v2805_v39, %v2787_v22  ;;  %v2772_v23 = vpop.f32.mrf.mxu1  ;;  %v10685_v37 = vld [vmem:[#allocation110_spill] sm:$0xff] }
 0x463   :  { %v2773_v34 = vadd.f32 %v2772_v23, %v2754_v9  ;;  %v2790_v58 = vpop.f32.mrf.mxu2 }
 0x464   :  { %v9343_v48 = vadd.f32 %v2806_v51, %v2577_v43  ;;  %v10674_v43 = vld [vmem:[#allocation98_spill] sm:$0xff] }
 0x465   :  { %3425 = vmatpush.bf16.msra.mxu0 %v10669_v55  ;;  %v9345_v33 = vadd.f32 %v2773_v34, %v2578_v62  ;;  %v2756_v42 = vpop.f32.mrf.mxu0  ;;  %6725 = vmatmul.msk.bf16.gmra.mxu1 %vm581_vm2, %v10671_v21  ;;  %v10687_v55 = vld [vmem:[#allocation116_spill] sm:$0xff]  ;;  %v10689_v34 = vld [vmem:[#allocation115_spill] sm:$0xff] }
 0x466   :  { %3461 = vmatpush.bf16.msra.mxu2 %v10670_v17  ;;  %6727 = vmatmul.msk.bf16.gmra.mxu3 %vm581_vm2, %v10671_v21  ;;  %v10688_v17 = vld [vmem:[#allocation118_spill] sm:$0xff] }
 0x467   :  { %v10690_v21 = vld [vmem:[#allocation122_spill] sm:$0xff] }
 0x469   :  { %3426 = vmatpush.bf16.msra.mxu0 %v10672_v63  ;;  %v2808_v47 = vpop.f32.mrf.mxu3 }
 0x46a   :  { %3462 = vmatpush.bf16.msra.mxu2 %v10673_v3  ;;  %v2809_v46 = vadd.f32 %v2808_v47, %v2790_v58  ;;  %v2774_v38 = vpop.f32.mrf.mxu1 }
 0x46b   :  { %v2792_v50 = vpop.f32.mrf.mxu2  ;;  %v10692_v38 = vld [vmem:[#allocation123_spill] sm:$0xff] }
 0x46c   :  { %v9355_v62 = vadd.f32 %v2809_v46, %v2579_v2  ;;  %v10691_v46 = vld [vmem:[#allocation119_spill] sm:$0xff] }
 0x46d   :  { %3427 = vmatpush.bf16.msra.mxu0 %v10674_v43  ;;  %v2894_v0 = vpop.f32.mrf.mxu0  ;;  %v10693_v43 = vld [vmem:[#allocation124_spill] sm:$0xff] }
 0x46e   :  { %3463 = vmatpush.bf16.msra.mxu2 %v10675_v19 }
 0x470   :  { %3301 = vmatmul.bf16.vlgmr.msrb.gmra.mxu0 %v10678_v57  ;;  %3337 = vmatmul.bf16.vlgmr.msrb.gmra.mxu2 %v10678_v57 }
 0x471   :  { %3428 = vmatpush.bf16.msra.mxu0 %v10676_v5  ;;  %v2810_v32 = vpop.f32.mrf.mxu3 }
 0x472   :  { %3464 = vmatpush.bf16.msra.mxu2 %v10677_v24  ;;  %v2912_v41 = vpop.f32.mrf.mxu1 }
 0x473   :  { %v2913_v13 = vadd.f32 %v2912_v41, %v2894_v0  ;;  %v2930_v54 = vpop.f32.mrf.mxu2 }
 0x475   :  { %3525 = vmatpush.bf16.msrb.mxu0 %v10679_v12  ;;  %v2896_v2 = vpop.f32.mrf.mxu0  ;;  %6728 = vmatmul.msk.bf16.vlgmr.msrb.gmra.mxu1 %vm581_vm2, %v10681_v11 }
 0x476   :  { %3561 = vmatpush.bf16.msrb.mxu2 %v10680_v15  ;;  %6730 = vmatmul.msk.bf16.vlgmr.msrb.gmra.mxu3 %vm581_vm2, %v10681_v11  ;;  %v10697_v11 = vld [vmem:[#allocation137_spill] sm:$0xff] }
 0x477   :  { %3586 = vmatpush.bf16.msrb.mxu3 %v10684_v20  ;;  %3550 = vmatpush.bf16.msrb.mxu1 %v8940_v1 }
 0x479   :  { %3526 = vmatpush.bf16.msrb.mxu0 %v10682_v45  ;;  %v2948_v22 = vpop.f32.mrf.mxu3 }
 0x47a   :  { %3562 = vmatpush.bf16.msrb.mxu2 %v10683_v7  ;;  %v2949_v9 = vadd.f32 %v2948_v22, %v2930_v54  ;;  %v2914_v28 = vpop.f32.mrf.mxu1  ;;  %v10694_v54 = vld [vmem:[#allocation135_spill] sm:$0xff] }
 0x47b   :  { %v2915_v39 = vadd.f32 %v2914_v28, %v2896_v2  ;;  %v2932_v51 = vpop.f32.mrf.mxu2  ;;  %v10700_v28 = vld [vmem:[#allocation139_spill] sm:$0xff] }
 0x47d   :  { %3527 = vmatpush.bf16.msrb.mxu0 %v10685_v37  ;;  %v2899_v23 = vpop.f32.mrf.mxu0 }
 0x47e   :  { %3563 = vmatpush.bf16.msrb.mxu2 %v10686_v53 }
 0x480   :  { %3306 = vmatmul.bf16.gmra.mxu0 %v10689_v34  ;;  %3342 = vmatmul.bf16.gmra.mxu2 %v10689_v34 }
 0x481   :  { %3528 = vmatpush.bf16.msrb.mxu0 %v10687_v55  ;;  %v2950_v58 = vpop.f32.mrf.mxu3  ;;  %v10701_v55 = vld [vmem:[#allocation127_spill] sm:$0xff] }
 0x482   :  { %3564 = vmatpush.bf16.msrb.mxu2 %v10688_v17  ;;  %v2951_v1 = vadd.f32 %v2950_v58, %v2932_v51  ;;  %v2917_v42 = vpop.f32.mrf.mxu1 }
 0x483   :  { %v2918_v63 = vadd.f32 %v2917_v42, %v2899_v23  ;;  %v2935_v3 = vpop.f32.mrf.mxu2  ;;  %v10703_v42 = vld [vmem:[#allocation126_spill] sm:$0xff] }
 0x485   :  { %3529 = vmatpush.bf16.msrb.mxu0 %v8926_v36  ;;  %v2901_v47 = vpop.f32.mrf.mxu0  ;;  %6729 = vmatmul.msk.bf16.gmra.mxu1 %vm581_vm2, %v10691_v46 }
 0x486   :  { %3565 = vmatpush.bf16.msrb.mxu2 %v10690_v21  ;;  %6731 = vmatmul.msk.bf16.gmra.mxu3 %vm581_vm2, %v10691_v46 }
 0x489   :  { %3530 = vmatpush.bf16.msrb.mxu0 %v10692_v38  ;;  %v2953_v19 = vpop.f32.mrf.mxu3 }
 0x48a   :  { %3566 = vmatpush.bf16.msrb.mxu2 %v10693_v43  ;;  %v2954_v50 = vadd.f32 %v2953_v19, %v2935_v3  ;;  %v2919_v0 = vpop.f32.mrf.mxu1  ;;  %v10704_v43 = vld [vmem:[#allocation128_spill] sm:$0xff] }
 0x48b   :  { %v2937_v36 = vpop.f32.mrf.mxu2 }
 0x48d   :  { %3531 = vmatpush.bf16.msrb.mxu0 %v8981_v49  ;;  %v2972_v5 = vpop.f32.mrf.mxu0 }
 0x48e   :  { %3567 = vmatpush.bf16.msrb.mxu2 %v8987_v8  ;;  %v2973_v24 = vadd.f32 %v2972_v5, %v2913_v13 }
 0x490   :  { %3429 = vmatmul.bf16.vlgmr.msra.gmra.mxu0 %v8985_v14  ;;  %3465 = vmatmul.bf16.vlgmr.msra.gmra.mxu2 %v8985_v14 }
 0x491   :  { %3532 = vmatpush.bf16.msrb.mxu0 %v9005_v26  ;;  %v2955_v57 = vpop.f32.mrf.mxu3 }
 0x492   :  { %3568 = vmatpush.bf16.msrb.mxu2 %v9011_v27  ;;  %v2990_v32 = vpop.f32.mrf.mxu1 }
 0x493   :  { %v9393_v49 = vadd.f32 %v2990_v32, %v2973_v24  ;;  %v3008_v8 = vpop.f32.mrf.mxu2  ;;  %v10705_v32 = vld [vmem:[#allocation132_spill] sm:$0xff] }
 0x494   :  { %v3009_v12 = vadd.f32 %v3008_v8, %v2949_v9  ;;  %v10699_v9 = vld [vmem:[#allocation129_spill] sm:$0xff] }
 0x495   :  { %3653 = vmatpush.bf16.msra.mxu0 %v9018_v30  ;;  %v2974_v15 = vpop.f32.mrf.mxu0  ;;  %6732 = vmatmul.msk.bf16.vlgmr.msra.gmra.mxu1 %vm581_vm2, %v9015_v59 }
 0x496   :  { %3689 = vmatpush.bf16.msra.mxu2 %v9022_v40  ;;  %6734 = vmatmul.msk.bf16.vlgmr.msra.gmra.mxu3 %vm581_vm2, %v9015_v59  ;;  %v2975_v26 = vadd.f32 %v2974_v15, %v2915_v39 }
 0x497   :  { %3714 = vmatpush.bf16.msra.mxu3 %v9063_v44  ;;  %3678 = vmatpush.bf16.msra.mxu1 %v9088_v61  ;;  %v10696_v44 = vld [vmem:[#allocation125_spill] sm:$0xff] }
 0x499   :  { %3654 = vmatpush.bf16.msra.mxu0 %v9036_v52  ;;  %v3026_v14 = vpop.f32.mrf.mxu3 }
 0x49a   :  { %3690 = vmatpush.bf16.msra.mxu2 %v9038_v25  ;;  %v9403_v27 = vadd.f32 %v3026_v14, %v3009_v12  ;;  %v2992_v30 = vpop.f32.mrf.mxu1  ;;  %v10695_v25 = vld [vmem:[#allocation136_spill] sm:$0xff] }
 0x49b   :  { %v9407_v40 = vadd.f32 %v2992_v30, %v2975_v26  ;;  %v3010_v59 = vpop.f32.mrf.mxu2 }
 0x49c   :  { %v3011_v41 = vadd.f32 %v3010_v59, %v2951_v1  ;;  %v10702_v1 = vld [vmem:[#allocation130_spill] sm:$0xff] }
 0x49d   :  { %3655 = vmatpush.bf16.msra.mxu0 %v9057_v35  ;;  %v2977_v13 = vpop.f32.mrf.mxu0 }
 0x49e   :  { %3691 = vmatpush.bf16.msra.mxu2 %v9059_v29  ;;  %v2978_v52 = vadd.f32 %v2977_v13, %v2918_v63  ;;  %v10698_v29 = vld [vmem:[#allocation138_spill] sm:$0xff] }
 0x49f   :  { %v10706_v13 = vld [vmem:[#allocation134_spill] sm:$0xff] }
 0x4a0   :  { %3434 = vmatmul.bf16.gmra.mxu0 %v10696_v44  ;;  %3470 = vmatmul.bf16.gmra.mxu2 %v10696_v44 }
 0x4a1   :  { %3656 = vmatpush.bf16.msra.mxu0 %v10694_v54  ;;  %v3028_v61 = vpop.f32.mrf.mxu3 }
 0x4a2   :  { %3692 = vmatpush.bf16.msra.mxu2 %v10695_v25  ;;  %v9413_v2 = vadd.f32 %v3028_v61, %v3011_v41  ;;  %v2995_v35 = vpop.f32.mrf.mxu1 }
 0x4a3   :  { %v2996_v45 = vadd.f32 %v2995_v35, %v2978_v52  ;;  %v3013_v7 = vpop.f32.mrf.mxu2 }
 0x4a4   :  { %v3014_v20 = vadd.f32 %v3013_v7, %v2954_v50 }
 0x4a5   :  { %3657 = vmatpush.bf16.msra.mxu0 %v10697_v11  ;;  %v2979_v22 = vpop.f32.mrf.mxu0  ;;  %6733 = vmatmul.msk.bf16.gmra.mxu1 %vm581_vm2, %v10699_v9  ;;  %v10707_v11 = vld [vmem:[#allocation131_spill] sm:$0xff] }
 0x4a6   :  { %3693 = vmatpush.bf16.msra.mxu2 %v10698_v29  ;;  %6735 = vmatmul.msk.bf16.gmra.mxu3 %vm581_vm2, %v10699_v9 }
 0x4a9   :  { %3658 = vmatpush.bf16.msra.mxu0 %v9094_v31  ;;  %v3031_v37 = vpop.f32.mrf.mxu3 }
 0x4aa   :  { %3694 = vmatpush.bf16.msra.mxu2 %v10700_v28  ;;  %v3032_v53 = vadd.f32 %v3031_v37, %v3014_v20  ;;  %v2997_v39 = vpop.f32.mrf.mxu1  ;;  %v10708_v28 = vld [vmem:[#allocation133_spill] sm:$0xff] }
 0x4ab   :  { %v3015_v51 = vpop.f32.mrf.mxu2 }
 0x4ad   :  { %3659 = vmatpush.bf16.msra.mxu0 %v9105_v18  ;;  %v3070_v23 = vpop.f32.mrf.mxu0 }
 0x4ae   :  { %3695 = vmatpush.bf16.msra.mxu2 %v9107_v60 }
 0x4b0   :  { %3533 = vmatmul.bf16.vlgmr.msrb.gmra.mxu0 %v10701_v55  ;;  %3569 = vmatmul.bf16.vlgmr.msrb.gmra.mxu2 %v10701_v55 }
 0x4b1   :  { %3660 = vmatpush.bf16.msra.mxu0 %v9110_v16  ;;  %v3033_v31 = vpop.f32.mrf.mxu3 }
 0x4b2   :  { %3696 = vmatpush.bf16.msra.mxu2 %v9114_v10  ;;  %v3088_v17 = vpop.f32.mrf.mxu1 }
 0x4b3   :  { %v3106_v34 = vpop.f32.mrf.mxu2  ;;  %v3089_v57 = vadd.f32 %v3088_v17, %v3070_v23 }
 0x4b5   :  { %v9429_v58 = vpop.f32.mrf.mxu0  ;;  %6736 = vmatmul.msk.bf16.vlgmr.msrb.gmra.mxu1 %vm581_vm2, %v10702_v1  ;;  %v3133_v15 = vadd.f32 %v3089_v57, %v9393_v49 }
 0x4b6   :  { %6738 = vmatmul.msk.bf16.vlgmr.msrb.gmra.mxu3 %vm581_vm2, %v10702_v1 }
 0x4b9   :  { %v3124_v60 = vpop.f32.mrf.mxu3 }
 0x4ba   :  { %v9435_v18 = vpop.f32.mrf.mxu1  ;;  %v3125_v30 = vadd.f32 %v3124_v60, %v3106_v34 }
 0x4bb   :  { %v9437_v16 = vpop.f32.mrf.mxu2 }
 0x4bc   :  { %v3134_v54 = vadd.f32 %v3125_v30, %v9403_v27 }
 0x4bd   :  { %v3075_v10 = vpop.f32.mrf.mxu0 }
 0x4c0   :  { %3538 = vmatmul.bf16.gmra.mxu0 %v10703_v42  ;;  %3574 = vmatmul.bf16.gmra.mxu2 %v10703_v42 }
 0x4c1   :  { %v9441_v21 = vpop.f32.mrf.mxu3 }
 0x4c2   :  { %v3093_v63 = vpop.f32.mrf.mxu1 }
 0x4c3   :  { %v3094_v3 = vadd.f32 %v3093_v63, %v3075_v10  ;;  %v3111_v47 = vpop.f32.mrf.mxu2 }
 0x4c5   :  { %v3137_v46 = vadd.f32 %v3094_v3, %v2996_v45  ;;  %v3077_v38 = vpop.f32.mrf.mxu0  ;;  %6737 = vmatmul.msk.bf16.gmra.mxu1 %vm581_vm2, %v10704_v43 }
 0x4c6   :  { %6739 = vmatmul.msk.bf16.gmra.mxu3 %vm581_vm2, %v10704_v43 }
 0x4c9   :  { %v3129_v19 = vpop.f32.mrf.mxu3 }
 0x4ca   :  { %v3130_v50 = vadd.f32 %v3129_v19, %v3111_v47  ;;  %v3095_v0 = vpop.f32.mrf.mxu1 }
 0x4cb   :  { %v3113_v5 = vpop.f32.mrf.mxu2 }
 0x4cc   :  { %v3138_v36 = vadd.f32 %v3130_v50, %v3032_v53 }
 0x4cd   :  { %v3198_v24 = vpop.f32.mrf.mxu0 }
 0x4d0   :  { %3661 = vmatmul.bf16.vlgmr.msra.gmra.mxu0 %v10705_v32  ;;  %3697 = vmatmul.bf16.vlgmr.msra.gmra.mxu2 %v10705_v32 }
 0x4d1   :  { %v3131_v8 = vpop.f32.mrf.mxu3 }
 0x4d2   :  { %v3216_v12 = vpop.f32.mrf.mxu1 }
 0x4d3   :  { %v3217_v26 = vadd.f32 %v3216_v12, %v3198_v24  ;;  %v3234_v14 = vpop.f32.mrf.mxu2 }
 0x4d5   :  { %v3261_v59 = vadd.f32 %v3217_v26, %v3133_v15  ;;  %v9450_v41 = vpop.f32.mrf.mxu0  ;;  %6740 = vmatmul.msk.bf16.vlgmr.msra.gmra.mxu1 %vm581_vm2, %v10706_v13 }
 0x4d6   :  { %6742 = vmatmul.msk.bf16.vlgmr.msra.gmra.mxu3 %vm581_vm2, %v10706_v13 }
 0x4d9   :  { %v3252_v52 = vpop.f32.mrf.mxu3 }
 0x4da   :  { %v3253_v25 = vadd.f32 %v3252_v52, %v3234_v14  ;;  %v9457_v44 = vpop.f32.mrf.mxu1 }
 0x4db   :  { %v9459_v49 = vpop.f32.mrf.mxu2 }
 0x4dc   :  { %v3262_v61 = vadd.f32 %v3253_v25, %v3134_v54 }
 0x4dd   :  { %v3203_v35 = vpop.f32.mrf.mxu0 }
 0x4e0   :  { %3666 = vmatmul.bf16.gmra.mxu0 %v10707_v11  ;;  %3702 = vmatmul.bf16.gmra.mxu2 %v10707_v11 }
 0x4e1   :  { %v9463_v29 = vpop.f32.mrf.mxu3 }
 0x4e2   :  { %v3221_v45 = vpop.f32.mrf.mxu1 }
 0x4e3   :  { %v3222_v7 = vadd.f32 %v3221_v45, %v3203_v35  ;;  %v3239_v20 = vpop.f32.mrf.mxu2 }
 0x4e5   :  { %v3265_v22 = vadd.f32 %v3222_v7, %v3137_v46  ;;  %v3205_v9 = vpop.f32.mrf.mxu0  ;;  %6741 = vmatmul.msk.bf16.gmra.mxu1 %vm581_vm2, %v10708_v28 }
 0x4e6   :  { %6743 = vmatmul.msk.bf16.gmra.mxu3 %vm581_vm2, %v10708_v28 }
 0x4e9   :  { %v3257_v27 = vpop.f32.mrf.mxu3 }
 0x4ea   :  { %v3258_v37 = vadd.f32 %v3257_v27, %v3239_v20  ;;  %v3223_v53 = vpop.f32.mrf.mxu1 }
 0x4eb   :  { %v3241_v51 = vpop.f32.mrf.mxu2 }
 0x4ec   :  { %v3266_v39 = vadd.f32 %v3258_v37, %v3138_v36 }
 0x4ed   :  { %v3302_v23 = vpop.f32.mrf.mxu0 }
 0x4f1   :  { %v3259_v55 = vpop.f32.mrf.mxu3 }
 0x4f2   :  { %v3320_v31 = vpop.f32.mrf.mxu1 }
 0x4f3   :  { %v3321_v17 = vadd.f32 %v3320_v31, %v3302_v23  ;;  %v3338_v34 = vpop.f32.mrf.mxu2 }
 0x4f5   :  { %v3365_v1 = vadd.f32 %v3321_v17, %v3261_v59  ;;  %v9469_v60 = vpop.f32.mrf.mxu0 }
 0x4f9   :  { %v3356_v10 = vpop.f32.mrf.mxu3 }
 0x4fa   :  { %v3357_v42 = vadd.f32 %v3356_v10, %v3338_v34  ;;  %v9471_v63 = vpop.f32.mrf.mxu1 }
 0x4fb   :  { %v9473_v47 = vpop.f32.mrf.mxu2 }
 0x4fc   :  { %v3366_v3 = vadd.f32 %v3357_v42, %v3262_v61 }
 0x4fd   :  { %v3307_v46 = vpop.f32.mrf.mxu0 }
 0x501   :  { %v9475_v38 = vpop.f32.mrf.mxu3 }
 0x502   :  { %v3325_v43 = vpop.f32.mrf.mxu1 }
 0x503   :  { %v3326_v19 = vadd.f32 %v3325_v43, %v3307_v46  ;;  %v3343_v50 = vpop.f32.mrf.mxu2 }
 0x505   :  { %v3369_v0 = vadd.f32 %v3326_v19, %v3265_v22  ;;  %v3309_v36 = vpop.f32.mrf.mxu0 }
 0x509   :  { %v3361_v5 = vpop.f32.mrf.mxu3 }
 0x50a   :  { %v3362_v24 = vadd.f32 %v3361_v5, %v3343_v50  ;;  %v3327_v57 = vpop.f32.mrf.mxu1  ;;  %v3849_v50 = vld [vmem:[%s10284_s12 + $0x78] sm:$0xff]  ;;  %v3847_v5 = vld [vmem:[%s10284_s12 + $0x68] sm:$0xff] }
 0x50b   :  { %v3345_v8 = vpop.f32.mrf.mxu2  ;;  %3861 = vmatpush.msrb.mxu0 %v3849_v50  ;;  %3904 = vmatpush.msrb.mxu2 %v3849_v50 }
 0x50c   :  { %v3370_v32 = vadd.f32 %v3362_v24, %v3266_v39  ;;  %v1037_v8 = vld [vmem:[%s10281_s9] sm:$0x3] }
 0x50d   :  { %v3430_v12 = vpop.f32.mrf.mxu0 }
 0x511   :  { %v3363_v15 = vpop.f32.mrf.mxu3 }
 0x512   :  { %v3448_v26 = vpop.f32.mrf.mxu1 }
 0x513   :  { %v3449_v14 = vadd.f32 %v3448_v26, %v3430_v12  ;;  %v3466_v30 = vpop.f32.mrf.mxu2  ;;  %v9528_v26 = vperm.slane %v1037_v8, 0 }
 0x515   :  { %v9477_v59 = vadd.f32 %v3449_v14, %v3365_v1  ;;  %v9479_v13 = vpop.f32.mrf.mxu0  ;;  %v9530_v14 = vperm.slane %v1037_v8, 1 }
 0x519   :  { %v3484_v52 = vpop.f32.mrf.mxu3 }
 0x51a   :  { %v3485_v54 = vadd.f32 %v3484_v52, %v3466_v30  ;;  %v9481_v25 = vpop.f32.mrf.mxu1  ;;  %v3091_v30 = vadd.f32 %v9435_v18, %v9429_v58  ;;  %v9536_v52 = vadd.f32 %v9528_v26, %v9335_v4  ;;  %v3323_v58 = vadd.f32 %v9471_v63, %v9469_v60  ;;  %v3845_v18 = vld [vmem:[%s10284_s12 + $0x58] sm:$0xff] }
 0x51b   :  { %v9485_v35 = vpop.f32.mrf.mxu2  ;;  %v3127_v60 = vadd.f32 %v9441_v21, %v9437_v16  ;;  %v3255_v21 = vadd.f32 %v9463_v29, %v9459_v49  ;;  %v3359_v49 = vadd.f32 %v9475_v38, %v9473_v47 }
 0x51c   :  { %v9483_v61 = vadd.f32 %v3485_v54, %v3366_v3 }
 0x51d   :  { %v3435_v11 = vpop.f32.mrf.mxu0 }
 0x521   :  { %v9487_v45 = vpop.f32.mrf.mxu3 }
 0x522   :  { %v3453_v7 = vpop.f32.mrf.mxu1  ;;  %v3487_v8 = vadd.f32 %v9487_v45, %v9485_v35 }
 0x523   :  { %v3454_v20 = vadd.f32 %v3453_v7, %v3435_v11  ;;  %v3471_v22 = vpop.f32.mrf.mxu2  ;;  %v3219_v11 = vadd.f32 %v9457_v44, %v9450_v41  ;;  %v9542_v7 = vadd.f32 %v9528_v26, %v9321_v6  ;;  %v3844_v6 = vld [vmem:[%s10284_s12 + $0x50] sm:$0xff]  ;;  %v3761_v41 = vmul.f32 %v9536_v52, %v9536_v52  ;;  %v3857_v44 = vld [vmem:[%s10284_s12 + $0xb8] sm:$0xff] }
 0x524   :  { %3932 = vmatpush.msrb.mxu3 %v3857_v44  ;;  %3889 = vmatpush.msrb.mxu1 %v3857_v44  ;;  %v3855_v44 = vld [vmem:[%s10284_s12 + $0xa8] sm:$0xff] }
 0x525   :  { %v9489_v9 = vadd.f32 %v3454_v20, %v3369_v0  ;;  %v3437_v28 = vpop.f32.mrf.mxu0  ;;  %v3848_v0 = vld [vmem:[%s10284_s12 + $0x70] sm:$0xff]  ;;  %v9546_v20 = vadd.f32 %v9530_v14, %v9333_v56  ;;  %v9561_v56 = vadd.f32 %v9530_v14, %v9343_v48  ;;  %v3843_v48 = vld [vmem:[%s10284_s12 + $0x48] sm:$0xff]  ;;  %v3737_v16 = vadd.f32 %v9536_v52, %v9542_v7 }
 0x526   :  { %3862 = vmatpush.msrb.mxu0 %v3848_v0  ;;  %3905 = vmatpush.msrb.mxu2 %v3848_v0  ;;  %v3135_v28 = vadd.f32 %v3091_v30, %v9407_v40  ;;  %v9565_v40 = vadd.f32 %v9528_v26, %v9345_v33  ;;  %v3759_v33 = vmul.f32 %v9542_v7, %v9542_v7 }
 0x527   :  { %v3746_v47 = vsel %vm3745_vm0, %v9546_v20, 0.0 }
 0x528   :  { %3863 = vmatpush.msrb.mxu0 %v3847_v5  ;;  %3906 = vmatpush.msrb.mxu2 %v3847_v5  ;;  %v3263_v63 = vadd.f32 %v3219_v11, %v3135_v28  ;;  %v3136_v5 = vadd.f32 %v3127_v60, %v9413_v2 }
 0x529   :  { %v3489_v27 = vpop.f32.mrf.mxu3 }
 0x52a   :  { %v3490_v37 = vadd.f32 %v3489_v27, %v3471_v22  ;;  %v3455_v53 = vpop.f32.mrf.mxu1  ;;  %v3451_v27 = vadd.f32 %v9481_v25, %v9479_v13  ;;  %v3367_v13 = vadd.f32 %v3323_v58, %v3263_v63 }
 0x52b   :  { %v3473_v51 = vpop.f32.mrf.mxu2  ;;  %v3760_v53 = vmul.f32 %v9546_v20, %v9546_v20 }
 0x52c   :  { %v9491_v39 = vadd.f32 %v3490_v37, %v3370_v32  ;;  %v3846_v32 = vld [vmem:[%s10284_s12 + $0x60] sm:$0xff]  ;;  %v3765_v51 = vadd.f32 %v3761_v41, %v3759_v33  ;;  %v3495_v29 = vadd.f32 %v3451_v27, %v3367_v13 }
 0x52d   :  { %v9493_v23 = vpop.f32.mrf.mxu0  ;;  %3864 = vmatpush.msrb.mxu0 %v3846_v32  ;;  %3907 = vmatpush.msrb.mxu2 %v3846_v32  ;;  %v3264_v32 = vadd.f32 %v3255_v21, %v3136_v5  ;;  %v3842_v41 = vld [vmem:[%s10284_s12 + $0x40] sm:$0xff] }
 0x52f   :  { %3865 = vmatpush.msrb.mxu0 %v3845_v18  ;;  %3908 = vmatpush.msrb.mxu2 %v3845_v18 }
 0x531   :  { %v3491_v55 = vpop.f32.mrf.mxu3  ;;  %3866 = vmatpush.msrb.mxu0 %v3844_v6  ;;  %3909 = vmatpush.msrb.mxu2 %v3844_v6 }
 0x532   :  { %v9495_v31 = vpop.f32.mrf.mxu1  ;;  %v3762_v55 = vmul.f32 %v9561_v56, %v9561_v56 }
 0x533   :  { %v9497_v17 = vpop.f32.mrf.mxu2  ;;  %v3553_v50 = vadd.f32 %v9495_v31, %v9493_v23  ;;  %3867 = vmatpush.msrb.mxu0 %v3843_v48  ;;  %3910 = vmatpush.msrb.mxu2 %v3843_v48  ;;  %v9599_v23 = vadd.f32 %v9530_v14, %v9355_v62  ;;  %v3840_v48 = vld [vmem:[%s10284_s12 + $0x30] sm:$0xff] }
 0x534   :  { %v3774_v38 = vsel %vm3745_vm0, %v3762_v55, 0.0 }
 0x535   :  { %v3536_v34 = vpop.f32.mrf.mxu0  ;;  %3868 = vmatpush.msrb.mxu0 %v3842_v41  ;;  %3911 = vmatpush.msrb.mxu2 %v3842_v41 }
 0x539   :  { %v9499_v1 = vpop.f32.mrf.mxu3 }
 0x53a   :  { %v3554_v10 = vpop.f32.mrf.mxu1  ;;  %v3589_v62 = vadd.f32 %v9499_v1, %v9497_v17  ;;  %v3856_v17 = vld [vmem:[%s10284_s12 + $0xb0] sm:$0xff]  ;;  %v3773_v1 = vsel %vm3745_vm0, %v3760_v53, 0.0 }
 0x53b   :  { %v9501_v42 = vpop.f32.mrf.mxu2  ;;  %v3555_v25 = vadd.f32 %v3554_v10, %v3536_v34  ;;  %v3747_v34 = vsel %vm3745_vm0, %v9561_v56, 0.0  ;;  %v3738_v10 = vadd.f32 %v3737_v16, %v9565_v40  ;;  %v3775_v60 = vadd.f32 %v3774_v38, %v3773_v1  ;;  %3933 = vmatpush.msrb.mxu3 %v3856_v17  ;;  %3890 = vmatpush.msrb.mxu1 %v3856_v17  ;;  %v3835_v1 = vld [vmem:[%s10284_s12 + $0x8] sm:$0xff] }
 0x53c   :  { %v3748_v45 = vadd.f32 %v3747_v34, %v3746_v47  ;;  %v3598_v63 = vadd.f32 %v3589_v62, %v9483_v61  ;;  %v3854_v61 = vld [vmem:[%s10284_s12 + $0xa0] sm:$0xff]  ;;  %v3851_v62 = vld [vmem:[%s10284_s12 + $0x88] sm:$0xff] }
 0x53d   :  { %v9503_v3 = vpop.f32.mrf.mxu0  ;;  %v3599_v2 = vadd.f32 %v3555_v25, %v3495_v29  ;;  %v3739_v58 = vrot.slane %v3738_v10, 4  ;;  %3934 = vmatpush.msrb.mxu3 %v3855_v44  ;;  %3891 = vmatpush.msrb.mxu1 %v3855_v44 }
 0x53f   :  { %v9640_v16 = vadd.f32 %v3739_v58, %v3738_v10  ;;  %3935 = vmatpush.msrb.mxu3 %v3854_v61  ;;  %3892 = vmatpush.msrb.mxu1 %v3854_v61 }
 0x541   :  { %v9505_v46 = vpop.f32.mrf.mxu3  ;;  %v3741_v47 = vrot.slane %v9640_v16, 2 }
 0x542   :  { %v9507_v43 = vpop.f32.mrf.mxu1 }
 0x543   :  { %v9509_v19 = vpop.f32.mrf.mxu2 }
 0x545   :  { %v3541_v36 = vpop.f32.mrf.mxu0 }
 0x546   :  { %v3763_v36 = vmul.f32 %v9565_v40, %v9565_v40 }
 0x548   :  { %v3766_v11 = vadd.f32 %v3765_v51, %v3763_v36  ;;  %v3839_v51 = vld [vmem:[%s10284_s12 + $0x28] sm:$0xff] }
 0x549   :  { %v9520_v24 = vpop.f32.mrf.mxu3 }
 0x54a   :  { %v3559_v57 = vpop.f32.mrf.mxu1  ;;  %v3594_v34 = vadd.f32 %v9520_v24, %v9509_v19  ;;  %v3852_v19 = vld [vmem:[%s10284_s12 + $0x90] sm:$0xff] }
 0x54b   :  { %v3577_v12 = vpop.f32.mrf.mxu2 }
 0x54d   :  { %v3662_v15 = vpop.f32.mrf.mxu0 }
 0x551   :  { %v3595_v54 = vpop.f32.mrf.mxu3 }
 0x552   :  { %v3680_v22 = vpop.f32.mrf.mxu1  ;;  %v3597_v54 = vadd.f32 %v3553_v50, %v9477_v59  ;;  %v3841_v59 = vld [vmem:[%s10284_s12 + $0x38] sm:$0xff] }
 0x553   :  { %v3698_v4 = vpop.f32.mrf.mxu2  ;;  %v3681_v31 = vadd.f32 %v3680_v22, %v3662_v15  ;;  %v3368_v15 = vadd.f32 %v3359_v49, %v3264_v32  ;;  %v3591_v22 = vadd.f32 %v9505_v46, %v9501_v42  ;;  %v3764_v42 = vmul.f32 %v9599_v23, %v9599_v23  ;;  %3869 = vmatpush.msrb.mxu0 %v3841_v59  ;;  %v3853_v49 = vld [vmem:[%s10284_s12 + $0x98] sm:$0xff] }
 0x554   :  { %3912 = vmatpush.msrb.mxu2 %v3841_v59  ;;  %3936 = vmatpush.msrb.mxu3 %v3853_v49 }
 0x555   :  { %v3664_v37 = vpop.f32.mrf.mxu0  ;;  %v3725_v18 = vadd.f32 %v3681_v31, %v3597_v54  ;;  %v3496_v46 = vadd.f32 %v3487_v8, %v3368_v15  ;;  %v3776_v55 = vsel %vm3745_vm0, %v3764_v42, 0.0  ;;  %3870 = vmatpush.msrb.mxu0 %v3840_v48  ;;  %3893 = vmatpush.msrb.mxu1 %v3853_v49  ;;  %v3602_v15 = vadd.f32 %v3594_v34, %v9491_v39  ;;  %v3850_v39 = vld [vmem:[%s10284_s12 + $0x80] sm:$0xff] }
 0x556   :  { %3913 = vmatpush.msrb.mxu2 %v3840_v48  ;;  %v3777_v24 = vadd.f32 %v3776_v55, %v3775_v60  ;;  %3937 = vmatpush.msrb.mxu3 %v3852_v19 }
 0x557   :  { %v3600_v33 = vadd.f32 %v3591_v22, %v3496_v46  ;;  %v9643_v21 = vadd.f32 %v3725_v18, %v9528_v26  ;;  %3871 = vmatpush.msrb.mxu0 %v3839_v51  ;;  %3894 = vmatpush.msrb.mxu1 %v3852_v19 }
 0x558   :  { %3914 = vmatpush.msrb.mxu2 %v3839_v51  ;;  %v3778_v41 = vrot.slane %v3777_v24, 4  ;;  %3938 = vmatpush.msrb.mxu3 %v3851_v62 }
 0x559   :  { %v3716_v0 = vpop.f32.mrf.mxu3  ;;  %3895 = vmatpush.msrb.mxu1 %v3851_v62 }
 0x55a   :  { %v3682_v57 = vpop.f32.mrf.mxu1  ;;  %v3717_v6 = vadd.f32 %v3716_v0, %v3698_v4  ;;  %v3558_v4 = vadd.f32 %v9507_v43, %v9503_v3  ;;  %v3767_v3 = vrot.slane %v3766_v11, 4  ;;  %v3749_v43 = vsel %vm3745_vm0, %v9599_v23, 0.0  ;;  %3939 = vmatpush.msrb.mxu3 %v3850_v39 }
 0x55b   :  { %v3683_v12 = vadd.f32 %v3682_v57, %v3664_v37  ;;  %v3700_v30 = vpop.f32.mrf.mxu2  ;;  %v3750_v29 = vadd.f32 %v3749_v43, %v3748_v45  ;;  %v3836_v45 = vld [vmem:[%s10284_s12 + $0x10] sm:$0xff]  ;;  %3896 = vmatpush.msrb.mxu1 %v3850_v39 }
 0x55c   :  { %v3726_v13 = vadd.f32 %v3717_v6, %v3598_v63  ;;  %v3601_v50 = vadd.f32 %v3558_v4, %v9489_v9  ;;  %v3838_v9 = vld [vmem:[%s10284_s12 + $0x20] sm:$0xff]  ;;  %v3768_v31 = vadd.f32 %v3767_v3, %v3766_v11  ;;  %v3742_v63 = vadd.f32 %v3741_v47, %v9640_v16 }
 0x55d   :  { %v3727_v28 = vadd.f32 %v3683_v12, %v3599_v2  ;;  %v3667_v35 = vpop.f32.mrf.mxu0  ;;  %v3807_v2 = vmul.f32 %v9643_v21, %v9643_v21  ;;  %3872 = vmatpush.msrb.mxu0 %v3838_v9  ;;  %3915 = vmatpush.msrb.mxu2 %v3838_v9  ;;  %v3751_v11 = vrot.slane %v3750_v29, 4  ;;  %v3834_v3 = vld [vmem:[%s10284_s12] sm:$0xff] }
 0x55e   :  { %v9669_v12 = vadd.f32 %v3726_v13, %v9530_v14  ;;  %v3769_v6 = vrot.slane %v3768_v31, 2  ;;  %v3779_v13 = vadd.f32 %v3778_v41, %v3777_v24  ;;  %v3743_v34 = vrot.slane %v3742_v63, 1 }
 0x55f   :  { %v9630_v27 = vadd.f32 %v3727_v28, %v9528_v26 }
 0x560   :  { %v3808_v59 = vmul.f32 %v9669_v12, %v9669_v12  ;;  %v3794_v48 = vsel %vm3745_vm0, %v9669_v12, 0.0  ;;  %v3770_v16 = vadd.f32 %v3769_v6, %v3768_v31 }
 0x561   :  { %v3718_v37 = vpop.f32.mrf.mxu3  ;;  %v3809_v10 = vmul.f32 %v9630_v27, %v9630_v27  ;;  %v3786_v38 = vadd.f32 %v9630_v27, %v9643_v21 }
 0x562   :  { %v3719_v53 = vadd.f32 %v3718_v37, %v3700_v30  ;;  %v3685_v25 = vpop.f32.mrf.mxu1  ;;  %v3837_v30 = vld [vmem:[%s10284_s12 + $0x18] sm:$0xff]  ;;  %v3752_v37 = vadd.f32 %v3751_v11, %v3750_v29  ;;  %v3744_v11 = vadd.f32 %v3743_v34, %v3742_v63 }
 0x563   :  { %v3686_v36 = vadd.f32 %v3685_v25, %v3667_v35  ;;  %v3703_v5 = vpop.f32.mrf.mxu2  ;;  %v3813_v22 = vadd.f32 %v3809_v10, %v3807_v2  ;;  %3873 = vmatpush.msrb.mxu0 %v3837_v30  ;;  %3916 = vmatpush.msrb.mxu2 %v3837_v30  ;;  %v3821_v25 = vsel %vm3745_vm0, %v3808_v59, 0.0  ;;  %v3771_v30 = vrot.slane %v3770_v16, 1 }
 0x564   :  { %v3728_v0 = vadd.f32 %v3719_v53, %v3600_v33 }
 0x565   :  { %v3729_v32 = vadd.f32 %v3686_v36, %v3601_v50  ;;  %v3669_v8 = vpop.f32.mrf.mxu0  ;;  %3874 = vmatpush.msrb.mxu0 %v3836_v45  ;;  %3917 = vmatpush.msrb.mxu2 %v3836_v45 }
 0x566   :  { %v9661_v57 = vadd.f32 %v3728_v0, %v9530_v14 }
 0x567   :  { %v9678_v54 = vadd.f32 %v3729_v32, %v9528_v26  ;;  %3875 = vmatpush.msrb.mxu0 %v3835_v1  ;;  %3918 = vmatpush.msrb.mxu2 %v3835_v1  ;;  %v3780_v32 = vrot.slane %v3779_v13, 2 }
 0x568   :  { %v3810_v28 = vmul.f32 %v9661_v57, %v9661_v57  ;;  %v3795_v42 = vsel %vm3745_vm0, %v9661_v57, 0.0 }
 0x569   :  { %v3721_v35 = vpop.f32.mrf.mxu3  ;;  %v3787_v26 = vadd.f32 %v3786_v38, %v9678_v54  ;;  %v3811_v58 = vmul.f32 %v9678_v54, %v9678_v54  ;;  %v3796_v51 = vadd.f32 %v3795_v42, %v3794_v48  ;;  %3876 = vmatpush.msrb.mxu0 %v3834_v3  ;;  %3919 = vmatpush.msrb.mxu2 %v3834_v3 }
 0x56a   :  { %v3722_v18 = vadd.f32 %v3721_v35, %v3703_v5  ;;  %v3687_v17 = vpop.f32.mrf.mxu1  ;;  %v3822_v43 = vsel %vm3745_vm0, %v3810_v28, 0.0  ;;  %v3753_v5 = vrot.slane %v3752_v37, 2  ;;  %v3781_v28 = vadd.f32 %v3780_v32, %v3779_v13  ;;  %v3966_v13 = vld [vmem:[%s10285_s13 + $0x8] sm:$0xff] }
 0x56b   :  { %v3788_v46 = vrot.slane %v3787_v26, 4  ;;  %v3814_v4 = vadd.f32 %v3813_v22, %v3811_v58  ;;  %v3705_v60 = vpop.f32.mrf.mxu2  ;;  %v3772_v58 = vadd.f32 %v3771_v30, %v3770_v16  ;;  %v3965_v16 = vld [vmem:[%s10285_s13] sm:$0xff]  ;;  %4006 = vmatpush.msra.mxu1 %v3966_v13  ;;  %4049 = vmatpush.msra.mxu3 %v3966_v13 }
 0x56c   :  { %v3730_v44 = vadd.f32 %v3722_v18, %v3602_v15  ;;  %v3754_v47 = vadd.f32 %v3753_v5, %v3752_v37  ;;  %v3782_v17 = vrot.slane %v3781_v28, 1  ;;  %3986 = vmatpush.msra.mxu0 %v3965_v16  ;;  %4029 = vmatpush.msra.mxu2 %v3965_v16 }
 0x56d   :  { %v3789_v33 = vadd.f32 %v3788_v46, %v3787_v26  ;;  %v3815_v53 = vrot.slane %v3814_v4, 4 }
 0x56e   :  { %v9710_v61 = vadd.f32 %v3730_v44, %v9530_v14  ;;  %v3823_v14 = vadd.f32 %v3822_v43, %v3821_v25  ;;  %v3755_v39 = vrot.slane %v3754_v47, 1  ;;  %v3783_v60 = vadd.f32 %v3782_v17, %v3781_v28 }
 0x56f   :  { %v3790_v55 = vrot.slane %v3789_v33, 2  ;;  %v3816_v50 = vadd.f32 %v3815_v53, %v3814_v4 }
 0x570   :  { %v3797_v0 = vsel %vm3745_vm0, %v9710_v61, 0.0  ;;  %v3812_v36 = vmul.f32 %v9710_v61, %v9710_v61  ;;  %v3756_v46 = vadd.f32 %v3755_v39, %v3754_v47 }
 0x571   :  { %v3798_v49 = vadd.f32 %v3797_v0, %v3796_v51  ;;  %v3723_v29 = vpop.f32.mrf.mxu3  ;;  %v3791_v10 = vadd.f32 %v3790_v55, %v3789_v33  ;;  %v3817_v9 = vrot.slane %v3816_v50, 2 }
 0x572   :  { %v3824_v31 = vsel %vm3745_vm0, %v3812_v36, 0.0 }
 0x573   :  { %v3799_v8 = vrot.slane %v3798_v49, 4  ;;  %v3825_v19 = vadd.f32 %v3824_v31, %v3823_v14  ;;  %v3792_v24 = vrot.slane %v3791_v10, 1  ;;  %v3818_v2 = vadd.f32 %v3817_v9, %v3816_v50  ;;  %v3949_v31 = vld [vmem:[%s10282_s10] sm:$0x1] }
 0x575   :  { %v3800_v38 = vadd.f32 %v3799_v8, %v3798_v49  ;;  %v3826_v62 = vrot.slane %v3825_v19, 4  ;;  %v3793_v15 = vadd.f32 %v3792_v24, %v3791_v10  ;;  %v3819_v22 = vrot.slane %v3818_v2, 1  ;;  %v3962_v24 = vld [vmem:[%s10283_s11] sm:$0x1] }
 0x577   :  { %v3801_v35 = vrot.slane %v3800_v38, 2  ;;  %v3827_v45 = vadd.f32 %v3826_v62, %v3825_v19  ;;  %v3805_v26 = vadd.f32 %v3793_v15, %v3744_v11  ;;  %v3820_v18 = vadd.f32 %v3819_v22, %v3818_v2 }
 0x579   :  { %v3802_v6 = vadd.f32 %v3801_v35, %v3800_v38  ;;  %v3828_v41 = vrot.slane %v3827_v45, 2  ;;  %3877 = vmatmul.f32.vlgmr.msrb.gmra.mxu0 %v3805_v26  ;;  %v3832_v59 = vadd.f32 %v3820_v18, %v3772_v58 }
 0x57b   :  { %v3803_v1 = vrot.slane %v3802_v6, 1  ;;  %v3829_v42 = vadd.f32 %v3828_v41, %v3827_v45  ;;  %3920 = vmatmul.f32.vlgmr.msrb.gmra.mxu2 %v3832_v59 }
 0x57d   :  { %v3804_v4 = vadd.f32 %v3803_v1, %v3802_v6  ;;  %v3830_v44 = vrot.slane %v3829_v42, 1 }
 0x57f   :  { %v3831_v63 = vadd.f32 %v3830_v44, %v3829_v42  ;;  %v3806_v37 = vadd.f32 %v3804_v4, %v3756_v46 }
 0x581   :  { %6744 = vmatmul.msk.f32.vlgmr.msrb.gmra.mxu1 %vm3745_vm0, %v3806_v37  ;;  %v3833_v48 = vadd.f32 %v3831_v63, %v3783_v60 }
 0x583   :  { %6745 = vmatmul.msk.f32.vlgmr.msrb.gmra.mxu3 %vm3745_vm0, %v3833_v48 }
 0x5f6   :  { %v3878_v43 = vpop.f32.mrf.mxu0 }
 0x5fe   :  { %v3898_v3 = vpop.f32.mrf.mxu1  ;;  %v3921_v25 = vpop.f32.mrf.mxu2 }
 0x5ff   :  { %v3899_v33 = vadd.f32 %v3898_v3, %v3878_v43 }
 0x601   :  { %v3944_v53 = vmul.f32 0.00086805556, %v3899_v33 }
 0x603   :  { %v3946_v50 = vmul.f32 %v3944_v53, %v3944_v53 }
 0x606   :  { %v3941_v51 = vpop.f32.mrf.mxu3 }
 0x607   :  { %v3942_v55 = vadd.f32 %v3941_v51, %v3921_v25 }
 0x609   :  { %v3945_v0 = vmul.f32 0.00086805556, %v3942_v55 }
 0x60b   :  { %v3947_v36 = vsub.f32 %v3945_v0, %v3946_v50 }
 0x60d   :  { %v3948_v5 = vmax.f32 %v3947_v36, 0.0 }
 0x60f   :  { %v3950_v14 = vadd.f32 1e-05, %v3948_v5 }
 0x611   :  { %7483 = vrsqrt.f32 %v3950_v14  ;;  %vm3957_vm2 = vweird.f32 %v3950_v14 }
 0x617   :  { %v7484_v49 = vpop.eup %7483 }
 0x618   :  { %v3952_v29 = vmul.f32 %v7484_v49, %v3950_v14  ;;  %vm3958_vm1 = vweird.f32 %v7484_v49 }
 0x619   :  { %vm3959_vm3 = vmor %vm3957_vm2, %vm3958_vm1 }
 0x61a   :  { %v3953_v34 = vmul.f32 %v7484_v49, %v3952_v29 }
 0x61c   :  { %v3954_v10 = vmul.f32 0.5, %v3953_v34 }
 0x61e   :  { %v3955_v9 = vsub.f32 1.5, %v3954_v10  ;;  %v7401_v10 = vld [vmem:[%s10286_s14] sm:$0xff] }
 0x620   :  { %v3956_v32 = vmul.f32 %v7484_v49, %v3955_v9 }
 0x622   :  { %v3960_v8 = vsel %vm3959_vm3, %v7484_v49, %v3956_v32  ;;  %v7411_v32 = vld [vmem:[%s10287_s15 + $0x38] sm:$0xff] }
 0x623   :  { %v3961_v19 = vmul.f32 %v3960_v8, %v3949_v31  ;;  %v7402_v31 = vld [vmem:[%s10286_s14 + $0x8] sm:$0xff]  ;;  %v7415_v8 = vld [vmem:[%s10287_s15 + $0x58] sm:$0xff] }
 0x625   :  { %v3963_v2 = vmul.f32 %v3961_v19, %v3944_v53  ;;  %6746 = vmatmul.msk.f32.vlgmr.msra.gmra.mxu0 %vm3967_vm4, %v3961_v19  ;;  %6747 = vmatmul.msk.f32.vlgmr.msra.gmra.mxu1 %vm3967_vm4, %v3961_v19  ;;  %v7423_v19 = vld [vmem:[%s10287_s15 + $0x98] sm:$0xff] }
 0x627   :  { %v3964_v30 = vsub.f32 %v3962_v24, %v3963_v2  ;;  %v7427_v24 = vld [vmem:[%s10287_s15 + $0xb8] sm:$0xff]  ;;  %v7410_v2 = vld [vmem:[%s10287_s15 + $0x30] sm:$0xff] }
 0x629   :  { %6748 = vmatmul.msk.f32.vlgmr.msra.gmra.mxu2 %vm3967_vm4, %v3964_v30  ;;  %6749 = vmatmul.msk.f32.vlgmr.msra.gmra.mxu3 %vm3967_vm4, %v3964_v30  ;;  %v7414_v30 = vld [vmem:[%s10287_s15 + $0x50] sm:$0xff] }
 0x6a2   :  { %v3988_v47 = vpop.f32.mrf.mxu0  ;;  %v4008_v38 = vpop.f32.mrf.mxu1 }
 0x6a3   :  { %v4054_v62 = vperm.slane %v3988_v47, 0  ;;  %v4055_v11 = vperm.slane %v4008_v38, 0  ;;  %v7422_v47 = vld [vmem:[%s10287_s15 + $0x90] sm:$0xff] }
 0x6a4   :  { %v7426_v38 = vld [vmem:[%s10287_s15 + $0xb0] sm:$0xff] }
 0x6a5   :  { %v4060_v28 = vmul.f32 %v4054_v62, %v9565_v40  ;;  %v4061_v35 = vmul.f32 %v4055_v11, %v9599_v23  ;;  %v4080_v45 = vmul.f32 %v4054_v62, %v9678_v54  ;;  %v4081_v26 = vmul.f32 %v4055_v11, %v9710_v61 }
 0x6a6   :  { %v4056_v39 = vmul.f32 %v4054_v62, %v9542_v7  ;;  %v4058_v6 = vmul.f32 %v4054_v62, %v9536_v52  ;;  %v4057_v41 = vmul.f32 %v4055_v11, %v9546_v20  ;;  %v4059_v59 = vmul.f32 %v4055_v11, %v9561_v56 }
 0x6a7   :  { %v4076_v17 = vmul.f32 %v4054_v62, %v9643_v21  ;;  %v4078_v40 = vmul.f32 %v4054_v62, %v9630_v27  ;;  %v4077_v56 = vmul.f32 %v4055_v11, %v9669_v12  ;;  %v4079_v21 = vmul.f32 %v4055_v11, %v9661_v57  ;;  %v7409_v62 = vld [vmem:[%s10287_s15 + $0x28] sm:$0xff] }
 0x6a8   :  { %v7421_v11 = vld [vmem:[%s10287_s15 + $0x88] sm:$0xff] }
 0x6ac   :  { %v4031_v15 = vpop.f32.mrf.mxu2  ;;  %v4051_v22 = vpop.f32.mrf.mxu3 }
 0x6ad   :  { %v4062_v58 = vperm.slane %v4031_v15, 0  ;;  %v4063_v18 = vperm.slane %v4051_v22, 0  ;;  %v7403_v15 = vld [vmem:[%s10286_s14 + $0x10] sm:$0xff]  ;;  %v4100_v22 = vld [vmem:[%s10286_s14 + $0x18] sm:$0x3] }
 0x6af   :  { %v4068_v1 = vadd.f32 %v4062_v58, %v4060_v28  ;;  %v4069_v23 = vadd.f32 %v4063_v18, %v4061_v35  ;;  %v4086_v42 = vadd.f32 %v4080_v45, %v4062_v58  ;;  %v4087_v54 = vadd.f32 %v4081_v26, %v4063_v18  ;;  %v7408_v45 = vld [vmem:[%s10287_s15 + $0x20] sm:$0xff] }
 0x6b0   :  { %v4064_v46 = vadd.f32 %v4062_v58, %v4056_v39  ;;  %v4066_v61 = vadd.f32 %v4062_v58, %v4058_v6  ;;  %v4065_v4 = vadd.f32 %v4063_v18, %v4057_v41  ;;  %v4067_v44 = vadd.f32 %v4063_v18, %v4059_v59  ;;  %v7420_v26 = vld [vmem:[%s10287_s15 + $0x80] sm:$0xff]  ;;  %v7413_v39 = vld [vmem:[%s10287_s15 + $0x48] sm:$0xff]  ;;  %v7419_v6 = vld [vmem:[%s10287_s15 + $0x78] sm:$0xff] }
 0x6b1   :  { %v4074_v60 = vmax.f32 %v4068_v1, 0.0  ;;  %v4075_v7 = vmax.f32 %v4069_v23, 0.0  ;;  %v4092_v63 = vmax.f32 %v4086_v42, 0.0  ;;  %v4093_v52 = vmax.f32 %v4087_v54, 0.0  ;;  %v7425_v41 = vld [vmem:[%s10287_s15 + $0xa8] sm:$0xff]  ;;  %v7418_v1 = vld [vmem:[%s10287_s15 + $0x70] sm:$0xff] }
 0x6b2   :  { %v4070_v37 = vmax.f32 %v4064_v46, 0.0  ;;  %v4072_v20 = vmax.f32 %v4066_v61, 0.0  ;;  %v4071_v33 = vmax.f32 %v4065_v4, 0.0  ;;  %v4073_v53 = vmax.f32 %v4067_v44, 0.0  ;;  %v7405_v59 = vld [vmem:[%s10287_s15 + $0x8] sm:$0xff]  ;;  %v7424_v42 = vld [vmem:[%s10287_s15 + $0xa0] sm:$0xff] }
 0x6b3   :  { %v4103_v48 = vpack.c.bf16 %v4074_v60, %v4074_v60  ;;  %v4104_v27 = vpack.c.bf16 %v4075_v7, %v4075_v7  ;;  %v4215_v3 = vpack.c.bf16 %v4092_v63, %v4092_v63  ;;  %v4216_v43 = vpack.c.bf16 %v4093_v52, %v4093_v52  ;;  %v7417_v23 = vld [vmem:[%s10287_s15 + $0x68] sm:$0xff]  ;;  %v7416_v61 = vld [vmem:[%s10287_s15 + $0x60] sm:$0xff]  ;;  %v7459_v52 = vld [vmem:[%s10287_s15 + $0x98] sm:$0xff] }
 0x6b4   :  { %v4082_v16 = vadd.f32 %v4076_v17, %v4062_v58  ;;  %v4084_v13 = vadd.f32 %v4078_v40, %v4062_v58  ;;  %v4083_v0 = vadd.f32 %v4077_v56, %v4063_v18  ;;  %v4085_v36 = vadd.f32 %v4079_v21, %v4063_v18  ;;  %v7407_v58 = vld [vmem:[%s10287_s15 + $0x18] sm:$0xff]  ;;  %v7406_v18 = vld [vmem:[%s10287_s15 + $0x10] sm:$0xff]  ;;  %v7404_v17 = vld [vmem:[%s10287_s15] sm:$0xff] }
 0x6b5   :  { %v4137_v25 = vsel %vm925_vm6, %v4103_v48, 0  ;;  %v4140_v51 = vsel %vm925_vm6, %v4104_v27, 0  ;;  %v4218_v55 = vsel %vm925_vm6, %v4215_v3, 0  ;;  %v4221_v50 = vsel %vm925_vm6, %v4216_v43, 0  ;;  %v7412_v40 = vld [vmem:[%s10287_s15 + $0x40] sm:$0xff]  ;;  %v7439_v56 = vld [vmem:[%s10287_s15 + $0x118] sm:$0xff] }
 0x6b6   :  { %4148 = vmatpush.bf16.msrb.mxu0 %v4137_v25  ;;  %4176 = vmatpush.bf16.msrb.mxu1 %v4140_v51  ;;  %v4088_v12 = vmax.f32 %v4082_v16, 0.0  ;;  %v4090_v57 = vmax.f32 %v4084_v13, 0.0  ;;  %v4101_v5 = vpack.c.bf16 %v4072_v20, %v4070_v37  ;;  %v4102_v14 = vpack.c.bf16 %v4073_v53, %v4071_v33  ;;  %v7463_v37 = vld [vmem:[%s10287_s15 + $0xb8] sm:$0xff]  ;;  %v7458_v25 = vld [vmem:[%s10287_s15 + $0x90] sm:$0xff] }
 0x6b7   :  { %4229 = vmatpush.bf16.msrb.mxu2 %v4218_v55  ;;  %4257 = vmatpush.bf16.msrb.mxu3 %v4221_v50  ;;  %v4089_v49 = vmax.f32 %v4083_v0, 0.0  ;;  %v4091_v29 = vmax.f32 %v4085_v36, 0.0  ;;  %v4118_v28 = vunpack.c.l.b16 %v4100_v22  ;;  %v7435_v20 = vld [vmem:[%s10287_s15 + $0xf8] sm:$0xff]  ;;  %v7434_v51 = vld [vmem:[%s10287_s15 + $0xf0] sm:$0xff]  ;;  %vm4211_vm6 = vcmask 518144  }
 0x6b8   :  { %v4213_v34 = vpack.c.bf16 %v4090_v57, %v4088_v12 }
 0x6b9   :  { %v4214_v9 = vpack.c.bf16 %v4091_v29, %v4089_v49  ;;  %v4122_v35 = vpack.c.b16 %v4118_v28, %v4118_v28 }
 0x6ba   :  { %4149 = vmatpush.bf16.msrb.mxu0 %v4101_v5  ;;  %4177 = vmatpush.bf16.msrb.mxu1 %v4102_v14  ;;  %v7457_v5 = vld [vmem:[%s10287_s15 + $0x88] sm:$0xff]  ;;  %v7462_v14 = vld [vmem:[%s10287_s15 + $0xb0] sm:$0xff] }
 0x6bb   :  { %4230 = vmatpush.bf16.msrb.mxu2 %v4213_v34  ;;  %4258 = vmatpush.bf16.msrb.mxu3 %v4214_v9  ;;  %v7438_v9 = vld [vmem:[%s10287_s15 + $0x110] sm:$0xff] }
 0x6bd   :  { %6762 = vmatmul.msk.bf16.vlgmr.msrb.gmra.mxu0 %vm4123_vm5, %v7401_v10  ;;  %6766 = vmatmul.msk.bf16.vlgmr.msrb.gmra.mxu1 %vm4123_vm5, %v7401_v10 }
 0x6be   :  { %6770 = vmatmul.msk.bf16.vlgmr.msrb.gmra.mxu2 %vm4123_vm5, %v7401_v10  ;;  %6774 = vmatmul.msk.bf16.vlgmr.msrb.gmra.mxu3 %vm4123_vm5, %v7401_v10  ;;  %v7433_v10 = vld [vmem:[%s10287_s15 + $0xe8] sm:$0xff] }
 0x6bf   :  { %4660 = vmatpush.bf16.msra.mxu2 %v7411_v32  ;;  %4692 = vmatpush.bf16.msra.mxu3 %v7415_v8  ;;  %v7456_v8 = vld [vmem:[%s10287_s15 + $0x80] sm:$0xff] }
 0x6c0   :  { %4522 = vmatpush.bf16.msra.mxu0 %v7423_v19  ;;  %4554 = vmatpush.bf16.msra.mxu1 %v7427_v24 }
 0x6c3   :  { %4661 = vmatpush.bf16.msra.mxu2 %v7410_v2  ;;  %4693 = vmatpush.bf16.msra.mxu3 %v7414_v30 }
 0x6c4   :  { %4523 = vmatpush.bf16.msra.mxu0 %v7422_v47  ;;  %4555 = vmatpush.bf16.msra.mxu1 %v7426_v38 }
 0x6c7   :  { %4662 = vmatpush.bf16.msra.mxu2 %v7409_v62  ;;  %4694 = vmatpush.bf16.msra.mxu3 %v7413_v39 }
 0x6c8   :  { %4524 = vmatpush.bf16.msra.mxu0 %v7421_v11  ;;  %4556 = vmatpush.bf16.msra.mxu1 %v7425_v41 }
 0x6cb   :  { %4663 = vmatpush.bf16.msra.mxu2 %v7408_v45  ;;  %4695 = vmatpush.bf16.msra.mxu3 %v7412_v40 }
 0x6cc   :  { %4525 = vmatpush.bf16.msra.mxu0 %v7420_v26  ;;  %4557 = vmatpush.bf16.msra.mxu1 %v7424_v42 }
 0x6cd   :  { %6763 = vmatmul.msk.bf16.gmra.mxu0 %vm4123_vm5, %v7402_v31  ;;  %6767 = vmatmul.msk.bf16.gmra.mxu1 %vm4123_vm5, %v7402_v31 }
 0x6ce   :  { %6771 = vmatmul.msk.bf16.gmra.mxu2 %vm4123_vm5, %v7402_v31  ;;  %6775 = vmatmul.msk.bf16.gmra.mxu3 %vm4123_vm5, %v7402_v31 }
 0x6cf   :  { %4664 = vmatpush.bf16.msra.mxu2 %v7407_v58  ;;  %5332 = vmatpush.bf16.msrb.mxu3 %v7463_v37  ;;  %v7455_v58 = vld [vmem:[%s10287_s15 + $0x78] sm:$0xff] }
 0x6d0   :  { %4526 = vmatpush.bf16.msra.mxu0 %v7419_v6  ;;  %4891 = vmatpush.bf16.msrb.mxu1 %v7439_v56 }
 0x6d3   :  { %4665 = vmatpush.bf16.msra.mxu2 %v7406_v18  ;;  %5333 = vmatpush.bf16.msrb.mxu3 %v7462_v14  ;;  %v7432_v18 = vld [vmem:[%s10287_s15 + $0xe0] sm:$0xff] }
 0x6d4   :  { %4527 = vmatpush.bf16.msra.mxu0 %v7418_v1  ;;  %4892 = vmatpush.bf16.msrb.mxu1 %v7438_v9  ;;  %v7454_v1 = vld [vmem:[%s10287_s15 + $0x70] sm:$0xff] }
 0x6d7   :  { %4666 = vmatpush.bf16.msra.mxu2 %v7405_v59 }
 0x6d8   :  { %4528 = vmatpush.bf16.msra.mxu0 %v7417_v23  ;;  %v7461_v23 = vld [vmem:[%s10287_s15 + $0xa8] sm:$0xff] }
 0x6d9   :  { %5334 = vmatpush.bf16.msrb.mxu3 %v7461_v23 }
 0x6db   :  { %4667 = vmatpush.bf16.msra.mxu2 %v7404_v17 }
 0x6dc   :  { %4529 = vmatpush.bf16.msra.mxu0 %v7416_v61  ;;  %v7437_v61 = vld [vmem:[%s10287_s15 + $0x108] sm:$0xff] }
 0x6dd   :  { %6764 = vmatmul.msk.bf16.gmra.mxu0 %vm4123_vm5, %v7403_v15  ;;  %6768 = vmatmul.msk.bf16.gmra.mxu1 %vm4123_vm5, %v7403_v15 }
 0x6de   :  { %6772 = vmatmul.msk.bf16.gmra.mxu2 %vm4123_vm5, %v7403_v15  ;;  %6776 = vmatmul.msk.bf16.gmra.mxu3 %vm4123_vm5, %v7403_v15 }
 0x6df   :  { %5300 = vmatpush.bf16.msrb.mxu2 %v7459_v52  ;;  %v7453_v52 = vld [vmem:[%s10287_s15 + $0x68] sm:$0xff]  ;;  %4893 = vmatpush.bf16.msrb.mxu1 %v7437_v61 }
 0x6e0   :  { %4859 = vmatpush.bf16.msrb.mxu0 %v7435_v20 }
 0x6e3   :  { %5301 = vmatpush.bf16.msrb.mxu2 %v7458_v25 }
 0x6e4   :  { %4860 = vmatpush.bf16.msrb.mxu0 %v7434_v51 }
 0x6e7   :  { %5302 = vmatpush.bf16.msrb.mxu2 %v7457_v5 }
 0x6e8   :  { %4861 = vmatpush.bf16.msrb.mxu0 %v7433_v10 }
 0x6eb   :  { %5303 = vmatpush.bf16.msrb.mxu2 %v7456_v8 }
 0x6ec   :  { %4862 = vmatpush.bf16.msrb.mxu0 %v7432_v18 }
 0x6ed   :  { %6765 = vmatmul.msk.bf16.gmra.mxu0 %vm4123_vm5, %v4122_v35  ;;  %6769 = vmatmul.msk.bf16.gmra.mxu1 %vm4123_vm5, %v4122_v35 }
 0x6ee   :  { %6773 = vmatmul.msk.bf16.gmra.mxu2 %vm4123_vm5, %v4122_v35  ;;  %6777 = vmatmul.msk.bf16.gmra.mxu3 %vm4123_vm5, %v4122_v35 }
 0x6ef   :  { %5304 = vmatpush.bf16.msrb.mxu2 %v7455_v58 }
 0x6f3   :  { %5305 = vmatpush.bf16.msrb.mxu2 %v7454_v1 }
 0x6f7   :  { %5306 = vmatpush.bf16.msrb.mxu2 %v7453_v52 }
 0x73a   :  { %v4151_v54 = vpop.f32.mrf.mxu0  ;;  %v4179_v46 = vpop.f32.mrf.mxu1 }
 0x73b   :  { %4198 = vst [vmem:[#allocation3] sm:$0xff] %v4151_v54 }
 0x73c   :  { %4199 = vst.msk [vmem:[#allocation3 + $0x8] sm:$0xff] %vm3745_vm0, %v4179_v46  ;;  %v7431_v46 = vld [vmem:[%s10287_s15 + $0xd8] sm:$0xff] }
 0x73d   :  { %4863 = vmatpush.bf16.msrb.mxu0 %v7431_v46 }
 0x741   :  { %v9853_v7 = vpop.f32.mrf.mxu2  ;;  %v4260_v63 = vpop.f32.mrf.mxu3 }
 0x742   :  { %v9849_v4 = vpop.f32.mrf.mxu0  ;;  %v4181_v44 = vpop.f32.mrf.mxu1  ;;  %4280 = vst [vmem:[#allocation3 + $0x70] sm:$0xff] %v9853_v7  ;;  %v4341_v21 = vld [vmem:[#allocation3] sm:$0xfe] }
 0x743   :  { %v4309_v60 = vpack.c.bf16 %v9849_v4, %v4151_v54  ;;  %4201 = vst.msk [vmem:[#allocation3 + $0x18] sm:$0xff] %vm3745_vm0, %v4181_v44  ;;  %v4296_v3 = vld [vmem:[#allocation3 + $0x8] sm:$0xff]  ;;  %v4345_v33 = vpack.c.bf16 %v9849_v4, %v4341_v21 }
 0x744   :  { %4281 = vst.msk [vmem:[#allocation3 + $0x78] sm:$0xff] %vm3745_vm0, %v4260_v63  ;;  %v4342_v36 = vld [vmem:[#allocation3 + $0x8] sm:$0xfe]  ;;  %v7460_v63 = vld [vmem:[%s10287_s15 + $0xa0] sm:$0xff] }
 0x745   :  { %4668 = vmatmul.bf16.vlgmr.msra.gmra.mxu2 %v4309_v60  ;;  %v4377_v55 = vshll.u32 %v4345_v33, 16  ;;  %v4375_v31 = vshrl.u32 %v4345_v33, 16  ;;  %5335 = vmatpush.bf16.msrb.mxu3 %v7460_v63  ;;  %v4717_v21 = vld [vmem:[#allocation3 + $0x8] sm:$0xfc] }
 0x747   :  { %v4379_v0 = vrot.slane %v4377_v55, 1 }
 0x749   :  { %v9874_v16 = vpop.f32.mrf.mxu2  ;;  %v4262_v13 = vpop.f32.mrf.mxu3  ;;  %v4380_v19 = vor.u32 %v4379_v0, %v4375_v31  ;;  %v5120_v5 = vld [vmem:[#allocation3 + $0x70] sm:$0xfe] }
 0x74a   :  { %v4156_v48 = vpop.f32.mrf.mxu0  ;;  %v4184_v27 = vpop.f32.mrf.mxu1  ;;  %v9869_v43 = vld [vmem:[#allocation3 + $0x18] sm:$0xff]  ;;  %4283 = vst.msk [vmem:[#allocation3 + $0x88] sm:$0xff] %vm3745_vm0, %v4262_v13 }
 0x74b   :  { %4203 = vst.msk [vmem:[#allocation3 + $0x28] sm:$0xff] %vm3745_vm0, %v4184_v27  ;;  %v4310_v53 = vpack.c.bf16 %v9869_v43, %v4296_v3  ;;  %v4346_v49 = vpack.c.bf16 %v9869_v43, %v4342_v36  ;;  %v7452_v3 = vld [vmem:[%s10287_s15 + $0x60] sm:$0xff]  ;;  %v4721_v33 = vpack.c.bf16 %v9869_v43, %v4717_v21  ;;  %v7430_v43 = vld [vmem:[%s10287_s15 + $0xd0] sm:$0xff]  ;;  %v5121_v61 = vld [vmem:[#allocation3 + $0x78] sm:$0xfe] }
 0x74c   :  { %5307 = vmatpush.bf16.msrb.mxu2 %v7452_v3  ;;  %4864 = vmatpush.bf16.msrb.mxu0 %v7430_v43  ;;  %v7471_v43 = vld [vmem:[%s10287_s15 + $0xf8] sm:$0xff] }
 0x74d   :  { %6902 = vmatmul.msk.bf16.vlgmr.msra.gmra.mxu3 %vm3745_vm0, %v4310_v53  ;;  %v4389_v2 = vshll.u32 %v4346_v49, 16  ;;  %v4387_v45 = vshrl.u32 %v4346_v49, 16  ;;  %v4760_v0 = vrot.slane %v4721_v33, 1 }
 0x74f   :  { %v4391_v22 = vrot.slane %v4389_v2, 1 }
 0x750   :  { %5636 = vmatpush.bf16.msra.mxu2 %v7471_v43 }
 0x751   :  { %v9894_v29 = vpop.f32.mrf.mxu2  ;;  %v4265_v34 = vpop.f32.mrf.mxu3  ;;  %v4392_v39 = vor.u32 %v4391_v22, %v4387_v45  ;;  %v10007_v46 = vld [vmem:[#allocation3 + $0x88] sm:$0xff] }
 0x752   :  { %v4158_v50 = vpop.f32.mrf.mxu0  ;;  %v4186_v12 = vpop.f32.mrf.mxu1  ;;  %4285 = vst.msk [vmem:[#allocation3 + $0x98] sm:$0xff] %vm3745_vm0, %v4265_v34  ;;  %v4300_v62 = vld [vmem:[#allocation3 + $0x28] sm:$0xff]  ;;  %v5125_v52 = vpack.c.bf16 %v10007_v46, %v5121_v61 }
 0x753   :  { %v9884_v57 = vpack.c.bf16 %v4158_v50, %v4156_v48  ;;  %4205 = vst.msk [vmem:[#allocation3 + $0x38] sm:$0xff] %vm3745_vm0, %v4186_v12 }
 0x755   :  { %4673 = vmatmul.bf16.gmra.mxu2 %v9884_v57  ;;  %v4382_v32 = vshll.u32 %v9884_v57, 16  ;;  %v4398_v44 = vshrl.u32 %v9884_v57, 16 }
 0x757   :  { %v4384_v24 = vrot.slane %v4382_v32, 1 }
 0x759   :  { %v4385_v30 = vsel %vm1093_vm10, %v4380_v19, %v4384_v24  ;;  %v9912_v28 = vpop.f32.mrf.mxu2  ;;  %v4267_v35 = vpop.f32.mrf.mxu3  ;;  %v4400_v37 = vor.u32 %v4398_v44, %v4384_v24  ;;  %v5124_v19 = vpack.c.bf16 %v9874_v16, %v5120_v5  ;;  %v5079_v21 = vld [vmem:[#allocation3 + $0x98] sm:$0xff] }
 0x75a   :  { %v4161_v47 = vpop.f32.mrf.mxu0  ;;  %v4189_v38 = vpop.f32.mrf.mxu1  ;;  %4530 = vmatmul.bf16.vlgmr.msra.gmra.mxu0 %v4385_v30  ;;  %v4302_v11 = vld [vmem:[#allocation3 + $0x38] sm:$0xff]  ;;  %4287 = vst.msk [vmem:[#allocation3 + $0xa8] sm:$0xff] %vm3745_vm0, %v4267_v35  ;;  %v9990_v35 = vpack.c.bf16 %v9912_v28, %v9894_v29 }
 0x75b   :  { %4207 = vst.msk [vmem:[#allocation3 + $0x48] sm:$0xff] %vm3745_vm0, %v4189_v38  ;;  %v9910_v15 = vpack.c.bf16 %v4302_v11, %v4300_v62  ;;  %v7436_v38 = vld [vmem:[%s10287_s15 + $0x100] sm:$0xff]  ;;  %v5153_v23 = vshrl.u32 %v5124_v19, 16  ;;  %v7451_v5 = vld [vmem:[%s10287_s15 + $0x58] sm:$0xff] }
 0x75c   :  { %4894 = vmatpush.bf16.msrb.mxu1 %v7436_v38  ;;  %v5160_v29 = vshll.u32 %v9990_v35, 16 }
 0x75d   :  { %6903 = vmatmul.msk.bf16.gmra.mxu3 %vm3745_vm0, %v9910_v15  ;;  %v4394_v26 = vshll.u32 %v9910_v15, 16  ;;  %v4406_v50 = vshrl.u32 %v9910_v15, 16  ;;  %v4761_v36 = vrot.slane %v9910_v15, 1 }
 0x75e   :  { %v5162_v63 = vrot.slane %v5160_v29, 1  ;;  %v7450_v29 = vld [vmem:[%s10287_s15 + $0x50] sm:$0xff] }
 0x75f   :  { %v4396_v6 = vrot.slane %v4394_v26, 1  ;;  %v9973_v34 = vsel %vm1493_vm11, %v4760_v0, %v4761_v36  ;;  %v5155_v26 = vshll.u32 %v5124_v19, 16  ;;  %v7475_v0 = vld [vmem:[%s10287_s15 + $0x118] sm:$0xff] }
 0x760   :  { %5668 = vmatpush.bf16.msra.mxu3 %v7475_v0  ;;  %v7472_v0 = vld [vmem:[%s10287_s15 + $0x100] sm:$0xff] }
 0x761   :  { %v4397_v17 = vsel %vm1093_vm10, %v4392_v39, %v4396_v6  ;;  %v9935_v42 = vpop.f32.mrf.mxu2  ;;  %v4270_v54 = vpop.f32.mrf.mxu3  ;;  %v4408_v14 = vor.u32 %v4406_v50, %v4396_v6  ;;  %v4758_v6 = vrot.slane %v9884_v57, 1  ;;  %v7444_v57 = vld [vmem:[%s10287_s15 + $0x20] sm:$0xff] }
 0x762   :  { %v4163_v41 = vpop.f32.mrf.mxu0  ;;  %v4191_v59 = vpop.f32.mrf.mxu1  ;;  %6850 = vmatmul.msk.bf16.vlgmr.msra.gmra.mxu1 %vm3745_vm0, %v4397_v17  ;;  %4289 = vst.msk [vmem:[#allocation3 + $0xb8] sm:$0xff] %vm3745_vm0, %v4270_v54  ;;  %v4304_v53 = vld [vmem:[#allocation3 + $0x48] sm:$0xff]  ;;  %v5157_v54 = vrot.slane %v5155_v26, 1 }
 0x763   :  { %v9926_v40 = vpack.c.bf16 %v4163_v41, %v4161_v47  ;;  %4209 = vst.msk [vmem:[#allocation3 + $0x58] sm:$0xff] %vm3745_vm0, %v4191_v59  ;;  %v7429_v47 = vld [vmem:[%s10287_s15 + $0xc8] sm:$0xff]  ;;  %5470 = vmatpush.bf16.msra.mxu1 %v7451_v5 }
 0x764   :  { %4865 = vmatpush.bf16.msrb.mxu0 %v7429_v47 }
 0x765   :  { %4678 = vmatmul.bf16.gmra.mxu2 %v9926_v40  ;;  %v4402_v60 = vshll.u32 %v9926_v40, 16  ;;  %v4414_v15 = vshrl.u32 %v9926_v40, 16  ;;  %v4763_v41 = vrot.slane %v9926_v40, 1 }
 0x767   :  { %v4404_v20 = vrot.slane %v4402_v60, 1  ;;  %v10004_v28 = vsel %vm1493_vm11, %v4758_v6, %v4763_v41  ;;  %5471 = vmatpush.bf16.msra.mxu1 %v7450_v29 }
 0x769   :  { %v4405_v56 = vsel %vm1093_vm10, %v4400_v37, %v4404_v20  ;;  %v9961_v51 = vpop.f32.mrf.mxu2  ;;  %v4272_v55 = vpop.f32.mrf.mxu3  ;;  %v4416_v18 = vor.u32 %v4414_v15, %v4404_v20  ;;  %v5083_v38 = vld [vmem:[#allocation3 + $0xb8] sm:$0xff] }
 0x76a   :  { %v4166_v48 = vpop.f32.mrf.mxu0  ;;  %v4194_v27 = vpop.f32.mrf.mxu1  ;;  %4535 = vmatmul.bf16.gmra.mxu0 %v4405_v56  ;;  %v4306_v13 = vld [vmem:[#allocation3 + $0x58] sm:$0xff]  ;;  %4291 = vst.msk [vmem:[#allocation3 + $0xc8] sm:$0xff] %vm3745_vm0, %v4272_v55  ;;  %v5158_v56 = vor.u32 %v5157_v54, %v5153_v23  ;;  %v5167_v55 = vshll.u32 %v5125_v52, 16  ;;  %v7468_v23 = vld [vmem:[%s10287_s15 + $0xe0] sm:$0xff] }
 0x76b   :  { %4210 = vst [vmem:[#allocation3 + $0x60] sm:$0x7] %v4166_v48  ;;  %v9959_v25 = vpack.c.bf16 %v4306_v13, %v4304_v53  ;;  %v5081_v48 = vld [vmem:[#allocation3 + $0xa8] sm:$0xff] }
 0x76c   :  { %4212 = vst.msk [vmem:[#allocation3 + $0x68] sm:$0x7] %vm4211_vm6, %v4194_v27  ;;  %v7428_v27 = vld [vmem:[%s10287_s15 + $0xc0] sm:$0xff]  ;;  %v10021_v13 = vpack.c.bf16 %v5081_v48, %v5079_v21  ;;  %v7467_v48 = vld [vmem:[%s10287_s15 + $0xd8] sm:$0xff] }
 0x76d   :  { %6904 = vmatmul.msk.bf16.gmra.mxu3 %vm3745_vm0, %v9959_v25  ;;  %v4410_v12 = vshll.u32 %v9959_v25, 16  ;;  %v4422_v37 = vshrl.u32 %v9959_v25, 16  ;;  %v4765_v3 = vrot.slane %v9959_v25, 1  ;;  %4866 = vmatpush.bf16.msrb.mxu0 %v7428_v27 }
 0x76f   :  { %v4412_v49 = vrot.slane %v4410_v12, 1  ;;  %v10019_v53 = vsel %vm1493_vm11, %v4761_v36, %v4765_v3  ;;  %v5163_v12 = vsel %vm1093_vm10, %v5158_v56, %v5162_v63  ;;  %v7447_v36 = vld [vmem:[%s10287_s15 + $0x38] sm:$0xff] }
 0x771   :  { %v4413_v10 = vsel %vm1093_vm10, %v4408_v14, %v4412_v49  ;;  %v4247_v62 = vpop.f32.mrf.mxu2  ;;  %v4275_v11 = vpop.f32.mrf.mxu3  ;;  %v4424_v33 = vor.u32 %v4422_v37, %v4412_v49  ;;  %v5165_v14 = vshrl.u32 %v5125_v52, 16  ;;  %v5169_v49 = vrot.slane %v5167_v55, 1  ;;  %5438 = vmatpush.bf16.msra.mxu0 %v7447_v36  ;;  %v7473_v55 = vld [vmem:[%s10287_s15 + $0x108] sm:$0xff] }
 0x772   :  { %v4168_v9 = vpop.f32.mrf.mxu0  ;;  %v4196_v31 = vpop.f32.mrf.mxu1  ;;  %v4307_v32 = vld [vmem:[#allocation3 + $0x60] sm:$0x1]  ;;  %6851 = vmatmul.msk.bf16.gmra.mxu1 %vm3745_vm0, %v4413_v10  ;;  %4292 = vst [vmem:[#allocation3 + $0xd0] sm:$0x7] %v4247_v62  ;;  %v5172_v10 = vshll.u32 %v10021_v13, 16  ;;  %v5085_v62 = vld [vmem:[#allocation3 + $0xc8] sm:$0xff] }
 0x773   :  { %v4343_v8 = vld [vmem:[#allocation3 + $0x60] sm:$0x3]  ;;  %v4315_v24 = vpack.c.bf16 %v4307_v32, %v4307_v32  ;;  %v4344_v30 = vld [vmem:[#allocation3 + $0x68] sm:$0x3]  ;;  %4293 = vst.msk [vmem:[#allocation3 + $0xd8] sm:$0x7] %vm4211_vm6, %v4275_v11  ;;  %v10041_v9 = vpack.c.bf16 %v9961_v51, %v9935_v42 }
 0x774   :  { %v9978_v2 = vpack.c.bf16 %v4343_v8, %v4343_v8  ;;  %v9992_v45 = vpack.c.bf16 %v4344_v30, %v4344_v30  ;;  %v4308_v58 = vld [vmem:[#allocation3 + $0x68] sm:$0x1]  ;;  %v7470_v31 = vld [vmem:[%s10287_s15 + $0xf0] sm:$0xff]  ;;  %v5170_v8 = vor.u32 %v5169_v49, %v5165_v14  ;;  %v5174_v19 = vrot.slane %v5172_v10, 1  ;;  %v4716_v11 = vld [vmem:[#allocation3] sm:$0xfc] }
 0x775   :  { %4683 = vmatmul.bf16.gmra.mxu2 %v4315_v24  ;;  %v4316_v17 = vpack.c.bf16 %v4308_v58, %v4308_v58  ;;  %v5176_v24 = vshrl.u32 %v9990_v35, 16  ;;  %v5180_v30 = vshll.u32 %v10041_v9, 16  ;;  %v7465_v36 = vld [vmem:[%s10287_s15 + $0xc8] sm:$0xff]  ;;  %v7464_v49 = vld [vmem:[%s10287_s15 + $0xc0] sm:$0xff]  ;;  %v5540_v29 = vrot.slane %v10041_v9, 1 }
 0x776   :  { %v4418_v22 = vshll.u32 %v9978_v2, 16  ;;  %v4426_v1 = vshll.u32 %v9992_v45, 16  ;;  %v4430_v32 = vshrl.u32 %v9978_v2, 16  ;;  %5637 = vmatpush.bf16.msra.mxu2 %v7470_v31  ;;  %v5175_v42 = vsel %vm1093_vm10, %v5170_v8, %v5174_v19  ;;  %v7446_v2 = vld [vmem:[%s10287_s15 + $0x30] sm:$0xff]  ;;  %v4718_v31 = vld [vmem:[#allocation3 + $0x60] sm:$0x7] }
 0x777   :  { %v5178_v51 = vor.u32 %v5176_v24, %v5162_v63  ;;  %v5182_v47 = vrot.slane %v5180_v30, 1  ;;  %5439 = vmatpush.bf16.msra.mxu0 %v7446_v2  ;;  %v4432_v15 = vshrl.u32 %v9992_v45, 16  ;;  %v7445_v45 = vld [vmem:[%s10287_s15 + $0x28] sm:$0xff]  ;;  %v5192_v63 = vshrl.u32 %v10041_v9, 16 }
 0x778   :  { %v4420_v39 = vrot.slane %v4418_v22, 1  ;;  %v4428_v20 = vrot.slane %v4426_v1, 1  ;;  %v10055_v22 = vpack.c.bf16 %v5085_v62, %v5083_v38  ;;  %v4719_v30 = vld [vmem:[#allocation3 + $0x68] sm:$0x7] }
 0x779   :  { %v4249_v44 = vpop.f32.mrf.mxu2  ;;  %v4277_v60 = vpop.f32.mrf.mxu3  ;;  %v5183_v26 = vsel %vm1093_vm10, %v5178_v51, %v5182_v47  ;;  %v5122_v58 = vld [vmem:[#allocation3 + $0xd0] sm:$0x3]  ;;  %v5494_v51 = vld [vmem:[#allocation3 + $0x70] sm:$0xfc]  ;;  %v4723_v38 = vpack.c.bf16 %v4719_v30, %v4719_v30 }
 0x77a   :  { %v4421_v59 = vsel %vm1093_vm10, %v4416_v18, %v4420_v39  ;;  %v4429_v50 = vsel %vm1093_vm10, %v4424_v33, %v4428_v20  ;;  %v4720_v18 = vpack.c.bf16 %v9849_v4, %v4716_v11  ;;  %v7469_v39 = vld [vmem:[%s10287_s15 + $0xe8] sm:$0xff]  ;;  %v5188_v4 = vshll.u32 %v10055_v22, 16  ;;  %v5123_v21 = vld [vmem:[#allocation3 + $0xd8] sm:$0x3]  ;;  %v7466_v33 = vld [vmem:[%s10287_s15 + $0xd0] sm:$0xff] }
 0x77b   :  { %4540 = vmatmul.bf16.gmra.mxu0 %v4421_v59  ;;  %v7474_v59 = vld [vmem:[%s10287_s15 + $0x110] sm:$0xff]  ;;  %v5126_v1 = vpack.c.bf16 %v5122_v58, %v5122_v58  ;;  %5638 = vmatpush.bf16.msra.mxu2 %v7469_v39  ;;  %v5194_v20 = vor.u32 %v5192_v63, %v5182_v47  ;;  %v5200_v43 = vshrl.u32 %v10055_v22, 16  ;;  %v7448_v47 = vld [vmem:[%s10287_s15 + $0x40] sm:$0xff]  ;;  %v5498_v62 = vpack.c.bf16 %v9874_v16, %v5494_v51 }
 0x77c   :  { %5669 = vmatpush.bf16.msra.mxu3 %v7474_v59  ;;  %5440 = vmatpush.bf16.msra.mxu0 %v7445_v45  ;;  %v4757_v54 = vrot.slane %v4720_v18, 1  ;;  %v5190_v44 = vrot.slane %v5188_v4, 1  ;;  %v4769_v2 = vrot.slane %v4723_v38, 1  ;;  %v5538_v45 = vrot.slane %v10021_v13, 1 }
 0x77d   :  { %6905 = vmatmul.msk.bf16.gmra.mxu3 %vm3745_vm0, %v4316_v17  ;;  %v5184_v17 = vshrl.u32 %v10021_v13, 16  ;;  %v5196_v52 = vshll.u32 %v5126_v1, 16  ;;  %v5208_v8 = vshrl.u32 %v5126_v1, 16  ;;  %v5534_v11 = vrot.slane %v5498_v62, 1 }
 0x77e   :  { %v4759_v60 = vsel %vm1493_vm11, %v4757_v54, %v4758_v6  ;;  %v5127_v6 = vpack.c.bf16 %v5123_v21, %v5123_v21  ;;  %v5202_v5 = vor.u32 %v5200_v43, %v5190_v44  ;;  %v4770_v40 = vsel %vm1493_vm11, %v4765_v3, %v4769_v2 }
 0x77f   :  { %v5186_v61 = vor.u32 %v5184_v17, %v5174_v19  ;;  %5639 = vmatpush.bf16.msra.mxu2 %v7468_v23  ;;  %v5198_v56 = vrot.slane %v5196_v52, 1  ;;  %v4722_v19 = vpack.c.bf16 %v4718_v31, %v4718_v31  ;;  %v5088_v54 = vpack.c.bf16 %v9874_v16, %v9853_v7  ;;  %v5497_v7 = vld [vmem:[#allocation3 + $0xd8] sm:$0x7] }
 0x780   :  { %5441 = vmatpush.bf16.msra.mxu0 %v7444_v57  ;;  %5670 = vmatpush.bf16.msra.mxu3 %v7473_v55  ;;  %v5501_v55 = vpack.c.bf16 %v5497_v7, %v5497_v7 }
 0x781   :  { %v5191_v37 = vsel %vm1093_vm10, %v5186_v61, %v5190_v44  ;;  %v5199_v27 = vsel %vm1093_vm10, %v5194_v20, %v5198_v56  ;;  %v4767_v24 = vrot.slane %v4722_v19, 1  ;;  %v5542_v44 = vrot.slane %v10055_v22, 1 }
 0x782   :  { %6852 = vmatmul.msk.bf16.gmra.mxu1 %vm3745_vm0, %v4429_v50  ;;  %v7443_v50 = vld [vmem:[%s10287_s15 + $0x18] sm:$0xff] }
 0x783   :  { %5640 = vmatpush.bf16.msra.mxu2 %v7467_v48  ;;  %v5543_v52 = vsel %vm1493_vm11, %v5538_v45, %v5542_v44 }
 0x784   :  { %5442 = vmatpush.bf16.msra.mxu0 %v7443_v50  ;;  %5671 = vmatpush.bf16.msra.mxu3 %v7472_v0 }
 0x785   :  { %5308 = vmatmul.bf16.vlgmr.msrb.gmra.mxu2 %v5163_v12  ;;  %v7449_v12 = vld [vmem:[%s10287_s15 + $0x48] sm:$0xff] }
 0x786   :  { %5472 = vmatpush.bf16.msra.mxu1 %v7449_v12 }
 0x787   :  { %5641 = vmatpush.bf16.msra.mxu2 %v7466_v33 }
 0x78a   :  { %5473 = vmatpush.bf16.msra.mxu1 %v7448_v47 }
 0x78b   :  { %4545 = vmatmul.bf16.gmra.mxu0 %v4430_v32  ;;  %5642 = vmatpush.bf16.msra.mxu2 %v7465_v36  ;;  %v7442_v32 = vld [vmem:[%s10287_s15 + $0x10] sm:$0xff]  ;;  %v5546_v36 = vrot.slane %v5501_v55, 1 }
 0x78c   :  { %5443 = vmatpush.bf16.msra.mxu0 %v7442_v32 }
 0x78d   :  { %7061 = vmatmul.msk.bf16.vlgmr.msrb.gmra.mxu3 %vm3745_vm0, %v5175_v42  ;;  %v4768_v42 = vsel %vm1493_vm11, %v4763_v41, %v4767_v24  ;;  %v5495_v41 = vld [vmem:[#allocation3 + $0x78] sm:$0xfc] }
 0x78e   :  { %v5499_v18 = vpack.c.bf16 %v10007_v46, %v5495_v41 }
 0x78f   :  { %5643 = vmatpush.bf16.msra.mxu2 %v7464_v49 }
 0x790   :  { %v5537_v59 = vrot.slane %v5499_v18, 1 }
 0x792   :  { %6853 = vmatmul.msk.bf16.gmra.mxu1 %vm3745_vm0, %v4432_v15  ;;  %v5535_v15 = vrot.slane %v9990_v35, 1  ;;  %v5539_v25 = vsel %vm1493_vm11, %v5537_v59, %v5538_v45  ;;  %v5087_v45 = vld [vmem:[#allocation3 + $0xd8] sm:$0x1] }
 0x794   :  { %v5536_v58 = vsel %vm1493_vm11, %v5534_v11, %v5535_v15  ;;  %v5541_v4 = vsel %vm1493_vm11, %v5535_v15, %v5540_v29 }
 0x795   :  { %5313 = vmatmul.bf16.gmra.mxu2 %v5183_v26  ;;  %v7440_v26 = vld [vmem:[%s10287_s15] sm:$0xff] }
 0x79b   :  { %4867 = vmatmul.bf16.vlgmr.msrb.gmra.mxu0 %v4759_v60  ;;  %v5496_v60 = vld [vmem:[#allocation3 + $0xd0] sm:$0x7] }
 0x79c   :  { %v5500_v63 = vpack.c.bf16 %v5496_v60, %v5496_v60 }
 0x79d   :  { %7062 = vmatmul.msk.bf16.gmra.mxu3 %vm3745_vm0, %v5191_v37  ;;  %v5075_v37 = vld [vmem:[#allocation3 + $0x78] sm:$0xff] }
 0x79e   :  { %v5544_v48 = vrot.slane %v5500_v63, 1 }
 0x7a0   :  { %v5545_v33 = vsel %vm1493_vm11, %v5540_v29, %v5544_v48 }
 0x7a2   :  { %6978 = vmatmul.msk.bf16.vlgmr.msrb.gmra.mxu1 %vm3745_vm0, %v9973_v34  ;;  %v5204_v34 = vshll.u32 %v5127_v6, 16 }
 0x7a4   :  { %v5206_v14 = vrot.slane %v5204_v34, 1 }
 0x7a5   :  { %5318 = vmatmul.bf16.gmra.mxu2 %v5199_v27  ;;  %v5089_v27 = vpack.c.bf16 %v10007_v46, %v5075_v37 }
 0x7a6   :  { %v5207_v10 = vsel %vm1093_vm10, %v5202_v5, %v5206_v14  ;;  %v5547_v14 = vsel %vm1493_vm11, %v5542_v44, %v5546_v36  ;;  %vm5065_vm10 = vcmask 400384  }
 0x7ab   :  { %4872 = vmatmul.bf16.gmra.mxu0 %v10004_v28  ;;  %v7441_v28 = vld [vmem:[%s10287_s15 + $0x8] sm:$0xff] }
 0x7ac   :  { %5444 = vmatpush.bf16.msra.mxu0 %v7441_v28 }
 0x7ad   :  { %7063 = vmatmul.msk.bf16.gmra.mxu3 %vm3745_vm0, %v5207_v10 }
 0x7b0   :  { %5445 = vmatpush.bf16.msra.mxu0 %v7440_v26 }
 0x7b2   :  { %6979 = vmatmul.msk.bf16.gmra.mxu1 %vm3745_vm0, %v10019_v53  ;;  %v5210_v53 = vshrl.u32 %v5127_v6, 16 }
 0x7b5   :  { %5323 = vmatmul.bf16.gmra.mxu2 %v5208_v8 }
 0x7bb   :  { %4877 = vmatmul.bf16.gmra.mxu0 %v4768_v42 }
 0x7bd   :  { %7064 = vmatmul.msk.bf16.gmra.mxu3 %vm3745_vm0, %v5210_v53 }
 0x7c2   :  { %6980 = vmatmul.msk.bf16.gmra.mxu1 %vm3745_vm0, %v4770_v40 }
 0x7c5   :  { %5644 = vmatmul.bf16.vlgmr.msra.gmra.mxu2 %v5536_v58 }
 0x7c8   :  { %v4669_v39 = vpop.f32.mrf.mxu2 }
 0x7cb   :  { %4882 = vmatmul.bf16.gmra.mxu0 %v4767_v24 }
 0x7cd   :  { %7189 = vmatmul.msk.bf16.vlgmr.msra.gmra.mxu3 %vm3745_vm0, %v5539_v25 }
 0x7d0   :  { %v4671_v3 = vpop.f32.mrf.mxu2  ;;  %v4697_v17 = vpop.f32.mrf.mxu3 }
 0x7d2   :  { %6981 = vmatmul.msk.bf16.gmra.mxu1 %vm3745_vm0, %v4769_v2 }
 0x7d5   :  { %5649 = vmatmul.bf16.gmra.mxu2 %v5541_v4 }
 0x7d7   :  { %v4531_v1 = vpop.f32.mrf.mxu0 }
 0x7d8   :  { %v4674_v23 = vpop.f32.mrf.mxu2  ;;  %v4699_v61 = vpop.f32.mrf.mxu3 }
 0x7db   :  { %5446 = vmatmul.bf16.vlgmr.msra.gmra.mxu0 %v5088_v54 }
 0x7dd   :  { %7190 = vmatmul.msk.bf16.gmra.mxu3 %vm3745_vm0, %v5543_v52 }
 0x7df   :  { %v4533_v20 = vpop.f32.mrf.mxu0  ;;  %v4559_v56 = vpop.f32.mrf.mxu1 }
 0x7e0   :  { %v4676_v21 = vpop.f32.mrf.mxu2  ;;  %v4560_v57 = vadd.f32 %v4559_v56, %v4531_v1  ;;  %v4702_v6 = vpop.f32.mrf.mxu3  ;;  %v5095_v1 = vpack.c.bf16 %v5087_v45, %v5087_v45 }
 0x7e2   :  { %v4670_v16 = vadd.f32 %v4669_v39, %v4560_v57  ;;  %7113 = vmatmul.msk.bf16.vlgmr.msra.gmra.mxu1 %vm3745_vm0, %v5089_v27 }
 0x7e4   :  { %v4698_v19 = vadd.f32 %v4697_v17, %v4670_v16 }
 0x7e5   :  { %5654 = vmatmul.bf16.gmra.mxu2 %v5545_v33 }
 0x7e7   :  { %v4536_v50 = vpop.f32.mrf.mxu0  ;;  %v4561_v12 = vpop.f32.mrf.mxu1 }
 0x7e8   :  { %v4679_v43 = vpop.f32.mrf.mxu2  ;;  %v4562_v34 = vadd.f32 %v4561_v12, %v4533_v20  ;;  %v4704_v0 = vpop.f32.mrf.mxu3 }
 0x7ea   :  { %v4672_v5 = vadd.f32 %v4671_v3, %v4562_v34 }
 0x7eb   :  { %5451 = vmatmul.bf16.gmra.mxu0 %v9990_v35 }
 0x7ec   :  { %v4700_v47 = vadd.f32 %v4699_v61, %v4672_v5 }
 0x7ed   :  { %7191 = vmatmul.msk.bf16.gmra.mxu3 %vm3745_vm0, %v5547_v14 }
 0x7ef   :  { %v4538_v46 = vpop.f32.mrf.mxu0  ;;  %v4564_v49 = vpop.f32.mrf.mxu1 }
 0x7f0   :  { %v4681_v10 = vpop.f32.mrf.mxu2  ;;  %v4565_v31 = vadd.f32 %v4564_v49, %v4536_v50  ;;  %v4707_v32 = vpop.f32.mrf.mxu3 }
 0x7f2   :  { %v4675_v8 = vadd.f32 %v4674_v23, %v4565_v31  ;;  %7114 = vmatmul.msk.bf16.gmra.mxu1 %vm3745_vm0, %v10021_v13  ;;  %v5086_v13 = vld [vmem:[#allocation3 + $0xd0] sm:$0x1] }
 0x7f3   :  { %v5094_v58 = vpack.c.bf16 %v5086_v13, %v5086_v13 }
 0x7f4   :  { %v4703_v40 = vadd.f32 %v4702_v6, %v4675_v8 }
 0x7f5   :  { %5659 = vmatmul.bf16.gmra.mxu2 %v5544_v48 }
 0x7f7   :  { %v4566_v24 = vpop.f32.mrf.mxu1 }
 0x7f8   :  { %v4541_v28 = vpop.f32.mrf.mxu0  ;;  %v4684_v30 = vpop.f32.mrf.mxu2  ;;  %v4567_v35 = vadd.f32 %v4566_v24, %v4538_v46 }
 0x7f9   :  { %v4709_v42 = vpop.f32.mrf.mxu3 }
 0x7fa   :  { %v4677_v51 = vadd.f32 %v4676_v21, %v4567_v35  ;;  %v10178_v21 = vld [vmem:[%s10288_s16] ss:$0 sm:$0xff] }
 0x7fb   :  { %5456 = vmatmul.bf16.gmra.mxu0 %v10041_v9 }
 0x7fc   :  { %v4705_v59 = vadd.f32 %v4704_v0, %v4677_v51 }
 0x7fd   :  { %7192 = vmatmul.msk.bf16.gmra.mxu3 %vm3745_vm0, %v5546_v36 }
 0x7ff   :  { %v4569_v53 = vpop.f32.mrf.mxu1 }
 0x800   :  { %v4543_v38 = vpop.f32.mrf.mxu0  ;;  %v4686_v62 = vpop.f32.mrf.mxu2  ;;  %v4570_v2 = vadd.f32 %v4569_v53, %v4541_v28 }
 0x801   :  { %v4712_v11 = vpop.f32.mrf.mxu3 }
 0x802   :  { %v4680_v15 = vadd.f32 %v4679_v43, %v4570_v2  ;;  %7115 = vmatmul.msk.bf16.gmra.mxu1 %vm3745_vm0, %v10055_v22 }
 0x804   :  { %v10169_v54 = vadd.f32 %v4707_v32, %v4680_v15 }
 0x807   :  { %v4571_v26 = vpop.f32.mrf.mxu1 }
 0x808   :  { %v4546_v41 = vpop.f32.mrf.mxu0  ;;  %v4572_v18 = vadd.f32 %v4571_v26, %v4543_v38  ;;  %v5309_v25 = vpop.f32.mrf.mxu2 }
 0x809   :  { %v4714_v9 = vpop.f32.mrf.mxu3 }
 0x80a   :  { %v4682_v39 = vadd.f32 %v4681_v10, %v4572_v18 }
 0x80b   :  { %5461 = vmatmul.bf16.gmra.mxu0 %v5094_v58 }
 0x80c   :  { %v10173_v37 = vadd.f32 %v4709_v42, %v4682_v39 }
 0x80f   :  { %v4574_v29 = vpop.f32.mrf.mxu1 }
 0x810   :  { %v4548_v3 = vpop.f32.mrf.mxu0  ;;  %v4575_v17 = vadd.f32 %v4574_v29, %v4546_v41  ;;  %v5311_v44 = vpop.f32.mrf.mxu2 }
 0x811   :  { %v5337_v4 = vpop.f32.mrf.mxu3 }
 0x812   :  { %v10166_v23 = vadd.f32 %v5337_v4, %v5309_v25  ;;  %v4685_v22 = vadd.f32 %v4684_v30, %v4575_v17  ;;  %7116 = vmatmul.msk.bf16.gmra.mxu1 %vm3745_vm0, %v5095_v1 }
 0x814   :  { %v10183_v33 = vadd.f32 %v4712_v11, %v4685_v22 }
 0x817   :  { %v4576_v61 = vpop.f32.mrf.mxu1 }
 0x818   :  { %v4868_v52 = vpop.f32.mrf.mxu0  ;;  %v5314_v57 = vpop.f32.mrf.mxu2 }
 0x819   :  { %v5339_v60 = vpop.f32.mrf.mxu3 }
 0x81a   :  { %v10171_v63 = vadd.f32 %v5339_v60, %v5311_v44 }
 0x81f   :  { %v4896_v20 = vpop.f32.mrf.mxu1 }
 0x820   :  { %v4897_v56 = vadd.f32 %v4896_v20, %v4868_v52  ;;  %v4870_v7 = vpop.f32.mrf.mxu0  ;;  %v5316_v34 = vpop.f32.mrf.mxu2 }
 0x821   :  { %v5342_v6 = vpop.f32.mrf.mxu3 }
 0x822   :  { %v4915_v48 = vadd.f32 %v4897_v56, %v4698_v19  ;;  %v10180_v27 = vadd.f32 %v5342_v6, %v5314_v57 }
 0x824   :  { %v4925_v16 = vadd.f32 %v10178_v21, %v4915_v48 }
 0x826   :  { %v6982_v55 = vmul.f32 -1.442695, %v4925_v16 }
 0x827   :  { %v4898_v50 = vpop.f32.mrf.mxu1 }
 0x828   :  { %7485 = vpow2.f32 %v6982_v55  ;;  %v4899_v12 = vadd.f32 %v4898_v50, %v4870_v7  ;;  %v4873_v5 = vpop.f32.mrf.mxu0  ;;  %v5319_v19 = vpop.f32.mrf.mxu2 }
 0x829   :  { %v5344_v0 = vpop.f32.mrf.mxu3 }
 0x82a   :  { %v4916_v43 = vadd.f32 %v4899_v12, %v4700_v47  ;;  %v10185_v36 = vadd.f32 %v5344_v0, %v5316_v34 }
 0x82c   :  { %v4926_v14 = vadd.f32 %v10178_v21, %v4916_v43 }
 0x82e   :  { %v7486_v46 = vpop.eup %7485  ;;  %v6983_v49 = vmul.f32 -1.442695, %v4926_v14 }
 0x82f   :  { %v4953_v10 = vadd.f32 1.0, %v7486_v46  ;;  %v4901_v31 = vpop.f32.mrf.mxu1 }
 0x830   :  { %7487 = vpow2.f32 %v6983_v49  ;;  %v4902_v32 = vadd.f32 %v4901_v31, %v4873_v5  ;;  %v4875_v30 = vpop.f32.mrf.mxu0  ;;  %v5321_v13 = vpop.f32.mrf.mxu2 }
 0x831   :  { %7489 = vrcp.f32 %v4953_v10  ;;  %v5347_v28 = vpop.f32.mrf.mxu3  ;;  %v4971_v41 = vand.u32 2147483648, %v4953_v10  ;;  %v4969_v9 = vand.u32 2147483647, %v4953_v10  ;;  %vm4965_vm8 = vweird.f32 %v4953_v10 }
 0x832   :  { %v4917_v8 = vadd.f32 %v4902_v32, %v4703_v40  ;;  %v10188_v24 = vadd.f32 %v5347_v28, %v5319_v19 }
 0x833   :  { %v4972_v17 = vor.u32 1.1754944e-38, %v4971_v41  ;;  %vm4970_vm11 = vcmp.eq.f32.partialorder %v4969_v9, 8.507059e+37 }
 0x834   :  { %v4927_v35 = vadd.f32 %v10178_v21, %v4917_v8 }
 0x836   :  { %v7488_v42 = vpop.eup %7487  ;;  %v6984_v51 = vmul.f32 -1.442695, %v4927_v35 }
 0x837   :  { %v7490_v47 = vpop.eup %7489  ;;  %v4954_v38 = vadd.f32 1.0, %v7488_v42  ;;  %v4903_v53 = vpop.f32.mrf.mxu1 }
 0x838   :  { %v4961_v62 = vmul.f32 %v7490_v47, %v4953_v10  ;;  %7491 = vpow2.f32 %v6984_v51  ;;  %v4904_v2 = vadd.f32 %v4903_v53, %v4875_v30  ;;  %v4878_v58 = vpop.f32.mrf.mxu0  ;;  %vm4966_vm7 = vweird.f32 %v7490_v47  ;;  %v5324_v57 = vpop.f32.mrf.mxu2 }
 0x839   :  { %7493 = vrcp.f32 %v4954_v38  ;;  %v5349_v40 = vpop.f32.mrf.mxu3  ;;  %vm4967_vm9 = vmor %vm4965_vm8, %vm4966_vm7  ;;  %v4986_v52 = vand.u32 2147483648, %v4954_v38  ;;  %v4984_v56 = vand.u32 2147483647, %v4954_v38  ;;  %vm4980_vm13 = vweird.f32 %v4954_v38 }
 0x83a   :  { %v4962_v11 = vsub.f32 1.0, %v4961_v62  ;;  %v4918_v15 = vadd.f32 %v4904_v2, %v4705_v59  ;;  %v10191_v26 = vadd.f32 %v5349_v40, %v5321_v13 }
 0x83b   :  { %v4987_v34 = vor.u32 1.1754944e-38, %v4986_v52  ;;  %vm4985_vm15 = vcmp.eq.f32.partialorder %v4984_v56, 8.507059e+37 }
 0x83c   :  { %v4963_v18 = vmul.f32 %v7490_v47, %v4962_v11  ;;  %v4928_v39 = vadd.f32 %v10178_v21, %v4918_v15 }
 0x83e   :  { %v7492_v45 = vpop.eup %7491  ;;  %v4964_v25 = vadd.f32 %v7490_v47, %v4963_v18  ;;  %v6985_v3 = vmul.f32 -1.442695, %v4928_v39 }
 0x83f   :  { %v7494_v29 = vpop.eup %7493  ;;  %v4955_v59 = vadd.f32 1.0, %v7492_v45  ;;  %v4906_v4 = vpop.f32.mrf.mxu1 }
 0x840   :  { %v4968_v1 = vsel %vm4967_vm9, %v7490_v47, %v4964_v25  ;;  %v4976_v22 = vmul.f32 %v7494_v29, %v4954_v38  ;;  %7495 = vpow2.f32 %v6985_v3  ;;  %v4907_v60 = vadd.f32 %v4906_v4, %v4878_v58  ;;  %v4880_v16 = vpop.f32.mrf.mxu0  ;;  %v5326_v30 = vpop.f32.mrf.mxu2 }
 0x841   :  { %v4973_v61 = vsel %vm4970_vm11, %v4972_v17, %v4968_v1  ;;  %7497 = vrcp.f32 %v4955_v59  ;;  %vm4981_vm12 = vweird.f32 %v7494_v29  ;;  %v5352_v6 = vpop.f32.mrf.mxu3  ;;  %v5001_v32 = vand.u32 2147483648, %v4955_v59 }
 0x842   :  { %5066 = vst.msk [vmem:[%s10289_s17] sm:$0xff] %vm5065_vm10, %v4973_v61  ;;  %v4977_v44 = vsub.f32 1.0, %v4976_v22  ;;  %v4919_v48 = vadd.f32 %v4907_v60, %v10169_v54  ;;  %v10199_v7 = vadd.f32 %v5352_v6, %v5324_v57  ;;  %vm4982_vm14 = vmor %vm4980_vm13, %vm4981_vm12  ;;  %v4999_v19 = vand.u32 2147483647, %v4955_v59 }
 0x843   :  { %vm4995_vm1 = vweird.f32 %v4955_v59  ;;  %v5002_v53 = vor.u32 1.1754944e-38, %v5001_v32 }
 0x844   :  { %v4978_v20 = vmul.f32 %v7494_v29, %v4977_v44  ;;  %v4929_v12 = vadd.f32 %v10178_v21, %v4919_v48  ;;  %vm5000_vm3 = vcmp.eq.f32.partialorder %v4999_v19, 8.507059e+37 }
 0x846   :  { %v7496_v55 = vpop.eup %7495  ;;  %v4979_v50 = vadd.f32 %v7494_v29, %v4978_v20  ;;  %v6986_v49 = vmul.f32 -1.442695, %v4929_v12 }
 0x847   :  { %v7498_v43 = vpop.eup %7497  ;;  %v4956_v0 = vadd.f32 1.0, %v7496_v55  ;;  %v4908_v5 = vpop.f32.mrf.mxu1 }
 0x848   :  { %v4983_v14 = vsel %vm4982_vm14, %v7494_v29, %v4979_v50  ;;  %v4991_v46 = vmul.f32 %v7498_v43, %v4955_v59  ;;  %v4909_v31 = vadd.f32 %v4908_v5, %v4880_v16  ;;  %vm4996_vm0 = vweird.f32 %v7498_v43  ;;  %v4883_v42 = vpop.f32.mrf.mxu0  ;;  %v5645_v25 = vpop.f32.mrf.mxu2 }
 0x849   :  { %v4988_v54 = vsel %vm4985_vm15, %v4987_v34, %v4983_v14  ;;  %7499 = vrcp.f32 %v4956_v0  ;;  %v5354_v35 = vpop.f32.mrf.mxu3  ;;  %vm4997_vm2 = vmor %vm4995_vm1, %vm4996_vm0  ;;  %v5016_v18 = vand.u32 2147483648, %v4956_v0  ;;  %v5014_v39 = vand.u32 2147483647, %v4956_v0 }
 0x84a   :  { %5067 = vst.msk [vmem:[%s10289_s17 + $0x8] sm:$0xff] %vm5065_vm10, %v4988_v54  ;;  %v4992_v10 = vsub.f32 1.0, %v4991_v46  ;;  %7501 = vpow2.f32 %v6986_v49  ;;  %v4920_v28 = vadd.f32 %v4909_v31, %v10173_v37  ;;  %vm5010_vm5 = vweird.f32 %v4956_v0 }
 0x84b   :  { %v5017_v4 = vor.u32 1.1754944e-38, %v5016_v18  ;;  %vm5015_vm7 = vcmp.eq.f32.partialorder %v5014_v39, 8.507059e+37 }
 0x84c   :  { %v4993_v8 = vmul.f32 %v7498_v43, %v4992_v10  ;;  %v4930_v47 = vadd.f32 %v10178_v21, %v4920_v28 }
 0x84e   :  { %v4994_v51 = vadd.f32 %v7498_v43, %v4993_v8  ;;  %v6987_v13 = vmul.f32 -1.442695, %v4930_v47 }
 0x84f   :  { %v7500_v38 = vpop.eup %7499  ;;  %v4911_v62 = vpop.f32.mrf.mxu1 }
 0x850   :  { %v7502_v2 = vpop.eup %7501  ;;  %v4998_v11 = vsel %vm4997_vm2, %v7498_v43, %v4994_v51  ;;  %v5006_v15 = vmul.f32 %v7500_v38, %v4956_v0  ;;  %v4912_v58 = vadd.f32 %v4911_v62, %v4883_v42  ;;  %7503 = vpow2.f32 %v6987_v13  ;;  %v4885_v29 = vpop.f32.mrf.mxu0 }
 0x851   :  { %v5003_v40 = vsel %vm5000_vm3, %v5002_v53, %v4998_v11  ;;  %v4957_v41 = vadd.f32 1.0, %v7502_v2  ;;  %vm5011_vm4 = vweird.f32 %v7500_v38  ;;  %v5673_v3 = vpop.f32.mrf.mxu3  ;;  %v5647_v48 = vpop.f32.mrf.mxu2 }
 0x852   :  { %5068 = vst.msk [vmem:[%s10289_s17 + $0x10] sm:$0xff] %vm5065_vm10, %v5003_v40  ;;  %v5007_v37 = vsub.f32 1.0, %v5006_v15  ;;  %v4921_v45 = vadd.f32 %v4912_v58, %v10183_v33  ;;  %vm5012_vm6 = vmor %vm5010_vm5, %vm5011_vm4  ;;  %v5674_v5 = vadd.f32 %v5673_v3, %v5645_v25  ;;  %vm5072_vm4 = vcmask 393216  }
 0x853   :  { %7505 = vrcp.f32 %v4957_v41  ;;  %v5031_v6 = vand.u32 2147483648, %v4957_v41  ;;  %v5029_v50 = vand.u32 2147483647, %v4957_v41  ;;  %vm5025_vm9 = vweird.f32 %v4957_v41 }
 0x854   :  { %v5008_v9 = vmul.f32 %v7500_v38, %v5007_v37  ;;  %v4931_v59 = vadd.f32 %v10178_v21, %v4921_v45 }
 0x855   :  { %v5032_v49 = vor.u32 1.1754944e-38, %v5031_v6  ;;  %vm5030_vm12 = vcmp.eq.f32.partialorder %v5029_v50, 8.507059e+37 }
 0x856   :  { %v5009_v17 = vadd.f32 %v7500_v38, %v5008_v9  ;;  %v7504_v22 = vpop.eup %7503  ;;  %v6988_v44 = vmul.f32 -1.442695, %v4931_v59 }
 0x857   :  { %v4913_v1 = vpop.f32.mrf.mxu1  ;;  %v4958_v20 = vadd.f32 1.0, %v7504_v22 }
 0x858   :  { %v5013_v61 = vsel %vm5012_vm6, %v7500_v38, %v5009_v17  ;;  %7507 = vpow2.f32 %v6988_v44  ;;  %v5447_v16 = vpop.f32.mrf.mxu0 }
 0x859   :  { %v7506_v60 = vpop.eup %7505  ;;  %v5018_v52 = vsel %vm5015_vm7, %v5017_v4, %v5013_v61  ;;  %7509 = vrcp.f32 %v4958_v20  ;;  %v5675_v57 = vpop.f32.mrf.mxu3  ;;  %v5448_v12 = vadd.f32 %v5447_v16, %v10166_v23  ;;  %v5044_v35 = vand.u32 2147483647, %v4958_v20 }
 0x85a   :  { %5069 = vst.msk [vmem:[%s10289_s17 + $0x18] sm:$0xff] %vm5065_vm10, %v5018_v52  ;;  %v5021_v33 = vmul.f32 %v7506_v60, %v4957_v41  ;;  %vm5026_vm8 = vweird.f32 %v7506_v60  ;;  %v5650_v28 = vpop.f32.mrf.mxu2  ;;  %v5046_v42 = vand.u32 2147483648, %v4958_v20  ;;  %vm5040_vm14 = vweird.f32 %v4958_v20 }
 0x85b   :  { %vm5027_vm11 = vmor %vm5025_vm9, %vm5026_vm8  ;;  %v5676_v11 = vadd.f32 %v5675_v57, %v5647_v48  ;;  %vm5045_vm0 = vcmp.eq.f32.partialorder %v5044_v35, 8.507059e+37 }
 0x85c   :  { %v5022_v56 = vsub.f32 1.0, %v5021_v33  ;;  %v5047_v40 = vor.u32 1.1754944e-38, %v5046_v42 }
 0x85e   :  { %v5023_v55 = vmul.f32 %v7506_v60, %v5022_v56  ;;  %v7508_v34 = vpop.eup %7507 }
 0x85f   :  { %v5475_v43 = vpop.f32.mrf.mxu1  ;;  %v7510_v46 = vpop.eup %7509  ;;  %v4959_v54 = vadd.f32 1.0, %v7508_v34 }
 0x860   :  { %v5024_v0 = vadd.f32 %v7506_v60, %v5023_v55  ;;  %v5476_v14 = vadd.f32 %v5475_v43, %v5448_v12  ;;  %v5036_v31 = vmul.f32 %v7510_v46, %v4958_v20  ;;  %v5449_v51 = vpop.f32.mrf.mxu0  ;;  %vm5041_vm13 = vweird.f32 %v7510_v46 }
 0x861   :  { %7511 = vrcp.f32 %v4959_v54  ;;  %v5678_v30 = vpop.f32.mrf.mxu3  ;;  %v5450_v53 = vadd.f32 %v5449_v51, %v10171_v63  ;;  %vm5042_vm15 = vmor %vm5040_vm14, %vm5041_vm13  ;;  %v5059_v25 = vand.u32 2147483647, %v4959_v54  ;;  %v5061_v3 = vand.u32 2147483648, %v4959_v54 }
 0x862   :  { %v5028_v10 = vsel %vm5027_vm11, %v7506_v60, %v5024_v0  ;;  %v5692_v32 = vadd.f32 %v5674_v5, %v5476_v14  ;;  %v5037_v23 = vsub.f32 1.0, %v5036_v31  ;;  %v5652_v39 = vpop.f32.mrf.mxu2  ;;  %vm5055_vm2 = vweird.f32 %v4959_v54 }
 0x863   :  { %v5033_v8 = vsel %vm5030_vm12, %v5032_v49, %v5028_v10  ;;  %v5679_v60 = vadd.f32 %v5678_v30, %v5650_v28  ;;  %v5062_v20 = vor.u32 1.1754944e-38, %v5061_v3  ;;  %vm5060_vm5 = vcmp.eq.f32.partialorder %v5059_v25, 8.507059e+37 }
 0x864   :  { %5070 = vst.msk [vmem:[%s10289_s17 + $0x20] sm:$0xff] %vm5065_vm10, %v5033_v8  ;;  %v5699_v19 = vadd.f32 %v10178_v21, %v5692_v32  ;;  %v5038_v47 = vmul.f32 %v7510_v46, %v5037_v23 }
 0x866   :  { %v7193_v38 = vmul.f32 -1.442695, %v5699_v19  ;;  %v5039_v2 = vadd.f32 %v7510_v46, %v5038_v47 }
 0x867   :  { %v5477_v62 = vpop.f32.mrf.mxu1  ;;  %v7512_v13 = vpop.eup %7511 }
 0x868   :  { %7513 = vpow2.f32 %v7193_v38  ;;  %v5478_v15 = vadd.f32 %v5477_v62, %v5450_v53  ;;  %v5043_v41 = vsel %vm5042_vm15, %v7510_v46, %v5039_v2  ;;  %v5051_v58 = vmul.f32 %v7512_v13, %v4959_v54  ;;  %v5452_v29 = vpop.f32.mrf.mxu0 }
 0x869   :  { %v5048_v18 = vsel %vm5045_vm0, %v5047_v40, %v5043_v41  ;;  %v5680_v45 = vpop.f32.mrf.mxu3  ;;  %vm5056_vm1 = vweird.f32 %v7512_v13  ;;  %v5453_v1 = vadd.f32 %v5452_v29, %v10180_v27 }
 0x86a   :  { %v5693_v37 = vadd.f32 %v5676_v11, %v5478_v15  ;;  %5071 = vst.msk [vmem:[%s10289_s17 + $0x28] sm:$0xff] %vm5065_vm10, %v5048_v18  ;;  %v5052_v63 = vsub.f32 1.0, %v5051_v58  ;;  %vm5057_vm3 = vmor %vm5055_vm2, %vm5056_vm1  ;;  %v5655_v57 = vpop.f32.mrf.mxu2  ;;  %v5681_v14 = vadd.f32 %v5680_v45, %v5652_v39 }
 0x86c   :  { %v5700_v9 = vadd.f32 %v10178_v21, %v5693_v37  ;;  %v5053_v59 = vmul.f32 %v7512_v13, %v5052_v63 }
 0x86e   :  { %v7514_v17 = vpop.eup %7513  ;;  %v7194_v4 = vmul.f32 -1.442695, %v5700_v9  ;;  %v5054_v44 = vadd.f32 %v7512_v13, %v5053_v59 }
 0x86f   :  { %v5727_v22 = vadd.f32 1.0, %v7514_v17  ;;  %v5480_v61 = vpop.f32.mrf.mxu1 }
 0x870   :  { %7515 = vpow2.f32 %v7194_v4  ;;  %v5481_v52 = vadd.f32 %v5480_v61, %v5453_v1  ;;  %v5058_v33 = vsel %vm5057_vm3, %v7512_v13, %v5054_v44  ;;  %v5454_v16 = vpop.f32.mrf.mxu0 }
 0x871   :  { %7517 = vrcp.f32 %v5727_v22  ;;  %v5063_v48 = vsel %vm5060_vm5, %v5062_v20, %v5058_v33  ;;  %v5683_v6 = vpop.f32.mrf.mxu3  ;;  %v5455_v12 = vadd.f32 %v5454_v16, %v10185_v36  ;;  %v5743_v10 = vand.u32 2147483647, %v5727_v22 }
 0x872   :  { %v5694_v56 = vadd.f32 %v5679_v60, %v5481_v52  ;;  %5073 = vst.msk [vmem:[%s10289_s17 + $0x30] sm:$0x1] %vm5072_vm4, %v5063_v48  ;;  %v5745_v31 = vand.u32 2147483648, %v5727_v22  ;;  %v5657_v23 = vpop.f32.mrf.mxu2  ;;  %vm5739_vm7 = vweird.f32 %v5727_v22  ;;  %v5684_v13 = vadd.f32 %v5683_v6, %v5655_v57 }
 0x873   :  { %vm5744_vm9 = vcmp.eq.f32.partialorder %v5743_v10, 8.507059e+37 }
 0x874   :  { %v5701_v27 = vadd.f32 %v10178_v21, %v5694_v56  ;;  %v5746_v51 = vor.u32 1.1754944e-38, %v5745_v31 }
 0x876   :  { %v7516_v55 = vpop.eup %7515  ;;  %v7195_v50 = vmul.f32 -1.442695, %v5701_v27 }
 0x877   :  { %v7518_v43 = vpop.eup %7517  ;;  %v5728_v34 = vadd.f32 1.0, %v7516_v55  ;;  %v5482_v0 = vpop.f32.mrf.mxu1 }
 0x878   :  { %v5735_v5 = vmul.f32 %v7518_v43, %v5727_v22  ;;  %7519 = vpow2.f32 %v7195_v50  ;;  %v5483_v46 = vadd.f32 %v5482_v0, %v5455_v12  ;;  %vm5740_vm6 = vweird.f32 %v7518_v43  ;;  %v5457_v28 = vpop.f32.mrf.mxu0 }
 0x879   :  { %7521 = vrcp.f32 %v5728_v34  ;;  %v5685_v19 = vpop.f32.mrf.mxu3  ;;  %vm5741_vm8 = vmor %vm5739_vm7, %vm5740_vm6  ;;  %v5458_v2 = vadd.f32 %v5457_v28, %v10188_v24  ;;  %v5758_v41 = vand.u32 2147483647, %v5728_v34  ;;  %v5760_v58 = vand.u32 2147483648, %v5728_v34 }
 0x87a   :  { %v5736_v49 = vsub.f32 1.0, %v5735_v5  ;;  %v5695_v54 = vadd.f32 %v5681_v14, %v5483_v46  ;;  %v5660_v63 = vpop.f32.mrf.mxu2  ;;  %vm5754_vm12 = vweird.f32 %v5728_v34  ;;  %v5686_v52 = vadd.f32 %v5685_v19, %v5657_v23 }
 0x87b   :  { %vm5759_vm14 = vcmp.eq.f32.partialorder %v5758_v41, 8.507059e+37  ;;  %v5761_v29 = vor.u32 1.1754944e-38, %v5760_v58 }
 0x87c   :  { %v5737_v32 = vmul.f32 %v7518_v43, %v5736_v49  ;;  %v5702_v8 = vadd.f32 %v10178_v21, %v5695_v54 }
 0x87e   :  { %v7520_v36 = vpop.eup %7519  ;;  %v5738_v30 = vadd.f32 %v7518_v43, %v5737_v32  ;;  %v7196_v35 = vmul.f32 -1.442695, %v5702_v8 }
 0x87f   :  { %v7522_v42 = vpop.eup %7521  ;;  %v5729_v47 = vadd.f32 1.0, %v7520_v36  ;;  %v5485_v38 = vpop.f32.mrf.mxu1 }
 0x880   :  { %v5742_v53 = vsel %vm5741_vm8, %v7518_v43, %v5738_v30  ;;  %v5750_v62 = vmul.f32 %v7522_v42, %v5728_v34  ;;  %7523 = vpow2.f32 %v7196_v35  ;;  %v5486_v40 = vadd.f32 %v5485_v38, %v5458_v2  ;;  %v5459_v39 = vpop.f32.mrf.mxu0 }
 0x881   :  { %v5747_v11 = vsel %vm5744_vm9, %v5746_v51, %v5742_v53  ;;  %7525 = vrcp.f32 %v5729_v47  ;;  %vm5755_vm11 = vweird.f32 %v7522_v42  ;;  %v5688_v9 = vpop.f32.mrf.mxu3  ;;  %v5460_v61 = vadd.f32 %v5459_v39, %v10191_v26 }
 0x882   :  { %7200 = vst.msk [vmem:[%s10289_s17 + $0x38] sm:$0xff] %vm5065_vm10, %v5747_v11  ;;  %v5751_v15 = vsub.f32 1.0, %v5750_v62  ;;  %v5696_v18 = vadd.f32 %v5684_v13, %v5486_v40  ;;  %vm5756_vm13 = vmor %vm5754_vm12, %vm5755_vm11  ;;  %v5775_v33 = vand.u32 2147483648, %v5729_v47  ;;  %v5773_v48 = vand.u32 2147483647, %v5729_v47  ;;  %v5662_v57 = vpop.f32.mrf.mxu2 }
 0x883   :  { %vm5769_vm0 = vweird.f32 %v5729_v47  ;;  %v5689_v32 = vadd.f32 %v5688_v9, %v5660_v63 }
 0x884   :  { %v5752_v37 = vmul.f32 %v7522_v42, %v5751_v15  ;;  %v5703_v25 = vadd.f32 %v10178_v21, %v5696_v18  ;;  %v5776_v12 = vor.u32 1.1754944e-38, %v5775_v33  ;;  %vm5774_vm2 = vcmp.eq.f32.partialorder %v5773_v48, 8.507059e+37 }
 0x886   :  { %v7524_v45 = vpop.eup %7523  ;;  %v5753_v24 = vadd.f32 %v7522_v42, %v5752_v37  ;;  %v7197_v22 = vmul.f32 -1.442695, %v5703_v25 }
 0x887   :  { %v7526_v3 = vpop.eup %7525  ;;  %v5730_v17 = vadd.f32 1.0, %v7524_v45  ;;  %v5487_v59 = vpop.f32.mrf.mxu1 }
 0x888   :  { %v5757_v4 = vsel %vm5756_vm13, %v7522_v42, %v5753_v24  ;;  %v5765_v1 = vmul.f32 %v7526_v3, %v5729_v47  ;;  %v5488_v20 = vadd.f32 %v5487_v59, %v5460_v61  ;;  %vm5770_vm15 = vweird.f32 %v7526_v3  ;;  %v5462_v16 = vpop.f32.mrf.mxu0 }
 0x889   :  { %v5762_v44 = vsel %vm5759_vm14, %v5761_v29, %v5757_v4  ;;  %7527 = vrcp.f32 %v5730_v17  ;;  %v5690_v6 = vpop.f32.mrf.mxu3  ;;  %vm5771_vm1 = vmor %vm5769_vm0, %vm5770_vm15  ;;  %v5463_v43 = vadd.f32 %v5462_v16, %v10199_v7  ;;  %v5790_v8 = vand.u32 2147483648, %v5730_v17 }
 0x88a   :  { %7201 = vst.msk [vmem:[%s10289_s17 + $0x40] sm:$0xff] %vm5065_vm10, %v5762_v44  ;;  %v5766_v60 = vsub.f32 1.0, %v5765_v1  ;;  %7529 = vpow2.f32 %v7197_v22  ;;  %v5697_v27 = vadd.f32 %v5686_v52, %v5488_v20  ;;  %v5788_v23 = vand.u32 2147483647, %v5730_v17 }
 0x88b   :  { %vm5784_vm5 = vweird.f32 %v5730_v17  ;;  %v5791_v35 = vor.u32 1.1754944e-38, %v5790_v8 }
 0x88c   :  { %v5767_v56 = vmul.f32 %v7526_v3, %v5766_v60  ;;  %v5704_v55 = vadd.f32 %v10178_v21, %v5697_v27  ;;  %vm5789_vm7 = vcmp.eq.f32.partialorder %v5788_v23, 8.507059e+37 }
 0x88e   :  { %v5768_v26 = vadd.f32 %v7526_v3, %v5767_v56  ;;  %v7198_v46 = vmul.f32 -1.442695, %v5704_v55 }
 0x88f   :  { %v7528_v50 = vpop.eup %7527  ;;  %v5490_v34 = vpop.f32.mrf.mxu1 }
 0x890   :  { %v7530_v0 = vpop.eup %7529  ;;  %v5772_v5 = vsel %vm5771_vm1, %v7526_v3, %v5768_v26  ;;  %v5780_v14 = vmul.f32 %v7528_v50, %v5730_v17  ;;  %v5491_v10 = vadd.f32 %v5490_v34, %v5463_v43  ;;  %7531 = vpow2.f32 %v7198_v46  ;;  %v5464_v28 = vpop.f32.mrf.mxu0 }
 0x891   :  { %v5777_v49 = vsel %vm5774_vm2, %v5776_v12, %v5772_v5  ;;  %v5731_v54 = vadd.f32 1.0, %v7530_v0  ;;  %vm5785_vm3 = vweird.f32 %v7528_v50 }
 0x892   :  { %7202 = vst.msk [vmem:[%s10289_s17 + $0x48] sm:$0xff] %vm5065_vm10, %v5777_v49  ;;  %v5781_v31 = vsub.f32 1.0, %v5780_v14  ;;  %v5698_v19 = vadd.f32 %v5689_v32, %v5491_v10  ;;  %vm5786_vm6 = vmor %vm5784_vm5, %vm5785_vm3 }
 0x893   :  { %7533 = vrcp.f32 %v5731_v54  ;;  %v5803_v40 = vand.u32 2147483647, %v5731_v54  ;;  %vm5799_vm9 = vweird.f32 %v5731_v54 }
 0x894   :  { %v5782_v7 = vmul.f32 %v7528_v50, %v5781_v31  ;;  %v5705_v30 = vadd.f32 %v10178_v21, %v5698_v19  ;;  %v5805_v21 = vand.u32 2147483648, %v5731_v54 }
 0x895   :  { %vm5804_vm12 = vcmp.eq.f32.partialorder %v5803_v40, 8.507059e+37 }
 0x896   :  { %v5783_v36 = vadd.f32 %v7528_v50, %v5782_v7  ;;  %v7532_v51 = vpop.eup %7531  ;;  %v7199_v38 = vmul.f32 -1.442695, %v5705_v30  ;;  %v5806_v18 = vor.u32 1.1754944e-38, %v5805_v21 }
 0x897   :  { %v5492_v42 = vpop.f32.mrf.mxu1  ;;  %v5732_v2 = vadd.f32 1.0, %v7532_v51 }
 0x898   :  { %v5787_v47 = vsel %vm5786_vm6, %v7528_v50, %v5783_v36  ;;  %7535 = vpow2.f32 %v7199_v38 }
 0x899   :  { %v7534_v53 = vpop.eup %7533  ;;  %v5792_v62 = vsel %vm5789_vm7, %v5791_v35, %v5787_v47  ;;  %7537 = vrcp.f32 %v5732_v2  ;;  %v5820_v25 = vand.u32 2147483648, %v5732_v2  ;;  %v5818_v29 = vand.u32 2147483647, %v5732_v2 }
 0x89a   :  { %7203 = vst.msk [vmem:[%s10289_s17 + $0x50] sm:$0xff] %vm5065_vm10, %v5792_v62  ;;  %v5795_v11 = vmul.f32 %v7534_v53, %v5731_v54  ;;  %vm5800_vm8 = vweird.f32 %v7534_v53  ;;  %vm5814_vm14 = vweird.f32 %v5732_v2 }
 0x89b   :  { %vm5801_vm11 = vmor %vm5799_vm9, %vm5800_vm8  ;;  %v5821_v4 = vor.u32 1.1754944e-38, %v5820_v25  ;;  %vm5819_vm0 = vcmp.eq.f32.partialorder %v5818_v29, 8.507059e+37 }
 0x89c   :  { %v5796_v15 = vsub.f32 1.0, %v5795_v11 }
 0x89e   :  { %v5797_v13 = vmul.f32 %v7534_v53, %v5796_v15  ;;  %v7536_v41 = vpop.eup %7535 }
 0x89f   :  { %v7538_v37 = vpop.eup %7537  ;;  %v5733_v63 = vadd.f32 1.0, %v7536_v41 }
 0x8a0   :  { %v5798_v58 = vadd.f32 %v7534_v53, %v5797_v13  ;;  %v5810_v39 = vmul.f32 %v7538_v37, %v5732_v2  ;;  %vm5815_vm13 = vweird.f32 %v7538_v37 }
 0x8a1   :  { %7539 = vrcp.f32 %v5733_v63  ;;  %vm5816_vm15 = vmor %vm5814_vm14, %vm5815_vm13  ;;  %v5835_v60 = vand.u32 2147483648, %v5733_v63  ;;  %v5833_v20 = vand.u32 2147483647, %v5733_v63  ;;  %vm5829_vm2 = vweird.f32 %v5733_v63 }
 0x8a2   :  { %v5802_v9 = vsel %vm5801_vm11, %v7534_v53, %v5798_v58  ;;  %v5811_v24 = vsub.f32 1.0, %v5810_v39 }
 0x8a3   :  { %v5807_v45 = vsel %vm5804_vm12, %v5806_v18, %v5802_v9  ;;  %v5836_v56 = vor.u32 1.1754944e-38, %v5835_v60  ;;  %vm5834_vm5 = vcmp.eq.f32.partialorder %v5833_v20, 8.507059e+37 }
 0x8a4   :  { %7204 = vst.msk [vmem:[%s10289_s17 + $0x58] sm:$0xff] %vm5065_vm10, %v5807_v45  ;;  %v5812_v3 = vmul.f32 %v7538_v37, %v5811_v24 }
 0x8a6   :  { %v5813_v17 = vadd.f32 %v7538_v37, %v5812_v3 }
 0x8a7   :  { %v7540_v59 = vpop.eup %7539 }
 0x8a8   :  { %v5817_v1 = vsel %vm5816_vm15, %v7538_v37, %v5813_v17  ;;  %v5825_v22 = vmul.f32 %v7540_v59, %v5733_v63  ;;  %vm5830_vm1 = vweird.f32 %v7540_v59 }
 0x8a9   :  { %v5822_v61 = vsel %vm5819_vm0, %v5821_v4, %v5817_v1  ;;  %vm5831_vm3 = vmor %vm5829_vm2, %vm5830_vm1 }
 0x8aa   :  { %7205 = vst.msk [vmem:[%s10289_s17 + $0x60] sm:$0xff] %vm5065_vm10, %v5822_v61  ;;  %v5826_v44 = vsub.f32 1.0, %v5825_v22 }
 0x8ac   :  { %v5827_v52 = vmul.f32 %v7540_v59, %v5826_v44 }
 0x8ae   :  { %v5828_v33 = vadd.f32 %v7540_v59, %v5827_v52 }
 0x8b0   :  { %v5832_v48 = vsel %vm5831_vm3, %v7540_v59, %v5828_v33 }
 0x8b1   :  { %v5837_v27 = vsel %vm5834_vm5, %v5836_v56, %v5832_v48 }
 0x8b2   :  { %7206 = vst.msk [vmem:[%s10289_s17 + $0x68] sm:$0x1] %vm5072_vm4, %v5837_v27 }
 0x8b3   :  { %5851 = vsyncpa [#allocation5], 1 }

</bundles_post_ra>
